<compile_context>
chip_gen: v6e
topology: v6e:2x2x1
jax: 0.10.0
libtpu: 0.0.40
codegen_flags: <defaults>
</compile_context>

<pallas_src>
import jax
import jax.numpy as jnp
from jax import lax
from jax.experimental import pallas as pl
from jax.experimental.pallas import tpu as pltpu

STREAMS = ("sobel", "laplace", "kirsch")
BN_EPS = 1e-5

# Channel counts padded to multiples of 8 so every sublane slab is whole-vreg
# and every im2col store is tile-aligned (padding is done with zero weights).
C_IN_PAD = 8      # 3 streams (1 channel each) -> 8
C_MID1_PAD = 16   # 3 streams x 3 mid channels = 9 -> 16
C_FEAT_PAD = 24   # 3 streams x 6 out channels = 18 -> 24
C_MID2_PAD = 16   # fusion mid channels 12 -> 16
C_Z_PAD = 8       # fusion temporal out channels 6 -> 8


# ---------------------------------------------------------------------------
# Fully fused kernel: 3-stream Conv2Plus1D + Conv2Plus1DExtended + GAP/linear
# ---------------------------------------------------------------------------
def make_kernel(T, H, W):
    HW = H * W
    N = T * HW
    # GAP over the zero-padded output of the (bias-free) 1x1x1 conv.
    inv_denom = 1.0 / float((T + 2) * (H + 2) * (W + 2))

    def kernel(x_ref, masks_ref, w1_ref, b1_ref, wt1_ref, w2_ref, b2_ref,
               wt2_ref, b3_ref, whead_ref, bhead_ref,
               o_ref, col1_ref, col2_ref, mid1_ref, feat_ref, mid2_ref):

        def spatial_conv(src_ref, cpad, col_ref, w_ref, b_ref):
            # (1,3,3) conv as im2col: 9 masked lane-rolls of the (cpad, N) source
            # are written into col_ref (9*cpad, N) (slab offsets are multiples of
            # 8 -> tile-aligned stores), then ONE MXU dot with K = 9*cpad.
            # BN scale is folded into w_ref; bias + ReLU fused below.
            k = 0
            for dy in (-1, 0, 1):
                for dx in (-1, 0, 1):
                    d = dy * W + dx
                    tap = src_ref[...]          # reload per tap: bounded live range
                    if d != 0:
                        # shifted[n] = src[n + d]; frame borders zeroed by the mask.
                        tap = pltpu.roll(tap, (-d) % N, axis=1) * masks_ref[k]
                    col_ref[k * cpad:(k + 1) * cpad, :] = tap
                    k += 1
            acc = jnp.dot(w_ref[...], col_ref[...],
                          preferred_element_type=jnp.float32)
            return jnp.maximum(acc + b_ref[...], 0.0)

        def temporal_conv(src_ref, wt_ref):
            # (3,1,1) conv, zero padding of 1 along T.  T lives on lanes in chunks
            # of HW, so the +-1 frame taps are 256-aligned lane slices; the zero
            # padding is a 256-aligned concat on the small output.
            cout = wt_ref.shape[1]
            zc = jnp.zeros((cout, HW), jnp.float32)
            prev = jnp.dot(wt_ref[0], src_ref[:, :N - HW],
                           preferred_element_type=jnp.float32)
            cur = jnp.dot(wt_ref[1], src_ref[...],
                          preferred_element_type=jnp.float32)
            nxt = jnp.dot(wt_ref[2], src_ref[:, HW:],
                          preferred_element_type=jnp.float32)
            return (cur + jnp.concatenate([zc, prev], axis=1)
                        + jnp.concatenate([nxt, zc], axis=1))

        # Stage 1: the three per-stream Conv2Plus1D blocks, packed block-diagonally.
        #   (1,3,3) conv + BN + ReLU  ->  (3,1,1) conv      (== torch.cat(dim=1))
        mid1_ref[...] = spatial_conv(x_ref.at[0], C_IN_PAD, col1_ref,
                                     w1_ref, b1_ref)                 # (16, N)
        feat_ref[...] = temporal_conv(mid1_ref, wt1_ref)             # (24, N)

        # Stage 2: Conv2Plus1DExtended fusion block.
        #   (1,3,3)+BN+ReLU -> (3,1,1)+BN+ReLU -> 1x1x1 conv (folded into head)
        mid2_ref[...] = spatial_conv(feat_ref, C_FEAT_PAD, col2_ref,
                                     w2_ref, b2_ref)                 # (16, N)
        z = jnp.maximum(temporal_conv(mid2_ref, wt2_ref) + b3_ref[...], 0.0)  # (8, N)

        # Head (stand-in GAP + linear for `pretrained_model`), reordered: reduce
        # over lanes first, then the tiny contraction (w3 and the linear layer are
        # pre-multiplied into whead at pack time).  Lane-dense logits store.
        zsum = jnp.sum(z, axis=1, keepdims=True)                     # (8, 1)
        logits = jnp.sum(whead_ref[...] * zsum, axis=0, keepdims=True)   # (1, n_cls)
        o_ref[0] = logits * inv_denom + bhead_ref[...]

    return kernel


def _make_tap_masks(T, H, W):
    """9 multiplicative (1, N) masks (one per 3x3 tap) encoding the H/W zero
    padding of the (1,3,3) convs in the flattened (T*H*W)-on-lanes layout."""
    N = T * H * W
    idx = jnp.arange(N, dtype=jnp.int32)
    col = idx % W
    row = (idx // W) % H
    rows = []
    for dy in (-1, 0, 1):
        for dx in (-1, 0, 1):
            ok = ((row + dy >= 0) & (row + dy < H) &
                  (col + dx >= 0) & (col + dx < W))
            rows.append(ok.astype(jnp.float32))
    return jnp.stack(rows).reshape(9, 1, N)


def two_stream_forward(x, packed):
    """x: (B, 3 streams, T, H, W) float32 -> logits (B, num_classes)."""
    B, S, T, H, W = x.shape
    assert S == len(STREAMS)
    HW = H * W
    N = T * HW
    n_cls = packed["whead"].shape[1]

    # Lane-dense, sublane-dense kernel layout: (B, 8, T*H*W) -- the 3 stream
    # channels (zero-padded to 8 sublanes) on sublanes, flattened (t,h,w) on lanes.
    xk = jnp.pad(x.reshape(B, S, N), ((0, 0), (0, C_IN_PAD - S), (0, 0)))
    masks = _make_tap_masks(T, H, W)

    out = pl.pallas_call(
        make_kernel(T, H, W),
        out_shape=jax.ShapeDtypeStruct((B, 1, n_cls), jnp.float32),
        grid=(B,),
        in_specs=[
            pl.BlockSpec((1, C_IN_PAD, N), lambda b: (b, 0, 0)),
            pl.BlockSpec((9, 1, N), lambda b: (0, 0, 0)),
            pl.BlockSpec(packed["w1"].shape, lambda b: (0, 0)),
            pl.BlockSpec(packed["b1"].shape, lambda b: (0, 0)),
            pl.BlockSpec(packed["wt1"].shape, lambda b: (0, 0, 0)),
            pl.BlockSpec(packed["w2"].shape, lambda b: (0, 0)),
            pl.BlockSpec(packed["b2"].shape, lambda b: (0, 0)),
            pl.BlockSpec(packed["wt2"].shape, lambda b: (0, 0, 0)),
            pl.BlockSpec(packed["b3"].shape, lambda b: (0, 0)),
            pl.BlockSpec(packed["whead"].shape, lambda b: (0, 0)),
            pl.BlockSpec(packed["bhead"].shape, lambda b: (0, 0)),
        ],
        out_specs=pl.BlockSpec((1, 1, n_cls), lambda b: (b, 0, 0)),
        scratch_shapes=[
            pltpu.VMEM((9 * C_IN_PAD, N), jnp.float32),    # col1: stage-1 im2col
            pltpu.VMEM((9 * C_FEAT_PAD, N), jnp.float32),  # col2: fusion im2col
            pltpu.VMEM((C_MID1_PAD, N), jnp.float32),      # mid1 (BN+ReLU'd)
            pltpu.VMEM((C_FEAT_PAD, N), jnp.float32),      # feat == torch.cat(streams)
            pltpu.VMEM((C_MID2_PAD, N), jnp.float32),      # mid2 (BN+ReLU'd)
        ],
        compiler_params=pltpu.CompilerParams(
            dimension_semantics=("parallel",)),
    )(xk, masks, packed["w1"], packed["b1"], packed["wt1"], packed["w2"],
      packed["b2"], packed["wt2"], packed["b3"], packed["whead"], packed["bhead"])
    return out[:, 0, :]


# ---------------------------------------------------------------------------
# Parameter handling (PyTorch-layout params -> packed kernel weights)
# ---------------------------------------------------------------------------
def _bn_fold(bn):
    scale = bn["gamma"] / jnp.sqrt(bn["var"] + BN_EPS)
    bias = bn["beta"] - bn["mean"] * scale
    return scale, bias


def pack_params(params):
    """One-time repack: fold inference BN into conv weights, pack the three
    streams block-diagonally, im2col-order the (1,3,3) weights with channel
    counts padded to multiples of 8, and pre-fold (1x1x1 conv) @ (head linear)."""
    # --- stage 1: per-stream (1,3,3)+BN and (3,1,1), packed block-diagonally ---
    w1 = jnp.zeros((C_MID1_PAD, 9, C_IN_PAD), jnp.float32)   # (out, tap, in_pad)
    b1 = jnp.zeros((C_MID1_PAD, 1), jnp.float32)
    wt1 = jnp.zeros((3, C_FEAT_PAD, C_MID1_PAD), jnp.float32)
    for s, name in enumerate(STREAMS):
        p = params[name]
        scale, bias = _bn_fold(p["bn1"])                      # (3,)
        ws = p["ws"][:, 0, 0] * scale[:, None, None]          # (3 out, 3 ky, 3 kx)
        w1 = w1.at[3 * s:3 * s + 3, :, s].set(ws.reshape(3, 9))
        b1 = b1.at[3 * s:3 * s + 3, 0].set(bias)
        wt = jnp.transpose(p["wt"][:, :, :, 0, 0], (2, 0, 1))  # (kt, 6 out, 3 in)
        wt1 = wt1.at[:, 6 * s:6 * s + 6, 3 * s:3 * s + 3].set(wt)
    w1 = w1.reshape(C_MID1_PAD, 9 * C_IN_PAD)

    # --- fusion block (Conv2Plus1DExtended) ---
    pf = params["fusion"]
    scale2, bias2 = _bn_fold(pf["bn1"])
    ws2 = jnp.transpose(pf["ws"][:, :, 0] * scale2[:, None, None, None],
                        (0, 2, 3, 1)).reshape(12, 9, 18)       # (out, tap, in)
    w2 = (jnp.zeros((C_MID2_PAD, 9, C_FEAT_PAD), jnp.float32)
          .at[:12, :, :18].set(ws2).reshape(C_MID2_PAD, 9 * C_FEAT_PAD))
    b2 = jnp.zeros((C_MID2_PAD, 1), jnp.float32).at[:12, 0].set(bias2)

    scale3, bias3 = _bn_fold(pf["bn2"])
    wt2c = jnp.transpose(pf["wt"][:, :, :, 0, 0] * scale3[:, None, None],
                         (2, 0, 1))                            # (kt, 6 out, 12 in)
    wt2 = jnp.zeros((3, C_Z_PAD, C_MID2_PAD), jnp.float32).at[:, :6, :12].set(wt2c)
    b3 = jnp.zeros((C_Z_PAD, 1), jnp.float32).at[:6, 0].set(bias3)

    # --- head: (bias-free 1x1x1 conv) then GAP + linear, pre-multiplied ---
    w3 = pf["w3"][:, :, 0, 0, 0]                               # (3, 6)
    whead_core = jnp.matmul(w3.T, params["head"]["w"])         # (6, n_cls)
    whead = jnp.zeros((C_Z_PAD, whead_core.shape[1]), jnp.float32).at[:6].set(whead_core)
    bhead = params["head"]["b"].reshape(1, -1)                 # (1, n_cls)

    return dict(w1=w1, b1=b1, wt1=wt1, w2=w2, b2=b2, wt2=wt2, b3=b3,
                whead=whead, bhead=bhead)


def init_params(key, num_classes=10):
    keys = iter(jax.random.split(key, 40))

    def draw(shape, scale=0.5):
        return scale * jax.random.normal(next(keys), shape, jnp.float32)

    def bn(c):   # inference-mode BatchNorm3d (gamma, beta, running stats)
        return dict(gamma=1.0 + 0.1 * draw((c,), 1.0),
                    beta=0.1 * draw((c,), 1.0),
                    mean=0.1 * draw((c,), 1.0),
                    var=1.0 + 0.5 * jnp.abs(draw((c,), 1.0)))

    params = {}
    for name in STREAMS:
        # Conv2Plus1D(1,6,3): Conv3d(1,3,(1,3,3)) + BN(3) + ReLU + Conv3d(3,6,(3,1,1))
        params[name] = dict(ws=draw((3, 1, 1, 3, 3)),
                            wt=draw((6, 3, 3, 1, 1)),
                            bn1=bn(3))
    # Conv2Plus1DExtended(18, 3, 12)
    params["fusion"] = dict(ws=draw((12, 18, 1, 3, 3)),
                            wt=draw((6, 12, 3, 1, 1)),
                            w3=draw((3, 6, 1, 1, 1)),
                            bn1=bn(12), bn2=bn(6))
    # TODO(synk): `pretrained_model` is an external constructor argument
    #             (typically r2plus1d_18); a deterministic GAP + linear head
    #             stands in for it (fused into the kernel).
    params["head"] = dict(w=draw((3, num_classes)),
                          b=draw((num_classes,), 0.05))
    return params


# ---------------------------------------------------------------------------
# Pure-JAX reference (mirrors the PyTorch module, inference-mode BN)
# ---------------------------------------------------------------------------
def reference_forward(x, params):
    def conv3d(v, w, pad):
        return lax.conv_general_dilated(
            v, w, window_strides=(1, 1, 1),
            padding=[(p, p) for p in pad],
            dimension_numbers=("NCDHW", "OIDHW", "NCDHW"),
            precision=lax.Precision.HIGHEST)

    def bn(v, p):
        scale = p["gamma"] / jnp.sqrt(p["var"] + BN_EPS)
        bias = p["beta"] - p["mean"] * scale
        return v * scale[None, :, None, None, None] + bias[None, :, None, None, None]

    streams = []
    for s, name in enumerate(STREAMS):
        p = params[name]
        v = conv3d(x[:, s:s + 1], p["ws"], (0, 1, 1))
        v = jax.nn.relu(bn(v, p["bn1"]))
        streams.append(conv3d(v, p["wt"], (1, 0, 0)))
    feat = jnp.concatenate(streams, axis=1)

    pf = params["fusion"]
    v = conv3d(feat, pf["ws"], (0, 1, 1))
    v = jax.nn.relu(bn(v, pf["bn1"]))
    v = conv3d(v, pf["wt"], (1, 0, 0))
    v = jax.nn.relu(bn(v, pf["bn2"]))
    v = conv3d(v, pf["w3"], (1, 1, 1))               # (B, 3, T+2, H+2, W+2)

    pooled = jnp.mean(v, axis=(2, 3, 4))             # stand-in head: GAP + linear
    return jnp.matmul(pooled, params["head"]["w"],
                      precision=lax.Precision.HIGHEST) + params["head"]["b"]


if __name__ == "__main__":
    key = jax.random.PRNGKey(0)
    kx, kp = jax.random.split(key)
    # (batch, 3 edge-filter streams, T, H, W)
    x = jax.random.normal(kx, (2, 3, 8, 16, 16), jnp.float32)
    params = init_params(kp)
    packed = pack_params(params)                     # one-time, outside hot path

    out = jax.block_until_ready(jax.jit(two_stream_forward)(x, packed))
    assert out.shape == (2, 10), out.shape
    assert bool(jnp.all(jnp.isfinite(out)))

    # Numerical check against the pure-JAX reference of the module.
    ref = jax.block_until_ready(jax.jit(reference_forward)(x, params))
    err = float(jnp.max(jnp.abs(out - ref)))
    tol = 1e-3 * (1.0 + float(jnp.max(jnp.abs(ref))))
    assert err < tol, f"kernel/reference mismatch: {err} (tol {tol})"

    print("KERNEL_OK")
</pallas_src>

<mosaic_0001>
module attributes {stable_mosaic.version = 11 : i64} {
  func.func @kernel(%arg0: i32, %arg1: memref<1x8x2048xf32, #tpu.memory_space<vmem>>, %arg2: memref<9x1x2048xf32, #tpu.memory_space<vmem>>, %arg3: memref<16x72xf32, #tpu.memory_space<vmem>>, %arg4: memref<16x1xf32, #tpu.memory_space<vmem>>, %arg5: memref<3x24x16xf32, #tpu.memory_space<vmem>>, %arg6: memref<16x216xf32, #tpu.memory_space<vmem>>, %arg7: memref<16x1xf32, #tpu.memory_space<vmem>>, %arg8: memref<3x8x16xf32, #tpu.memory_space<vmem>>, %arg9: memref<8x1xf32, #tpu.memory_space<vmem>>, %arg10: memref<8x10xf32, #tpu.memory_space<vmem>>, %arg11: memref<1x10xf32, #tpu.memory_space<vmem>>, %arg12: memref<1x1x10xf32, #tpu.memory_space<vmem>>, %arg13: memref<72x2048xf32, #tpu.memory_space<vmem>>, %arg14: memref<216x2048xf32, #tpu.memory_space<vmem>>, %arg15: memref<16x2048xf32, #tpu.memory_space<vmem>>, %arg16: memref<24x2048xf32, #tpu.memory_space<vmem>>, %arg17: memref<16x2048xf32, #tpu.memory_space<vmem>>) attributes {dimension_semantics = [#tpu.dimension_semantics<parallel>], iteration_bounds = array<i64: 2>, scalar_prefetch = 0 : i64, scratch_operands = 5 : i64, tpu.core_type = #tpu.core_type<tc>, window_params = [{transform_indices = @transform_0, window_bounds = array<i64: 1, 8, 2048>}, {pipeline_mode = #tpu.pipeline_mode<synchronous>, transform_indices = @transform_1, window_bounds = array<i64: 9, 1, 2048>}, {pipeline_mode = #tpu.pipeline_mode<synchronous>, transform_indices = @transform_2, window_bounds = array<i64: 16, 72>}, {pipeline_mode = #tpu.pipeline_mode<synchronous>, transform_indices = @transform_3, window_bounds = array<i64: 16, 1>}, {pipeline_mode = #tpu.pipeline_mode<synchronous>, transform_indices = @transform_4, window_bounds = array<i64: 3, 24, 16>}, {pipeline_mode = #tpu.pipeline_mode<synchronous>, transform_indices = @transform_5, window_bounds = array<i64: 16, 216>}, {pipeline_mode = #tpu.pipeline_mode<synchronous>, transform_indices = @transform_6, window_bounds = array<i64: 16, 1>}, {pipeline_mode = #tpu.pipeline_mode<synchronous>, transform_indices = @transform_7, window_bounds = array<i64: 3, 8, 16>}, {pipeline_mode = #tpu.pipeline_mode<synchronous>, transform_indices = @transform_8, window_bounds = array<i64: 8, 1>}, {pipeline_mode = #tpu.pipeline_mode<synchronous>, transform_indices = @transform_9, window_bounds = array<i64: 8, 10>}, {pipeline_mode = #tpu.pipeline_mode<synchronous>, transform_indices = @transform_10, window_bounds = array<i64: 1, 10>}, {transform_indices = @transform_11, window_bounds = array<i64: 1, 1, 10>}]} {
    %c0 = arith.constant 0 : index
    %c0_0 = arith.constant 0 : index
    %c0_1 = arith.constant 0 : index
    %0 = vector.load %arg1[%c0, %c0_0, %c0_1] : memref<1x8x2048xf32, #tpu.memory_space<vmem>>, vector<1x8x2048xf32>
    %1 = vector.shape_cast %0 : vector<1x8x2048xf32> to vector<8x2048xf32>
    %c17_i32 = arith.constant 17 : i32
    %2 = tpu.dynamic_rotate %1 by %c17_i32 dim 1 : vector<8x2048xf32>, i32 -> vector<8x2048xf32>
    %c0_2 = arith.constant 0 : index
    %c0_3 = arith.constant 0 : index
    %c0_4 = arith.constant 0 : index
    %3 = vector.load %arg2[%c0_2, %c0_3, %c0_4] : memref<9x1x2048xf32, #tpu.memory_space<vmem>>, vector<1x1x2048xf32>
    %4 = vector.shape_cast %3 : vector<1x1x2048xf32> to vector<1x2048xf32>
    %5 = vector.broadcast %4 : vector<1x2048xf32> to vector<8x2048xf32>
    %6 = arith.mulf %2, %5 : vector<8x2048xf32>
    %c0_5 = arith.constant 0 : index
    %c0_6 = arith.constant 0 : index
    %7 = vector.load %arg13[%c0_5, %c0_6] : memref<72x2048xf32, #tpu.memory_space<vmem>>, vector<8x2048xf32>
    tpu.vector_store %arg13[%c0_5, %c0_6], %6 {strides = array<i32>} : memref<72x2048xf32, #tpu.memory_space<vmem>>, vector<8x2048xf32>,
    %c0_7 = arith.constant 0 : index
    %c0_8 = arith.constant 0 : index
    %c0_9 = arith.constant 0 : index
    %8 = vector.load %arg1[%c0_7, %c0_8, %c0_9] : memref<1x8x2048xf32, #tpu.memory_space<vmem>>, vector<1x8x2048xf32>
    %9 = vector.shape_cast %8 : vector<1x8x2048xf32> to vector<8x2048xf32>
    %c16_i32 = arith.constant 16 : i32
    %10 = tpu.dynamic_rotate %9 by %c16_i32 dim 1 : vector<8x2048xf32>, i32 -> vector<8x2048xf32>
    %c1 = arith.constant 1 : index
    %c0_10 = arith.constant 0 : index
    %c0_11 = arith.constant 0 : index
    %11 = vector.load %arg2[%c1, %c0_10, %c0_11] : memref<9x1x2048xf32, #tpu.memory_space<vmem>>, vector<1x1x2048xf32>
    %12 = vector.shape_cast %11 : vector<1x1x2048xf32> to vector<1x2048xf32>
    %13 = vector.broadcast %12 : vector<1x2048xf32> to vector<8x2048xf32>
    %14 = arith.mulf %10, %13 : vector<8x2048xf32>
    %c8 = arith.constant 8 : index
    %c0_12 = arith.constant 0 : index
    %15 = vector.load %arg13[%c8, %c0_12] : memref<72x2048xf32, #tpu.memory_space<vmem>>, vector<8x2048xf32>
    tpu.vector_store %arg13[%c8, %c0_12], %14 {strides = array<i32>} : memref<72x2048xf32, #tpu.memory_space<vmem>>, vector<8x2048xf32>,
    %c0_13 = arith.constant 0 : index
    %c0_14 = arith.constant 0 : index
    %c0_15 = arith.constant 0 : index
    %16 = vector.load %arg1[%c0_13, %c0_14, %c0_15] : memref<1x8x2048xf32, #tpu.memory_space<vmem>>, vector<1x8x2048xf32>
    %17 = vector.shape_cast %16 : vector<1x8x2048xf32> to vector<8x2048xf32>
    %c15_i32 = arith.constant 15 : i32
    %18 = tpu.dynamic_rotate %17 by %c15_i32 dim 1 : vector<8x2048xf32>, i32 -> vector<8x2048xf32>
    %c2 = arith.constant 2 : index
    %c0_16 = arith.constant 0 : index
    %c0_17 = arith.constant 0 : index
    %19 = vector.load %arg2[%c2, %c0_16, %c0_17] : memref<9x1x2048xf32, #tpu.memory_space<vmem>>, vector<1x1x2048xf32>
    %20 = vector.shape_cast %19 : vector<1x1x2048xf32> to vector<1x2048xf32>
    %21 = vector.broadcast %20 : vector<1x2048xf32> to vector<8x2048xf32>
    %22 = arith.mulf %18, %21 : vector<8x2048xf32>
    %c16 = arith.constant 16 : index
    %c0_18 = arith.constant 0 : index
    %23 = vector.load %arg13[%c16, %c0_18] : memref<72x2048xf32, #tpu.memory_space<vmem>>, vector<8x2048xf32>
    tpu.vector_store %arg13[%c16, %c0_18], %22 {strides = array<i32>} : memref<72x2048xf32, #tpu.memory_space<vmem>>, vector<8x2048xf32>,
    %c0_19 = arith.constant 0 : index
    %c0_20 = arith.constant 0 : index
    %c0_21 = arith.constant 0 : index
    %24 = vector.load %arg1[%c0_19, %c0_20, %c0_21] : memref<1x8x2048xf32, #tpu.memory_space<vmem>>, vector<1x8x2048xf32>
    %25 = vector.shape_cast %24 : vector<1x8x2048xf32> to vector<8x2048xf32>
    %c1_i32 = arith.constant 1 : i32
    %26 = tpu.dynamic_rotate %25 by %c1_i32 dim 1 : vector<8x2048xf32>, i32 -> vector<8x2048xf32>
    %c3 = arith.constant 3 : index
    %c0_22 = arith.constant 0 : index
    %c0_23 = arith.constant 0 : index
    %27 = vector.load %arg2[%c3, %c0_22, %c0_23] : memref<9x1x2048xf32, #tpu.memory_space<vmem>>, vector<1x1x2048xf32>
    %28 = vector.shape_cast %27 : vector<1x1x2048xf32> to vector<1x2048xf32>
    %29 = vector.broadcast %28 : vector<1x2048xf32> to vector<8x2048xf32>
    %30 = arith.mulf %26, %29 : vector<8x2048xf32>
    %c24 = arith.constant 24 : index
    %c0_24 = arith.constant 0 : index
    %31 = vector.load %arg13[%c24, %c0_24] : memref<72x2048xf32, #tpu.memory_space<vmem>>, vector<8x2048xf32>
    tpu.vector_store %arg13[%c24, %c0_24], %30 {strides = array<i32>} : memref<72x2048xf32, #tpu.memory_space<vmem>>, vector<8x2048xf32>,
    %c0_25 = arith.constant 0 : index
    %c0_26 = arith.constant 0 : index
    %c0_27 = arith.constant 0 : index
    %32 = vector.load %arg1[%c0_25, %c0_26, %c0_27] : memref<1x8x2048xf32, #tpu.memory_space<vmem>>, vector<1x8x2048xf32>
    %33 = vector.shape_cast %32 : vector<1x8x2048xf32> to vector<8x2048xf32>
    %c32 = arith.constant 32 : index
    %c0_28 = arith.constant 0 : index
    %34 = vector.load %arg13[%c32, %c0_28] : memref<72x2048xf32, #tpu.memory_space<vmem>>, vector<8x2048xf32>
    tpu.vector_store %arg13[%c32, %c0_28], %33 {strides = array<i32>} : memref<72x2048xf32, #tpu.memory_space<vmem>>, vector<8x2048xf32>,
    %c0_29 = arith.constant 0 : index
    %c0_30 = arith.constant 0 : index
    %c0_31 = arith.constant 0 : index
    %35 = vector.load %arg1[%c0_29, %c0_30, %c0_31] : memref<1x8x2048xf32, #tpu.memory_space<vmem>>, vector<1x8x2048xf32>
    %36 = vector.shape_cast %35 : vector<1x8x2048xf32> to vector<8x2048xf32>
    %c2047_i32 = arith.constant 2047 : i32
    %37 = tpu.dynamic_rotate %36 by %c2047_i32 dim 1 : vector<8x2048xf32>, i32 -> vector<8x2048xf32>
    %c5 = arith.constant 5 : index
    %c0_32 = arith.constant 0 : index
    %c0_33 = arith.constant 0 : index
    %38 = vector.load %arg2[%c5, %c0_32, %c0_33] : memref<9x1x2048xf32, #tpu.memory_space<vmem>>, vector<1x1x2048xf32>
    %39 = vector.shape_cast %38 : vector<1x1x2048xf32> to vector<1x2048xf32>
    %40 = vector.broadcast %39 : vector<1x2048xf32> to vector<8x2048xf32>
    %41 = arith.mulf %37, %40 : vector<8x2048xf32>
    %c40 = arith.constant 40 : index
    %c0_34 = arith.constant 0 : index
    %42 = vector.load %arg13[%c40, %c0_34] : memref<72x2048xf32, #tpu.memory_space<vmem>>, vector<8x2048xf32>
    tpu.vector_store %arg13[%c40, %c0_34], %41 {strides = array<i32>} : memref<72x2048xf32, #tpu.memory_space<vmem>>, vector<8x2048xf32>,
    %c0_35 = arith.constant 0 : index
    %c0_36 = arith.constant 0 : index
    %c0_37 = arith.constant 0 : index
    %43 = vector.load %arg1[%c0_35, %c0_36, %c0_37] : memref<1x8x2048xf32, #tpu.memory_space<vmem>>, vector<1x8x2048xf32>
    %44 = vector.shape_cast %43 : vector<1x8x2048xf32> to vector<8x2048xf32>
    %c2033_i32 = arith.constant 2033 : i32
    %45 = tpu.dynamic_rotate %44 by %c2033_i32 dim 1 : vector<8x2048xf32>, i32 -> vector<8x2048xf32>
    %c6 = arith.constant 6 : index
    %c0_38 = arith.constant 0 : index
    %c0_39 = arith.constant 0 : index
    %46 = vector.load %arg2[%c6, %c0_38, %c0_39] : memref<9x1x2048xf32, #tpu.memory_space<vmem>>, vector<1x1x2048xf32>
    %47 = vector.shape_cast %46 : vector<1x1x2048xf32> to vector<1x2048xf32>
    %48 = vector.broadcast %47 : vector<1x2048xf32> to vector<8x2048xf32>
    %49 = arith.mulf %45, %48 : vector<8x2048xf32>
    %c48 = arith.constant 48 : index
    %c0_40 = arith.constant 0 : index
    %50 = vector.load %arg13[%c48, %c0_40] : memref<72x2048xf32, #tpu.memory_space<vmem>>, vector<8x2048xf32>
    tpu.vector_store %arg13[%c48, %c0_40], %49 {strides = array<i32>} : memref<72x2048xf32, #tpu.memory_space<vmem>>, vector<8x2048xf32>,
    %c0_41 = arith.constant 0 : index
    %c0_42 = arith.constant 0 : index
    %c0_43 = arith.constant 0 : index
    %51 = vector.load %arg1[%c0_41, %c0_42, %c0_43] : memref<1x8x2048xf32, #tpu.memory_space<vmem>>, vector<1x8x2048xf32>
    %52 = vector.shape_cast %51 : vector<1x8x2048xf32> to vector<8x2048xf32>
    %c2032_i32 = arith.constant 2032 : i32
    %53 = tpu.dynamic_rotate %52 by %c2032_i32 dim 1 : vector<8x2048xf32>, i32 -> vector<8x2048xf32>
    %c7 = arith.constant 7 : index
    %c0_44 = arith.constant 0 : index
    %c0_45 = arith.constant 0 : index
    %54 = vector.load %arg2[%c7, %c0_44, %c0_45] : memref<9x1x2048xf32, #tpu.memory_space<vmem>>, vector<1x1x2048xf32>
    %55 = vector.shape_cast %54 : vector<1x1x2048xf32> to vector<1x2048xf32>
    %56 = vector.broadcast %55 : vector<1x2048xf32> to vector<8x2048xf32>
    %57 = arith.mulf %53, %56 : vector<8x2048xf32>
    %c56 = arith.constant 56 : index
    %c0_46 = arith.constant 0 : index
    %58 = vector.load %arg13[%c56, %c0_46] : memref<72x2048xf32, #tpu.memory_space<vmem>>, vector<8x2048xf32>
    tpu.vector_store %arg13[%c56, %c0_46], %57 {strides = array<i32>} : memref<72x2048xf32, #tpu.memory_space<vmem>>, vector<8x2048xf32>,
    %c0_47 = arith.constant 0 : index
    %c0_48 = arith.constant 0 : index
    %c0_49 = arith.constant 0 : index
    %59 = vector.load %arg1[%c0_47, %c0_48, %c0_49] : memref<1x8x2048xf32, #tpu.memory_space<vmem>>, vector<1x8x2048xf32>
    %60 = vector.shape_cast %59 : vector<1x8x2048xf32> to vector<8x2048xf32>
    %c2031_i32 = arith.constant 2031 : i32
    %61 = tpu.dynamic_rotate %60 by %c2031_i32 dim 1 : vector<8x2048xf32>, i32 -> vector<8x2048xf32>
    %c8_50 = arith.constant 8 : index
    %c0_51 = arith.constant 0 : index
    %c0_52 = arith.constant 0 : index
    %62 = vector.load %arg2[%c8_50, %c0_51, %c0_52] : memref<9x1x2048xf32, #tpu.memory_space<vmem>>, vector<1x1x2048xf32>
    %63 = vector.shape_cast %62 : vector<1x1x2048xf32> to vector<1x2048xf32>
    %64 = vector.broadcast %63 : vector<1x2048xf32> to vector<8x2048xf32>
    %65 = arith.mulf %61, %64 : vector<8x2048xf32>
    %c64 = arith.constant 64 : index
    %c0_53 = arith.constant 0 : index
    %66 = vector.load %arg13[%c64, %c0_53] : memref<72x2048xf32, #tpu.memory_space<vmem>>, vector<8x2048xf32>
    tpu.vector_store %arg13[%c64, %c0_53], %65 {strides = array<i32>} : memref<72x2048xf32, #tpu.memory_space<vmem>>, vector<8x2048xf32>,
    %c0_54 = arith.constant 0 : index
    %c0_55 = arith.constant 0 : index
    %67 = vector.load %arg3[%c0_54, %c0_55] : memref<16x72xf32, #tpu.memory_space<vmem>>, vector<16x72xf32>
    %c0_56 = arith.constant 0 : index
    %c0_57 = arith.constant 0 : index
    %68 = vector.load %arg13[%c0_56, %c0_57] : memref<72x2048xf32, #tpu.memory_space<vmem>>, vector<72x2048xf32>
    %cst = arith.constant dense<0.000000e+00> : vector<16x2048xf32>
    %69 = tpu.matmul %67, %68, %cst {dimension_numbers = #tpu.dot_dimension_numbers<[1], [0], [0], [1], [0, 0, 1, 1], [], []>} : vector<16x72xf32>, vector<72x2048xf32>, vector<16x2048xf32> -> vector<16x2048xf32>
    %c0_58 = arith.constant 0 : index
    %c0_59 = arith.constant 0 : index
    %70 = vector.load %arg4[%c0_58, %c0_59] : memref<16x1xf32, #tpu.memory_space<vmem>>, vector<16x1xf32>
    %71 = vector.broadcast %70 : vector<16x1xf32> to vector<16x2048xf32>
    %72 = arith.addf %69, %71 : vector<16x2048xf32>
    %cst_60 = arith.constant 0.000000e+00 : f32
    %73 = vector.broadcast %cst_60 : f32 to vector<16x2048xf32>
    %74 = arith.maximumf %72, %73 : vector<16x2048xf32>
    %c0_61 = arith.constant 0 : index
    %c0_62 = arith.constant 0 : index
    %75 = vector.load %arg15[%c0_61, %c0_62] : memref<16x2048xf32, #tpu.memory_space<vmem>>, vector<16x2048xf32>
    tpu.vector_store %arg15[%c0_61, %c0_62], %74 {strides = array<i32>} : memref<16x2048xf32, #tpu.memory_space<vmem>>, vector<16x2048xf32>,
    %cst_63 = arith.constant 0.000000e+00 : f32
    %76 = vector.broadcast %cst_63 : f32 to vector<24x256xf32>
    %c0_64 = arith.constant 0 : index
    %c0_65 = arith.constant 0 : index
    %c0_66 = arith.constant 0 : index
    %77 = vector.load %arg5[%c0_64, %c0_65, %c0_66] : memref<3x24x16xf32, #tpu.memory_space<vmem>>, vector<1x24x16xf32>
    %78 = vector.shape_cast %77 : vector<1x24x16xf32> to vector<24x16xf32>
    %c0_67 = arith.constant 0 : index
    %c0_68 = arith.constant 0 : index
    %79 = vector.load %arg15[%c0_67, %c0_68] : memref<16x2048xf32, #tpu.memory_space<vmem>>, vector<16x1792xf32>
    %cst_69 = arith.constant dense<0.000000e+00> : vector<24x1792xf32>
    %80 = tpu.matmul %78, %79, %cst_69 {dimension_numbers = #tpu.dot_dimension_numbers<[1], [0], [0], [1], [0, 0, 1, 1], [], []>} : vector<24x16xf32>, vector<16x1792xf32>, vector<24x1792xf32> -> vector<24x1792xf32>
    %c1_70 = arith.constant 1 : index
    %c0_71 = arith.constant 0 : index
    %c0_72 = arith.constant 0 : index
    %81 = vector.load %arg5[%c1_70, %c0_71, %c0_72] : memref<3x24x16xf32, #tpu.memory_space<vmem>>, vector<1x24x16xf32>
    %82 = vector.shape_cast %81 : vector<1x24x16xf32> to vector<24x16xf32>
    %c0_73 = arith.constant 0 : index
    %c0_74 = arith.constant 0 : index
    %83 = vector.load %arg15[%c0_73, %c0_74] : memref<16x2048xf32, #tpu.memory_space<vmem>>, vector<16x2048xf32>
    %cst_75 = arith.constant dense<0.000000e+00> : vector<24x2048xf32>
    %84 = tpu.matmul %82, %83, %cst_75 {dimension_numbers = #tpu.dot_dimension_numbers<[1], [0], [0], [1], [0, 0, 1, 1], [], []>} : vector<24x16xf32>, vector<16x2048xf32>, vector<24x2048xf32> -> vector<24x2048xf32>
    %c2_76 = arith.constant 2 : index
    %c0_77 = arith.constant 0 : index
    %c0_78 = arith.constant 0 : index
    %85 = vector.load %arg5[%c2_76, %c0_77, %c0_78] : memref<3x24x16xf32, #tpu.memory_space<vmem>>, vector<1x24x16xf32>
    %86 = vector.shape_cast %85 : vector<1x24x16xf32> to vector<24x16xf32>
    %c0_79 = arith.constant 0 : index
    %c256 = arith.constant 256 : index
    %87 = vector.load %arg15[%c0_79, %c256] : memref<16x2048xf32, #tpu.memory_space<vmem>>, vector<16x1792xf32>
    %cst_80 = arith.constant dense<0.000000e+00> : vector<24x1792xf32>
    %88 = tpu.matmul %86, %87, %cst_80 {dimension_numbers = #tpu.dot_dimension_numbers<[1], [0], [0], [1], [0, 0, 1, 1], [], []>} : vector<24x16xf32>, vector<16x1792xf32>, vector<24x1792xf32> -> vector<24x1792xf32>
    %89 = tpu.concatenate %76, %80 in 1 : vector<24x256xf32>, vector<24x1792xf32> -> vector<24x2048xf32>
    %90 = arith.addf %84, %89 : vector<24x2048xf32>
    %91 = tpu.concatenate %88, %76 in 1 : vector<24x1792xf32>, vector<24x256xf32> -> vector<24x2048xf32>
    %92 = arith.addf %90, %91 : vector<24x2048xf32>
    %c0_81 = arith.constant 0 : index
    %c0_82 = arith.constant 0 : index
    %93 = vector.load %arg16[%c0_81, %c0_82] : memref<24x2048xf32, #tpu.memory_space<vmem>>, vector<24x2048xf32>
    tpu.vector_store %arg16[%c0_81, %c0_82], %92 {strides = array<i32>} : memref<24x2048xf32, #tpu.memory_space<vmem>>, vector<24x2048xf32>,
    %c0_83 = arith.constant 0 : index
    %c0_84 = arith.constant 0 : index
    %94 = vector.load %arg16[%c0_83, %c0_84] : memref<24x2048xf32, #tpu.memory_space<vmem>>, vector<24x2048xf32>
    %c17_i32_85 = arith.constant 17 : i32
    %95 = tpu.dynamic_rotate %94 by %c17_i32_85 dim 1 : vector<24x2048xf32>, i32 -> vector<24x2048xf32>
    %c0_86 = arith.constant 0 : index
    %c0_87 = arith.constant 0 : index
    %c0_88 = arith.constant 0 : index
    %96 = vector.load %arg2[%c0_86, %c0_87, %c0_88] : memref<9x1x2048xf32, #tpu.memory_space<vmem>>, vector<1x1x2048xf32>
    %97 = vector.shape_cast %96 : vector<1x1x2048xf32> to vector<1x2048xf32>
    %98 = vector.broadcast %97 : vector<1x2048xf32> to vector<24x2048xf32>
    %99 = arith.mulf %95, %98 : vector<24x2048xf32>
    %c0_89 = arith.constant 0 : index
    %c0_90 = arith.constant 0 : index
    %100 = vector.load %arg14[%c0_89, %c0_90] : memref<216x2048xf32, #tpu.memory_space<vmem>>, vector<24x2048xf32>
    tpu.vector_store %arg14[%c0_89, %c0_90], %99 {strides = array<i32>} : memref<216x2048xf32, #tpu.memory_space<vmem>>, vector<24x2048xf32>,
    %c0_91 = arith.constant 0 : index
    %c0_92 = arith.constant 0 : index
    %101 = vector.load %arg16[%c0_91, %c0_92] : memref<24x2048xf32, #tpu.memory_space<vmem>>, vector<24x2048xf32>
    %c16_i32_93 = arith.constant 16 : i32
    %102 = tpu.dynamic_rotate %101 by %c16_i32_93 dim 1 : vector<24x2048xf32>, i32 -> vector<24x2048xf32>
    %c1_94 = arith.constant 1 : index
    %c0_95 = arith.constant 0 : index
    %c0_96 = arith.constant 0 : index
    %103 = vector.load %arg2[%c1_94, %c0_95, %c0_96] : memref<9x1x2048xf32, #tpu.memory_space<vmem>>, vector<1x1x2048xf32>
    %104 = vector.shape_cast %103 : vector<1x1x2048xf32> to vector<1x2048xf32>
    %105 = vector.broadcast %104 : vector<1x2048xf32> to vector<24x2048xf32>
    %106 = arith.mulf %102, %105 : vector<24x2048xf32>
    %c24_97 = arith.constant 24 : index
    %c0_98 = arith.constant 0 : index
    %107 = vector.load %arg14[%c24_97, %c0_98] : memref<216x2048xf32, #tpu.memory_space<vmem>>, vector<24x2048xf32>
    tpu.vector_store %arg14[%c24_97, %c0_98], %106 {strides = array<i32>} : memref<216x2048xf32, #tpu.memory_space<vmem>>, vector<24x2048xf32>,
    %c0_99 = arith.constant 0 : index
    %c0_100 = arith.constant 0 : index
    %108 = vector.load %arg16[%c0_99, %c0_100] : memref<24x2048xf32, #tpu.memory_space<vmem>>, vector<24x2048xf32>
    %c15_i32_101 = arith.constant 15 : i32
    %109 = tpu.dynamic_rotate %108 by %c15_i32_101 dim 1 : vector<24x2048xf32>, i32 -> vector<24x2048xf32>
    %c2_102 = arith.constant 2 : index
    %c0_103 = arith.constant 0 : index
    %c0_104 = arith.constant 0 : index
    %110 = vector.load %arg2[%c2_102, %c0_103, %c0_104] : memref<9x1x2048xf32, #tpu.memory_space<vmem>>, vector<1x1x2048xf32>
    %111 = vector.shape_cast %110 : vector<1x1x2048xf32> to vector<1x2048xf32>
    %112 = vector.broadcast %111 : vector<1x2048xf32> to vector<24x2048xf32>
    %113 = arith.mulf %109, %112 : vector<24x2048xf32>
    %c48_105 = arith.constant 48 : index
    %c0_106 = arith.constant 0 : index
    %114 = vector.load %arg14[%c48_105, %c0_106] : memref<216x2048xf32, #tpu.memory_space<vmem>>, vector<24x2048xf32>
    tpu.vector_store %arg14[%c48_105, %c0_106], %113 {strides = array<i32>} : memref<216x2048xf32, #tpu.memory_space<vmem>>, vector<24x2048xf32>,
    %c0_107 = arith.constant 0 : index
    %c0_108 = arith.constant 0 : index
    %115 = vector.load %arg16[%c0_107, %c0_108] : memref<24x2048xf32, #tpu.memory_space<vmem>>, vector<24x2048xf32>
    %c1_i32_109 = arith.constant 1 : i32
    %116 = tpu.dynamic_rotate %115 by %c1_i32_109 dim 1 : vector<24x2048xf32>, i32 -> vector<24x2048xf32>
    %c3_110 = arith.constant 3 : index
    %c0_111 = arith.constant 0 : index
    %c0_112 = arith.constant 0 : index
    %117 = vector.load %arg2[%c3_110, %c0_111, %c0_112] : memref<9x1x2048xf32, #tpu.memory_space<vmem>>, vector<1x1x2048xf32>
    %118 = vector.shape_cast %117 : vector<1x1x2048xf32> to vector<1x2048xf32>
    %119 = vector.broadcast %118 : vector<1x2048xf32> to vector<24x2048xf32>
    %120 = arith.mulf %116, %119 : vector<24x2048xf32>
    %c72 = arith.constant 72 : index
    %c0_113 = arith.constant 0 : index
    %121 = vector.load %arg14[%c72, %c0_113] : memref<216x2048xf32, #tpu.memory_space<vmem>>, vector<24x2048xf32>
    tpu.vector_store %arg14[%c72, %c0_113], %120 {strides = array<i32>} : memref<216x2048xf32, #tpu.memory_space<vmem>>, vector<24x2048xf32>,
    %c0_114 = arith.constant 0 : index
    %c0_115 = arith.constant 0 : index
    %122 = vector.load %arg16[%c0_114, %c0_115] : memref<24x2048xf32, #tpu.memory_space<vmem>>, vector<24x2048xf32>
    %c96 = arith.constant 96 : index
    %c0_116 = arith.constant 0 : index
    %123 = vector.load %arg14[%c96, %c0_116] : memref<216x2048xf32, #tpu.memory_space<vmem>>, vector<24x2048xf32>
    tpu.vector_store %arg14[%c96, %c0_116], %122 {strides = array<i32>} : memref<216x2048xf32, #tpu.memory_space<vmem>>, vector<24x2048xf32>,
    %c0_117 = arith.constant 0 : index
    %c0_118 = arith.constant 0 : index
    %124 = vector.load %arg16[%c0_117, %c0_118] : memref<24x2048xf32, #tpu.memory_space<vmem>>, vector<24x2048xf32>
    %c2047_i32_119 = arith.constant 2047 : i32
    %125 = tpu.dynamic_rotate %124 by %c2047_i32_119 dim 1 : vector<24x2048xf32>, i32 -> vector<24x2048xf32>
    %c5_120 = arith.constant 5 : index
    %c0_121 = arith.constant 0 : index
    %c0_122 = arith.constant 0 : index
    %126 = vector.load %arg2[%c5_120, %c0_121, %c0_122] : memref<9x1x2048xf32, #tpu.memory_space<vmem>>, vector<1x1x2048xf32>
    %127 = vector.shape_cast %126 : vector<1x1x2048xf32> to vector<1x2048xf32>
    %128 = vector.broadcast %127 : vector<1x2048xf32> to vector<24x2048xf32>
    %129 = arith.mulf %125, %128 : vector<24x2048xf32>
    %c120 = arith.constant 120 : index
    %c0_123 = arith.constant 0 : index
    %130 = vector.load %arg14[%c120, %c0_123] : memref<216x2048xf32, #tpu.memory_space<vmem>>, vector<24x2048xf32>
    tpu.vector_store %arg14[%c120, %c0_123], %129 {strides = array<i32>} : memref<216x2048xf32, #tpu.memory_space<vmem>>, vector<24x2048xf32>,
    %c0_124 = arith.constant 0 : index
    %c0_125 = arith.constant 0 : index
    %131 = vector.load %arg16[%c0_124, %c0_125] : memref<24x2048xf32, #tpu.memory_space<vmem>>, vector<24x2048xf32>
    %c2033_i32_126 = arith.constant 2033 : i32
    %132 = tpu.dynamic_rotate %131 by %c2033_i32_126 dim 1 : vector<24x2048xf32>, i32 -> vector<24x2048xf32>
    %c6_127 = arith.constant 6 : index
    %c0_128 = arith.constant 0 : index
    %c0_129 = arith.constant 0 : index
    %133 = vector.load %arg2[%c6_127, %c0_128, %c0_129] : memref<9x1x2048xf32, #tpu.memory_space<vmem>>, vector<1x1x2048xf32>
    %134 = vector.shape_cast %133 : vector<1x1x2048xf32> to vector<1x2048xf32>
    %135 = vector.broadcast %134 : vector<1x2048xf32> to vector<24x2048xf32>
    %136 = arith.mulf %132, %135 : vector<24x2048xf32>
    %c144 = arith.constant 144 : index
    %c0_130 = arith.constant 0 : index
    %137 = vector.load %arg14[%c144, %c0_130] : memref<216x2048xf32, #tpu.memory_space<vmem>>, vector<24x2048xf32>
    tpu.vector_store %arg14[%c144, %c0_130], %136 {strides = array<i32>} : memref<216x2048xf32, #tpu.memory_space<vmem>>, vector<24x2048xf32>,
    %c0_131 = arith.constant 0 : index
    %c0_132 = arith.constant 0 : index
    %138 = vector.load %arg16[%c0_131, %c0_132] : memref<24x2048xf32, #tpu.memory_space<vmem>>, vector<24x2048xf32>
    %c2032_i32_133 = arith.constant 2032 : i32
    %139 = tpu.dynamic_rotate %138 by %c2032_i32_133 dim 1 : vector<24x2048xf32>, i32 -> vector<24x2048xf32>
    %c7_134 = arith.constant 7 : index
    %c0_135 = arith.constant 0 : index
    %c0_136 = arith.constant 0 : index
    %140 = vector.load %arg2[%c7_134, %c0_135, %c0_136] : memref<9x1x2048xf32, #tpu.memory_space<vmem>>, vector<1x1x2048xf32>
    %141 = vector.shape_cast %140 : vector<1x1x2048xf32> to vector<1x2048xf32>
    %142 = vector.broadcast %141 : vector<1x2048xf32> to vector<24x2048xf32>
    %143 = arith.mulf %139, %142 : vector<24x2048xf32>
    %c168 = arith.constant 168 : index
    %c0_137 = arith.constant 0 : index
    %144 = vector.load %arg14[%c168, %c0_137] : memref<216x2048xf32, #tpu.memory_space<vmem>>, vector<24x2048xf32>
    tpu.vector_store %arg14[%c168, %c0_137], %143 {strides = array<i32>} : memref<216x2048xf32, #tpu.memory_space<vmem>>, vector<24x2048xf32>,
    %c0_138 = arith.constant 0 : index
    %c0_139 = arith.constant 0 : index
    %145 = vector.load %arg16[%c0_138, %c0_139] : memref<24x2048xf32, #tpu.memory_space<vmem>>, vector<24x2048xf32>
    %c2031_i32_140 = arith.constant 2031 : i32
    %146 = tpu.dynamic_rotate %145 by %c2031_i32_140 dim 1 : vector<24x2048xf32>, i32 -> vector<24x2048xf32>
    %c8_141 = arith.constant 8 : index
    %c0_142 = arith.constant 0 : index
    %c0_143 = arith.constant 0 : index
    %147 = vector.load %arg2[%c8_141, %c0_142, %c0_143] : memref<9x1x2048xf32, #tpu.memory_space<vmem>>, vector<1x1x2048xf32>
    %148 = vector.shape_cast %147 : vector<1x1x2048xf32> to vector<1x2048xf32>
    %149 = vector.broadcast %148 : vector<1x2048xf32> to vector<24x2048xf32>
    %150 = arith.mulf %146, %149 : vector<24x2048xf32>
    %c192 = arith.constant 192 : index
    %c0_144 = arith.constant 0 : index
    %151 = vector.load %arg14[%c192, %c0_144] : memref<216x2048xf32, #tpu.memory_space<vmem>>, vector<24x2048xf32>
    tpu.vector_store %arg14[%c192, %c0_144], %150 {strides = array<i32>} : memref<216x2048xf32, #tpu.memory_space<vmem>>, vector<24x2048xf32>,
    %c0_145 = arith.constant 0 : index
    %c0_146 = arith.constant 0 : index
    %152 = vector.load %arg6[%c0_145, %c0_146] : memref<16x216xf32, #tpu.memory_space<vmem>>, vector<16x216xf32>
    %c0_147 = arith.constant 0 : index
    %c0_148 = arith.constant 0 : index
    %153 = vector.load %arg14[%c0_147, %c0_148] : memref<216x2048xf32, #tpu.memory_space<vmem>>, vector<216x2048xf32>
    %cst_149 = arith.constant dense<0.000000e+00> : vector<16x2048xf32>
    %154 = tpu.matmul %152, %153, %cst_149 {dimension_numbers = #tpu.dot_dimension_numbers<[1], [0], [0], [1], [0, 0, 1, 1], [], []>} : vector<16x216xf32>, vector<216x2048xf32>, vector<16x2048xf32> -> vector<16x2048xf32>
    %c0_150 = arith.constant 0 : index
    %c0_151 = arith.constant 0 : index
    %155 = vector.load %arg7[%c0_150, %c0_151] : memref<16x1xf32, #tpu.memory_space<vmem>>, vector<16x1xf32>
    %156 = vector.broadcast %155 : vector<16x1xf32> to vector<16x2048xf32>
    %157 = arith.addf %154, %156 : vector<16x2048xf32>
    %cst_152 = arith.constant 0.000000e+00 : f32
    %158 = vector.broadcast %cst_152 : f32 to vector<16x2048xf32>
    %159 = arith.maximumf %157, %158 : vector<16x2048xf32>
    %c0_153 = arith.constant 0 : index
    %c0_154 = arith.constant 0 : index
    %160 = vector.load %arg17[%c0_153, %c0_154] : memref<16x2048xf32, #tpu.memory_space<vmem>>, vector<16x2048xf32>
    tpu.vector_store %arg17[%c0_153, %c0_154], %159 {strides = array<i32>} : memref<16x2048xf32, #tpu.memory_space<vmem>>, vector<16x2048xf32>,
    %cst_155 = arith.constant 0.000000e+00 : f32
    %161 = vector.broadcast %cst_155 : f32 to vector<8x256xf32>
    %c0_156 = arith.constant 0 : index
    %c0_157 = arith.constant 0 : index
    %c0_158 = arith.constant 0 : index
    %162 = vector.load %arg8[%c0_156, %c0_157, %c0_158] : memref<3x8x16xf32, #tpu.memory_space<vmem>>, vector<1x8x16xf32>
    %163 = vector.shape_cast %162 : vector<1x8x16xf32> to vector<8x16xf32>
    %c0_159 = arith.constant 0 : index
    %c0_160 = arith.constant 0 : index
    %164 = vector.load %arg17[%c0_159, %c0_160] : memref<16x2048xf32, #tpu.memory_space<vmem>>, vector<16x1792xf32>
    %cst_161 = arith.constant dense<0.000000e+00> : vector<8x1792xf32>
    %165 = tpu.matmul %163, %164, %cst_161 {dimension_numbers = #tpu.dot_dimension_numbers<[1], [0], [0], [1], [0, 0, 1, 1], [], []>} : vector<8x16xf32>, vector<16x1792xf32>, vector<8x1792xf32> -> vector<8x1792xf32>
    %c1_162 = arith.constant 1 : index
    %c0_163 = arith.constant 0 : index
    %c0_164 = arith.constant 0 : index
    %166 = vector.load %arg8[%c1_162, %c0_163, %c0_164] : memref<3x8x16xf32, #tpu.memory_space<vmem>>, vector<1x8x16xf32>
    %167 = vector.shape_cast %166 : vector<1x8x16xf32> to vector<8x16xf32>
    %c0_165 = arith.constant 0 : index
    %c0_166 = arith.constant 0 : index
    %168 = vector.load %arg17[%c0_165, %c0_166] : memref<16x2048xf32, #tpu.memory_space<vmem>>, vector<16x2048xf32>
    %cst_167 = arith.constant dense<0.000000e+00> : vector<8x2048xf32>
    %169 = tpu.matmul %167, %168, %cst_167 {dimension_numbers = #tpu.dot_dimension_numbers<[1], [0], [0], [1], [0, 0, 1, 1], [], []>} : vector<8x16xf32>, vector<16x2048xf32>, vector<8x2048xf32> -> vector<8x2048xf32>
    %c2_168 = arith.constant 2 : index
    %c0_169 = arith.constant 0 : index
    %c0_170 = arith.constant 0 : index
    %170 = vector.load %arg8[%c2_168, %c0_169, %c0_170] : memref<3x8x16xf32, #tpu.memory_space<vmem>>, vector<1x8x16xf32>
    %171 = vector.shape_cast %170 : vector<1x8x16xf32> to vector<8x16xf32>
    %c0_171 = arith.constant 0 : index
    %c256_172 = arith.constant 256 : index
    %172 = vector.load %arg17[%c0_171, %c256_172] : memref<16x2048xf32, #tpu.memory_space<vmem>>, vector<16x1792xf32>
    %cst_173 = arith.constant dense<0.000000e+00> : vector<8x1792xf32>
    %173 = tpu.matmul %171, %172, %cst_173 {dimension_numbers = #tpu.dot_dimension_numbers<[1], [0], [0], [1], [0, 0, 1, 1], [], []>} : vector<8x16xf32>, vector<16x1792xf32>, vector<8x1792xf32> -> vector<8x1792xf32>
    %174 = tpu.concatenate %161, %165 in 1 : vector<8x256xf32>, vector<8x1792xf32> -> vector<8x2048xf32>
    %175 = arith.addf %169, %174 : vector<8x2048xf32>
    %176 = tpu.concatenate %173, %161 in 1 : vector<8x1792xf32>, vector<8x256xf32> -> vector<8x2048xf32>
    %177 = arith.addf %175, %176 : vector<8x2048xf32>
    %c0_174 = arith.constant 0 : index
    %c0_175 = arith.constant 0 : index
    %178 = vector.load %arg9[%c0_174, %c0_175] : memref<8x1xf32, #tpu.memory_space<vmem>>, vector<8x1xf32>
    %179 = vector.broadcast %178 : vector<8x1xf32> to vector<8x2048xf32>
    %180 = arith.addf %177, %179 : vector<8x2048xf32>
    %cst_176 = arith.constant 0.000000e+00 : f32
    %181 = vector.broadcast %cst_176 : f32 to vector<8x2048xf32>
    %182 = arith.maximumf %180, %181 : vector<8x2048xf32>
    %cst_177 = arith.constant dense<0.000000e+00> : vector<8xf32>
    %183 = vector.multi_reduction <add>, %182, %cst_177 [1] : vector<8x2048xf32> to vector<8xf32>
    %184 = vector.shape_cast %183 : vector<8xf32> to vector<8x1xf32>
    %c0_178 = arith.constant 0 : index
    %c0_179 = arith.constant 0 : index
    %185 = vector.load %arg10[%c0_178, %c0_179] : memref<8x10xf32, #tpu.memory_space<vmem>>, vector<8x10xf32>
    %186 = vector.broadcast %184 : vector<8x1xf32> to vector<8x10xf32>
    %187 = arith.mulf %185, %186 : vector<8x10xf32>
    %cst_180 = arith.constant dense<0.000000e+00> : vector<10xf32>
    %188 = vector.multi_reduction <add>, %187, %cst_180 [0] : vector<8x10xf32> to vector<10xf32>
    %189 = vector.shape_cast %188 : vector<10xf32> to vector<1x10xf32>
    %cst_181 = arith.constant 3.086420e-04 : f32
    %190 = vector.broadcast %cst_181 : f32 to vector<1x10xf32>
    %191 = arith.mulf %189, %190 : vector<1x10xf32>
    %c0_182 = arith.constant 0 : index
    %c0_183 = arith.constant 0 : index
    %192 = vector.load %arg11[%c0_182, %c0_183] : memref<1x10xf32, #tpu.memory_space<vmem>>, vector<1x10xf32>
    %193 = arith.addf %191, %192 : vector<1x10xf32>
    %c0_184 = arith.constant 0 : index
    %c0_185 = arith.constant 0 : index
    %c0_186 = arith.constant 0 : index
    %194 = vector.load %arg12[%c0_184, %c0_185, %c0_186] : memref<1x1x10xf32, #tpu.memory_space<vmem>>, vector<1x1x10xf32>
    %195 = vector.shape_cast %194 : vector<1x1x10xf32> to vector<1x10xf32>
    %196 = vector.shape_cast %193 : vector<1x10xf32> to vector<1x1x10xf32>
    tpu.vector_store %arg12[%c0_184, %c0_185, %c0_186], %196 {strides = array<i32>} : memref<1x1x10xf32, #tpu.memory_space<vmem>>, vector<1x1x10xf32>,
    return
  }
  func.func @transform_0(%arg0: i32) -> (i32, i32, i32) {
    %c0_i32 = arith.constant 0 : i32
    %c0_i32_0 = arith.constant 0 : i32
    %c0_i32_1 = arith.constant 0 : i32
    return %arg0, %c0_i32, %c0_i32_0 : i32, i32, i32
  }
  func.func @transform_1(%arg0: i32) -> (i32, i32, i32) {
    %c0_i32 = arith.constant 0 : i32
    %c0_i32_0 = arith.constant 0 : i32
    %c0_i32_1 = arith.constant 0 : i32
    %c0_i32_2 = arith.constant 0 : i32
    return %c0_i32, %c0_i32_0, %c0_i32_1 : i32, i32, i32
  }
  func.func @transform_2(%arg0: i32) -> (i32, i32) {
    %c0_i32 = arith.constant 0 : i32
    %c0_i32_0 = arith.constant 0 : i32
    %c0_i32_1 = arith.constant 0 : i32
    return %c0_i32, %c0_i32_0 : i32, i32
  }
  func.func @transform_3(%arg0: i32) -> (i32, i32) {
    %c0_i32 = arith.constant 0 : i32
    %c0_i32_0 = arith.constant 0 : i32
    %c0_i32_1 = arith.constant 0 : i32
    return %c0_i32, %c0_i32_0 : i32, i32
  }
  func.func @transform_4(%arg0: i32) -> (i32, i32, i32) {
    %c0_i32 = arith.constant 0 : i32
    %c0_i32_0 = arith.constant 0 : i32
    %c0_i32_1 = arith.constant 0 : i32
    %c0_i32_2 = arith.constant 0 : i32
    return %c0_i32, %c0_i32_0, %c0_i32_1 : i32, i32, i32
  }
  func.func @transform_5(%arg0: i32) -> (i32, i32) {
    %c0_i32 = arith.constant 0 : i32
    %c0_i32_0 = arith.constant 0 : i32
    %c0_i32_1 = arith.constant 0 : i32
    return %c0_i32, %c0_i32_0 : i32, i32
  }
  func.func @transform_6(%arg0: i32) -> (i32, i32) {
    %c0_i32 = arith.constant 0 : i32
    %c0_i32_0 = arith.constant 0 : i32
    %c0_i32_1 = arith.constant 0 : i32
    return %c0_i32, %c0_i32_0 : i32, i32
  }
  func.func @transform_7(%arg0: i32) -> (i32, i32, i32) {
    %c0_i32 = arith.constant 0 : i32
    %c0_i32_0 = arith.constant 0 : i32
    %c0_i32_1 = arith.constant 0 : i32
    %c0_i32_2 = arith.constant 0 : i32
    return %c0_i32, %c0_i32_0, %c0_i32_1 : i32, i32, i32
  }
  func.func @transform_8(%arg0: i32) -> (i32, i32) {
    %c0_i32 = arith.constant 0 : i32
    %c0_i32_0 = arith.constant 0 : i32
    %c0_i32_1 = arith.constant 0 : i32
    return %c0_i32, %c0_i32_0 : i32, i32
  }
  func.func @transform_9(%arg0: i32) -> (i32, i32) {
    %c0_i32 = arith.constant 0 : i32
    %c0_i32_0 = arith.constant 0 : i32
    %c0_i32_1 = arith.constant 0 : i32
    return %c0_i32, %c0_i32_0 : i32, i32
  }
  func.func @transform_10(%arg0: i32) -> (i32, i32) {
    %c0_i32 = arith.constant 0 : i32
    %c0_i32_0 = arith.constant 0 : i32
    %c0_i32_1 = arith.constant 0 : i32
    return %c0_i32, %c0_i32_0 : i32, i32
  }
  func.func @transform_11(%arg0: i32) -> (i32, i32, i32) {
    %c0_i32 = arith.constant 0 : i32
    %c0_i32_0 = arith.constant 0 : i32
    %c0_i32_1 = arith.constant 0 : i32
    return %arg0, %c0_i32, %c0_i32_0 : i32, i32, i32
  }
}

</mosaic_0001>

<bundles_post_ra>
// kernel: two_stream_forward.1
= control target key start
LH: loop header
LB: loop body
LE: loop exit
PB: predicated region body
PF: predicated region fallthrough
CT: control target
= control target key end

     0   :  { %s17095_s0 = inlined_call_operand.vmem [shape: f32[2,8,2048], index: 0, kind: input, shape index: {}]   ;;  %s17096_s1 = inlined_call_operand.vmem [shape: f32[9,1,2048], index: 1, kind: input, shape index: {}]   ;;  %s17097_s2 = inlined_call_operand.vmem [shape: f32[16,72], index: 2, kind: input, shape index: {}]   ;;  %s17098_s3 = inlined_call_operand.vmem [shape: f32[16,1], index: 3, kind: input, shape index: {}]   ;;  %s17099_s4 = inlined_call_operand.vmem [shape: f32[3,24,16], index: 4, kind: input, shape index: {}]   ;;  %s17100_s5 = inlined_call_operand.vmem [shape: f32[16,216], index: 5, kind: input, shape index: {}]   ;;  %s17101_s6 = inlined_call_operand.vmem [shape: f32[16,1], index: 6, kind: input, shape index: {}]   ;;  %s17102_s7 = inlined_call_operand.vmem [shape: f32[3,8,16], index: 7, kind: input, shape index: {}]   ;;  %s17103_s8 = inlined_call_operand.vmem [shape: f32[8,1], index: 8, kind: input, shape index: {}]   ;;  %s17104_s9 = inlined_call_operand.vmem [shape: f32[8,10], index: 9, kind: input, shape index: {}]   ;;  %s17105_s10 = inlined_call_operand.vmem [shape: f32[1,10], index: 10, kind: input, shape index: {}]   ;;  %s17106_s11 = inlined_call_operand.hbm [shape: f32[2,1,10], index: 11, kind: output, shape index: {}]  }
   0x1   :  { %17419 = sst [smem:[#allocation204_spill]] %s17095_s0 }
   0x2   :  { %17420 = sst [smem:[#allocation205_spill]] %s17097_s2 }
   0x3   :  { %16 = vsyncpa [#allocation8], 0 }
   0x4   :  { %18 = vsyncpa [#allocation8 + $0x1], 0  ;;  %s11112_s17 = smov 0   ;;  %s11114_s18 = smov 0  }
   0x5   :  { %s11116_s19 = smov 0   ;;  %s11118_s20 = smov 0  }
   0x6 LB: > { %s11133_s21 = sadd.s32 4294967295, %s11039_s20   ;;  %s10736_s22 = sadd.s32 4294967294, %s11039_s20   ;;  %s11039_s20 = sphi %s11118_s20, %s18094_s20   ;;  %s11035_s19 = sphi %s11116_s19, %s18093_s19   ;;  %s11031_s18 = sphi %s11114_s18, %s18092_s18   ;;  %s11027_s17 = sphi %s11112_s17, %s18091_s17  }
   0x7   : > { %s11137_s23 = sadd.s32 1, %s11039_s20   ;;  %s267_s24 = sadd.s32 1, %s11035_s19 }
   0x8   : > { %s264_s25 = ssub.s32 %s11039_s20, %s11137_s23  ;;  %p277_p0 = scmp.ne.s32.totalorder %s11035_s19, %s11031_s18 }
   0x9   : > { %p265_p1 = scmp.eq.s32.totalorder %s264_s25, 0  ;;  %p278_p2 = scmp.eq.s32.totalorder %s11133_s21, 1 }
   0xa   : > { %p283_p3 = scmp.ne.s32.totalorder %s11031_s18, %s11027_s17  ;;  %p284_p4 = scmp.eq.s32.totalorder %s10736_s22, 1 }
   0xb   : > { %s11148_s26 = scalar_select %p265_p1, %s11035_s19, %s267_s24  }
   0xc   : > { %p11150_p5 = por %p278_p2, %p277_p0  ;;  %p11154_p6 = por %p284_p4, %p283_p3 }
   0xd   : > { %p10739_p7 = scmp.ge.s32.totalorder %s11039_s20, 1  ;;  %p340_p8 = scmp.lt.s32.totalorder %s11039_s20, 3 }
   0xf   : > { %p341_p9 = pnand %p10739_p7, %p340_p8 }
  0x11   : > { %344 = sbr.rel (%p341_p9) target bundleno = 2334 (0x91e), region = 64 }
  0x16   : > { %p379_p10 = scmp.lt.s32.totalorder %s11133_s21, 1  ;;  %s17423_s0 = sld [smem:[#allocation204_spill]]  ;;  %v17115_v4 = vmov 0.0   ;;  %v432_v10 = vlaneseq  ;;  %v11336_v20 = vld [vmem:[%s17096_s1 + $0x80] sm:$0xff]  ;;  %v11350_v23 = vld [vmem:[%s17096_s1 + $0x70] sm:$0xff]  ;;  %vm2031_vm8 = vcmask 588800  }
  0x17   : > { %s17134_s15 = smov 111   ;;  %s17121_s16 = smov 112   ;;  %2179 = vmatprep.mubr.f32.mxu1 %v17115_v4  ;;  %2102 = vmatprep.mubr.f32.mxu0 %v17115_v4  ;;  %v11375_v33 = vld [vmem:[%s17096_s1 + $0x60] sm:$0xff]  ;;  %v11408_v46 = vld [vmem:[%s17096_s1 + $0x50] sm:$0xff]  ;;  %vm2749_vm9 = vcmask 130048   ;;  %vm8259_vm10 = vcmask 719872  }
  0x18   : > { %s380_s29 = scalar_select %p379_p10, %s11133_s21, 1  ;;  %v11314_v13 = vshrl.u32 %v432_v10, 7  ;;  %v11316_v14 = vand.u32 127, %v432_v10  ;;  %v11427_v53 = vld [vmem:[%s17096_s1 + $0x30] sm:$0xff]  ;;  %vm10655_vm11 = vcmask 80896   ;;  %vm10666_vm12 = vcmask 73728  }
  0x19   : > { %s17113_s22 = smov 113   ;;  %s17111_s24 = smov 127  }
  0x1a   : > { %s10901_s30 = sshll.u32 %s380_s29, 7  ;;  %s17345_s25 = smov 1   ;;  %v11323_v15 = vsub.s32 3, %v11314_v13  ;;  %v11329_v17 = vsub.s32 2, %v11314_v13  ;;  %vm1739_vm0 = vcmp.lt.s32.totalorder %v11316_v14, 111  ;;  %vm1557_vm1 = vcmp.lt.s32.totalorder %v11316_v14, 112 }
  0x1b   : > { %s17132_s29 = smov 15   ;;  %s17107_s12 = smov 17   ;;  %vm1375_vm2 = vcmp.lt.s32.totalorder %v11316_v14, 113  ;;  %vm1193_vm3 = vcmp.lt.s32.totalorder %v11316_v14, 127  ;;  %vm979_vm4 = vcmp.lt.s32.totalorder %v11316_v14, 1  ;;  %vm797_vm5 = vcmp.lt.s32.totalorder %v11316_v14, 15 }
  0x1c   : > { %s11165_s14 = scalar_lea.vmem %s17423_s0, %s10901_s30  ;;  %s17109_s30 = smov 16   ;;  %17424 = vst [vmem:[#allocation10_spill] sm:$0xff] %v11323_v15  ;;  %17425 = vst [vmem:[#allocation11_spill] sm:$0xff] %v11329_v17  ;;  %v1776_v21 = vrot.slane %v11336_v20, %v11323_v15  ;;  %v1772_v22 = vrot.slane %v11336_v20, %v11329_v17  ;;  %v1594_v29 = vrot.slane %v11350_v23, %v11323_v15  ;;  %vm615_vm6 = vcmp.lt.s32.totalorder %v11316_v14, 16 }
  0x1d   : > { %v11168_v0 = vld [vmem:[%s11165_s14 + $0x18] sm:$0xff]  ;;  %v11171_v1 = vld [vmem:[%s11165_s14 + $0x10] sm:$0xff]  ;;  %v11178_v2 = vld [vmem:[%s11165_s14 + $0x20] sm:$0xff]  ;;  %v1590_v30 = vrot.slane %v11350_v23, %v11329_v17  ;;  %v1412_v40 = vrot.slane %v11375_v33, %v11323_v15  ;;  %v1408_v45 = vrot.slane %v11375_v33, %v11329_v17  ;;  %v1230_v51 = vrot.slane %v11408_v46, %v11323_v15  ;;  %s17427_s13 = smov 16   ;;  %s17431_s2 = sld [smem:[#allocation205_spill]] }
  0x1e   : > { %1713 = vrot.lane.b32.xlu0 %v11168_v0, %s17134_s15  ;;  %1711 = vrot.lane.b32.xlu1 %v11171_v1, %s17134_s15  ;;  %v11205_v3 = vld [vmem:[%s11165_s14 + $0x8] sm:$0xff]  ;;  %v11230_v5 = vld [vmem:[%s11165_s14 + $0x38] sm:$0xff]  ;;  %v1226_v52 = vrot.slane %v11408_v46, %v11329_v17  ;;  %v1016_v60 = vrot.slane %v11427_v53, %v11323_v15  ;;  %vm434_vm7 = vcmp.lt.s32.totalorder %v11316_v14, 17  ;;  %s17778_s0 = smov 1  }
  0x1f   : > { %v11233_v6 = vld [vmem:[%s11165_s14 + $0x40] sm:$0xff]  ;;  %v11240_v7 = vld [vmem:[%s11165_s14 + $0x30] sm:$0xff]  ;;  %v11267_v8 = vld [vmem:[%s11165_s14 + $0x28] sm:$0xff] }
  0x20   : > { %v11278_v9 = vld [vmem:[%s11165_s14] sm:$0xff]  ;;  %v11309_v11 = vld [vmem:[%s11165_s14 + $0x58] sm:$0xff]  ;;  %v11326_v16 = vld [vmem:[%s11165_s14 + $0x50] sm:$0xff] }
  0x21   : > { %v11312_v12 = vld [vmem:[%s11165_s14 + $0x60] sm:$0xff]  ;;  %v11370_v32 = vld [vmem:[%s11165_s14 + $0x78] sm:$0xff] }
  0x22   : > { %1715 = vrot.lane.b32.xlu0 %v11178_v2, %s17134_s15  ;;  %1531 = vrot.lane.b32.xlu1 %v11168_v0, %s17121_s16 }
  0x26   : > { %1533 = vrot.lane.b32.xlu0 %v11178_v2, %s17121_s16  ;;  %1529 = vrot.lane.b32.xlu1 %v11171_v1, %s17121_s16 }
  0x2a   : > { %1351 = vrot.lane.b32.xlu1 %v11178_v2, %s17113_s22  ;;  %1349 = vrot.lane.b32.xlu0 %v11168_v0, %s17113_s22 }
  0x2e   : > { %1347 = vrot.lane.b32.xlu0 %v11171_v1, %s17113_s22  ;;  %1167 = vrot.lane.b32.xlu1 %v11168_v0, %s17111_s24 }
  0x32   : > { %1169 = vrot.lane.b32.xlu0 %v11178_v2, %s17111_s24  ;;  %1165 = vrot.lane.b32.xlu1 %v11171_v1, %s17111_s24 }
  0x36   : > { %953 = vrot.lane.b32.xlu1 %v11168_v0, %s17345_s25  ;;  %951 = vrot.lane.b32.xlu0 %v11171_v1, %s17345_s25 }
  0x3a   : > { %949 = vrot.lane.b32.xlu0 %v11205_v3, %s17345_s25  ;;  %769 = vrot.lane.b32.xlu1 %v11171_v1, %s17132_s29 }
  0x3e   : > { %771 = vrot.lane.b32.xlu0 %v11168_v0, %s17132_s29  ;;  %767 = vrot.lane.b32.xlu1 %v11205_v3, %s17132_s29 }
  0x42   : > { %589 = vrot.lane.b32.xlu1 %v11168_v0, %s17109_s30  ;;  %587 = vrot.lane.b32.xlu0 %v11171_v1, %s17109_s30 }
  0x46   : > { %585 = vrot.lane.b32.xlu0 %v11205_v3, %s17109_s30  ;;  %404 = vrot.lane.b32.xlu1 %v11171_v1, %s17107_s12 }
  0x4a   : > { %406 = vrot.lane.b32.xlu0 %v11168_v0, %s17107_s12  ;;  %402 = vrot.lane.b32.xlu1 %v11205_v3, %s17107_s12 }
  0x4e   : > { %1721 = vrot.lane.b32.xlu0 %v11230_v5, %s17134_s15  ;;  %1723 = vrot.lane.b32.xlu1 %v11233_v6, %s17134_s15 }
  0x52   : > { %1719 = vrot.lane.b32.xlu0 %v11240_v7, %s17134_s15  ;;  %1539 = vrot.lane.b32.xlu1 %v11230_v5, %s17121_s16 }
  0x56   : > { %1541 = vrot.lane.b32.xlu0 %v11233_v6, %s17121_s16  ;;  %1537 = vrot.lane.b32.xlu1 %v11240_v7, %s17121_s16 }
  0x5a   : > { %1357 = vrot.lane.b32.xlu0 %v11230_v5, %s17113_s22  ;;  %1359 = vrot.lane.b32.xlu1 %v11233_v6, %s17113_s22 }
  0x5e   : > { %1355 = vrot.lane.b32.xlu0 %v11240_v7, %s17113_s22  ;;  %1175 = vrot.lane.b32.xlu1 %v11230_v5, %s17111_s24 }
  0x62   : > { %1177 = vrot.lane.b32.xlu0 %v11233_v6, %s17111_s24  ;;  %1173 = vrot.lane.b32.xlu1 %v11240_v7, %s17111_s24 }
  0x66   : > { %959 = vrot.lane.b32.xlu0 %v11240_v7, %s17345_s25  ;;  %961 = vrot.lane.b32.xlu1 %v11230_v5, %s17345_s25 }
  0x6a   : > { %957 = vrot.lane.b32.xlu0 %v11267_v8, %s17345_s25  ;;  %1709 = vrot.lane.b32.xlu1 %v11205_v3, %s17134_s15 }
  0x6e   : > { %777 = vrot.lane.b32.xlu0 %v11240_v7, %s17132_s29  ;;  %779 = vrot.lane.b32.xlu1 %v11230_v5, %s17132_s29 }
  0x72   : > { %1707 = vrot.lane.b32.xlu0 %v11278_v9, %s17134_s15  ;;  %775 = vrot.lane.b32.xlu1 %v11267_v8, %s17132_s29 }
  0x76   : > { %1527 = vrot.lane.b32.xlu0 %v11205_v3, %s17121_s16  ;;  %595 = vrot.lane.b32.xlu1 %v11240_v7, %s17109_s30 }
  0x7a   : > { %597 = vrot.lane.b32.xlu0 %v11230_v5, %s17109_s30  ;;  %1525 = vrot.lane.b32.xlu1 %v11278_v9, %s17121_s16 }
  0x7e   : > { %593 = vrot.lane.b32.xlu0 %v11267_v8, %s17109_s30  ;;  %1345 = vrot.lane.b32.xlu1 %v11205_v3, %s17113_s22  ;;  %s17510_s30 = smov 15  }
  0x82   : > { %412 = vrot.lane.b32.xlu0 %v11240_v7, %s17107_s12  ;;  %414 = vrot.lane.b32.xlu1 %v11230_v5, %s17107_s12 }
  0x86   : > { %1343 = vrot.lane.b32.xlu0 %v11278_v9, %s17113_s22  ;;  %410 = vrot.lane.b32.xlu1 %v11267_v8, %s17107_s12  ;;  %s17426_s12 = smov 127  }
  0x8a   : > { %1163 = vrot.lane.b32.xlu0 %v11205_v3, %s17111_s24  ;;  %1161 = vrot.lane.b32.xlu1 %v11278_v9, %s17111_s24  ;;  %s17432_s24 = smov 113  }
  0x8e   : > { %1729 = vrot.lane.b32.xlu0 %v11309_v11, %s17134_s15  ;;  %1731 = vrot.lane.b32.xlu1 %v11312_v12, %s17134_s15 }
  0x90   : > { %v1714_v18 = vpop.permute.xlu0 %1713  ;;  %v11331_v19 = vpop.permute.xlu1 %1711 }
  0x91   : > { %v1752_v26 = vsel %vm1739_vm0, %v11331_v19, %v1714_v18 }
  0x92   : > { %1727 = vrot.lane.b32.xlu0 %v11326_v16, %s17134_s15  ;;  %1547 = vrot.lane.b32.xlu1 %v11309_v11, %s17121_s16  ;;  %v1843_v31 = vmul.f32 %v1772_v22, %v1752_v26 }
  0x94   : > { %v11352_v24 = vpop.permute.xlu0 %1715  ;;  %v1532_v25 = vpop.permute.xlu1 %1531 }
  0x95   : > { %v1751_v27 = vsel %vm1739_vm0, %v1714_v18, %v11352_v24  ;;  %v1012_v18 = vrot.slane %v11427_v53, %v11329_v17 }
  0x96   : > { %1549 = vrot.lane.b32.xlu0 %v11312_v12, %s17121_s16  ;;  %947 = vrot.lane.b32.xlu1 %v11278_v9, %s17345_s25  ;;  %v1844_v28 = vmul.f32 %v1776_v21, %v1751_v27  ;;  %v11462_v21 = vld [vmem:[%s17096_s1 + $0x20] sm:$0xff] }
  0x97   : > { %v830_v27 = vrot.slane %v11462_v21, %v11329_v17 }
  0x98   : > { %2129 = vmatprep.subr.mxu1 %v1844_v28  ;;  %v11377_v34 = vpop.permute.xlu0 %1533  ;;  %v11379_v35 = vpop.permute.xlu1 %1529  ;;  %v11481_v28 = vld [vmem:[%s17096_s1 + $0x10] sm:$0xff] }
  0x99   : > { %v1569_v36 = vsel %vm1557_vm1, %v1532_v25, %v11377_v34  ;;  %v1570_v37 = vsel %vm1557_vm1, %v11379_v35, %v1532_v25  ;;  %2130 = vmatpush1.msra.mxu1 %v1843_v31 }
  0x9a   : > { %1545 = vrot.lane.b32.xlu0 %v11326_v16, %s17121_s16  ;;  %977 = vrot.lane.b32.xlu1 %v11370_v32, %s17345_s25  ;;  %v1662_v38 = vmul.f32 %v1594_v29, %v1569_v36  ;;  %v1661_v39 = vmul.f32 %v1590_v30, %v1570_v37 }
  0x9c   : > { %2131 = vmatprep.subr.mxu1 %v1662_v38  ;;  %v11394_v41 = vpop.permute.xlu1 %1351  ;;  %v1350_v42 = vpop.permute.xlu0 %1349 }
  0x9d   : > { %v1387_v43 = vsel %vm1375_vm2, %v1350_v42, %v11394_v41  ;;  %2132 = vmatpush1.msra.mxu1 %v1661_v39  ;;  %v652_v39 = vrot.slane %v11481_v28, %v11323_v15 }
  0x9e   : > { %1365 = vrot.lane.b32.xlu0 %v11309_v11, %s17113_s22  ;;  %1367 = vrot.lane.b32.xlu1 %v11312_v12, %s17113_s22  ;;  %v1480_v44 = vmul.f32 %v1412_v40, %v1387_v43 }
  0xa0   : > { %2133 = vmatprep.subr.mxu1 %v1480_v44  ;;  %v11410_v47 = vpop.permute.xlu0 %1347  ;;  %v1168_v48 = vpop.permute.xlu1 %1167 }
  0xa1   : > { %v1388_v49 = vsel %vm1375_vm2, %v11410_v47, %v1350_v42 }
  0xa2   : > { %765 = vrot.lane.b32.xlu0 %v11278_v9, %s17132_s29  ;;  %1363 = vrot.lane.b32.xlu1 %v11326_v16, %s17113_s22  ;;  %v1479_v50 = vmul.f32 %v1408_v45, %v1388_v49  ;;  %s17428_s22 = smov 17   ;;  %v648_v45 = vrot.slane %v11481_v28, %v11329_v17  ;;  %v11517_v49 = vld [vmem:[%s17096_s1] sm:$0xff] }
  0xa4   : > { %2134 = vmatpush1.msra.mxu1 %v1479_v50  ;;  %v11429_v54 = vpop.permute.xlu0 %1169  ;;  %v11431_v55 = vpop.permute.xlu1 %1165 }
  0xa5   : > { %v1205_v56 = vsel %vm1193_vm3, %v1168_v48, %v11429_v54  ;;  %v1206_v57 = vsel %vm1193_vm3, %v11431_v55, %v1168_v48  ;;  %v11512_v48 = vld [vmem:[%s11165_s14 + $0x48] sm:$0xff] }
  0xa6   : > { %795 = vrot.lane.b32.xlu0 %v11370_v32, %s17132_s29  ;;  %1183 = vrot.lane.b32.xlu1 %v11309_v11, %s17426_s12  ;;  %v1298_v58 = vmul.f32 %v1230_v51, %v1205_v56  ;;  %v1297_v59 = vmul.f32 %v1226_v52, %v1206_v57  ;;  %v470_v57 = vrot.slane %v11517_v49, %v11323_v15 }
  0xa8   : > { %2135 = vmatprep.subr.mxu1 %v1298_v58  ;;  %v11446_v61 = vpop.permute.xlu1 %953  ;;  %v952_v62 = vpop.permute.xlu0 %951  ;;  %v466_v58 = vrot.slane %v11517_v49, %v11329_v17 }
  0xa9   : > { %v992_v63 = vsel %vm979_vm4, %v952_v62, %v11446_v61  ;;  %2136 = vmatpush1.msra.mxu1 %v1297_v59  ;;  %v11532_v59 = vsub.s32 7, %v11314_v13 }
  0xaa   : > { %2137 = vmatprep.subr.mxu1 %v11168_v0  ;;  %1185 = vrot.lane.b32.xlu0 %v11312_v12, %s17426_s12  ;;  %v1084_v10 = vmul.f32 %v1016_v60, %v992_v63 }
  0xab   : > { %583 = vrot.lane.b32.xlu1 %v11278_v9, %s17427_s13  ;;  %2138 = vmatpush1.msra.mxu1 %v11171_v1  ;;  %v834_v1 = vrot.slane %v11462_v21, %v11323_v15  ;;  %17429 = vst [vmem:[#allocation12_spill] sm:$0xff] %v11532_v59 }
  0xac   : > { %2139 = vmatprep.subr.mxu1 %v1084_v10  ;;  %v11464_v22 = vpop.permute.xlu0 %949  ;;  %v770_v0 = vpop.permute.xlu1 %769 }
  0xad   : > { %v993_v25 = vsel %vm979_vm4, %v11464_v22, %v952_v62 }
  0xae   : > { %1181 = vrot.lane.b32.xlu0 %v11326_v16, %s17426_s12  ;;  %v1083_v26 = vmul.f32 %v1012_v18, %v993_v25  ;;  %v11549_v25 = vsub.s32 6, %v11314_v13 }
  0xaf   : > { %613 = vrot.lane.b32.xlu1 %v11370_v32, %s17427_s13 }
  0xb0   : > { %2140 = vmatpush1.msra.mxu1 %v1083_v26  ;;  %v11483_v29 = vpop.permute.xlu0 %771  ;;  %v11485_v30 = vpop.permute.xlu1 %767  ;;  %17430 = vst [vmem:[#allocation13_spill] sm:$0xff] %v11549_v25  ;;  %v1792_v26 = vrot.slane %v11336_v20, %v11532_v59 }
  0xb1   : > { %v810_v31 = vsel %vm797_vm5, %v770_v0, %v11483_v29  ;;  %v811_v36 = vsel %vm797_vm5, %v11485_v30, %v770_v0 }
  0xb2   : > { %400 = vrot.lane.b32.xlu0 %v11278_v9, %s17428_s22  ;;  %v902_v37 = vmul.f32 %v834_v1, %v810_v31  ;;  %v901_v38 = vmul.f32 %v830_v27, %v811_v36  ;;  %v11558_v1 = vld [vmem:[%s17431_s2] sm:$0xff] }
  0xb3   : > { %430 = vrot.lane.b32.xlu1 %v11370_v32, %s17428_s22 }
  0xb4   : > { %2141 = vmatprep.subr.mxu1 %v902_v37  ;;  %v11500_v40 = vpop.permute.xlu1 %589  ;;  %v588_v42 = vpop.permute.xlu0 %587  ;;  %v1788_v37 = vrot.slane %v11336_v20, %v11549_v25 }
  0xb5   : > { %v628_v43 = vsel %vm615_vm6, %v588_v42, %v11500_v40  ;;  %2142 = vmatpush1.msra.mxu1 %v901_v38 }
  0xb6   : > { %967 = vrot.lane.b32.xlu0 %v11326_v16, %s17345_s25  ;;  %v720_v44 = vmul.f32 %v652_v39, %v628_v43  ;;  %v11577_v39 = vld [vmem:[%s17431_s2 + $0x8] sm:$0xff] }
  0xb7   : > { %969 = vrot.lane.b32.xlu1 %v11309_v11, %s17345_s25 }
  0xb8   : > { %2143 = vmatprep.subr.mxu1 %v720_v44  ;;  %v11519_v50 = vpop.permute.xlu0 %585  ;;  %v405_v51 = vpop.permute.xlu1 %404 }
  0xb9   : > { %v629_v52 = vsel %vm615_vm6, %v11519_v50, %v588_v42 }
  0xba   : > { %965 = vrot.lane.b32.xlu0 %v11512_v48, %s17345_s25  ;;  %v719_v56 = vmul.f32 %v648_v45, %v629_v52  ;;  %v1610_v52 = vrot.slane %v11350_v23, %v11532_v59 }
  0xbb   : > { %1717 = vrot.lane.b32.xlu1 %v11267_v8, %s17134_s15 }
  0xbc   : > { %2144 = vmatpush1.msra.mxu1 %v719_v56  ;;  %v11536_v60 = vpop.permute.xlu0 %406  ;;  %v11538_v62 = vpop.permute.xlu1 %402 }
  0xbd   : > { %v447_v63 = vsel %vm434_vm7, %v405_v51, %v11536_v60  ;;  %v448_v10 = vsel %vm434_vm7, %v11538_v62, %v405_v51  ;;  %v1606_v51 = vrot.slane %v11350_v23, %v11549_v25 }
  0xbe   : > { %785 = vrot.lane.b32.xlu0 %v11326_v16, %s17132_s29  ;;  %v538_v18 = vmul.f32 %v470_v57, %v447_v63  ;;  %v537_v0 = vmul.f32 %v466_v58, %v448_v10 }
  0xbf   : > { %787 = vrot.lane.b32.xlu1 %v11309_v11, %s17132_s29 }
  0xc0   : > { %v1722_v27 = vpop.permute.xlu0 %1721  ;;  %2145 = vmatprep.subr.mxu1 %v538_v18  ;;  %v11560_v31 = vpop.permute.xlu1 %1723 }
  0xc1   : > { %v1747_v36 = vsel %vm1739_vm0, %v1722_v27, %v11560_v31  ;;  %2146 = vmatpush1.msra.mxu1 %v537_v0  ;;  %v1428_v0 = vrot.slane %v11375_v33, %v11532_v59 }
  0xc2   : > { %783 = vrot.lane.b32.xlu0 %v11512_v48, %s17132_s29  ;;  %v1848_v38 = vmul.f32 %v1792_v26, %v1747_v36  ;;  %10758 = vmatmul.mubr.msk.f32.vlgmr.msra.gmra.mxu1 %vm2031_vm8, %v11558_v1 }
  0xc3   : > { %1535 = vrot.lane.b32.xlu1 %v11267_v8, %s17121_s16  ;;  %2185 = vmatprep.mubr.f32.mxu1 %v17115_v4 }
  0xc4   : > { %v11579_v42 = vpop.permute.xlu0 %1719  ;;  %2283 = vmatprep.subr.mxu1 %v1848_v38  ;;  %v1540_v43 = vpop.permute.xlu1 %1539 }
  0xc5   : > { %v1748_v44 = vsel %vm1739_vm0, %v11579_v42, %v1722_v27 }
  0xc6   : > { %v1847_v45 = vmul.f32 %v1788_v37, %v1748_v44  ;;  %603 = vrot.lane.b32.xlu0 %v11326_v16, %s17427_s13  ;;  %10759 = vmatmul.mubr.msk.f32.gmra.mxu1 %vm2031_vm8, %v11577_v39  ;;  %v1424_v37 = vrot.slane %v11375_v33, %v11549_v25 }
  0xc7   : > { %605 = vrot.lane.b32.xlu1 %v11309_v11, %s17427_s13  ;;  %2333 = vmatprep.mubr.f32.mxu1 %v17115_v4 }
  0xc8   : > { %v11595_v56 = vpop.permute.xlu0 %1541  ;;  %2284 = vmatpush1.msra.mxu1 %v1847_v45  ;;  %v11597_v57 = vpop.permute.xlu1 %1537 }
  0xc9   : > { %v1565_v58 = vsel %vm1557_vm1, %v1540_v43, %v11595_v56  ;;  %v1566_v63 = vsel %vm1557_vm1, %v11597_v57, %v1540_v43 }
  0xca   : > { %v1665_v10 = vmul.f32 %v1606_v51, %v1566_v63  ;;  %601 = vrot.lane.b32.xlu0 %v11512_v48, %s17427_s13  ;;  %v1666_v18 = vmul.f32 %v1610_v52, %v1565_v58  ;;  %v1242_v52 = vrot.slane %v11408_v46, %v11549_v25  ;;  %v1246_v58 = vrot.slane %v11408_v46, %v11532_v59 }
  0xcb   : > { %1353 = vrot.lane.b32.xlu1 %v11267_v8, %s17432_s24 }
  0xcc   : > { %v1358_v26 = vpop.permute.xlu0 %1357  ;;  %2285 = vmatprep.subr.mxu1 %v1666_v18  ;;  %v11611_v27 = vpop.permute.xlu1 %1359 }
  0xcd   : > { %v1383_v36 = vsel %vm1375_vm2, %v1358_v26, %v11611_v27  ;;  %2286 = vmatpush1.msra.mxu1 %v1665_v10 }
  0xce   : > { %420 = vrot.lane.b32.xlu0 %v11326_v16, %s17428_s22  ;;  %v1484_v38 = vmul.f32 %v1428_v0, %v1383_v36 }
  0xcf   : > { %422 = vrot.lane.b32.xlu1 %v11309_v11, %s17428_s22 }
  0xd0   : > { %v11622_v43 = vpop.permute.xlu0 %1355  ;;  %2287 = vmatprep.subr.mxu1 %v1484_v38  ;;  %v1176_v44 = vpop.permute.xlu1 %1175 }
  0xd1   : > { %v1384_v45 = vsel %vm1375_vm2, %v11622_v43, %v1358_v26 }
  0xd2   : > { %v1483_v51 = vmul.f32 %v1424_v37, %v1384_v45  ;;  %418 = vrot.lane.b32.xlu0 %v11512_v48, %s17428_s22  ;;  %v11650_v37 = vsub.s32 1, %v11314_v13 }
  0xd3   : > { %1171 = vrot.lane.b32.xlu1 %v11267_v8, %s17426_s12  ;;  %v1032_v8 = vrot.slane %v11427_v53, %v11532_v59 }
  0xd4   : > { %v11635_v63 = vpop.permute.xlu0 %1177  ;;  %2288 = vmatpush1.msra.mxu1 %v1483_v51  ;;  %v11637_v10 = vpop.permute.xlu1 %1173  ;;  %17433 = vst [vmem:[#allocation14_spill] sm:$0xff] %v11650_v37  ;;  %v1028_v51 = vrot.slane %v11427_v53, %v11549_v25 }
  0xd5   : > { %v1201_v18 = vsel %vm1193_vm3, %v1176_v44, %v11635_v63  ;;  %v1202_v0 = vsel %vm1193_vm3, %v11637_v10, %v1176_v44 }
  0xd6   : > { %v1301_v26 = vmul.f32 %v1242_v52, %v1202_v0  ;;  %955 = vrot.lane.b32.xlu0 %v11178_v2, %s17345_s25  ;;  %v1302_v36 = vmul.f32 %v1246_v58, %v1201_v18  ;;  %v1768_v58 = vrot.slane %v11336_v20, %v11650_v37 }
  0xd7   : > { %773 = vrot.lane.b32.xlu1 %v11178_v2, %s17132_s29 }
  0xd8   : > { %v960_v38 = vpop.permute.xlu0 %959  ;;  %2289 = vmatprep.subr.mxu1 %v1302_v36  ;;  %v11654_v45 = vpop.permute.xlu1 %961 }
  0xd9   : > { %v988_v44 = vsel %vm979_vm4, %v960_v38, %v11654_v45  ;;  %2290 = vmatpush1.msra.mxu1 %v1301_v26 }
  0xda   : > { %2291 = vmatprep.subr.mxu1 %v11230_v5  ;;  %591 = vrot.lane.b32.xlu0 %v11178_v2, %s17427_s13  ;;  %v1088_v52 = vmul.f32 %v1032_v8, %v988_v44 }
  0xdb   : > { %408 = vrot.lane.b32.xlu1 %v11178_v2, %s17428_s22  ;;  %2292 = vmatpush1.msra.mxu1 %v11240_v7  ;;  %v850_v2 = vrot.slane %v11462_v21, %v11532_v59  ;;  %v11682_v7 = vsub.s32 0, %v11314_v13 }
  0xdc   : > { %v11669_v18 = vpop.permute.xlu0 %957  ;;  %2293 = vmatprep.subr.mxu1 %v1088_v52  ;;  %v1710_v0 = vpop.permute.xlu1 %1709  ;;  %v846_v52 = vrot.slane %v11462_v21, %v11549_v25 }
  0xdd   : > { %v989_v5 = vsel %vm979_vm4, %v11669_v18, %v960_v38  ;;  %v1753_v26 = vsel %vm1739_vm0, %v1710_v0, %v11331_v19  ;;  %17434 = vst [vmem:[#allocation15_spill] sm:$0xff] %v11682_v7 }
  0xde   : > { %v1087_v36 = vmul.f32 %v1028_v51, %v989_v5  ;;  %1725 = vrot.lane.b32.xlu0 %v11512_v48, %s17134_s15  ;;  %v1842_v8 = vmul.f32 %v1768_v58, %v1753_v26  ;;  %v1764_v58 = vrot.slane %v11336_v20, %v11682_v7 }
  0xdf   : > { %1543 = vrot.lane.b32.xlu1 %v11512_v48, %s17121_s16 }
  0xe0   : > { %v778_v44 = vpop.permute.xlu0 %777  ;;  %2052 = vmatprep.subr.mxu0 %v1842_v8  ;;  %2294 = vmatpush1.msra.mxu1 %v1087_v36  ;;  %v11686_v38 = vpop.permute.xlu1 %779 }
  0xe1   : > { %17435 = vst [vmem:[#allocation16_spill] sm:$0xff] %v11686_v38  ;;  %v806_v19 = vsel %vm797_vm5, %v778_v44, %v11686_v38 }
  0xe2   : > { %1361 = vrot.lane.b32.xlu0 %v11512_v48, %s17432_s24  ;;  %v906_v51 = vmul.f32 %v850_v2, %v806_v19 }
  0xe3   : > { %1179 = vrot.lane.b32.xlu1 %v11512_v48, %s17426_s12  ;;  %v1586_v48 = vrot.slane %v11350_v23, %v11650_v37 }
  0xe4   : > { %v11699_v5 = vpop.permute.xlu0 %1707  ;;  %2295 = vmatprep.subr.mxu1 %v906_v51  ;;  %v11701_v26 = vpop.permute.xlu1 %775 }
  0xe5   : > { %17436 = vst [vmem:[#allocation17_spill] sm:$0xff] %v11699_v5  ;;  %v807_v36 = vsel %vm797_vm5, %v11701_v26, %v778_v44  ;;  %v1754_v8 = vsel %vm1739_vm0, %v11699_v5, %v1710_v0  ;;  %v1404_v5 = vrot.slane %v11375_v33, %v11650_v37 }
  0xe6   : > { %v905_v2 = vmul.f32 %v846_v52, %v807_v36  ;;  %963 = vrot.lane.b32.xlu0 %v11233_v6, %s17345_s25  ;;  %v1841_v19 = vmul.f32 %v1764_v58, %v1754_v8  ;;  %v1582_v58 = vrot.slane %v11350_v23, %v11682_v7  ;;  %v668_v36 = vrot.slane %v11481_v28, %v11532_v59  ;;  %v11727_v8 = vld [vmem:[%s11165_s14 + $0x68] sm:$0xff] }
  0xe7   : > { %781 = vrot.lane.b32.xlu1 %v11233_v6, %s17132_s29  ;;  %17437 = vst [vmem:[#allocation18_spill] sm:$0xff] %v11727_v8 }
  0xe8   : > { %v1528_v51 = vpop.permute.xlu0 %1527  ;;  %2053 = vmatpush1.msra.mxu0 %v1841_v19  ;;  %2296 = vmatpush1.msra.mxu1 %v905_v2  ;;  %v596_v44 = vpop.permute.xlu1 %595 }
  0xe9   : > { %v1571_v0 = vsel %vm1557_vm1, %v1528_v51, %v11379_v35  ;;  %v11734_v35 = vld [vmem:[%s11165_s14 + $0x70] sm:$0xff] }
  0xea   : > { %599 = vrot.lane.b32.xlu0 %v11233_v6, %s17427_s13  ;;  %v1660_v52 = vmul.f32 %v1586_v48, %v1571_v0 }
  0xeb   : > { %416 = vrot.lane.b32.xlu1 %v11233_v6, %s17428_s22  ;;  %v664_v6 = vrot.slane %v11481_v28, %v11549_v25 }
  0xec   : > { %v11729_v2 = vpop.permute.xlu0 %597  ;;  %2054 = vmatprep.subr.mxu0 %v1660_v52  ;;  %v11731_v19 = vpop.permute.xlu1 %1525 }
  0xed   : > { %17438 = vst [vmem:[#allocation19_spill] sm:$0xff] %v11729_v2  ;;  %17439 = vst [vmem:[#allocation20_spill] sm:$0xff] %v11731_v19  ;;  %v624_v48 = vsel %vm615_vm6, %v596_v44, %v11729_v2  ;;  %v1572_v0 = vsel %vm1557_vm1, %v11731_v19, %v1528_v51 }
  0xee   : > { %1733 = vrot.lane.b32.xlu0 %v11727_v8, %s17134_s15  ;;  %v1659_v4 = vmul.f32 %v1582_v58, %v1572_v0  ;;  %v724_v52 = vmul.f32 %v668_v36, %v624_v48  ;;  %v486_v0 = vrot.slane %v11517_v49, %v11532_v59  ;;  %v17443_v59 = vmov 0.0  }
  0xef   : > { %1735 = vrot.lane.b32.xlu1 %v11734_v35, %s17134_s15 }
  0xf0   : > { %v11750_v38 = vpop.permute.xlu0 %593  ;;  %2055 = vmatpush1.msra.mxu0 %v1659_v4  ;;  %2297 = vmatprep.subr.mxu1 %v724_v52  ;;  %v1346_v2 = vpop.permute.xlu1 %1345 }
  0xf1   : > { %v625_v51 = vsel %vm615_vm6, %v11750_v38, %v596_v44  ;;  %v1389_v58 = vsel %vm1375_vm2, %v1346_v2, %v11410_v47 }
  0xf2   : > { %v723_v36 = vmul.f32 %v664_v6, %v625_v51  ;;  %1737 = vrot.lane.b32.xlu0 %v11370_v32, %s17134_s15  ;;  %v1478_v48 = vmul.f32 %v1404_v5, %v1389_v58  ;;  %v482_v5 = vrot.slane %v11517_v49, %v11549_v25  ;;  %v1400_v6 = vrot.slane %v11375_v33, %v11682_v7  ;;  %s10898_s15 = sshll.u32 %s11133_s21, 4 }
  0xf3   : > { %1551 = vrot.lane.b32.xlu1 %v11727_v8, %s17121_s16 }
  0xf4   : > { %v413_v4 = vpop.permute.xlu0 %412  ;;  %2056 = vmatprep.subr.mxu0 %v1478_v48  ;;  %2298 = vmatpush1.msra.mxu1 %v723_v36  ;;  %v11764_v52 = vpop.permute.xlu1 %414 }
  0xf5   : > { %17440 = vst [vmem:[#allocation21_spill] sm:$0xff] %v11764_v52  ;;  %v443_v47 = vsel %vm434_vm7, %v413_v4, %v11764_v52 }
  0xf6   : > { %1553 = vrot.lane.b32.xlu0 %v11734_v35, %s17121_s16  ;;  %v542_v44 = vmul.f32 %v486_v0, %v443_v47  ;;  %v1222_v0 = vrot.slane %v11408_v46, %v11650_v37 }
  0xf7   : > { %1555 = vrot.lane.b32.xlu1 %v11370_v32, %s17121_s16  ;;  %s17509_s16 = smov 111  }
  0xf8   : > { %v11777_v51 = vpop.permute.xlu0 %1343  ;;  %2299 = vmatprep.subr.mxu1 %v542_v44  ;;  %v11779_v58 = vpop.permute.xlu1 %410  ;;  %v1218_v44 = vrot.slane %v11408_v46, %v11682_v7 }
  0xf9   : > { %17441 = vst [vmem:[#allocation22_spill] sm:$0xff] %v11777_v51  ;;  %v1390_v36 = vsel %vm1375_vm2, %v11777_v51, %v1346_v2  ;;  %v444_v48 = vsel %vm434_vm7, %v11779_v58, %v413_v4  ;;  %v11798_v2 = vld [vmem:[%s17096_s1 + $0x88] sm:$0xff]  ;;  %v11050_v4 = vmov 0  }
  0xfa   : > { %v541_v47 = vmul.f32 %v482_v5, %v444_v48  ;;  %1369 = vrot.lane.b32.xlu0 %v11727_v8, %s17432_s24  ;;  %v1477_v19 = vmul.f32 %v1400_v6, %v1390_v36  ;;  %10952 = vset.pattern.permute.xlu1 %v11050_v4 }
  0xfb   : > { %1371 = vrot.lane.b32.xlu1 %v11734_v35, %s17432_s24  ;;  %10951 = vset.pattern.permute.xlu0 %v11050_v4 }
  0xfc   : > { %v1164_v51 = vpop.permute.xlu0 %1163  ;;  %2057 = vmatpush1.msra.mxu0 %v1477_v19  ;;  %2300 = vmatpush1.msra.mxu1 %v541_v47  ;;  %v11800_v5 = vpop.permute.xlu1 %1161  ;;  %v1808_v47 = vrot.slane %v11798_v2, %v11323_v15 }
  0xfd   : > { %17442 = vst [vmem:[#allocation23_spill] sm:$0xff] %v11800_v5  ;;  %v1207_v6 = vsel %vm1193_vm3, %v1164_v51, %v11431_v55  ;;  %v1208_v36 = vsel %vm1193_vm3, %v11800_v5, %v1164_v51  ;;  %10762 = vmatmul.mubr.msk.f32.vlgmr.msra.gmra.mxu1 %vm2031_vm8, %v11558_v1 }
  0xfe   : > { %1373 = vrot.lane.b32.xlu0 %v11370_v32, %s17432_s24  ;;  %v1296_v48 = vmul.f32 %v1222_v0, %v1207_v6  ;;  %v1295_v19 = vmul.f32 %v1218_v44, %v1208_v36  ;;  %2339 = vmatprep.mubr.f32.mxu1 %v17443_v59  ;;  %v1804_v0 = vrot.slane %v11798_v2, %v11329_v17  ;;  %v11835_v6 = vld [vmem:[%s17096_s1 + $0x78] sm:$0xff] }
  0xff   : > { %1187 = vrot.lane.b32.xlu1 %v11727_v8, %s17426_s12 }
 0x100   : > { %v1730_v55 = vpop.permute.xlu0 %1729  ;;  %2058 = vmatprep.subr.mxu0 %v1296_v48  ;;  %v11817_v51 = vpop.permute.xlu1 %1731 }
 0x101   : > { %17444 = vst [vmem:[#allocation24_spill] sm:$0xff] %v11817_v51  ;;  %v1743_v4 = vsel %vm1739_vm0, %v1730_v55, %v11817_v51  ;;  %2059 = vmatpush1.msra.mxu0 %v1295_v19  ;;  %10763 = vmatmul.mubr.msk.f32.gmra.mxu1 %vm2031_vm8, %v11577_v39 }
 0x102   : > { %1189 = vrot.lane.b32.xlu0 %v11734_v35, %s17426_s12  ;;  %v1852_v44 = vmul.f32 %v1808_v47, %v1743_v4  ;;  %2060 = vmatprep.subr.mxu0 %v11205_v3 }
 0x103   : > { %1191 = vrot.lane.b32.xlu1 %v11370_v32, %s17426_s12  ;;  %2061 = vmatpush1.msra.mxu0 %v11278_v9  ;;  %v1008_v9 = vrot.slane %v11427_v53, %v11650_v37  ;;  %v1626_v32 = vrot.slane %v11835_v6, %v11323_v15 }
 0x104   : > { %v11837_v36 = vpop.permute.xlu0 %1727  ;;  %2437 = vmatprep.subr.mxu1 %v1852_v44  ;;  %v1548_v48 = vpop.permute.xlu1 %1547  ;;  %2487 = vmatprep.mubr.f32.mxu1 %v17443_v59  ;;  %v1622_v44 = vrot.slane %v11835_v6, %v11329_v17 }
 0x105   : > { %v1744_v3 = vsel %vm1739_vm0, %v11837_v36, %v1730_v55 }
 0x106   : > { %v1851_v19 = vmul.f32 %v1804_v0, %v1744_v3  ;;  %971 = vrot.lane.b32.xlu0 %v11312_v12, %s17345_s25 }
 0x107   : > { %973 = vrot.lane.b32.xlu1 %v11727_v8, %s17345_s25 }
 0x108   : > { %v11851_v47 = vpop.permute.xlu0 %1549  ;;  %2438 = vmatpush1.msra.mxu1 %v1851_v19  ;;  %v948_v4 = vpop.permute.xlu1 %947  ;;  %v1004_v19 = vrot.slane %v11427_v53, %v11682_v7 }
 0x109   : > { %17445 = vst [vmem:[#allocation25_spill] sm:$0xff] %v11851_v47  ;;  %v1561_v55 = vsel %vm1557_vm1, %v1548_v48, %v11851_v47  ;;  %v994_v0 = vsel %vm979_vm4, %v948_v4, %v11464_v22  ;;  %v11870_v47 = vld [vmem:[%s17096_s1 + $0x68] sm:$0xff] }
 0x10a   : > { %975 = vrot.lane.b32.xlu0 %v11734_v35, %s17345_s25  ;;  %v1082_v3 = vmul.f32 %v1008_v9, %v994_v0  ;;  %v1670_v5 = vmul.f32 %v1626_v32, %v1561_v55  ;;  %v1444_v25 = vrot.slane %v11870_v47, %v11323_v15 }
 0x10b   : > { %789 = vrot.lane.b32.xlu1 %v11312_v12, %s17132_s29 }
 0x10c   : > { %v11872_v22 = vpop.permute.xlu0 %1545  ;;  %2062 = vmatprep.subr.mxu0 %v1082_v3  ;;  %2439 = vmatprep.subr.mxu1 %v1670_v5  ;;  %v11874_v51 = vpop.permute.xlu1 %977 }
 0x10d   : > { %17446 = vst [vmem:[#allocation26_spill] sm:$0xff] %v11874_v51  ;;  %v1562_v9 = vsel %vm1557_vm1, %v11872_v22, %v1548_v48  ;;  %v995_v32 = vsel %vm979_vm4, %v11874_v51, %v948_v4  ;;  %v822_v51 = vrot.slane %v11462_v21, %v11682_v7 }
 0x10e   : > { %v1669_v55 = vmul.f32 %v1622_v44, %v1562_v9  ;;  %791 = vrot.lane.b32.xlu0 %v11727_v8, %s17132_s29  ;;  %v1081_v0 = vmul.f32 %v1004_v19, %v995_v32  ;;  %v1440_v44 = vrot.slane %v11870_v47, %v11329_v17  ;;  %v826_v19 = vrot.slane %v11462_v21, %v11650_v37 }
 0x10f   : > { %793 = vrot.lane.b32.xlu1 %v11734_v35, %s17132_s29 }
 0x110   : > { %v1366_v5 = vpop.permute.xlu0 %1365  ;;  %2063 = vmatpush1.msra.mxu0 %v1081_v0  ;;  %2440 = vmatpush1.msra.mxu1 %v1669_v55  ;;  %v11888_v3 = vpop.permute.xlu1 %1367 }
 0x111   : > { %17447 = vst [vmem:[#allocation27_spill] sm:$0xff] %v11888_v3  ;;  %v1379_v48 = vsel %vm1375_vm2, %v1366_v5, %v11888_v3 }
 0x112   : > { %607 = vrot.lane.b32.xlu0 %v11312_v12, %s17427_s13  ;;  %v1488_v4 = vmul.f32 %v1444_v25, %v1379_v48 }
 0x113   : > { %609 = vrot.lane.b32.xlu1 %v11727_v8, %s17427_s13 }
 0x114   : > { %v766_v9 = vpop.permute.xlu0 %765  ;;  %2441 = vmatprep.subr.mxu1 %v1488_v4  ;;  %v11901_v32 = vpop.permute.xlu1 %1363  ;;  %v11918_v4 = vld [vmem:[%s17096_s1 + $0x58] sm:$0xff] }
 0x115   : > { %v812_v55 = vsel %vm797_vm5, %v766_v9, %v11485_v30  ;;  %v1380_v25 = vsel %vm1375_vm2, %v11901_v32, %v1366_v5 }
 0x116   : > { %v1487_v0 = vmul.f32 %v1440_v44, %v1380_v25  ;;  %611 = vrot.lane.b32.xlu0 %v11734_v35, %s17427_s13  ;;  %v900_v48 = vmul.f32 %v826_v19, %v812_v55  ;;  %v644_v55 = vrot.slane %v11481_v28, %v11650_v37  ;;  %v2020_v25 = vld [vmem:[%s17098_s3 + $0x8] sm:$0xff] }
 0x117   : > { %424 = vrot.lane.b32.xlu1 %v11312_v12, %s17428_s22  ;;  %v1262_v12 = vrot.slane %v11918_v4, %v11323_v15 }
 0x118   : > { %v11920_v30 = vpop.permute.xlu0 %795  ;;  %2064 = vmatprep.subr.mxu0 %v900_v48  ;;  %2442 = vmatpush1.msra.mxu1 %v1487_v0  ;;  %v1184_v5 = vpop.permute.xlu1 %1183 }
 0x119   : > { %17448 = vst [vmem:[#allocation28_spill] sm:$0xff] %v11920_v30  ;;  %v813_v44 = vsel %vm797_vm5, %v11920_v30, %v766_v9 }
 0x11a   : > { %426 = vrot.lane.b32.xlu0 %v11727_v8, %s17428_s22  ;;  %v899_v19 = vmul.f32 %v822_v51, %v813_v44  ;;  %v2019_v51 = vld [vmem:[%s17098_s3] sm:$0xff]  ;;  %v1258_v44 = vrot.slane %v11918_v4, %v11329_v17 }
 0x11b   : > { %428 = vrot.lane.b32.xlu1 %v11734_v35, %s17428_s22 }
 0x11c   : > { %v11936_v0 = vpop.permute.xlu0 %1185  ;;  %2065 = vmatpush1.msra.mxu0 %v899_v19  ;;  %v640_v19 = vrot.slane %v11481_v28, %v11682_v7 }
 0x11d   : > { %17449 = vst [vmem:[#allocation29_spill] sm:$0xff] %v11936_v0  ;;  %v1197_v9 = vsel %vm1193_vm3, %v1184_v5, %v11936_v0  ;;  %v584_v48 = vpop.permute.xlu1 %583 }
 0x11e   : > { %v630_v35 = vsel %vm615_vm6, %v584_v48, %v11519_v50  ;;  %v1306_v30 = vmul.f32 %v1262_v12, %v1197_v9  ;;  %2028 = vperm.xlu0 %10951, %v2020_v25  }
 0x11f   : > { %v718_v8 = vmul.f32 %v644_v55, %v630_v35  ;;  %2023 = vperm.xlu1 %10952, %v2019_v51   ;;  %v462_v55 = vrot.slane %v11517_v49, %v11650_v37  ;;  %v458_v51 = vrot.slane %v11517_v49, %v11682_v7 }
 0x120   : > { %v11951_v3 = vpop.permute.xlu0 %1181  ;;  %2443 = vmatprep.subr.mxu1 %v1306_v30 }
 0x121   : > { %v1198_v0 = vsel %vm1193_vm3, %v11951_v3, %v1184_v5  ;;  %2066 = vmatprep.subr.mxu0 %v718_v8  ;;  %v11956_v52 = vpop.permute.xlu1 %613  ;;  %v11968_v8 = vld [vmem:[%s17096_s1 + $0x38] sm:$0xff] }
 0x122   : > { %17450 = vst [vmem:[#allocation30_spill] sm:$0xff] %v11956_v52  ;;  %v1305_v50 = vmul.f32 %v1258_v44, %v1198_v0  ;;  %v631_v12 = vsel %vm615_vm6, %v11956_v52, %v584_v48  ;;  %v11981_v44 = vsub.s32 4, %v11314_v13 }
 0x123   : > { %v717_v25 = vmul.f32 %v640_v19, %v631_v12  ;;  %v1048_v19 = vrot.slane %v11968_v8, %v11323_v15 }
 0x124   : > { %2444 = vmatpush1.msra.mxu1 %v1305_v50  ;;  %v401_v30 = vpop.permute.xlu0 %400  ;;  %17452 = vst [vmem:[#allocation32_spill] sm:$0xff] %v11981_v44  ;;  %v11986_v50 = vsub.s32 5, %v11314_v13 }
 0x125   : > { %2067 = vmatpush1.msra.mxu0 %v717_v25  ;;  %v11970_v5 = vpop.permute.xlu1 %430  ;;  %v449_v0 = vsel %vm434_vm7, %v401_v30, %v11538_v62  ;;  %2445 = vmatprep.subr.mxu1 %v11309_v11 }
 0x126   : > { %17451 = vst [vmem:[#allocation31_spill] sm:$0xff] %v11970_v5  ;;  %v450_v9 = vsel %vm434_vm7, %v11970_v5, %v401_v30  ;;  %v536_v48 = vmul.f32 %v462_v55, %v449_v0  ;;  %2446 = vmatpush1.msra.mxu1 %v11326_v16  ;;  %17453 = vst [vmem:[#allocation33_spill] sm:$0xff] %v11986_v50  ;;  %v1044_v16 = vrot.slane %v11968_v8, %v11329_v17  ;;  %v12007_v30 = vld [vmem:[%s17096_s1 + $0x28] sm:$0xff] }
 0x127   : > { %v535_v35 = vmul.f32 %v458_v51, %v450_v9  ;;  %v1780_v55 = vrot.slane %v11336_v20, %v11981_v44  ;;  %v1784_v25 = vrot.slane %v11336_v20, %v11986_v50 }
 0x128   : > { %2068 = vmatprep.subr.mxu0 %v536_v48  ;;  %v968_v62 = vpop.permute.xlu0 %967 }
 0x129   : > { %v11988_v11 = vpop.permute.xlu1 %969  ;;  %2069 = vmatpush1.msra.mxu0 %v535_v35 }
 0x12a   : > { %v984_v12 = vsel %vm979_vm4, %v968_v62, %v11988_v11  ;;  %10756 = vmatmul.mubr.msk.f32.vlgmr.msra.gmra.mxu0 %vm2031_vm8, %v11558_v1 }
 0x12b   : > { %v1092_v13 = vmul.f32 %v1048_v19, %v984_v12  ;;  %2108 = vmatprep.mubr.f32.mxu0 %v17443_v59 }
 0x12c   : > { %v12002_v51 = vpop.permute.xlu0 %965 }
 0x12d   : > { %v1718_v0 = vpop.permute.xlu1 %1717  ;;  %2447 = vmatprep.subr.mxu1 %v1092_v13  ;;  %v985_v9 = vsel %vm979_vm4, %v12002_v51, %v968_v62  ;;  %v866_v13 = vrot.slane %v12007_v30, %v11323_v15 }
 0x12e   : > { %v1749_v48 = vsel %vm1739_vm0, %v1718_v0, %v11579_v42  ;;  %v1750_v20 = vsel %vm1739_vm0, %v11352_v24, %v1718_v0  ;;  %v1091_v35 = vmul.f32 %v1044_v16, %v985_v9  ;;  %10757 = vmatmul.mubr.msk.f32.gmra.mxu0 %vm2031_vm8, %v11577_v39  ;;  %v862_v42 = vrot.slane %v12007_v30, %v11329_v17  ;;  %v12039_v9 = vld [vmem:[%s17096_s1 + $0x18] sm:$0xff] }
 0x12f   : > { %v1845_v19 = vmul.f32 %v1780_v55, %v1750_v20  ;;  %v1846_v12 = vmul.f32 %v1784_v25, %v1749_v48  ;;  %2256 = vmatprep.mubr.f32.mxu0 %v17443_v59  ;;  %v1598_v16 = vrot.slane %v11350_v23, %v11981_v44  ;;  %v1602_v25 = vrot.slane %v11350_v23, %v11986_v50 }
 0x130   : > { %2448 = vmatpush1.msra.mxu1 %v1091_v35  ;;  %v786_v62 = vpop.permute.xlu0 %785 }
 0x131   : > { %v12023_v5 = vpop.permute.xlu1 %787  ;;  %2206 = vmatprep.subr.mxu0 %v1846_v12 }
 0x132   : > { %v802_v24 = vsel %vm797_vm5, %v786_v62, %v12023_v5  ;;  %2207 = vmatpush1.msra.mxu0 %v1845_v19 }
 0x133   : > { %v910_v55 = vmul.f32 %v866_v13, %v802_v24  ;;  %v684_v24 = vrot.slane %v12039_v9, %v11323_v15 }
 0x134   : > { %v12034_v0 = vpop.permute.xlu0 %783 }
 0x135   : > { %v1536_v48 = vpop.permute.xlu1 %1535  ;;  %2449 = vmatprep.subr.mxu1 %v910_v55  ;;  %v803_v20 = vsel %vm797_vm5, %v12034_v0, %v786_v62 }
 0x136   : > { %v1567_v35 = vsel %vm1557_vm1, %v1536_v48, %v11597_v57  ;;  %v1568_v23 = vsel %vm1557_vm1, %v11377_v34, %v1536_v48  ;;  %v909_v19 = vmul.f32 %v862_v42, %v803_v20  ;;  %v680_v57 = vrot.slane %v12039_v9, %v11329_v17  ;;  %v12068_v48 = vld [vmem:[%s17096_s1 + $0x8] sm:$0xff] }
 0x137   : > { %v1663_v12 = vmul.f32 %v1598_v16, %v1568_v23  ;;  %v1664_v13 = vmul.f32 %v1602_v25, %v1567_v35  ;;  %v1416_v34 = vrot.slane %v11375_v33, %v11981_v44  ;;  %v1420_v16 = vrot.slane %v11375_v33, %v11986_v50 }
 0x138   : > { %2450 = vmatpush1.msra.mxu1 %v909_v19  ;;  %v604_v55 = vpop.permute.xlu0 %603 }
 0x139   : > { %v12052_v52 = vpop.permute.xlu1 %605  ;;  %2208 = vmatprep.subr.mxu0 %v1664_v13 }
 0x13a   : > { %v620_v62 = vsel %vm615_vm6, %v604_v55, %v12052_v52  ;;  %2209 = vmatpush1.msra.mxu0 %v1663_v12 }
 0x13b   : > { %v728_v42 = vmul.f32 %v684_v24, %v620_v62  ;;  %v502_v24 = vrot.slane %v12068_v48, %v11323_v15 }
 0x13c   : > { %v12063_v25 = vpop.permute.xlu0 %601 }
 0x13d   : > { %v1354_v20 = vpop.permute.xlu1 %1353  ;;  %2451 = vmatprep.subr.mxu1 %v728_v42  ;;  %v621_v35 = vsel %vm615_vm6, %v12063_v25, %v604_v55 }
 0x13e   : > { %v1385_v23 = vsel %vm1375_vm2, %v1354_v20, %v11622_v43  ;;  %v1386_v33 = vsel %vm1375_vm2, %v11394_v41, %v1354_v20  ;;  %v727_v19 = vmul.f32 %v680_v57, %v621_v35  ;;  %v498_v43 = vrot.slane %v12068_v48, %v11329_v17 }
 0x13f   : > { %v1481_v12 = vmul.f32 %v1416_v34, %v1386_v33  ;;  %v1482_v13 = vmul.f32 %v1420_v16, %v1385_v23  ;;  %v1234_v41 = vrot.slane %v11408_v46, %v11981_v44  ;;  %v1238_v34 = vrot.slane %v11408_v46, %v11986_v50 }
 0x140   : > { %2452 = vmatpush1.msra.mxu1 %v727_v19  ;;  %v421_v62 = vpop.permute.xlu0 %420  ;;  %v1020_v23 = vrot.slane %v11427_v53, %v11981_v44 }
 0x141   : > { %v12081_v42 = vpop.permute.xlu1 %422  ;;  %2210 = vmatprep.subr.mxu0 %v1482_v13 }
 0x142   : > { %v439_v55 = vsel %vm434_vm7, %v421_v62, %v12081_v42  ;;  %2211 = vmatpush1.msra.mxu0 %v1481_v12  ;;  %v1024_v12 = vrot.slane %v11427_v53, %v11986_v50 }
 0x143   : > { %v546_v57 = vmul.f32 %v502_v24, %v439_v55 }
 0x144   : > { %v12092_v16 = vpop.permute.xlu0 %418 }
 0x145   : > { %v1172_v20 = vpop.permute.xlu1 %1171  ;;  %2453 = vmatprep.subr.mxu1 %v546_v57  ;;  %v440_v35 = vsel %vm434_vm7, %v12092_v16, %v421_v62  ;;  %v838_v62 = vrot.slane %v11462_v21, %v11981_v44  ;;  %v1118_v57 = vld [vmem:[%s11165_s14 + $0x28] sm:$0xff] }
 0x146   : > { %v1203_v33 = vsel %vm1193_vm3, %v1172_v20, %v11637_v10  ;;  %v1204_v46 = vsel %vm1193_vm3, %v11429_v54, %v1172_v20  ;;  %v545_v19 = vmul.f32 %v498_v43, %v440_v35  ;;  %v842_v10 = vrot.slane %v11462_v21, %v11986_v50  ;;  %v1117_v43 = vld [vmem:[%s11165_s14 + $0x20] sm:$0xff] }
 0x147   : > { %v1299_v13 = vmul.f32 %v1234_v41, %v1204_v46  ;;  %v1300_v24 = vmul.f32 %v1238_v34, %v1203_v33  ;;  %v656_v41 = vrot.slane %v11481_v28, %v11981_v44  ;;  %v474_v35 = vrot.slane %v11517_v49, %v11981_v44 }
 0x148   : > { %2454 = vmatpush1.msra.mxu1 %v545_v19  ;;  %v956_v55 = vpop.permute.xlu0 %955 }
 0x149   : > { %v774_v17 = vpop.permute.xlu1 %773  ;;  %2212 = vmatprep.subr.mxu0 %v1300_v24  ;;  %v990_v54 = vsel %vm979_vm4, %v956_v55, %v11669_v18  ;;  %v991_v53 = vsel %vm979_vm4, %v11446_v61, %v956_v55  ;;  %10766 = vmatmul.mubr.msk.f32.vlgmr.msra.gmra.mxu1 %vm2031_vm8, %v11558_v1  ;;  %v660_v18 = vrot.slane %v11481_v28, %v11986_v50 }
 0x14a   : > { %v808_v21 = vsel %vm797_vm5, %v774_v17, %v11701_v26  ;;  %v1085_v34 = vmul.f32 %v1020_v23, %v991_v53  ;;  %2213 = vmatpush1.msra.mxu0 %v1299_v13  ;;  %v1086_v20 = vmul.f32 %v1024_v12, %v990_v54  ;;  %v809_v61 = vsel %vm797_vm5, %v11483_v29, %v774_v17 }
 0x14b   : > { %2214 = vmatprep.subr.mxu0 %v1118_v57  ;;  %2493 = vmatprep.mubr.f32.mxu1 %v17443_v59  ;;  %v1796_v26 = vrot.slane %v11798_v2, %v11682_v7  ;;  %v478_v23 = vrot.slane %v11517_v49, %v11986_v50  ;;  %v1800_v28 = vrot.slane %v11798_v2, %v11650_v37 }
 0x14c   : > { %2215 = vmatpush1.msra.mxu0 %v1117_v43  ;;  %v592_v33 = vpop.permute.xlu0 %591  ;;  %v904_v19 = vmul.f32 %v842_v10, %v808_v21  ;;  %v903_v12 = vmul.f32 %v838_v62, %v809_v61  ;;  %v1618_v62 = vrot.slane %v11835_v6, %v11650_v37  ;;  %v1432_v54 = vrot.slane %v11870_v47, %v11682_v7 }
 0x14d   : > { %v409_v46 = vpop.permute.xlu1 %408  ;;  %2216 = vmatprep.subr.mxu0 %v1086_v20  ;;  %v626_v17 = vsel %vm615_vm6, %v592_v33, %v11750_v38  ;;  %v627_v29 = vsel %vm615_vm6, %v11500_v40, %v592_v33  ;;  %10767 = vmatmul.mubr.msk.f32.gmra.mxu1 %vm2031_vm8, %v11577_v39  ;;  %v1614_v40 = vrot.slane %v11835_v6, %v11682_v7 }
 0x14e   : > { %v445_v49 = vsel %vm434_vm7, %v409_v46, %v11779_v58  ;;  %v721_v13 = vmul.f32 %v656_v41, %v627_v29  ;;  %2217 = vmatpush1.msra.mxu0 %v1085_v34  ;;  %v722_v24 = vmul.f32 %v660_v18, %v626_v17  ;;  %v446_v38 = vsel %vm434_vm7, %v11536_v60, %v409_v46 }
 0x14f   : > { %2218 = vmatprep.subr.mxu0 %v904_v19  ;;  %2641 = vmatprep.mubr.f32.mxu1 %v17443_v59  ;;  %v540_v10 = vmul.f32 %v478_v23, %v445_v49  ;;  %v539_v53 = vmul.f32 %v474_v35, %v446_v38  ;;  %v1250_v34 = vrot.slane %v11918_v4, %v11682_v7  ;;  %v1122_v19 = vld [vmem:[%s11165_s14 + $0x48] sm:$0xff]  ;;  %v17454_v38 = vld [vmem:[#allocation16_spill] sm:$0xff] }
 0x150   : > { %2219 = vmatpush1.msra.mxu0 %v903_v12  ;;  %v1726_v55 = vpop.permute.xlu0 %1725  ;;  %v1254_v18 = vrot.slane %v11918_v4, %v11650_v37  ;;  %v1040_v46 = vrot.slane %v11968_v8, %v11650_v37  ;;  %v1036_v29 = vrot.slane %v11968_v8, %v11682_v7  ;;  %v858_v49 = vrot.slane %v12007_v30, %v11650_v37 }
 0x151   : > { %v1544_v57 = vpop.permute.xlu1 %1543  ;;  %2220 = vmatprep.subr.mxu0 %v722_v24  ;;  %v1745_v58 = vsel %vm1739_vm0, %v1726_v55, %v11837_v36  ;;  %v1746_v60 = vsel %vm1739_vm0, %v11560_v31, %v1726_v55  ;;  %v1436_v31 = vrot.slane %v11870_v47, %v11650_v37 }
 0x152   : > { %v1563_v43 = vsel %vm1557_vm1, %v1544_v57, %v11872_v22  ;;  %v1849_v41 = vmul.f32 %v1796_v26, %v1746_v60  ;;  %2221 = vmatpush1.msra.mxu0 %v721_v13  ;;  %v1850_v21 = vmul.f32 %v1800_v28, %v1745_v58  ;;  %v1564_v36 = vsel %vm1557_vm1, %v11595_v56, %v1544_v57  ;;  %v17455_v60 = vld [vmem:[#allocation19_spill] sm:$0xff] }
 0x153   : > { %2222 = vmatprep.subr.mxu0 %v540_v10  ;;  %v1668_v35 = vmul.f32 %v1618_v62, %v1563_v43  ;;  %v1667_v33 = vmul.f32 %v1614_v40, %v1564_v36  ;;  %v854_v13 = vrot.slane %v12007_v30, %v11682_v7  ;;  %v676_v62 = vrot.slane %v12039_v9, %v11650_v37  ;;  %v17456_v36 = vld [vmem:[#allocation21_spill] sm:$0xff] }
 0x154   : > { %2223 = vmatpush1.msra.mxu0 %v539_v53  ;;  %v1362_v20 = vpop.permute.xlu0 %1361  ;;  %v672_v58 = vrot.slane %v12039_v9, %v11682_v7  ;;  %v494_v53 = vrot.slane %v12068_v48, %v11650_v37 }
 0x155   : > { %v1180_v22 = vpop.permute.xlu1 %1179  ;;  %2360 = vmatprep.subr.mxu0 %v1850_v21  ;;  %v1381_v61 = vsel %vm1375_vm2, %v1362_v20, %v11901_v32  ;;  %v1382_v56 = vsel %vm1375_vm2, %v11611_v27, %v1362_v20  ;;  %10760 = vmatmul.mubr.msk.f32.vlgmr.msra.gmra.mxu0 %vm2031_vm8, %v11558_v1  ;;  %v1812_v20 = vrot.slane %v11798_v2, %v11981_v44 }
 0x156   : > { %v1199_v26 = vsel %vm1193_vm3, %v1180_v22, %v11951_v3  ;;  %v1485_v23 = vmul.f32 %v1432_v54, %v1382_v56  ;;  %2361 = vmatpush1.msra.mxu0 %v1849_v41  ;;  %2262 = vmatprep.mubr.f32.mxu0 %v17443_v59  ;;  %v1200_v32 = vsel %vm1193_vm3, %v11635_v63, %v1180_v22 }
 0x157   : > { %2362 = vmatprep.subr.mxu0 %v1668_v35  ;;  %v1486_v27 = vmul.f32 %v1436_v31, %v1381_v61  ;;  %v1304_v3 = vmul.f32 %v1254_v18, %v1199_v26  ;;  %v1303_v17 = vmul.f32 %v1250_v34, %v1200_v32  ;;  %v490_v41 = vrot.slane %v12068_v48, %v11682_v7 }
 0x158   : > { %2363 = vmatpush1.msra.mxu0 %v1667_v33  ;;  %v964_v1 = vpop.permute.xlu0 %963  ;;  %v1816_v22 = vrot.slane %v11798_v2, %v11986_v50  ;;  %v17458_v33 = vld [vmem:[#allocation12_spill] sm:$0xff] }
 0x159   : > { %v782_v28 = vpop.permute.xlu1 %781  ;;  %2364 = vmatprep.subr.mxu0 %v1486_v27  ;;  %10761 = vmatmul.mubr.msk.f32.gmra.mxu0 %vm2031_vm8, %v11577_v39  ;;  %v986_v63 = vsel %vm979_vm4, %v964_v1, %v12002_v51  ;;  %v987_v12 = vsel %vm979_vm4, %v11654_v45, %v964_v1  ;;  %v1121_v39 = vld [vmem:[%s11165_s14 + $0x40] sm:$0xff]  ;;  %v1824_v26 = vrot.slane %v11798_v2, %v17458_v33 }
 0x15a   : > { %2365 = vmatpush1.msra.mxu0 %v1485_v23  ;;  %2410 = vmatprep.mubr.f32.mxu0 %v17443_v59  ;;  %v804_v51 = vsel %vm797_vm5, %v782_v28, %v12034_v0  ;;  %v805_v45 = vsel %vm797_vm5, %v17454_v38, %v782_v28  ;;  %v1090_v55 = vmul.f32 %v1040_v46, %v986_v63  ;;  %v17459_v23 = vld [vmem:[#allocation24_spill] sm:$0xff]  ;;  %v17461_v38 = vld [vmem:[#allocation25_spill] sm:$0xff] }
 0x15b   : > { %2366 = vmatprep.subr.mxu0 %v1304_v3  ;;  %v1089_v57 = vmul.f32 %v1036_v29, %v987_v12  ;;  %v908_v54 = vmul.f32 %v858_v49, %v804_v51  ;;  %v907_v43 = vmul.f32 %v854_v13, %v805_v45  ;;  %v1630_v49 = vrot.slane %v11835_v6, %v11981_v44  ;;  %v12264_v13 = vld [vmem:[%s17431_s2] sm:$0xff] }
 0x15c   : > { %2367 = vmatpush1.msra.mxu0 %v1303_v17  ;;  %v600_v24 = vpop.permute.xlu0 %599  ;;  %v17460_v17 = vld [vmem:[#allocation17_spill] sm:$0xff] }
 0x15d   : > { %v417_v40 = vpop.permute.xlu1 %416  ;;  %2368 = vmatprep.subr.mxu0 %v1122_v19  ;;  %v622_v0 = vsel %vm615_vm6, %v600_v24, %v12063_v25  ;;  %v623_v10 = vsel %vm615_vm6, %v17455_v60, %v600_v24  ;;  %v1642_v24 = vrot.slane %v11835_v6, %v17458_v33  ;;  %v1448_v60 = vrot.slane %v11870_v47, %v11981_v44 }
 0x15e   : > { %2369 = vmatpush1.msra.mxu0 %v1121_v39  ;;  %v441_v21 = vsel %vm434_vm7, %v417_v40, %v12092_v16  ;;  %v442_v31 = vsel %vm434_vm7, %v17456_v36, %v417_v40  ;;  %v726_v18 = vmul.f32 %v676_v62, %v622_v0  ;;  %v725_v61 = vmul.f32 %v672_v58, %v623_v10  ;;  %v17457_v16 = vld [vmem:[#allocation13_spill] sm:$0xff]  ;;  %v17463_v36 = vld [vmem:[#allocation27_spill] sm:$0xff] }
 0x15f   : > { %2370 = vmatprep.subr.mxu0 %v1090_v55  ;;  %v1820_v35 = vrot.slane %v11798_v2, %v17457_v16  ;;  %v544_v27 = vmul.f32 %v494_v53, %v441_v21  ;;  %v543_v1 = vmul.f32 %v490_v41, %v442_v31  ;;  %v1634_v39 = vrot.slane %v11835_v6, %v11986_v50  ;;  %v12288_v53 = vld [vmem:[%s17431_s2 + $0x8] sm:$0xff]  ;;  %s377_s2 = sand.u32 1, %s11031_s18  }
 0x160   : > { %2371 = vmatpush1.msra.mxu0 %v1089_v57  ;;  %v1734_v25 = vpop.permute.xlu0 %1733  ;;  %v1638_v51 = vrot.slane %v11835_v6, %v17457_v16  ;;  %v17462_v57 = vld [vmem:[#allocation20_spill] sm:$0xff]  ;;  %v1452_v41 = vrot.slane %v11870_v47, %v11986_v50 }
 0x161   : > { %v1736_v34 = vpop.permute.xlu1 %1735  ;;  %2372 = vmatprep.subr.mxu0 %v908_v54  ;;  %v1742_v32 = vsel %vm1739_vm0, %v17459_v23, %v1734_v25  ;;  %v17464_v23 = vld [vmem:[#allocation22_spill] sm:$0xff] }
 0x162   : > { %v1741_v56 = vsel %vm1739_vm0, %v1734_v25, %v1736_v34  ;;  %2373 = vmatpush1.msra.mxu0 %v907_v43  ;;  %v1853_v2 = vmul.f32 %v1812_v20, %v1742_v32 }
 0x163   : > { %2374 = vmatprep.subr.mxu0 %v726_v18  ;;  %v1854_v63 = vmul.f32 %v1816_v22, %v1741_v56  ;;  %v1456_v18 = vrot.slane %v11870_v47, %v17457_v16  ;;  %v1460_v22 = vrot.slane %v11870_v47, %v17458_v33  ;;  %v1266_v47 = vrot.slane %v11918_v4, %v11981_v44 }
 0x164   : > { %2375 = vmatpush1.msra.mxu0 %v725_v61  ;;  %v1738_v28 = vpop.permute.xlu0 %1737 }
 0x165   : > { %v1552_v3 = vpop.permute.xlu1 %1551  ;;  %2376 = vmatprep.subr.mxu0 %v544_v27  ;;  %v1740_v46 = vsel %vm1739_vm0, %v1736_v34, %v1738_v28  ;;  %v1755_v29 = vsel %vm1739_vm0, %v1738_v28, %v17460_v17  ;;  %v1270_v28 = vrot.slane %v11918_v4, %v11986_v50  ;;  %v17465_v17 = vld [vmem:[#allocation29_spill] sm:$0xff] }
 0x166   : > { %v1855_v19 = vmul.f32 %v1820_v35, %v1740_v46  ;;  %2377 = vmatpush1.msra.mxu0 %v543_v1  ;;  %v1856_v12 = vmul.f32 %v1824_v26, %v1755_v29  ;;  %v1560_v45 = vsel %vm1557_vm1, %v17461_v38, %v1552_v3  ;;  %v1278_v46 = vrot.slane %v11918_v4, %v17458_v33 }
 0x167   : > { %10764 = vmatmul.mubr.msk.f32.vlgmr.msra.gmra.mxu0 %vm2031_vm8, %v12264_v13  ;;  %2514 = vmatprep.subr.mxu0 %v1854_v63  ;;  %v1671_v10 = vmul.f32 %v1630_v49, %v1560_v45 }
 0x168   : > { %2515 = vmatpush1.msra.mxu0 %v1853_v2  ;;  %2591 = vmatprep.subr.mxu1 %v1856_v12  ;;  %v1554_v40 = vpop.permute.xlu0 %1553  ;;  %v17466_v12 = vld [vmem:[#allocation23_spill] sm:$0xff] }
 0x169   : > { %v1556_v55 = vpop.permute.xlu1 %1555  ;;  %v1559_v62 = vsel %vm1557_vm1, %v1552_v3, %v1554_v40  ;;  %2416 = vmatprep.mubr.f32.mxu0 %v17443_v59  ;;  %2592 = vmatpush1.msra.mxu1 %v1855_v19  ;;  %v1274_v3 = vrot.slane %v11918_v4, %v17457_v16 }
 0x16a   : > { %v1573_v58 = vsel %vm1557_vm1, %v1556_v55, %v17462_v57  ;;  %v1558_v6 = vsel %vm1557_vm1, %v1554_v40, %v1556_v55  ;;  %v1672_v0 = vmul.f32 %v1634_v39, %v1559_v62  ;;  %v1056_v40 = vrot.slane %v11968_v8, %v11986_v50  ;;  %v1125_v62 = vld [vmem:[%s11165_s14 + $0x60] sm:$0xff]  ;;  %v1128_v57 = vld [vmem:[%s11165_s14 + $0x78] sm:$0xff] }
 0x16b   : > { %v1673_v54 = vmul.f32 %v1638_v51, %v1558_v6  ;;  %10765 = vmatmul.mubr.msk.f32.gmra.mxu0 %vm2031_vm8, %v12288_v53  ;;  %v1674_v43 = vmul.f32 %v1642_v24, %v1573_v58  ;;  %v1052_v51 = vrot.slane %v11968_v8, %v11981_v44 }
 0x16c   : > { %2516 = vmatprep.subr.mxu0 %v1672_v0  ;;  %v1370_v21 = vpop.permute.xlu0 %1369  ;;  %2564 = vmatprep.mubr.f32.mxu0 %v17443_v59  ;;  %v1060_v0 = vrot.slane %v11968_v8, %v17457_v16 }
 0x16d   : > { %v1372_v25 = vpop.permute.xlu1 %1371  ;;  %2593 = vmatprep.subr.mxu1 %v1674_v43  ;;  %v1378_v31 = vsel %vm1375_vm2, %v17463_v36, %v1370_v21  ;;  %2517 = vmatpush1.msra.mxu0 %v1671_v10  ;;  %v17467_v43 = vld [vmem:[#allocation18_spill] sm:$0xff] }
 0x16e   : > { %v1377_v34 = vsel %vm1375_vm2, %v1370_v21, %v1372_v25  ;;  %v1489_v20 = vmul.f32 %v1448_v60, %v1378_v31  ;;  %2594 = vmatpush1.msra.mxu1 %v1673_v54  ;;  %v1127_v60 = vld [vmem:[%s11165_s14 + $0x70] sm:$0xff]  ;;  %v17468_v36 = vld [vmem:[#allocation26_spill] sm:$0xff]  ;;  %s17511_s14 = smov 112  }
 0x16f   : > { %v1490_v61 = vmul.f32 %v1452_v41, %v1377_v34  ;;  %v1064_v41 = vrot.slane %v11968_v8, %v17458_v33  ;;  %v874_v8 = vrot.slane %v12007_v30, %v11986_v50 }
 0x170   : > { %v1374_v56 = vpop.permute.xlu0 %1373 }
 0x171   : > { %v1188_v35 = vpop.permute.xlu1 %1187  ;;  %2518 = vmatprep.subr.mxu0 %v1490_v61  ;;  %v1376_v26 = vsel %vm1375_vm2, %v1372_v25, %v1374_v56  ;;  %v1391_v32 = vsel %vm1375_vm2, %v1374_v56, %v17464_v23  ;;  %v878_v61 = vrot.slane %v12007_v30, %v17457_v16  ;;  %v882_v56 = vrot.slane %v12007_v30, %v17458_v33 }
 0x172   : > { %v1491_v27 = vmul.f32 %v1456_v18, %v1376_v26  ;;  %2519 = vmatpush1.msra.mxu0 %v1489_v20  ;;  %v1492_v1 = vmul.f32 %v1460_v22, %v1391_v32  ;;  %v1196_v29 = vsel %vm1193_vm3, %v17465_v17, %v1188_v35  ;;  %v870_v22 = vrot.slane %v12007_v30, %v11981_v44 }
 0x173   : > { %v1307_v24 = vmul.f32 %v1266_v47, %v1196_v29  ;;  %v688_v30 = vrot.slane %v12039_v9, %v11981_v44  ;;  %v692_v17 = vrot.slane %v12039_v9, %v11986_v50 }
 0x174   : > { %2595 = vmatprep.subr.mxu1 %v1492_v1  ;;  %v1190_v63 = vpop.permute.xlu0 %1189 }
 0x175   : > { %v1192_v2 = vpop.permute.xlu1 %1191  ;;  %v1195_v19 = vsel %vm1193_vm3, %v1188_v35, %v1190_v63  ;;  %2596 = vmatpush1.msra.mxu1 %v1491_v27  ;;  %v17469_v27 = vld [vmem:[#allocation28_spill] sm:$0xff] }
 0x176   : > { %v1209_v39 = vsel %vm1193_vm3, %v1192_v2, %v17466_v12  ;;  %v1194_v4 = vsel %vm1193_vm3, %v1190_v63, %v1192_v2  ;;  %v1308_v49 = vmul.f32 %v1270_v28, %v1195_v19 }
 0x177   : > { %v1309_v38 = vmul.f32 %v1274_v3, %v1194_v4  ;;  %v1310_v45 = vmul.f32 %v1278_v46, %v1209_v39  ;;  %v696_v39 = vrot.slane %v12039_v9, %v17457_v16  ;;  %v700_v4 = vrot.slane %v12039_v9, %v17458_v33 }
 0x178   : > { %2520 = vmatprep.subr.mxu0 %v1308_v49  ;;  %v972_v55 = vpop.permute.xlu0 %971  ;;  %v506_v9 = vrot.slane %v12068_v48, %v11981_v44 }
 0x179   : > { %v974_v58 = vpop.permute.xlu1 %973  ;;  %2597 = vmatprep.subr.mxu1 %v1310_v45  ;;  %v983_v6 = vsel %vm979_vm4, %v11988_v11, %v972_v55  ;;  %2521 = vmatpush1.msra.mxu0 %v1307_v24 }
 0x17a   : > { %v982_v10 = vsel %vm979_vm4, %v972_v55, %v974_v58  ;;  %v1093_v54 = vmul.f32 %v1052_v51, %v983_v6  ;;  %2598 = vmatpush1.msra.mxu1 %v1309_v38  ;;  %2522 = vmatprep.subr.mxu0 %v17467_v43  ;;  %v17470_v38 = vld [vmem:[#allocation30_spill] sm:$0xff]  ;;  %v17471_v43 = vld [vmem:[#allocation31_spill] sm:$0xff] }
 0x17b   : > { %2523 = vmatpush1.msra.mxu0 %v1125_v62  ;;  %v1094_v21 = vmul.f32 %v1056_v40, %v982_v10  ;;  %2599 = vmatprep.subr.mxu1 %v1128_v57  ;;  %v510_v62 = vrot.slane %v12068_v48, %v11986_v50  ;;  %v514_v57 = vrot.slane %v12068_v48, %v17457_v16 }
 0x17c   : > { %v976_v25 = vpop.permute.xlu0 %975  ;;  %2600 = vmatpush1.msra.mxu1 %v1127_v60 }
 0x17d   : > { %v790_v11 = vpop.permute.xlu1 %789  ;;  %2524 = vmatprep.subr.mxu0 %v1094_v21  ;;  %v980_v31 = vsel %vm979_vm4, %v976_v25, %v17468_v36  ;;  %v981_v34 = vsel %vm979_vm4, %v974_v58, %v976_v25  ;;  %v518_v58 = vrot.slane %v12068_v48, %v17458_v33 }
 0x17e   : > { %v1095_v20 = vmul.f32 %v1060_v0, %v981_v34  ;;  %2525 = vmatpush1.msra.mxu0 %v1093_v54  ;;  %v1096_v18 = vmul.f32 %v1064_v41, %v980_v31  ;;  %v801_v35 = vsel %vm797_vm5, %v12023_v5, %v790_v11 }
 0x17f   : > { %v911_v3 = vmul.f32 %v870_v22, %v801_v35 }
 0x180   : > { %2601 = vmatprep.subr.mxu1 %v1096_v18  ;;  %v792_v26 = vpop.permute.xlu0 %791 }
 0x181   : > { %v794_v23 = vpop.permute.xlu1 %793  ;;  %v800_v32 = vsel %vm797_vm5, %v790_v11, %v792_v26  ;;  %2602 = vmatpush1.msra.mxu1 %v1095_v20 }
 0x182   : > { %v798_v1 = vsel %vm797_vm5, %v794_v23, %v17469_v27  ;;  %v799_v28 = vsel %vm797_vm5, %v792_v26, %v794_v23  ;;  %v912_v47 = vmul.f32 %v874_v8, %v800_v32  ;;  %v2181_v6 = vpop.f32.mrf.mxu1  ;;  %v12436_v23 = vld [vmem:[%s17099_s4] sm:$0xff]  ;;  %v12446_v32 = vld [vmem:[%s17099_s4 + $0x8] sm:$0xff]  ;;  %v12454_v27 = vld [vmem:[%s17099_s4 + $0x10] sm:$0xff] }
 0x183   : > { %v913_v5 = vmul.f32 %v878_v61, %v799_v28  ;;  %v914_v46 = vmul.f32 %v882_v56, %v798_v1 }
 0x184   : > { %2526 = vmatprep.subr.mxu0 %v912_v47  ;;  %v608_v29 = vpop.permute.xlu0 %607  ;;  %v2183_v31 = vpop.f32.mrf.mxu1 }
 0x185   : > { %v610_v63 = vpop.permute.xlu1 %609  ;;  %2603 = vmatprep.subr.mxu1 %v914_v46  ;;  %v619_v2 = vsel %vm615_vm6, %v12052_v52, %v608_v29  ;;  %2527 = vmatpush1.msra.mxu0 %v911_v3 }
 0x186   : > { %v618_v19 = vsel %vm615_vm6, %v608_v29, %v610_v63  ;;  %v729_v12 = vmul.f32 %v688_v30, %v619_v2  ;;  %2604 = vmatpush1.msra.mxu1 %v913_v5 }
 0x187   : > { %v730_v49 = vmul.f32 %v692_v17, %v618_v19 }
 0x188   : > { %v612_v51 = vpop.permute.xlu0 %611 }
 0x189   : > { %v425_v24 = vpop.permute.xlu1 %424  ;;  %2528 = vmatprep.subr.mxu0 %v730_v49  ;;  %v616_v52 = vsel %vm615_vm6, %v612_v51, %v17470_v38  ;;  %v617_v45 = vsel %vm615_vm6, %v610_v63, %v612_v51 }
 0x18a   : > { %v731_v40 = vmul.f32 %v696_v39, %v617_v45  ;;  %2529 = vmatpush1.msra.mxu0 %v729_v12  ;;  %v732_v55 = vmul.f32 %v700_v4, %v616_v52  ;;  %v438_v0 = vsel %vm434_vm7, %v12081_v42, %v425_v24  ;;  %v2187_v42 = vpop.f32.mrf.mxu1 }
 0x18b   : > { %v547_v25 = vmul.f32 %v506_v9, %v438_v0 }
 0x18c   : > { %2605 = vmatprep.subr.mxu1 %v732_v55  ;;  %v427_v60 = vpop.permute.xlu0 %426  ;;  %v2189_v34 = vpop.f32.mrf.mxu1 }
 0x18d   : > { %v429_v10 = vpop.permute.xlu1 %428  ;;  %v437_v54 = vsel %vm434_vm7, %v425_v24, %v427_v60  ;;  %2606 = vmatpush1.msra.mxu1 %v731_v40 }
 0x18e   : > { %v435_v41 = vsel %vm434_vm7, %v429_v10, %v17471_v43  ;;  %v436_v21 = vsel %vm434_vm7, %v427_v60, %v429_v10  ;;  %v548_v48 = vmul.f32 %v510_v62, %v437_v54 }
 0x18f   : > { %v549_v11 = vmul.f32 %v514_v57, %v436_v21  ;;  %v550_v36 = vmul.f32 %v518_v58, %v435_v41 }
 0x190   : > { %2530 = vmatprep.subr.mxu0 %v548_v48 }
 0x191   : > { %2607 = vmatprep.subr.mxu1 %v550_v36  ;;  %2531 = vmatpush1.msra.mxu0 %v547_v25 }
 0x192   : > { %2608 = vmatpush1.msra.mxu1 %v549_v11  ;;  %10768 = vmatmul.mubr.msk.f32.vlgmr.msra.gmra.mxu0 %vm2031_vm8, %v12264_v13 }
 0x193   : > { %10770 = vmatmul.mubr.msk.f32.vlgmr.msra.gmra.mxu1 %vm2031_vm8, %v12264_v13  ;;  %2570 = vmatprep.mubr.f32.mxu0 %v17443_v59 }
 0x194   : > { %2647 = vmatprep.mubr.f32.mxu1 %v17443_v59 }
 0x196   : > { %10769 = vmatmul.mubr.msk.f32.gmra.mxu0 %vm2031_vm8, %v12288_v53 }
 0x197   : > { %10771 = vmatmul.mubr.msk.f32.gmra.mxu1 %vm2031_vm8, %v12288_v53  ;;  %2823 = vmatprep.mubr.f32.mxu0 %v17443_v59 }
 0x198   : > { %2906 = vmatprep.mubr.f32.mxu1 %v17443_v59 }
 0x199   : > { %v12415_v20 = vpop.permute.xlu0 %2028 }
 0x19a   : > { %v12417_v18 = vpop.permute.xlu1 %2023  ;;  %v2190_v13 = vadd.f32 %v2189_v34, %v12415_v20  ;;  %v2188_v8 = vadd.f32 %v2187_v42, %v12415_v20 }
 0x19b   : > { %v2184_v22 = vadd.f32 %v2183_v31, %v12417_v18  ;;  %v2182_v61 = vadd.f32 %v2181_v6, %v12417_v18 }
 0x19c   : > { %v12423_v56 = vmax.f32 %v2190_v13, 0.0  ;;  %v12425_v53 = vmax.f32 %v2188_v8, 0.0 }
 0x19d   : > { %v12427_v35 = vmax.f32 %v2184_v22, 0.0  ;;  %v12429_v26 = vmax.f32 %v2182_v61, 0.0 }
 0x19e   : > { %2870 = vmatprep.subr.mxu1 %v12423_v56 }
 0x19f   : > { %2871 = vmatpush1.msra.mxu1 %v12425_v53 }
 0x1a0   : > { %2872 = vmatprep.subr.mxu1 %v12427_v35 }
 0x1a1   : > { %2873 = vmatpush1.msra.mxu1 %v12429_v26 }
 0x1a2   : > { %10775 = vmatmul.mubr.msk.f32.vlgmr.msra.gmra.mxu1 %vm2749_vm9, %v12436_v23 }
 0x1a3   : > { %2912 = vmatprep.mubr.f32.mxu1 %v17443_v59 }
 0x1a6   : > { %10776 = vmatmul.mubr.msk.f32.gmra.mxu1 %vm2749_vm9, %v12446_v32 }
 0x1a7   : > { %2918 = vmatprep.mubr.f32.mxu1 %v17443_v59 }
 0x1aa   : > { %10777 = vmatmul.mubr.msk.f32.gmra.mxu1 %vm2749_vm9, %v12454_v27 }
 0x1ab   : > { %3072 = vmatprep.mubr.f32.mxu1 %v17443_v59 }
 0x1bd   : > { %v2335_v1 = vpop.f32.mrf.mxu1 }
 0x1be   : > { %v2336_v5 = vadd.f32 %v2335_v1, %v12417_v18 }
 0x1bf   : > { %v2337_v28 = vpop.f32.mrf.mxu1 }
 0x1c0   : > { %v2338_v30 = vadd.f32 %v2337_v28, %v12417_v18  ;;  %v12469_v19 = vmax.f32 %v2336_v5, 0.0 }
 0x1c1   : > { %v2341_v47 = vpop.f32.mrf.mxu1 }
 0x1c2   : > { %v2342_v3 = vadd.f32 %v2341_v47, %v12415_v20  ;;  %v12465_v63 = vmax.f32 %v2338_v30, 0.0  ;;  %v12564_v47 = vld [vmem:[%s17099_s4 + $0x30] sm:$0xff]  ;;  %v12577_v30 = vld [vmem:[%s17099_s4 + $0x38] sm:$0xff] }
 0x1c3   : > { %v2343_v46 = vpop.f32.mrf.mxu1 }
 0x1c4   : > { %v2344_v17 = vadd.f32 %v2343_v46, %v12415_v20  ;;  %v12463_v29 = vmax.f32 %v2342_v3, 0.0  ;;  %v12589_v46 = vld [vmem:[%s17099_s4 + $0x40] sm:$0xff] }
 0x1c6   : > { %v12467_v2 = vmax.f32 %v2344_v17, 0.0 }
 0x1c8   : > { %3036 = vmatprep.subr.mxu1 %v12467_v2 }
 0x1c9   : > { %3037 = vmatpush1.msra.mxu1 %v12463_v29 }
 0x1ca   : > { %3038 = vmatprep.subr.mxu1 %v12465_v63 }
 0x1cb   : > { %3039 = vmatpush1.msra.mxu1 %v12469_v19 }
 0x1cc   : > { %10781 = vmatmul.mubr.msk.f32.vlgmr.msra.gmra.mxu1 %vm2749_vm9, %v12436_v23 }
 0x1cd   : > { %3078 = vmatprep.mubr.f32.mxu1 %v17443_v59 }
 0x1d0   : > { %10782 = vmatmul.mubr.msk.f32.gmra.mxu1 %vm2749_vm9, %v12446_v32 }
 0x1d1   : > { %3084 = vmatprep.mubr.f32.mxu1 %v17443_v59 }
 0x1d4   : > { %10783 = vmatmul.mubr.msk.f32.gmra.mxu1 %vm2749_vm9, %v12454_v27 }
 0x1d5   : > { %3238 = vmatprep.mubr.f32.mxu1 %v17443_v59 }
 0x1ea   : > { %v2104_v12 = vpop.f32.mrf.mxu0 }
 0x1eb   : > { %v12491_v24 = vadd.f32 %v2104_v12, %v12417_v18 }
 0x1ec   : > { %v2106_v39 = vpop.f32.mrf.mxu0 }
 0x1ed   : > { %v12485_v49 = vadd.f32 %v2106_v39, %v12417_v18  ;;  %v2654_v62 = vmax.f32 %v12491_v24, 0.0 }
 0x1ee   : > { %v2110_v4 = vpop.f32.mrf.mxu0 }
 0x1ef   : > { %v12488_v51 = vadd.f32 %v2110_v4, %v12415_v20  ;;  %v2655_v40 = vmax.f32 %v12485_v49, 0.0 }
 0x1f0   : > { %v2112_v38 = vpop.f32.mrf.mxu0 }
 0x1f1   : > { %v12494_v52 = vadd.f32 %v2112_v38, %v12415_v20  ;;  %v2670_v45 = vmax.f32 %v12488_v51, 0.0 }
 0x1f3   : > { %v2671_v55 = vmax.f32 %v12494_v52, 0.0 }
 0x1f5   : > { %2787 = vmatprep.subr.mxu0 %v2671_v55 }
 0x1f6   : > { %2788 = vmatpush1.msra.mxu0 %v2670_v45 }
 0x1f7   : > { %2789 = vmatprep.subr.mxu0 %v2655_v40 }
 0x1f8   : > { %2790 = vmatpush1.msra.mxu0 %v2654_v62 }
 0x1f9   : > { %10772 = vmatmul.mubr.msk.f32.vlgmr.msra.gmra.mxu0 %vm2749_vm9, %v12436_v23 }
 0x1fa   : > { %2829 = vmatprep.mubr.f32.mxu0 %v17443_v59 }
 0x1fd   : > { %10773 = vmatmul.mubr.msk.f32.gmra.mxu0 %vm2749_vm9, %v12446_v32 }
 0x1fe   : > { %2835 = vmatprep.mubr.f32.mxu0 %v17443_v59 }
 0x201   : > { %10774 = vmatmul.mubr.msk.f32.gmra.mxu0 %vm2749_vm9, %v12454_v27 }
 0x202   : > { %2989 = vmatprep.mubr.f32.mxu0 %v17443_v59 }
 0x209   : > { %v2489_v9 = vpop.f32.mrf.mxu1 }
 0x20a   : > { %v2490_v60 = vadd.f32 %v2489_v9, %v12417_v18 }
 0x20b   : > { %v2491_v57 = vpop.f32.mrf.mxu1 }
 0x20c   : > { %v2492_v6 = vadd.f32 %v2491_v57, %v12417_v18  ;;  %v12527_v48 = vmax.f32 %v2490_v60, 0.0 }
 0x20d   : > { %v2495_v58 = vpop.f32.mrf.mxu1 }
 0x20e   : > { %v2496_v0 = vadd.f32 %v2495_v58, %v12415_v20  ;;  %v12523_v41 = vmax.f32 %v2492_v6, 0.0 }
 0x20f   : > { %v2497_v10 = vpop.f32.mrf.mxu1 }
 0x210   : > { %v2498_v54 = vadd.f32 %v2497_v10, %v12415_v20  ;;  %v12521_v43 = vmax.f32 %v2496_v0, 0.0 }
 0x212   : > { %v12525_v21 = vmax.f32 %v2498_v54, 0.0 }
 0x214   : > { %3202 = vmatprep.subr.mxu1 %v12525_v21 }
 0x215   : > { %v2258_v25 = vpop.f32.mrf.mxu0  ;;  %3203 = vmatpush1.msra.mxu1 %v12521_v43 }
 0x216   : > { %3204 = vmatprep.subr.mxu1 %v12523_v41  ;;  %v2259_v8 = vadd.f32 %v2258_v25, %v12417_v18 }
 0x217   : > { %v2260_v11 = vpop.f32.mrf.mxu0  ;;  %3205 = vmatpush1.msra.mxu1 %v12527_v48 }
 0x218   : > { %10787 = vmatmul.mubr.msk.f32.vlgmr.msra.gmra.mxu1 %vm2749_vm9, %v12436_v23  ;;  %3417 = vmatprep.subr.mxu1 %v12423_v56  ;;  %v2261_v34 = vadd.f32 %v2260_v11, %v12417_v18  ;;  %v12557_v28 = vmax.f32 %v2259_v8, 0.0 }
 0x219   : > { %v2264_v36 = vpop.f32.mrf.mxu0  ;;  %3418 = vmatpush1.msra.mxu1 %v12425_v53  ;;  %3244 = vmatprep.mubr.f32.mxu1 %v17443_v59 }
 0x21a   : > { %3419 = vmatprep.subr.mxu1 %v12427_v35  ;;  %v2265_v31 = vadd.f32 %v2264_v36, %v12415_v20  ;;  %v12552_v1 = vmax.f32 %v2261_v34, 0.0 }
 0x21b   : > { %v2266_v42 = vpop.f32.mrf.mxu0  ;;  %3420 = vmatpush1.msra.mxu1 %v12429_v26 }
 0x21c   : > { %v2267_v13 = vadd.f32 %v2266_v42, %v12415_v20  ;;  %10788 = vmatmul.mubr.msk.f32.gmra.mxu1 %vm2749_vm9, %v12446_v32  ;;  %3583 = vmatprep.subr.mxu1 %v12467_v2  ;;  %v12550_v61 = vmax.f32 %v2265_v31, 0.0 }
 0x21d   : > { %3250 = vmatprep.mubr.f32.mxu1 %v17443_v59 }
 0x21e   : > { %v12548_v22 = vmax.f32 %v2267_v13, 0.0 }
 0x220   : > { %2953 = vmatprep.subr.mxu0 %v12548_v22  ;;  %10789 = vmatmul.mubr.msk.f32.gmra.mxu1 %vm2749_vm9, %v12454_v27 }
 0x221   : > { %2954 = vmatpush1.msra.mxu0 %v12550_v61  ;;  %3453 = vmatprep.mubr.f32.mxu1 %v17443_v59 }
 0x222   : > { %2955 = vmatprep.subr.mxu0 %v12552_v1 }
 0x223   : > { %2956 = vmatpush1.msra.mxu0 %v12557_v28 }
 0x224   : > { %10799 = vmatmul.mubr.msk.f32.vlgmr.msra.gmra.mxu1 %vm2749_vm9, %v12564_v47  ;;  %10778 = vmatmul.mubr.msk.f32.vlgmr.msra.gmra.mxu0 %vm2749_vm9, %v12436_v23 }
 0x225   : > { %3584 = vmatpush1.msra.mxu1 %v12463_v29  ;;  %3459 = vmatprep.mubr.f32.mxu1 %v17443_v59 }
 0x226   : > { %3585 = vmatprep.subr.mxu1 %v12465_v63  ;;  %2995 = vmatprep.mubr.f32.mxu0 %v17443_v59 }
 0x227   : > { %v2412_v3 = vpop.f32.mrf.mxu0  ;;  %3586 = vmatpush1.msra.mxu1 %v12469_v19 }
 0x228   : > { %3749 = vmatprep.subr.mxu1 %v12525_v21  ;;  %10800 = vmatmul.mubr.msk.f32.gmra.mxu1 %vm2749_vm9, %v12577_v30  ;;  %v2413_v9 = vadd.f32 %v2412_v3, %v12417_v18 }
 0x229   : > { %v2414_v5 = vpop.f32.mrf.mxu0  ;;  %3465 = vmatprep.mubr.f32.mxu1 %v17443_v59  ;;  %10779 = vmatmul.mubr.msk.f32.gmra.mxu0 %vm2749_vm9, %v12446_v32 }
 0x22a   : > { %3001 = vmatprep.mubr.f32.mxu0 %v17443_v59  ;;  %v2415_v4 = vadd.f32 %v2414_v5, %v12417_v18  ;;  %v12616_v0 = vmax.f32 %v2413_v9, 0.0 }
 0x22b   : > { %v2418_v17 = vpop.f32.mrf.mxu0 }
 0x22c   : > { %10801 = vmatmul.mubr.msk.f32.gmra.mxu1 %vm2749_vm9, %v12589_v46  ;;  %v2419_v12 = vadd.f32 %v2418_v17, %v12415_v20  ;;  %v12612_v6 = vmax.f32 %v2415_v4, 0.0 }
 0x22d   : > { %v2420_v39 = vpop.f32.mrf.mxu0  ;;  %3619 = vmatprep.mubr.f32.mxu1 %v17443_v59  ;;  %10780 = vmatmul.mubr.msk.f32.gmra.mxu0 %vm2749_vm9, %v12454_v27 }
 0x22e   : > { %v2421_v38 = vadd.f32 %v2420_v39, %v12415_v20  ;;  %3155 = vmatprep.mubr.f32.mxu0 %v17443_v59  ;;  %v12608_v58 = vmax.f32 %v2419_v12, 0.0 }
 0x230   : > { %v12604_v57 = vmax.f32 %v2421_v38, 0.0  ;;  %10805 = vmatmul.mubr.msk.f32.vlgmr.msra.gmra.mxu1 %vm2749_vm9, %v12564_v47 }
 0x231   : > { %3750 = vmatpush1.msra.mxu1 %v12521_v43  ;;  %3625 = vmatprep.mubr.f32.mxu1 %v17443_v59 }
 0x232   : > { %3119 = vmatprep.subr.mxu0 %v12604_v57  ;;  %3751 = vmatprep.subr.mxu1 %v12523_v41 }
 0x233   : > { %3120 = vmatpush1.msra.mxu0 %v12608_v58  ;;  %3752 = vmatpush1.msra.mxu1 %v12527_v48 }
 0x234   : > { %3121 = vmatprep.subr.mxu0 %v12612_v6  ;;  %10806 = vmatmul.mubr.msk.f32.gmra.mxu1 %vm2749_vm9, %v12577_v30 }
 0x235   : > { %3122 = vmatpush1.msra.mxu0 %v12616_v0  ;;  %3631 = vmatprep.mubr.f32.mxu1 %v17443_v59 }
 0x236   : > { %10784 = vmatmul.mubr.msk.f32.vlgmr.msra.gmra.mxu0 %vm2749_vm9, %v12436_v23 }
 0x237   : > { %3161 = vmatprep.mubr.f32.mxu0 %v17443_v59 }
 0x238   : > { %10807 = vmatmul.mubr.msk.f32.gmra.mxu1 %vm2749_vm9, %v12589_v46 }
 0x239   : > { %3785 = vmatprep.mubr.f32.mxu1 %v17443_v59 }
 0x23a   : > { %10785 = vmatmul.mubr.msk.f32.gmra.mxu0 %vm2749_vm9, %v12446_v32 }
 0x23b   : > { %3167 = vmatprep.mubr.f32.mxu0 %v17443_v59 }
 0x23c   : > { %10811 = vmatmul.mubr.msk.f32.vlgmr.msra.gmra.mxu1 %vm2749_vm9, %v12564_v47 }
 0x23d   : > { %3791 = vmatprep.mubr.f32.mxu1 %v17443_v59 }
 0x23e   : > { %10786 = vmatmul.mubr.msk.f32.gmra.mxu0 %vm2749_vm9, %v12454_v27 }
 0x23f   : > { %3321 = vmatprep.mubr.f32.mxu0 %v17443_v59 }
 0x240   : > { %10812 = vmatmul.mubr.msk.f32.gmra.mxu1 %vm2749_vm9, %v12577_v30 }
 0x241   : > { %3797 = vmatprep.mubr.f32.mxu1 %v17443_v59 }
 0x244   : > { %10813 = vmatmul.mubr.msk.f32.gmra.mxu1 %vm2749_vm9, %v12589_v46 }
 0x245   : > { %3951 = vmatprep.mubr.f32.mxu1 %v17443_v59 }
 0x252   : > { %v2566_v60 = vpop.f32.mrf.mxu0 }
 0x253   : > { %v2643_v10 = vpop.f32.mrf.mxu1  ;;  %v2567_v5 = vadd.f32 %v2566_v60, %v12417_v18 }
 0x254   : > { %v2568_v54 = vpop.f32.mrf.mxu0  ;;  %v12660_v39 = vadd.f32 %v2643_v10, %v12417_v18 }
 0x255   : > { %v2645_v25 = vpop.f32.mrf.mxu1  ;;  %v2569_v34 = vadd.f32 %v2568_v54, %v12417_v18  ;;  %v12671_v60 = vmax.f32 %v2567_v5, 0.0 }
 0x256   : > { %v2572_v11 = vpop.f32.mrf.mxu0  ;;  %v12654_v17 = vadd.f32 %v2645_v25, %v12417_v18  ;;  %v2668_v18 = vmax.f32 %v12660_v39, 0.0 }
 0x257   : > { %v2649_v36 = vpop.f32.mrf.mxu1  ;;  %v2573_v31 = vadd.f32 %v2572_v11, %v12415_v20  ;;  %v12667_v54 = vmax.f32 %v2569_v34, 0.0 }
 0x258   : > { %v2574_v42 = vpop.f32.mrf.mxu0  ;;  %v12649_v13 = vadd.f32 %v2649_v36, %v12415_v20 }
 0x259   : > { %v2575_v8 = vadd.f32 %v2574_v42, %v12415_v20  ;;  %v2651_v3 = vpop.f32.mrf.mxu1  ;;  %v12664_v38 = vmax.f32 %v2573_v31, 0.0 }
 0x25a   : > { %v12657_v12 = vadd.f32 %v2651_v3, %v12415_v20  ;;  %v2684_v11 = vmax.f32 %v12649_v13, 0.0  ;;  %v2669_v20 = vmax.f32 %v12654_v17, 0.0 }
 0x25b   : > { %v12662_v4 = vmax.f32 %v2575_v8, 0.0 }
 0x25c   : > { %v2685_v9 = vmax.f32 %v12657_v12, 0.0 }
 0x25d   : > { %3285 = vmatprep.subr.mxu0 %v12662_v4 }
 0x25e   : > { %3915 = vmatprep.subr.mxu1 %v2685_v9  ;;  %3286 = vmatpush1.msra.mxu0 %v12664_v38 }
 0x25f   : > { %3916 = vmatpush1.msra.mxu1 %v2684_v11  ;;  %3287 = vmatprep.subr.mxu0 %v12667_v54 }
 0x260   : > { %3917 = vmatprep.subr.mxu1 %v2669_v20  ;;  %3288 = vmatpush1.msra.mxu0 %v12671_v60 }
 0x261   : > { %3918 = vmatpush1.msra.mxu1 %v2668_v18  ;;  %10790 = vmatmul.mubr.msk.f32.vlgmr.msra.gmra.mxu0 %vm2749_vm9, %v12436_v23 }
 0x262   : > { %3500 = vmatprep.subr.mxu0 %v12548_v22  ;;  %10817 = vmatmul.mubr.msk.f32.vlgmr.msra.gmra.mxu1 %vm2749_vm9, %v12564_v47 }
 0x263   : > { %4090 = vmatprep.subr.mxu1 %v12423_v56  ;;  %3501 = vmatpush1.msra.mxu0 %v12550_v61  ;;  %v12717_v56 = vld [vmem:[%s17099_s4 + $0x18] sm:$0xff] }
 0x264   : > { %4091 = vmatpush1.msra.mxu1 %v12425_v53  ;;  %3502 = vmatprep.subr.mxu0 %v12552_v1  ;;  %v12733_v53 = vld [vmem:[%s17099_s4 + $0x20] sm:$0xff] }
 0x265   : > { %4092 = vmatprep.subr.mxu1 %v12427_v35  ;;  %3327 = vmatprep.mubr.f32.mxu0 %v17443_v59  ;;  %v12747_v35 = vld [vmem:[%s17099_s4 + $0x28] sm:$0xff] }
 0x266   : > { %3503 = vmatpush1.msra.mxu0 %v12557_v28  ;;  %3957 = vmatprep.mubr.f32.mxu1 %v17443_v59 }
 0x267   : > { %4093 = vmatpush1.msra.mxu1 %v12429_v26  ;;  %10791 = vmatmul.mubr.msk.f32.gmra.mxu0 %vm2749_vm9, %v12446_v32  ;;  %v12841_v26 = vpop.f32.mrf.mxu1 }
 0x268   : > { %3666 = vmatprep.subr.mxu0 %v12604_v57  ;;  %10818 = vmatmul.mubr.msk.f32.gmra.mxu1 %vm2749_vm9, %v12577_v30 }
 0x269   : > { %4256 = vmatprep.subr.mxu1 %v12467_v2  ;;  %3333 = vmatprep.mubr.f32.mxu0 %v17443_v59  ;;  %v12847_v23 = vpop.f32.mrf.mxu1 }
 0x26a   : > { %3963 = vmatprep.mubr.f32.mxu1 %v17443_v59 }
 0x26b   : > { %10792 = vmatmul.mubr.msk.f32.gmra.mxu0 %vm2749_vm9, %v12454_v27  ;;  %v12852_v32 = vpop.f32.mrf.mxu1 }
 0x26c   : > { %10819 = vmatmul.mubr.msk.f32.gmra.mxu1 %vm2749_vm9, %v12589_v46  ;;  %3536 = vmatprep.mubr.f32.mxu0 %v17443_v59 }
 0x26d   : > { %4126 = vmatprep.mubr.f32.mxu1 %v17443_v59  ;;  %v12860_v27 = vpop.f32.mrf.mxu1 }
 0x26e   : > { %17472 = vst [vmem:[#allocation16_spill] sm:$0xff] %v12860_v27 }
 0x26f   : > { %10802 = vmatmul.mubr.msk.f32.vlgmr.msra.gmra.mxu0 %vm2749_vm9, %v12564_v47 }
 0x270   : > { %3667 = vmatpush1.msra.mxu0 %v12608_v58  ;;  %10823 = vmatmul.mubr.msk.f32.vlgmr.msra.gmra.mxu1 %vm2749_vm9, %v12717_v56 }
 0x271   : > { %4257 = vmatpush1.msra.mxu1 %v12463_v29  ;;  %3668 = vmatprep.subr.mxu0 %v12612_v6  ;;  %v12865_v29 = vpop.f32.mrf.mxu1 }
 0x272   : > { %4258 = vmatprep.subr.mxu1 %v12465_v63  ;;  %3669 = vmatpush1.msra.mxu0 %v12616_v0  ;;  %17473 = vst [vmem:[#allocation19_spill] sm:$0xff] %v12865_v29 }
 0x273   : > { %4259 = vmatpush1.msra.mxu1 %v12469_v19  ;;  %3542 = vmatprep.mubr.f32.mxu0 %v17443_v59  ;;  %v12870_v63 = vpop.f32.mrf.mxu1 }
 0x274   : > { %3832 = vmatprep.subr.mxu0 %v12662_v4  ;;  %4132 = vmatprep.mubr.f32.mxu1 %v17443_v59  ;;  %17474 = vst [vmem:[#allocation21_spill] sm:$0xff] %v12870_v63 }
 0x275   : > { %4422 = vmatprep.subr.mxu1 %v12525_v21  ;;  %10803 = vmatmul.mubr.msk.f32.gmra.mxu0 %vm2749_vm9, %v12577_v30 }
 0x276   : > { %10824 = vmatmul.mubr.msk.f32.gmra.mxu1 %vm2749_vm9, %v12733_v53  ;;  %3548 = vmatprep.mubr.f32.mxu0 %v17443_v59 }
 0x277   : > { %4138 = vmatprep.mubr.f32.mxu1 %v17443_v59 }
 0x279   : > { %10804 = vmatmul.mubr.msk.f32.gmra.mxu0 %vm2749_vm9, %v12589_v46 }
 0x27a   : > { %10825 = vmatmul.mubr.msk.f32.gmra.mxu1 %vm2749_vm9, %v12747_v35  ;;  %3702 = vmatprep.mubr.f32.mxu0 %v17443_v59 }
 0x27b   : > { %4292 = vmatprep.mubr.f32.mxu1 %v17443_v59 }
 0x27d   : > { %10808 = vmatmul.mubr.msk.f32.vlgmr.msra.gmra.mxu0 %vm2749_vm9, %v12564_v47 }
 0x27e   : > { %3833 = vmatpush1.msra.mxu0 %v12664_v38  ;;  %10829 = vmatmul.mubr.msk.f32.vlgmr.msra.gmra.mxu1 %vm2749_vm9, %v12717_v56 }
 0x27f   : > { %4423 = vmatpush1.msra.mxu1 %v12521_v43  ;;  %3834 = vmatprep.subr.mxu0 %v12667_v54 }
 0x280   : > { %4424 = vmatprep.subr.mxu1 %v12523_v41  ;;  %3835 = vmatpush1.msra.mxu0 %v12671_v60 }
 0x281   : > { %4425 = vmatpush1.msra.mxu1 %v12527_v48  ;;  %3708 = vmatprep.mubr.f32.mxu0 %v17443_v59 }
 0x282   : > { %4007 = vmatprep.subr.mxu0 %v2671_v55  ;;  %4298 = vmatprep.mubr.f32.mxu1 %v17443_v59 }
 0x283   : > { %4588 = vmatprep.subr.mxu1 %v2685_v9  ;;  %10809 = vmatmul.mubr.msk.f32.gmra.mxu0 %vm2749_vm9, %v12577_v30 }
 0x284   : > { %10830 = vmatmul.mubr.msk.f32.gmra.mxu1 %vm2749_vm9, %v12733_v53  ;;  %3714 = vmatprep.mubr.f32.mxu0 %v17443_v59 }
 0x285   : > { %4304 = vmatprep.mubr.f32.mxu1 %v17443_v59 }
 0x287   : > { %10810 = vmatmul.mubr.msk.f32.gmra.mxu0 %vm2749_vm9, %v12589_v46 }
 0x288   : > { %10831 = vmatmul.mubr.msk.f32.gmra.mxu1 %vm2749_vm9, %v12747_v35  ;;  %3868 = vmatprep.mubr.f32.mxu0 %v17443_v59 }
 0x289   : > { %4458 = vmatprep.mubr.f32.mxu1 %v17443_v59 }
 0x28b   : > { %10814 = vmatmul.mubr.msk.f32.vlgmr.msra.gmra.mxu0 %vm2749_vm9, %v12564_v47 }
 0x28c   : > { %4008 = vmatpush1.msra.mxu0 %v2670_v45  ;;  %10835 = vmatmul.mubr.msk.f32.vlgmr.msra.gmra.mxu1 %vm2749_vm9, %v12717_v56  ;;  %v12875_v2 = vpop.f32.mrf.mxu1 }
 0x28d   : > { %4589 = vmatpush1.msra.mxu1 %v2684_v11  ;;  %4009 = vmatprep.subr.mxu0 %v2655_v40  ;;  %17475 = vst [vmem:[#allocation24_spill] sm:$0xff] %v12875_v2 }
 0x28e   : > { %4590 = vmatprep.subr.mxu1 %v2669_v20  ;;  %4010 = vmatpush1.msra.mxu0 %v2654_v62  ;;  %v12880_v19 = vpop.f32.mrf.mxu1 }
 0x28f   : > { %4591 = vmatpush1.msra.mxu1 %v2668_v18  ;;  %3874 = vmatprep.mubr.f32.mxu0 %v17443_v59  ;;  %17476 = vst [vmem:[#allocation17_spill] sm:$0xff] %v12880_v19 }
 0x290   : > { %4173 = vmatprep.subr.mxu0 %v12548_v22  ;;  %4464 = vmatprep.mubr.f32.mxu1 %v17443_v59  ;;  %v12884_v49 = vpop.f32.mrf.mxu1 }
 0x291   : > { %10815 = vmatmul.mubr.msk.f32.gmra.mxu0 %vm2749_vm9, %v12577_v30  ;;  %10836 = vmatmul.mubr.msk.f32.gmra.mxu1 %vm2749_vm9, %v12733_v53  ;;  %17477 = vst [vmem:[#allocation25_spill] sm:$0xff] %v12884_v49 }
 0x292   : > { %3880 = vmatprep.mubr.f32.mxu0 %v17443_v59  ;;  %4470 = vmatprep.mubr.f32.mxu1 %v17443_v59  ;;  %v12886_v51 = vpop.f32.mrf.mxu1 }
 0x293   : > { %17478 = vst [vmem:[#allocation20_spill] sm:$0xff] %v12886_v51 }
 0x294   : > { %v12888_v24 = vpop.f32.mrf.mxu1 }
 0x295   : > { %10816 = vmatmul.mubr.msk.f32.gmra.mxu0 %vm2749_vm9, %v12589_v46  ;;  %10837 = vmatmul.mubr.msk.f32.gmra.mxu1 %vm2749_vm9, %v12747_v35  ;;  %17479 = vst [vmem:[#allocation27_spill] sm:$0xff] %v12888_v24 }
 0x296   : > { %4043 = vmatprep.mubr.f32.mxu0 %v17443_v59  ;;  %4624 = vmatprep.mubr.f32.mxu1 %v17443_v59  ;;  %v12890_v52 = vpop.f32.mrf.mxu1 }
 0x297   : > { %17480 = vst [vmem:[#allocation22_spill] sm:$0xff] %v12890_v52 }
 0x299   : > { %10820 = vmatmul.mubr.msk.f32.vlgmr.msra.gmra.mxu0 %vm2749_vm9, %v12717_v56  ;;  %10841 = vmatmul.mubr.msk.f32.vlgmr.msra.gmra.mxu1 %vm2749_vm9, %v12717_v56 }
 0x29a   : > { %4174 = vmatpush1.msra.mxu0 %v12550_v61  ;;  %4049 = vmatprep.mubr.f32.mxu0 %v17443_v59 }
 0x29b   : > { %4175 = vmatprep.subr.mxu0 %v12552_v1  ;;  %4630 = vmatprep.mubr.f32.mxu1 %v17443_v59 }
 0x29c   : > { %4176 = vmatpush1.msra.mxu0 %v12557_v28 }
 0x29d   : > { %4339 = vmatprep.subr.mxu0 %v12604_v57  ;;  %10821 = vmatmul.mubr.msk.f32.gmra.mxu0 %vm2749_vm9, %v12733_v53 }
 0x29e   : > { %10842 = vmatmul.mubr.msk.f32.gmra.mxu1 %vm2749_vm9, %v12733_v53  ;;  %4055 = vmatprep.mubr.f32.mxu0 %v17443_v59 }
 0x29f   : > { %4636 = vmatprep.mubr.f32.mxu1 %v17443_v59 }
 0x2a1   : > { %10822 = vmatmul.mubr.msk.f32.gmra.mxu0 %vm2749_vm9, %v12747_v35 }
 0x2a2   : > { %10843 = vmatmul.mubr.msk.f32.gmra.mxu1 %vm2749_vm9, %v12747_v35  ;;  %4209 = vmatprep.mubr.f32.mxu0 %v17443_v59 }
 0x2a5   : > { %10826 = vmatmul.mubr.msk.f32.vlgmr.msra.gmra.mxu0 %vm2749_vm9, %v12717_v56 }
 0x2a6   : > { %4340 = vmatpush1.msra.mxu0 %v12608_v58  ;;  %4215 = vmatprep.mubr.f32.mxu0 %v17443_v59 }
 0x2a7   : > { %4341 = vmatprep.subr.mxu0 %v12612_v6 }
 0x2a8   : > { %4342 = vmatpush1.msra.mxu0 %v12616_v0 }
 0x2a9   : > { %4505 = vmatprep.subr.mxu0 %v12662_v4  ;;  %10827 = vmatmul.mubr.msk.f32.gmra.mxu0 %vm2749_vm9, %v12733_v53 }
 0x2aa   : > { %4221 = vmatprep.mubr.f32.mxu0 %v17443_v59 }
 0x2ad   : > { %10828 = vmatmul.mubr.msk.f32.gmra.mxu0 %vm2749_vm9, %v12747_v35 }
 0x2ae   : > { %4375 = vmatprep.mubr.f32.mxu0 %v17443_v59 }
 0x2b1   : > { %10832 = vmatmul.mubr.msk.f32.vlgmr.msra.gmra.mxu0 %vm2749_vm9, %v12717_v56 }
 0x2b2   : > { %4506 = vmatpush1.msra.mxu0 %v12664_v38  ;;  %4381 = vmatprep.mubr.f32.mxu0 %v17443_v59 }
 0x2b3   : > { %4507 = vmatprep.subr.mxu0 %v12667_v54 }
 0x2b4   : > { %4508 = vmatpush1.msra.mxu0 %v12671_v60 }
 0x2b5   : > { %10833 = vmatmul.mubr.msk.f32.gmra.mxu0 %vm2749_vm9, %v12733_v53 }
 0x2b6   : > { %4387 = vmatprep.mubr.f32.mxu0 %v17443_v59 }
 0x2b9   : > { %10834 = vmatmul.mubr.msk.f32.gmra.mxu0 %vm2749_vm9, %v12747_v35  ;;  %v2825_v55 = vpop.f32.mrf.mxu0 }
 0x2ba   : > { %4541 = vmatprep.mubr.f32.mxu0 %v17443_v59 }
 0x2bb   : > { %v12900_v41 = vpop.f32.mrf.mxu0 }
 0x2bd   : > { %10838 = vmatmul.mubr.msk.f32.vlgmr.msra.gmra.mxu0 %vm2749_vm9, %v12717_v56  ;;  %v12906_v22 = vpop.f32.mrf.mxu0 }
 0x2be   : > { %4547 = vmatprep.mubr.f32.mxu0 %v17443_v59 }
 0x2bf   : > { %v12912_v28 = vpop.f32.mrf.mxu0 }
 0x2c1   : > { %10839 = vmatmul.mubr.msk.f32.gmra.mxu0 %vm2749_vm9, %v12733_v53  ;;  %v12918_v46 = vpop.f32.mrf.mxu0 }
 0x2c2   : > { %4553 = vmatprep.mubr.f32.mxu0 %v17443_v59 }
 0x2c3   : > { %v12924_v6 = vpop.f32.mrf.mxu0 }
 0x2c5   : > { %10840 = vmatmul.mubr.msk.f32.gmra.mxu0 %vm2749_vm9, %v12747_v35 }
 0x2d8   : > { %v12892_v45 = vpop.f32.mrf.mxu1 }
 0x2d9   : > { %17481 = vst [vmem:[#allocation29_spill] sm:$0xff] %v12892_v45 }
 0x2da   : > { %v12894_v40 = vpop.f32.mrf.mxu1 }
 0x2db   : > { %17482 = vst [vmem:[#allocation23_spill] sm:$0xff] %v12894_v40 }
 0x2dc   : > { %v12896_v62 = vpop.f32.mrf.mxu1 }
 0x2dd   : > { %17483 = vst [vmem:[#allocation18_spill] sm:$0xff] %v12896_v62 }
 0x2de   : > { %v12898_v43 = vpop.f32.mrf.mxu1 }
 0x2df   : > { %17484 = vst [vmem:[#allocation26_spill] sm:$0xff] %v12898_v43 }
 0x2e0   : > { %v12902_v21 = vpop.f32.mrf.mxu1 }
 0x2e1   : > { %17485 = vst [vmem:[#allocation28_spill] sm:$0xff] %v12902_v21 }
 0x2e2   : > { %v12904_v48 = vpop.f32.mrf.mxu1 }
 0x2e3   : > { %17486 = vst [vmem:[#allocation30_spill] sm:$0xff] %v12904_v48 }
 0x2e4   : > { %v12908_v61 = vpop.f32.mrf.mxu1  ;;  %v12928_v10 = vpop.f32.mrf.mxu0 }
 0x2e6   : > { %v12910_v1 = vpop.f32.mrf.mxu1  ;;  %v12932_v36 = vpop.f32.mrf.mxu0 }
 0x2e8   : > { %v12914_v47 = vpop.f32.mrf.mxu1 }
 0x2e9   : > { %v12936_v42 = vpop.f32.mrf.mxu0 }
 0x2ea   : > { %v12916_v30 = vpop.f32.mrf.mxu1 }
 0x2eb   : > { %v12940_v13 = vpop.f32.mrf.mxu0 }
 0x2ec   : > { %v12920_v57 = vpop.f32.mrf.mxu1 }
 0x2ed   : > { %v12944_v3 = vpop.f32.mrf.mxu0 }
 0x2ee   : > { %v12922_v58 = vpop.f32.mrf.mxu1 }
 0x2ef   : > { %v12948_v17 = vpop.f32.mrf.mxu0 }
 0x2f0   : > { %v12926_v0 = vpop.f32.mrf.mxu1  ;;  %17490 = vst [vmem:[#allocation36_spill] sm:$0xff] %v12948_v17 }
 0x2f2   : > { %v12930_v25 = vpop.f32.mrf.mxu1 }
 0x2f4   : > { %v12934_v31 = vpop.f32.mrf.mxu1 }
 0x2f6   : > { %v12938_v34 = vpop.f32.mrf.mxu1  ;;  %v12952_v39 = vpop.f32.mrf.mxu0 }
 0x2f7   : > { %17487 = vst [vmem:[#allocation31_spill] sm:$0xff] %v12938_v34  ;;  %17492 = vst [vmem:[#allocation38_spill] sm:$0xff] %v12952_v39 }
 0x2f8   : > { %v12942_v8 = vpop.f32.mrf.mxu1  ;;  %v12956_v38 = vpop.f32.mrf.mxu0 }
 0x2f9   : > { %17488 = vst [vmem:[#allocation34_spill] sm:$0xff] %v12942_v8  ;;  %17494 = vst [vmem:[#allocation40_spill] sm:$0xff] %v12956_v38 }
 0x2fa   : > { %v12946_v5 = vpop.f32.mrf.mxu1  ;;  %v12960_v54 = vpop.f32.mrf.mxu0 }
 0x2fb   : > { %17489 = vst [vmem:[#allocation35_spill] sm:$0xff] %v12946_v5 }
 0x2fc   : > { %v12950_v12 = vpop.f32.mrf.mxu1  ;;  %v12964_v60 = vpop.f32.mrf.mxu0 }
 0x2fd   : > { %17491 = vst [vmem:[#allocation37_spill] sm:$0xff] %v12950_v12 }
 0x2fe   : > { %v12954_v4 = vpop.f32.mrf.mxu1  ;;  %v12968_v18 = vpop.f32.mrf.mxu0 }
 0x2ff   : > { %17493 = vst [vmem:[#allocation39_spill] sm:$0xff] %v12954_v4 }
 0x300   : > { %v12958_v9 = vpop.f32.mrf.mxu1  ;;  %v12972_v53 = vpop.f32.mrf.mxu0 }
 0x301   : > { %17495 = vst [vmem:[#allocation41_spill] sm:$0xff] %v12958_v9 }
 0x302   : > { %v12962_v11 = vpop.f32.mrf.mxu1 }
 0x303   : > { %17496 = vst [vmem:[#allocation42_spill] sm:$0xff] %v12962_v11 }
 0x304   : > { %v12966_v20 = vpop.f32.mrf.mxu1 }
 0x305   : > { %17497 = vst [vmem:[#allocation43_spill] sm:$0xff] %v12966_v20 }
 0x306   : > { %v12970_v56 = vpop.f32.mrf.mxu1 }
 0x307   : > { %17498 = vst [vmem:[#allocation44_spill] sm:$0xff] %v12970_v56 }
 0x321   : > { %v12974_v35 = vpop.f32.mrf.mxu0 }
 0x322   : > { %v12976_v59 = vpop.f32.mrf.mxu1 }
 0x323   : > { %17499 = vst [vmem:[#allocation45_spill] sm:$0xff] %v12976_v59  ;;  %v12978_v43 = vpop.f32.mrf.mxu0 }
 0x324   : > { %17500 = vst [vmem:[#allocation46_spill] sm:$0xff] %v12978_v43  ;;  %v12980_v48 = vpop.f32.mrf.mxu1 }
 0x325   : > { %17501 = vst [vmem:[#allocation47_spill] sm:$0xff] %v12980_v48 }
 0x327   : > { %v12982_v40 = vpop.f32.mrf.mxu0 }
 0x328   : > { %v12984_v44 = vpop.f32.mrf.mxu1 }
 0x329   : > { %17502 = vst [vmem:[#allocation48_spill] sm:$0xff] %v12984_v44  ;;  %v12986_v50 = vpop.f32.mrf.mxu0 }
 0x32a   : > { %17503 = vst [vmem:[#allocation49_spill] sm:$0xff] %v12986_v50  ;;  %v12988_v62 = vpop.f32.mrf.mxu1 }
 0x32b   : > { %17504 = vst [vmem:[#allocation50_spill] sm:$0xff] %v12988_v62  ;;  %v12990_v21 = vpop.f32.mrf.mxu0 }
 0x32c   : > { %v12992_v16 = vpop.f32.mrf.mxu1 }
 0x32d   : > { %17505 = vst [vmem:[#allocation51_spill] sm:$0xff] %v12992_v16  ;;  %v12994_v33 = vpop.f32.mrf.mxu0 }
 0x32e   : > { %17506 = vst [vmem:[#allocation52_spill] sm:$0xff] %v12994_v33  ;;  %v12996_v45 = vpop.f32.mrf.mxu1 }
 0x32f   : > { %17507 = vst [vmem:[#allocation53_spill] sm:$0xff] %v12996_v45  ;;  %v3538_v59 = vpop.f32.mrf.mxu0 }
 0x330   : > { %v4128_v38 = vpop.f32.mrf.mxu1 }
 0x331   : > { %v4129_v11 = vadd.f32 %v4128_v38, %v2825_v55  ;;  %v3540_v48 = vpop.f32.mrf.mxu0 }
 0x332   : > { %v4130_v51 = vpop.f32.mrf.mxu1 }
 0x333   : > { %v12998_v56 = vadd.f32 %v4129_v11, %v3538_v59  ;;  %v4131_v50 = vadd.f32 %v4130_v51, %v12900_v41 }
 0x335   : > { %17508 = vst [vmem:[#allocation54_spill] sm:$0xff] %v12998_v56  ;;  %v13000_v44 = vpop.f32.mrf.mxu0  ;;  %5915 = vrot.lane.b32.xlu1 %v12998_v56, %s17345_s25  ;;  %6383 = vrot.lane.b32.xlu0 %v12998_v56, %s17426_s12  ;;  %v13039_v43 = vadd.f32 %v4131_v50, %v3540_v48 }
 0x336   : > { %v4134_v62 = vpop.f32.mrf.mxu1 }
 0x337   : > { %v13006_v16 = vpop.f32.mrf.mxu0 }
 0x338   : > { %v13008_v52 = vpop.f32.mrf.mxu1 }
 0x339   : > { %v13010_v45 = vpop.f32.mrf.mxu0  ;;  %7499 = vrot.lane.b32.xlu1 %v12998_v56, %s17509_s16  ;;  %5543 = vrot.lane.b32.xlu0 %v12998_v56, %s17510_s30 }
 0x33a   : > { %v13016_v59 = vpop.f32.mrf.mxu1 }
 0x33b   : > { %v13018_v55 = vpop.f32.mrf.mxu0 }
 0x33c   : > { %v13020_v38 = vpop.f32.mrf.mxu1 }
 0x33d   : > { %v13022_v11 = vpop.f32.mrf.mxu0  ;;  %5171 = vrot.lane.b32.xlu1 %v12998_v56, %s17427_s13  ;;  %7127 = vrot.lane.b32.xlu0 %v12998_v56, %s17511_s14 }
 0x33e   : > { %v13028_v33 = vpop.f32.mrf.mxu1 }
 0x33f   : > { %v13031_v20 = vpop.f32.mrf.mxu0 }
 0x340   : > { %v13033_v24 = vpop.f32.mrf.mxu1 }
 0x341   : > { %6755 = vrot.lane.b32.xlu1 %v12998_v56, %s17432_s24  ;;  %4799 = vrot.lane.b32.xlu0 %v12998_v56, %s17428_s22 }
 0x343   : > { %v13041_v4 = vpop.f32.mrf.mxu0 }
 0x344   : > { %v13043_v19 = vpop.f32.mrf.mxu1 }
 0x345   : > { %v13045_v9 = vpop.f32.mrf.mxu0  ;;  %5921 = vrot.lane.b32.xlu0 %v13039_v43, %s17345_s25  ;;  %6389 = vrot.lane.b32.xlu1 %v13039_v43, %s17426_s12 }
 0x346   : > { %v13051_v51 = vpop.f32.mrf.mxu1 }
 0x347   : > { %v13053_v41 = vpop.f32.mrf.mxu0 }
 0x348   : > { %v13055_v49 = vpop.f32.mrf.mxu1 }
 0x349   : > { %v13057_v50 = vpop.f32.mrf.mxu0  ;;  %5177 = vrot.lane.b32.xlu0 %v13039_v43, %s17427_s13  ;;  %5549 = vrot.lane.b32.xlu1 %v13039_v43, %s17510_s30 }
 0x34a   : > { %17512 = vst [vmem:[#allocation55_spill] sm:$0xff] %v13057_v50  ;;  %v13063_v48 = vpop.f32.mrf.mxu1 }
 0x34b   : > { %17513 = vst [vmem:[#allocation56_spill] sm:$0xff] %v13063_v48  ;;  %v13065_v12 = vpop.f32.mrf.mxu0 }
 0x34c   : > { %17514 = vst [vmem:[#allocation57_spill] sm:$0xff] %v13065_v12  ;;  %v13067_v2 = vpop.f32.mrf.mxu1 }
 0x34d   : > { %17515 = vst [vmem:[#allocation58_spill] sm:$0xff] %v13067_v2  ;;  %v13069_v56 = vpop.f32.mrf.mxu0  ;;  %4805 = vrot.lane.b32.xlu1 %v13039_v43, %s17428_s22 }
 0x34e   : > { %17516 = vst [vmem:[#allocation59_spill] sm:$0xff] %v13069_v56  ;;  %v13073_v5 = vpop.f32.mrf.mxu1 }
 0x34f   : > { %17517 = vst [vmem:[#allocation60_spill] sm:$0xff] %v13073_v5 }
 0x351   : > { %v3876_v63 = vpop.f32.mrf.mxu0  ;;  %v4466_v15 = vpop.f32.mrf.mxu1  ;;  %7505 = vrot.lane.b32.xlu1 %v13039_v43, %s17509_s16 }
 0x352   : > { %v4467_v8 = vadd.f32 %v4466_v15, %v12960_v54 }
 0x353   : > { %v3878_v29 = vpop.f32.mrf.mxu0  ;;  %v4468_v39 = vpop.f32.mrf.mxu1 }
 0x354   : > { %v13078_v34 = vadd.f32 %v4467_v8, %v3876_v63  ;;  %v4469_v12 = vadd.f32 %v4468_v39, %v12964_v60 }
 0x355   : > { %v3882_v2 = vpop.f32.mrf.mxu0  ;;  %v4472_v56 = vpop.f32.mrf.mxu1  ;;  %7133 = vrot.lane.b32.xlu1 %v13039_v43, %s17511_s14 }
 0x356   : > { %17518 = vst [vmem:[#allocation61_spill] sm:$0xff] %v13078_v34  ;;  %v13083_v27 = vadd.f32 %v4469_v12, %v3878_v29  ;;  %v4473_v5 = vadd.f32 %v4472_v56, %v12968_v18 }
 0x357   : > { %v3884_v50 = vpop.f32.mrf.mxu0  ;;  %v4474_v48 = vpop.f32.mrf.mxu1 }
 0x358   : > { %17519 = vst [vmem:[#allocation62_spill] sm:$0xff] %v13083_v27  ;;  %v13086_v17 = vadd.f32 %v4473_v5, %v3882_v2  ;;  %v4475_v15 = vadd.f32 %v4474_v48, %v12972_v53  ;;  %v4135_v2 = vadd.f32 %v4134_v62, %v12906_v22  ;;  %v4137_v62 = vadd.f32 %v13008_v52, %v12912_v28 }
 0x359   : > { %v4045_v54 = vpop.f32.mrf.mxu0  ;;  %v4626_v63 = vpop.f32.mrf.mxu1  ;;  %6761 = vrot.lane.b32.xlu1 %v13039_v43, %s17432_s24  ;;  %v4141_v22 = vadd.f32 %v13016_v59, %v12918_v46 }
 0x35a   : > { %17520 = vst [vmem:[#allocation63_spill] sm:$0xff] %v13086_v17  ;;  %v13091_v8 = vadd.f32 %v4475_v15, %v3884_v50  ;;  %v13094_v39 = vadd.f32 %v4045_v54, %v12908_v61  ;;  %v13097_v29 = vadd.f32 %v4626_v63, %v12974_v35  ;;  %v13116_v61 = vadd.f32 %v4135_v2, %v13000_v44 }
 0x35b   : > { %v13099_v12 = vpop.f32.mrf.mxu1  ;;  %v4047_v44 = vpop.f32.mrf.mxu0  ;;  %v4143_v63 = vadd.f32 %v13020_v38, %v12924_v6 }
 0x35c   : > { %17521 = vst [vmem:[#allocation64_spill] sm:$0xff] %v13091_v8  ;;  %17522 = vst [vmem:[#allocation65_spill] sm:$0xff] %v13097_v29  ;;  %5903 = vrot.lane.b32.xlu0 %v13094_v39, %s17345_s25 }
 0x35d   : > { %6371 = vrot.lane.b32.xlu1 %v13094_v39, %s17426_s12 }
 0x35e   : > { %v4632_v5 = vpop.f32.mrf.mxu1 }
 0x35f   : > { %v13107_v60 = vadd.f32 %v4632_v5, %v12982_v40  ;;  %v13146_v40 = vadd.f32 %v4047_v44, %v12910_v1  ;;  %v13195_v1 = vadd.f32 %v4141_v22, %v13010_v45 }
 0x360   : > { %v13109_v18 = vpop.f32.mrf.mxu1  ;;  %5159 = vrot.lane.b32.xlu0 %v13094_v39, %s17427_s13 }
 0x361   : > { %17523 = vst [vmem:[#allocation66_spill] sm:$0xff] %v13107_v60  ;;  %5531 = vrot.lane.b32.xlu1 %v13094_v39, %s17510_s30 }
 0x362   : > { %v4638_v56 = vpop.f32.mrf.mxu1 }
 0x363   : > { %v13119_v53 = vadd.f32 %v4638_v56, %v12990_v21  ;;  %v13159_v21 = vadd.f32 %v4137_v62, %v13006_v16  ;;  %v4051_v16 = vpop.f32.mrf.mxu0 }
 0x364   : > { %5917 = vrot.lane.b32.xlu0 %v13116_v61, %s17345_s25  ;;  %v13182_v52 = vadd.f32 %v4051_v16, %v12914_v47 }
 0x365   : > { %17524 = vst [vmem:[#allocation67_spill] sm:$0xff] %v13119_v53  ;;  %4787 = vrot.lane.b32.xlu1 %v13094_v39, %s17428_s22  ;;  %v4053_v59 = vpop.f32.mrf.mxu0 }
 0x366   : > { %v13234_v48 = vadd.f32 %v4053_v59, %v12916_v30  ;;  %v13253_v30 = vadd.f32 %v4143_v63, %v13018_v55 }
 0x367   : > { %v4057_v22 = vpop.f32.mrf.mxu0 }
 0x368   : > { %7501 = vrot.lane.b32.xlu0 %v13116_v61, %s17509_s16  ;;  %v4675_v63 = vadd.f32 %v4057_v22, %v12920_v57  ;;  %v4295_v22 = vadd.f32 %v13028_v33, %v12928_v10 }
 0x369   : > { %5545 = vrot.lane.b32.xlu1 %v13116_v61, %s17510_s30 }
 0x36c   : > { %5173 = vrot.lane.b32.xlu0 %v13116_v61, %s17427_s13 }
 0x36d   : > { %7129 = vrot.lane.b32.xlu1 %v13116_v61, %s17511_s14 }
 0x370   : > { %7487 = vrot.lane.b32.xlu0 %v13094_v39, %s17509_s16 }
 0x371   : > { %4801 = vrot.lane.b32.xlu1 %v13116_v61, %s17428_s22 }
 0x374   : > { %6757 = vrot.lane.b32.xlu0 %v13116_v61, %s17432_s24 }
 0x375   : > { %7115 = vrot.lane.b32.xlu1 %v13094_v39, %s17511_s14 }
 0x378   : > { %6743 = vrot.lane.b32.xlu0 %v13094_v39, %s17432_s24 }
 0x379   : > { %6385 = vrot.lane.b32.xlu1 %v13116_v61, %s17426_s12 }
 0x37c   : > { %5537 = vrot.lane.b32.xlu0 %v13146_v40, %s17510_s30 }
 0x37d   : > { %6377 = vrot.lane.b32.xlu1 %v13146_v40, %s17426_s12 }
 0x380   : > { %4793 = vrot.lane.b32.xlu0 %v13146_v40, %s17428_s22 }
 0x381   : > { %5909 = vrot.lane.b32.xlu1 %v13146_v40, %s17345_s25 }
 0x384   : > { %5551 = vrot.lane.b32.xlu0 %v13159_v21, %s17510_s30 }
 0x385   : > { %5165 = vrot.lane.b32.xlu1 %v13146_v40, %s17427_s13 }
 0x388   : > { %7493 = vrot.lane.b32.xlu0 %v13146_v40, %s17509_s16 }
 0x389   : > { %5923 = vrot.lane.b32.xlu1 %v13159_v21, %s17345_s25 }
 0x38c   : > { %4807 = vrot.lane.b32.xlu0 %v13159_v21, %s17428_s22 }
 0x38d   : > { %5179 = vrot.lane.b32.xlu1 %v13159_v21, %s17427_s13 }
 0x390   : > { %6749 = vrot.lane.b32.xlu0 %v13146_v40, %s17432_s24 }
 0x391   : > { %7121 = vrot.lane.b32.xlu1 %v13146_v40, %s17511_s14 }
 0x394   : > { %7507 = vrot.lane.b32.xlu0 %v13159_v21, %s17509_s16 }
 0x395   : > { %7135 = vrot.lane.b32.xlu1 %v13159_v21, %s17511_s14 }
 0x398   : > { %5533 = vrot.lane.b32.xlu0 %v13182_v52, %s17510_s30 }
 0x399   : > { %6763 = vrot.lane.b32.xlu1 %v13159_v21, %s17432_s24 }
 0x39c   : > { %4789 = vrot.lane.b32.xlu0 %v13182_v52, %s17428_s22 }
 0x39d   : > { %6391 = vrot.lane.b32.xlu1 %v13159_v21, %s17426_s12 }
 0x3a0   : > { %5547 = vrot.lane.b32.xlu0 %v13195_v1, %s17510_s30 }
 0x3a1   : > { %5905 = vrot.lane.b32.xlu1 %v13182_v52, %s17345_s25 }
 0x3a4   : > { %7131 = vrot.lane.b32.xlu0 %v13195_v1, %s17511_s14 }
 0x3a5   : > { %5161 = vrot.lane.b32.xlu1 %v13182_v52, %s17427_s13 }
 0x3a7   : > { %v13205_v28 = vpop.permute.xlu1 %5915  ;;  %v13213_v47 = vpop.permute.xlu0 %6383 }
 0x3a8   : > { %4803 = vrot.lane.b32.xlu0 %v13195_v1, %s17428_s22 }
 0x3a9   : > { %5919 = vrot.lane.b32.xlu1 %v13195_v1, %s17345_s25 }
 0x3ab   : > { %v13211_v45 = vpop.permute.xlu1 %7499  ;;  %v13225_v35 = vpop.permute.xlu0 %5543 }
 0x3ac   : > { %17525 = vst [vmem:[#allocation68_spill] sm:$0xff] %v13211_v45  ;;  %7117 = vrot.lane.b32.xlu0 %v13182_v52, %s17511_s14 }
 0x3ad   : > { %7503 = vrot.lane.b32.xlu1 %v13195_v1, %s17509_s16 }
 0x3af   : > { %v13219_v46 = vpop.permute.xlu1 %5171  ;;  %v13238_v54 = vpop.permute.xlu0 %7127 }
 0x3b0   : > { %6387 = vrot.lane.b32.xlu0 %v13195_v1, %s17426_s12  ;;  %17527 = vst [vmem:[#allocation70_spill] sm:$0xff] %v13238_v54 }
 0x3b1   : > { %5175 = vrot.lane.b32.xlu1 %v13195_v1, %s17427_s13 }
 0x3b3   : > { %v13227_v50 = vpop.permute.xlu1 %6755  ;;  %v13255_v5 = vpop.permute.xlu0 %4799 }
 0x3b4   : > { %17526 = vst [vmem:[#allocation69_spill] sm:$0xff] %v13227_v50  ;;  %6373 = vrot.lane.b32.xlu0 %v13182_v52, %s17426_s12 }
 0x3b5   : > { %7489 = vrot.lane.b32.xlu1 %v13182_v52, %s17509_s16 }
 0x3b7   : > { %v13236_v15 = vpop.permute.xlu1 %6389  ;;  %v13265_v38 = vpop.permute.xlu0 %5921 }
 0x3b8   : > { %5911 = vrot.lane.b32.xlu0 %v13234_v48, %s17345_s25  ;;  %17531 = vst [vmem:[#allocation74_spill] sm:$0xff] %v13265_v38 }
 0x3b9   : > { %6759 = vrot.lane.b32.xlu1 %v13195_v1, %s17432_s24 }
 0x3bb   : > { %v13246_v2 = vpop.permute.xlu1 %5549  ;;  %v13277_v44 = vpop.permute.xlu0 %5177 }
 0x3bc   : > { %17528 = vst [vmem:[#allocation71_spill] sm:$0xff] %v13246_v2  ;;  %5167 = vrot.lane.b32.xlu0 %v13234_v48, %s17427_s13  ;;  %17533 = vst [vmem:[#allocation76_spill] sm:$0xff] %v13277_v44 }
 0x3bd   : > { %6745 = vrot.lane.b32.xlu1 %v13182_v52, %s17432_s24 }
 0x3bf   : > { %v13257_v56 = vpop.permute.xlu1 %4805 }
 0x3c0   : > { %17529 = vst [vmem:[#allocation72_spill] sm:$0xff] %v13257_v56  ;;  %5925 = vrot.lane.b32.xlu0 %v13253_v30, %s17345_s25 }
 0x3c1   : > { %5539 = vrot.lane.b32.xlu1 %v13234_v48, %s17510_s30 }
 0x3c3   : > { %v13263_v6 = vpop.permute.xlu1 %7505 }
 0x3c4   : > { %17530 = vst [vmem:[#allocation73_spill] sm:$0xff] %v13263_v6  ;;  %5181 = vrot.lane.b32.xlu0 %v13253_v30, %s17427_s13 }
 0x3c5   : > { %4795 = vrot.lane.b32.xlu1 %v13234_v48, %s17428_s22 }
 0x3c7   : > { %v13271_v55 = vpop.permute.xlu1 %7133 }
 0x3c8   : > { %17532 = vst [vmem:[#allocation75_spill] sm:$0xff] %v13271_v55  ;;  %7123 = vrot.lane.b32.xlu0 %v13234_v48, %s17511_s14 }
 0x3c9   : > { %5553 = vrot.lane.b32.xlu1 %v13253_v30, %s17510_s30 }
 0x3cb   : > { %v13279_v62 = vpop.permute.xlu1 %6761 }
 0x3cc   : > { %17534 = vst [vmem:[#allocation77_spill] sm:$0xff] %v13279_v62  ;;  %6379 = vrot.lane.b32.xlu0 %v13234_v48, %s17426_s12 }
 0x3cd   : > { %7495 = vrot.lane.b32.xlu1 %v13234_v48, %s17509_s16 }
 0x3ce   : > { %v13285_v16 = vpop.permute.xlu0 %5903 }
 0x3cf   : > { %17535 = vst [vmem:[#allocation78_spill] sm:$0xff] %v13285_v16  ;;  %v13287_v59 = vpop.permute.xlu1 %6371 }
 0x3d0   : > { %17536 = vst [vmem:[#allocation79_spill] sm:$0xff] %v13287_v59  ;;  %7137 = vrot.lane.b32.xlu0 %v13253_v30, %s17511_s14 }
 0x3d1   : > { %4809 = vrot.lane.b32.xlu1 %v13253_v30, %s17428_s22 }
 0x3d2   : > { %v13294_v53 = vpop.permute.xlu0 %5159 }
 0x3d3   : > { %17537 = vst [vmem:[#allocation80_spill] sm:$0xff] %v13294_v53  ;;  %v13296_v60 = vpop.permute.xlu1 %5531 }
 0x3d4   : > { %17538 = vst [vmem:[#allocation81_spill] sm:$0xff] %v13296_v60  ;;  %5907 = vrot.lane.b32.xlu0 %v4675_v63, %s17345_s25  ;;  %v13325_v60 = vadd.f32 %v4295_v22, %v13022_v11 }
 0x3d5   : > { %6751 = vrot.lane.b32.xlu1 %v13234_v48, %s17432_s24 }
 0x3d6   : > { %v13301_v29 = vpop.permute.xlu0 %5917  ;;  %17542 = vst [vmem:[#allocation85_spill] sm:$0xff] %v13325_v60 }
 0x3d7   : > { %v13303_v16 = vpop.permute.xlu1 %4787 }
 0x3d8   : > { %17539 = vst [vmem:[#allocation82_spill] sm:$0xff] %v13303_v16  ;;  %5163 = vrot.lane.b32.xlu0 %v4675_v63, %s17427_s13 }
 0x3d9   : > { %7509 = vrot.lane.b32.xlu1 %v13253_v30, %s17509_s16 }
 0x3da   : > { %v13308_v27 = vpop.permute.xlu0 %7501 }
 0x3db   : > { %17540 = vst [vmem:[#allocation83_spill] sm:$0xff] %v13308_v27  ;;  %v13310_v57 = vpop.permute.xlu1 %5545 }
 0x3dc   : > { %7491 = vrot.lane.b32.xlu0 %v4675_v63, %s17509_s16 }
 0x3dd   : > { %6765 = vrot.lane.b32.xlu1 %v13253_v30, %s17432_s24 }
 0x3de   : > { %v13317_v53 = vpop.permute.xlu0 %5173 }
 0x3df   : > { %v13319_v16 = vpop.permute.xlu1 %7129 }
 0x3e0   : > { %17541 = vst [vmem:[#allocation84_spill] sm:$0xff] %v13319_v16  ;;  %6747 = vrot.lane.b32.xlu0 %v4675_v63, %s17432_s24 }
 0x3e1   : > { %6393 = vrot.lane.b32.xlu1 %v13253_v30, %s17426_s12 }
 0x3e2   : > { %v13327_v8 = vpop.permute.xlu0 %7487 }
 0x3e3   : > { %17543 = vst [vmem:[#allocation86_spill] sm:$0xff] %v13327_v8  ;;  %v13329_v50 = vpop.permute.xlu1 %4801  ;;  %v13348_v8 = vld [vmem:[%s17096_s1 + $0x50] sm:$0xff] }
 0x3e4   : > { %6407 = vrot.lane.b32.xlu0 %v13325_v60, %s17426_s12  ;;  %v13359_v62 = vrot.slane %v13348_v8, %v11650_v37 }
 0x3e5   : > { %5535 = vrot.lane.b32.xlu1 %v4675_v63, %s17510_s30 }
 0x3e6   : > { %v13334_v33 = vpop.permute.xlu0 %6757  ;;  %17549 = vst [vmem:[#allocation92_spill] sm:$0xff] %v13359_v62 }
 0x3e7   : > { %17544 = vst [vmem:[#allocation87_spill] sm:$0xff] %v13334_v33  ;;  %v13336_v10 = vpop.permute.xlu1 %7115 }
 0x3e8   : > { %17545 = vst [vmem:[#allocation88_spill] sm:$0xff] %v13336_v10  ;;  %7523 = vrot.lane.b32.xlu0 %v13325_v60, %s17509_s16  ;;  %v13355_v10 = vrot.slane %v13348_v8, %v11682_v7 }
 0x3e9   : > { %4791 = vrot.lane.b32.xlu1 %v4675_v63, %s17428_s22 }
 0x3ea   : > { %v13341_v11 = vpop.permute.xlu0 %6743  ;;  %17548 = vst [vmem:[#allocation91_spill] sm:$0xff] %v13355_v10 }
 0x3eb   : > { %17546 = vst [vmem:[#allocation89_spill] sm:$0xff] %v13341_v11  ;;  %v13343_v22 = vpop.permute.xlu1 %6385 }
 0x3ec   : > { %17547 = vst [vmem:[#allocation90_spill] sm:$0xff] %v13343_v22  ;;  %7151 = vrot.lane.b32.xlu0 %v13325_v60, %s17511_s14  ;;  %v4059_v22 = vpop.f32.mrf.mxu0 }
 0x3ed   : > { %7119 = vrot.lane.b32.xlu1 %v4675_v63, %s17511_s14  ;;  %v4676_v16 = vadd.f32 %v4059_v22, %v12922_v58  ;;  %v4301_v22 = vadd.f32 %v13043_v19, %v12936_v42 }
 0x3ee   : > { %v13361_v11 = vpop.permute.xlu0 %5537 }
 0x3ef   : > { %17550 = vst [vmem:[#allocation93_spill] sm:$0xff] %v13361_v11  ;;  %v6378_v33 = vpop.permute.xlu1 %6377 }
 0x3f0   : > { %6779 = vrot.lane.b32.xlu0 %v13325_v60, %s17432_s24  ;;  %v6506_v34 = vsel %vm1193_vm3, %v6378_v33, %v13213_v47  ;;  %v6509_v7 = vsel %vm1193_vm3, %v13287_v59, %v6378_v33 }
 0x3f1   : > { %v6599_v54 = vmul.f32 %v13355_v10, %v6509_v7  ;;  %6375 = vrot.lane.b32.xlu1 %v4675_v63, %s17426_s12  ;;  %v6600_v55 = vmul.f32 %v13359_v62, %v6506_v34  ;;  %v13443_v10 = vadd.f32 %v4301_v22, %v13041_v4 }
 0x3f2   : > { %v13375_v17 = vpop.permute.xlu0 %4793 }
 0x3f3   : > { %17551 = vst [vmem:[#allocation94_spill] sm:$0xff] %v13375_v17  ;;  %8266 = vmatprep.subr.mxu0 %v6600_v55  ;;  %v13377_v45 = vpop.permute.xlu1 %5909  ;;  %17567 = vst [vmem:[#allocation110_spill] sm:$0xff] %v13443_v10 }
 0x3f4   : > { %17552 = vst [vmem:[#allocation95_spill] sm:$0xff] %v13377_v45  ;;  %5541 = vrot.lane.b32.xlu0 %v4676_v16, %s17510_s30  ;;  %8267 = vmatpush1.msra.mxu0 %v6599_v54 }
 0x3f5   : > { %5939 = vrot.lane.b32.xlu1 %v13325_v60, %s17345_s25  ;;  %8268 = vmatprep.subr.mxu0 %v4676_v16 }
 0x3f6   : > { %v13382_v33 = vpop.permute.xlu0 %5551  ;;  %8269 = vmatpush1.msra.mxu0 %v4675_v63 }
 0x3f7   : > { %17553 = vst [vmem:[#allocation96_spill] sm:$0xff] %v13382_v33  ;;  %v13384_v7 = vpop.permute.xlu1 %5165  ;;  %8270 = vmatprep.subr.mxu0 %v13234_v48  ;;  %v4297_v48 = vadd.f32 %v13033_v24, %v12932_v36 }
 0x3f8   : > { %17554 = vst [vmem:[#allocation97_spill] sm:$0xff] %v13384_v7  ;;  %4797 = vrot.lane.b32.xlu0 %v4676_v16, %s17428_s22  ;;  %8271 = vmatpush1.msra.mxu0 %v13182_v52 }
 0x3f9   : > { %5567 = vrot.lane.b32.xlu1 %v13325_v60, %s17510_s30  ;;  %8272 = vmatprep.subr.mxu0 %v13146_v40 }
 0x3fa   : > { %v13392_v58 = vpop.permute.xlu0 %7493  ;;  %8273 = vmatpush1.msra.mxu0 %v13094_v39  ;;  %v13410_v39 = vadd.f32 %v4297_v48, %v13031_v20 }
 0x3fb   : > { %17555 = vst [vmem:[#allocation98_spill] sm:$0xff] %v13392_v58  ;;  %v13395_v34 = vpop.permute.xlu1 %5923 }
 0x3fc   : > { %17556 = vst [vmem:[#allocation99_spill] sm:$0xff] %v13395_v34  ;;  %7497 = vrot.lane.b32.xlu0 %v4676_v16, %s17509_s16 }
 0x3fd   : > { %5195 = vrot.lane.b32.xlu1 %v13325_v60, %s17427_s13 }
 0x3fe   : > { %v13402_v52 = vpop.permute.xlu0 %4807 }
 0x3ff   : > { %17557 = vst [vmem:[#allocation100_spill] sm:$0xff] %v13402_v52  ;;  %v13404_v54 = vpop.permute.xlu1 %5179 }
 0x400   : > { %17558 = vst [vmem:[#allocation101_spill] sm:$0xff] %v13404_v54  ;;  %6753 = vrot.lane.b32.xlu0 %v4676_v16, %s17432_s24 }
 0x401   : > { %4823 = vrot.lane.b32.xlu1 %v13325_v60, %s17428_s22 }
 0x402   : > { %v13412_v40 = vpop.permute.xlu0 %6749 }
 0x403   : > { %17559 = vst [vmem:[#allocation102_spill] sm:$0xff] %v13412_v40  ;;  %v13414_v55 = vpop.permute.xlu1 %7121 }
 0x404   : > { %17560 = vst [vmem:[#allocation103_spill] sm:$0xff] %v13414_v55  ;;  %5945 = vrot.lane.b32.xlu0 %v13410_v39, %s17345_s25 }
 0x405   : > { %5913 = vrot.lane.b32.xlu1 %v4676_v16, %s17345_s25 }
 0x406   : > { %v13419_v24 = vpop.permute.xlu0 %7507 }
 0x407   : > { %17561 = vst [vmem:[#allocation104_spill] sm:$0xff] %v13419_v24  ;;  %v13421_v36 = vpop.permute.xlu1 %7135 }
 0x408   : > { %17562 = vst [vmem:[#allocation105_spill] sm:$0xff] %v13421_v36  ;;  %5573 = vrot.lane.b32.xlu0 %v13410_v39, %s17510_s30 }
 0x409   : > { %5169 = vrot.lane.b32.xlu1 %v4676_v16, %s17427_s13 }
 0x40a   : > { %v13426_v20 = vpop.permute.xlu0 %5533 }
 0x40b   : > { %17563 = vst [vmem:[#allocation106_spill] sm:$0xff] %v13426_v20  ;;  %v13428_v63 = vpop.permute.xlu1 %6763 }
 0x40c   : > { %17564 = vst [vmem:[#allocation107_spill] sm:$0xff] %v13428_v63  ;;  %5201 = vrot.lane.b32.xlu0 %v13410_v39, %s17427_s13 }
 0x40d   : > { %7125 = vrot.lane.b32.xlu1 %v4676_v16, %s17511_s14 }
 0x40e   : > { %v13435_v48 = vpop.permute.xlu0 %4789 }
 0x40f   : > { %17565 = vst [vmem:[#allocation108_spill] sm:$0xff] %v13435_v48  ;;  %v13437_v59 = vpop.permute.xlu1 %6391 }
 0x410   : > { %17566 = vst [vmem:[#allocation109_spill] sm:$0xff] %v13437_v59  ;;  %4829 = vrot.lane.b32.xlu0 %v13410_v39, %s17428_s22 }
 0x411   : > { %6381 = vrot.lane.b32.xlu1 %v4676_v16, %s17426_s12  ;;  %v4211_v16 = vpop.f32.mrf.mxu0 }
 0x412   : > { %v13445_v62 = vpop.permute.xlu0 %5547  ;;  %v4212_v55 = vadd.f32 %v4211_v16, %v12841_v26 }
 0x413   : > { %v13447_v40 = vpop.permute.xlu1 %5905 }
 0x414   : > { %17568 = vst [vmem:[#allocation111_spill] sm:$0xff] %v13447_v40  ;;  %7525 = vrot.lane.b32.xlu0 %v13443_v10, %s17509_s16 }
 0x415   : > { %6413 = vrot.lane.b32.xlu1 %v13410_v39, %s17426_s12 }
 0x416   : > { %v13453_v19 = vpop.permute.xlu0 %7131 }
 0x417   : > { %17569 = vst [vmem:[#allocation112_spill] sm:$0xff] %v13453_v19  ;;  %v13455_v42 = vpop.permute.xlu1 %5161 }
 0x418   : > { %17570 = vst [vmem:[#allocation113_spill] sm:$0xff] %v13455_v42  ;;  %7153 = vrot.lane.b32.xlu0 %v13443_v10, %s17511_s14  ;;  %v13479_v42 = vadd.f32 %v4212_v55, %v12926_v0 }
 0x419   : > { %7529 = vrot.lane.b32.xlu1 %v13410_v39, %s17509_s16 }
 0x41a   : > { %v13461_v4 = vpop.permute.xlu0 %4803  ;;  %17573 = vst [vmem:[#allocation116_spill] sm:$0xff] %v13479_v42 }
 0x41b   : > { %v13463_v22 = vpop.permute.xlu1 %5919 }
 0x41c   : > { %6781 = vrot.lane.b32.xlu0 %v13443_v10, %s17432_s24 }
 0x41d   : > { %7157 = vrot.lane.b32.xlu1 %v13410_v39, %s17511_s14 }
 0x41e   : > { %v13470_v58 = vpop.permute.xlu0 %7117 }
 0x41f   : > { %17571 = vst [vmem:[#allocation114_spill] sm:$0xff] %v13470_v58  ;;  %v13472_v48 = vpop.permute.xlu1 %7503 }
 0x420   : > { %17572 = vst [vmem:[#allocation115_spill] sm:$0xff] %v13472_v48  ;;  %6409 = vrot.lane.b32.xlu0 %v13443_v10, %s17426_s12 }
 0x421   : > { %5941 = vrot.lane.b32.xlu1 %v13443_v10, %s17345_s25 }
 0x422   : > { %v13481_v20 = vpop.permute.xlu0 %6387 }
 0x423   : > { %17574 = vst [vmem:[#allocation117_spill] sm:$0xff] %v13481_v20  ;;  %v13483_v40 = vpop.permute.xlu1 %5175 }
 0x424   : > { %6395 = vrot.lane.b32.xlu0 %v13479_v42, %s17426_s12 }
 0x425   : > { %5569 = vrot.lane.b32.xlu1 %v13443_v10, %s17510_s30 }
 0x426   : > { %v13489_v26 = vpop.permute.xlu0 %6373 }
 0x427   : > { %17575 = vst [vmem:[#allocation118_spill] sm:$0xff] %v13489_v26  ;;  %v13491_v16 = vpop.permute.xlu1 %7489  ;;  %v4303_v26 = vadd.f32 %v13051_v51, %v12940_v13 }
 0x428   : > { %17576 = vst [vmem:[#allocation119_spill] sm:$0xff] %v13491_v16  ;;  %7511 = vrot.lane.b32.xlu0 %v13479_v42, %s17509_s16 }
 0x429   : > { %5197 = vrot.lane.b32.xlu1 %v13443_v10, %s17427_s13  ;;  %v13516_v60 = vadd.f32 %v4303_v26, %v13045_v9  ;;  %v4213_v26 = vpop.f32.mrf.mxu0 }
 0x42a   : > { %v13497_v0 = vpop.permute.xlu0 %5911 }
 0x42b   : > { %17577 = vst [vmem:[#allocation120_spill] sm:$0xff] %v13497_v0  ;;  %v13499_v55 = vpop.permute.xlu1 %6759  ;;  %17581 = vst [vmem:[#allocation124_spill] sm:$0xff] %v13516_v60 }
 0x42c   : > { %17578 = vst [vmem:[#allocation121_spill] sm:$0xff] %v13499_v55  ;;  %7139 = vrot.lane.b32.xlu0 %v13479_v42, %s17511_s14 }
 0x42d   : > { %4825 = vrot.lane.b32.xlu1 %v13443_v10, %s17428_s22  ;;  %v4214_v10 = vadd.f32 %v4213_v26, %v12847_v23 }
 0x42e   : > { %v13507_v58 = vpop.permute.xlu0 %5167 }
 0x42f   : > { %17579 = vst [vmem:[#allocation122_spill] sm:$0xff] %v13507_v58  ;;  %v13509_v16 = vpop.permute.xlu1 %6745 }
 0x430   : > { %17580 = vst [vmem:[#allocation123_spill] sm:$0xff] %v13509_v16  ;;  %6767 = vrot.lane.b32.xlu0 %v13479_v42, %s17432_s24 }
 0x431   : > { %5927 = vrot.lane.b32.xlu1 %v13479_v42, %s17345_s25 }
 0x432   : > { %v13518_v59 = vpop.permute.xlu0 %5925 }
 0x433   : > { %17582 = vst [vmem:[#allocation125_spill] sm:$0xff] %v13518_v59  ;;  %v13520_v20 = vpop.permute.xlu1 %5539 }
 0x434   : > { %17583 = vst [vmem:[#allocation126_spill] sm:$0xff] %v13520_v20  ;;  %5947 = vrot.lane.b32.xlu0 %v13516_v60, %s17345_s25 }
 0x435   : > { %5555 = vrot.lane.b32.xlu1 %v13479_v42, %s17510_s30 }
 0x436   : > { %v13526_v13 = vpop.permute.xlu0 %5181 }
 0x437   : > { %17584 = vst [vmem:[#allocation127_spill] sm:$0xff] %v13526_v13  ;;  %v13528_v51 = vpop.permute.xlu1 %4795 }
 0x438   : > { %17585 = vst [vmem:[#allocation128_spill] sm:$0xff] %v13528_v51  ;;  %5575 = vrot.lane.b32.xlu0 %v13516_v60, %s17510_s30 }
 0x439   : > { %5183 = vrot.lane.b32.xlu1 %v13479_v42, %s17427_s13 }
 0x43a   : > { %v13534_v9 = vpop.permute.xlu0 %7123 }
 0x43b   : > { %17586 = vst [vmem:[#allocation129_spill] sm:$0xff] %v13534_v9  ;;  %v13536_v16 = vpop.permute.xlu1 %5553  ;;  %v13552_v9 = vadd.f32 %v4214_v10, %v12930_v25  ;;  %v4307_v10 = vadd.f32 %v13055_v49, %v12944_v3 }
 0x43c   : > { %17587 = vst [vmem:[#allocation130_spill] sm:$0xff] %v13536_v16  ;;  %5203 = vrot.lane.b32.xlu0 %v13516_v60, %s17427_s13 }
 0x43d   : > { %4811 = vrot.lane.b32.xlu1 %v13479_v42, %s17428_s22  ;;  %17590 = vst [vmem:[#allocation133_spill] sm:$0xff] %v13552_v9 }
 0x43e   : > { %v13543_v63 = vpop.permute.xlu0 %6379 }
 0x43f   : > { %17588 = vst [vmem:[#allocation131_spill] sm:$0xff] %v13543_v63  ;;  %v13545_v55 = vpop.permute.xlu1 %7495 }
 0x440   : > { %17589 = vst [vmem:[#allocation132_spill] sm:$0xff] %v13545_v55  ;;  %4831 = vrot.lane.b32.xlu0 %v13516_v60, %s17428_s22 }
 0x441   : > { %7531 = vrot.lane.b32.xlu1 %v13516_v60, %s17509_s16 }
 0x442   : > { %v13554_v36 = vpop.permute.xlu0 %7137 }
 0x443   : > { %17591 = vst [vmem:[#allocation134_spill] sm:$0xff] %v13554_v36  ;;  %v13556_v19 = vpop.permute.xlu1 %4809 }
 0x444   : > { %17592 = vst [vmem:[#allocation135_spill] sm:$0xff] %v13556_v19  ;;  %5933 = vrot.lane.b32.xlu0 %v13552_v9, %s17345_s25 }
 0x445   : > { %7159 = vrot.lane.b32.xlu1 %v13516_v60, %s17511_s14 }
 0x446   : > { %v13562_v23 = vpop.permute.xlu0 %5907 }
 0x447   : > { %17593 = vst [vmem:[#allocation136_spill] sm:$0xff] %v13562_v23  ;;  %v13564_v26 = vpop.permute.xlu1 %6751 }
 0x448   : > { %17594 = vst [vmem:[#allocation137_spill] sm:$0xff] %v13564_v26  ;;  %5561 = vrot.lane.b32.xlu0 %v13552_v9, %s17510_s30  ;;  %v13583_v26 = vadd.f32 %v4307_v10, %v13053_v41 }
 0x449   : > { %6787 = vrot.lane.b32.xlu1 %v13516_v60, %s17432_s24 }
 0x44a   : > { %v13570_v25 = vpop.permute.xlu0 %5163  ;;  %17598 = vst [vmem:[#allocation141_spill] sm:$0xff] %v13583_v26 }
 0x44b   : > { %17595 = vst [vmem:[#allocation138_spill] sm:$0xff] %v13570_v25  ;;  %v13574_v42 = vpop.permute.xlu1 %7509 }
 0x44c   : > { %17596 = vst [vmem:[#allocation139_spill] sm:$0xff] %v13574_v42  ;;  %5189 = vrot.lane.b32.xlu0 %v13552_v9, %s17427_s13 }
 0x44d   : > { %6401 = vrot.lane.b32.xlu1 %v13552_v9, %s17426_s12 }
 0x44e   : > { %v13580_v63 = vpop.permute.xlu0 %7491 }
 0x44f   : > { %17597 = vst [vmem:[#allocation140_spill] sm:$0xff] %v13580_v63  ;;  %v13585_v55 = vpop.permute.xlu1 %6765 }
 0x450   : > { %17599 = vst [vmem:[#allocation142_spill] sm:$0xff] %v13585_v55  ;;  %4817 = vrot.lane.b32.xlu0 %v13552_v9, %s17428_s22 }
 0x451   : > { %5943 = vrot.lane.b32.xlu1 %v13583_v26, %s17345_s25 }
 0x452   : > { %v13591_v49 = vpop.permute.xlu0 %6747 }
 0x453   : > { %17600 = vst [vmem:[#allocation143_spill] sm:$0xff] %v13591_v49  ;;  %v13593_v3 = vpop.permute.xlu1 %6393  ;;  %v4217_v49 = vpop.f32.mrf.mxu0 }
 0x454   : > { %17601 = vst [vmem:[#allocation144_spill] sm:$0xff] %v13593_v3  ;;  %7527 = vrot.lane.b32.xlu0 %v13583_v26, %s17509_s16 }
 0x455   : > { %5571 = vrot.lane.b32.xlu1 %v13583_v26, %s17510_s30 }
 0x456   : > { %v13599_v41 = vpop.permute.xlu0 %6407 }
 0x457   : > { %17602 = vst [vmem:[#allocation145_spill] sm:$0xff] %v13599_v41  ;;  %v13601_v10 = vpop.permute.xlu1 %5535  ;;  %v4218_v41 = vadd.f32 %v4217_v49, %v12852_v32 }
 0x458   : > { %17603 = vst [vmem:[#allocation146_spill] sm:$0xff] %v13601_v10  ;;  %7155 = vrot.lane.b32.xlu0 %v13583_v26, %s17511_s14 }
 0x459   : > { %5199 = vrot.lane.b32.xlu1 %v13583_v26, %s17427_s13 }
 0x45a   : > { %v13607_v63 = vpop.permute.xlu0 %7523 }
 0x45b   : > { %17604 = vst [vmem:[#allocation147_spill] sm:$0xff] %v13607_v63  ;;  %v13609_v25 = vpop.permute.xlu1 %4791 }
 0x45c   : > { %17605 = vst [vmem:[#allocation148_spill] sm:$0xff] %v13609_v25  ;;  %6783 = vrot.lane.b32.xlu0 %v13583_v26, %s17432_s24  ;;  %v13625_v25 = vadd.f32 %v4218_v41, %v12934_v31  ;;  %v17613_v31 = vld [vmem:[#allocation36_spill] sm:$0xff] }
 0x45d   : > { %7517 = vrot.lane.b32.xlu1 %v13552_v9, %s17509_s16  ;;  %v17614_v41 = vld [vmem:[#allocation56_spill] sm:$0xff] }
 0x45e   : > { %v13616_v10 = vpop.permute.xlu0 %7151  ;;  %17608 = vst [vmem:[#allocation151_spill] sm:$0xff] %v13625_v25 }
 0x45f   : > { %17606 = vst [vmem:[#allocation149_spill] sm:$0xff] %v13616_v10  ;;  %v13618_v3 = vpop.permute.xlu1 %7119  ;;  %v17617_v10 = vld [vmem:[#allocation55_spill] sm:$0xff] }
 0x460   : > { %17607 = vst [vmem:[#allocation150_spill] sm:$0xff] %v13618_v3  ;;  %6411 = vrot.lane.b32.xlu0 %v13583_v26, %s17426_s12  ;;  %v4309_v3 = vadd.f32 %v17614_v41, %v17613_v31 }
 0x461   : > { %4827 = vrot.lane.b32.xlu1 %v13583_v26, %s17428_s22 }
 0x462   : > { %v13627_v63 = vpop.permute.xlu0 %6779 }
 0x463   : > { %17609 = vst [vmem:[#allocation152_spill] sm:$0xff] %v13627_v63  ;;  %v13629_v55 = vpop.permute.xlu1 %6375 }
 0x464   : > { %17610 = vst [vmem:[#allocation153_spill] sm:$0xff] %v13629_v55  ;;  %7141 = vrot.lane.b32.xlu0 %v13625_v25, %s17511_s14 }
 0x465   : > { %7145 = vrot.lane.b32.xlu1 %v13552_v9, %s17511_s14 }
 0x466   : > { %v13635_v32 = vpop.permute.xlu0 %5541 }
 0x467   : > { %17611 = vst [vmem:[#allocation154_spill] sm:$0xff] %v13635_v32  ;;  %v13637_v49 = vpop.permute.xlu1 %5939 }
 0x468   : > { %17612 = vst [vmem:[#allocation155_spill] sm:$0xff] %v13637_v49  ;;  %6769 = vrot.lane.b32.xlu0 %v13625_v25, %s17432_s24  ;;  %v13654_v49 = vadd.f32 %v4309_v3, %v17617_v10  ;;  %v13675_v3 = vld [vmem:[%s17096_s1 + $0x30] sm:$0xff] }
 0x469   : > { %6773 = vrot.lane.b32.xlu1 %v13552_v9, %s17432_s24  ;;  %v4219_v9 = vpop.f32.mrf.mxu0 }
 0x46a   : > { %v13645_v55 = vpop.permute.xlu0 %4797  ;;  %17618 = vst [vmem:[#allocation55_spill] sm:$0xff] %v13654_v49 }
 0x46b   : > { %17615 = vst [vmem:[#allocation36_spill] sm:$0xff] %v13645_v55  ;;  %v13647_v63 = vpop.permute.xlu1 %5567 }
 0x46c   : > { %17616 = vst [vmem:[#allocation56_spill] sm:$0xff] %v13647_v63  ;;  %6397 = vrot.lane.b32.xlu0 %v13625_v25, %s17426_s12  ;;  %v17625_v63 = vld [vmem:[#allocation16_spill] sm:$0xff] }
 0x46d   : > { %7513 = vrot.lane.b32.xlu1 %v13625_v25, %s17509_s16 }
 0x46e   : > { %v13656_v26 = vpop.permute.xlu0 %7497 }
 0x46f   : > { %17619 = vst [vmem:[#allocation156_spill] sm:$0xff] %v13656_v26  ;;  %v13658_v36 = vpop.permute.xlu1 %5195 }
 0x470   : > { %17620 = vst [vmem:[#allocation157_spill] sm:$0xff] %v13658_v36  ;;  %5949 = vrot.lane.b32.xlu0 %v13654_v49, %s17345_s25 }
 0x471   : > { %5929 = vrot.lane.b32.xlu1 %v13625_v25, %s17345_s25 }
 0x472   : > { %v13664_v31 = vpop.permute.xlu0 %6753 }
 0x473   : > { %17621 = vst [vmem:[#allocation158_spill] sm:$0xff] %v13664_v31  ;;  %v13666_v41 = vpop.permute.xlu1 %4823  ;;  %v13683_v31 = vrot.slane %v13675_v3, %v11650_v37  ;;  %v17628_v37 = vld [vmem:[#allocation31_spill] sm:$0xff] }
 0x474   : > { %17622 = vst [vmem:[#allocation159_spill] sm:$0xff] %v13666_v41  ;;  %5577 = vrot.lane.b32.xlu0 %v13654_v49, %s17510_s30 }
 0x475   : > { %5557 = vrot.lane.b32.xlu1 %v13625_v25, %s17510_s30  ;;  %17624 = vst [vmem:[#allocation161_spill] sm:$0xff] %v13683_v31 }
 0x476   : > { %v13677_v10 = vpop.permute.xlu0 %5945 }
 0x477   : > { %17623 = vst [vmem:[#allocation160_spill] sm:$0xff] %v13677_v10  ;;  %v13679_v26 = vpop.permute.xlu1 %5913  ;;  %v4220_v10 = vadd.f32 %v4219_v9, %v17625_v63 }
 0x478   : > { %5205 = vrot.lane.b32.xlu0 %v13654_v49, %s17427_s13  ;;  %v6043_v41 = vsel %vm979_vm4, %v13562_v23, %v13679_v26 }
 0x479   : > { %5185 = vrot.lane.b32.xlu1 %v13625_v25, %s17427_s13  ;;  %v6164_v36 = vmul.f32 %v13683_v31, %v6043_v41  ;;  %v13704_v23 = vadd.f32 %v4220_v10, %v17628_v37  ;;  %v17636_v41 = vld [vmem:[#allocation38_spill] sm:$0xff] }
 0x47a   : > { %v13695_v6 = vpop.permute.xlu0 %5573  ;;  %v17637_v10 = vld [vmem:[#allocation58_spill] sm:$0xff] }
 0x47b   : > { %17626 = vst [vmem:[#allocation16_spill] sm:$0xff] %v13695_v6  ;;  %v13697_v27 = vpop.permute.xlu1 %5169  ;;  %8274 = vmatprep.subr.mxu0 %v6164_v36  ;;  %17629 = vst [vmem:[#allocation31_spill] sm:$0xff] %v13704_v23 }
 0x47c   : > { %17627 = vst [vmem:[#allocation162_spill] sm:$0xff] %v13697_v27  ;;  %4833 = vrot.lane.b32.xlu0 %v13654_v49, %s17428_s22 }
 0x47d   : > { %4813 = vrot.lane.b32.xlu1 %v13625_v25, %s17428_s22  ;;  %v4461_v25 = vadd.f32 %v17637_v10, %v17636_v41  ;;  %v17645_v41 = vld [vmem:[#allocation34_spill] sm:$0xff] }
 0x47e   : > { %v13706_v24 = vpop.permute.xlu0 %5201 }
 0x47f   : > { %17630 = vst [vmem:[#allocation163_spill] sm:$0xff] %v13706_v24  ;;  %v13708_v48 = vpop.permute.xlu1 %7125  ;;  %v17642_v24 = vld [vmem:[#allocation19_spill] sm:$0xff] }
 0x480   : > { %17631 = vst [vmem:[#allocation164_spill] sm:$0xff] %v13708_v48  ;;  %5935 = vrot.lane.b32.xlu0 %v13704_v23, %s17345_s25  ;;  %v4223_v48 = vpop.f32.mrf.mxu0 }
 0x481   : > { %7533 = vrot.lane.b32.xlu1 %v13654_v49, %s17509_s16  ;;  %v4224_v6 = vadd.f32 %v4223_v48, %v17642_v24  ;;  %v17649_v24 = vld [vmem:[#allocation10_spill] sm:$0xff] }
 0x482   : > { %v13714_v36 = vpop.permute.xlu0 %4829  ;;  %v13763_v48 = vrot.slane %v13348_v8, %v17649_v24 }
 0x483   : > { %17632 = vst [vmem:[#allocation165_spill] sm:$0xff] %v13714_v36  ;;  %v13716_v63 = vpop.permute.xlu1 %6381  ;;  %v13753_v10 = vadd.f32 %v4224_v6, %v17645_v41  ;;  %v6503_v6 = vsel %vm1193_vm3, %v13213_v47, %v13236_v15  ;;  %v17652_v47 = vld [vmem:[#allocation21_spill] sm:$0xff] }
 0x484   : > { %17633 = vst [vmem:[#allocation166_spill] sm:$0xff] %v13716_v63  ;;  %5563 = vrot.lane.b32.xlu0 %v13704_v23, %s17510_s30 }
 0x485   : > { %7161 = vrot.lane.b32.xlu1 %v13654_v49, %s17511_s14  ;;  %17646 = vst [vmem:[#allocation34_spill] sm:$0xff] %v13753_v10 }
 0x486   : > { %v13722_v37 = vpop.permute.xlu0 %7525 }
 0x487   : > { %17634 = vst [vmem:[#allocation167_spill] sm:$0xff] %v13722_v37  ;;  %v13724_v9 = vpop.permute.xlu1 %6413  ;;  %v17640_v37 = vld [vmem:[#allocation57_spill] sm:$0xff] }
 0x488   : > { %17635 = vst [vmem:[#allocation168_spill] sm:$0xff] %v13724_v9  ;;  %5191 = vrot.lane.b32.xlu0 %v13704_v23, %s17427_s13  ;;  %v13741_v36 = vadd.f32 %v4461_v25, %v17640_v37  ;;  %v17650_v25 = vld [vmem:[#allocation11_spill] sm:$0xff] }
 0x489   : > { %6789 = vrot.lane.b32.xlu1 %v13654_v49, %s17432_s24  ;;  %v13767_v37 = vrot.slane %v13348_v8, %v17650_v25 }
 0x48a   : > { %v13732_v63 = vpop.permute.xlu0 %7153  ;;  %17641 = vst [vmem:[#allocation57_spill] sm:$0xff] %v13741_v36 }
 0x48b   : > { %17638 = vst [vmem:[#allocation38_spill] sm:$0xff] %v13732_v63  ;;  %v13734_v31 = vpop.permute.xlu1 %7529 }
 0x48c   : > { %17639 = vst [vmem:[#allocation58_spill] sm:$0xff] %v13734_v31  ;;  %4819 = vrot.lane.b32.xlu0 %v13704_v23, %s17428_s22 }
 0x48d   : > { %7519 = vrot.lane.b32.xlu1 %v13704_v23, %s17509_s16 }
 0x48e   : > { %v13744_v9 = vpop.permute.xlu0 %6781 }
 0x48f   : > { %17643 = vst [vmem:[#allocation19_spill] sm:$0xff] %v13744_v9  ;;  %v13746_v42 = vpop.permute.xlu1 %7157 }
 0x490   : > { %17644 = vst [vmem:[#allocation169_spill] sm:$0xff] %v13746_v42  ;;  %6431 = vrot.lane.b32.xlu0 %v13741_v36, %s17426_s12 }
 0x491   : > { %7147 = vrot.lane.b32.xlu1 %v13704_v23, %s17511_s14 }
 0x492   : > { %v13755_v63 = vpop.permute.xlu0 %6409 }
 0x493   : > { %17647 = vst [vmem:[#allocation170_spill] sm:$0xff] %v13755_v63  ;;  %v13757_v31 = vpop.permute.xlu1 %5941  ;;  %v4225_v63 = vpop.f32.mrf.mxu0 }
 0x494   : > { %17648 = vst [vmem:[#allocation171_spill] sm:$0xff] %v13757_v31  ;;  %7515 = vrot.lane.b32.xlu0 %v13753_v10, %s17509_s16  ;;  %v6601_v31 = vmul.f32 %v13767_v37, %v6503_v6  ;;  %v4226_v36 = vadd.f32 %v4225_v63, %v17652_v47  ;;  %v17654_v63 = vld [vmem:[#allocation35_spill] sm:$0xff]  ;;  %v6066_v6 = vrot.slane %v13675_v3, %v17649_v24 }
 0x495   : > { %6775 = vrot.lane.b32.xlu1 %v13704_v23, %s17432_s24 }
 0x496   : > { %v13775_v41 = vpop.permute.xlu0 %6395 }
 0x497   : > { %17651 = vst [vmem:[#allocation10_spill] sm:$0xff] %v13775_v41  ;;  %v6500_v9 = vsel %vm1193_vm3, %v13236_v15, %v13775_v41  ;;  %v13781_v42 = vpop.permute.xlu1 %5569  ;;  %v6037_v15 = vsel %vm979_vm4, %v13463_v22, %v13518_v59 }
 0x498   : > { %6771 = vrot.lane.b32.xlu0 %v13753_v10, %s17432_s24  ;;  %v6602_v8 = vmul.f32 %v13763_v48, %v6500_v9  ;;  %v13805_v9 = vadd.f32 %v4226_v36, %v17654_v63  ;;  %v6036_v36 = vsel %vm979_vm4, %v13301_v29, %v13395_v34  ;;  %v17658_v63 = vld [vmem:[#allocation54_spill] sm:$0xff]  ;;  %v5668_v34 = vsel %vm797_vm5, %v13635_v32, %v13445_v62  ;;  %v17726_v32 = vld [vmem:[#allocation29_spill] sm:$0xff] }
 0x499   : > { %6403 = vrot.lane.b32.xlu1 %v13704_v23, %s17426_s12 }
 0x49a   : > { %8343 = vmatprep.subr.mxu1 %v6602_v8  ;;  %v13790_v60 = vpop.permute.xlu0 %7511  ;;  %17655 = vst [vmem:[#allocation35_spill] sm:$0xff] %v13805_v9 }
 0x49b   : > { %17653 = vst [vmem:[#allocation21_spill] sm:$0xff] %v13790_v60  ;;  %8344 = vmatpush1.msra.mxu1 %v6601_v31  ;;  %v13792_v49 = vpop.permute.xlu1 %5197  ;;  %v6040_v31 = vsel %vm979_vm4, %v13679_v26, %v13463_v22  ;;  %v6166_v22 = vmul.f32 %v6066_v6, %v6037_v15  ;;  %v6035_v26 = vsel %vm979_vm4, %v13205_v28, %v13265_v38 }
 0x49c   : > { %6399 = vrot.lane.b32.xlu0 %v13753_v10, %s17426_s12  ;;  %8345 = vmatprep.subr.mxu1 %v13253_v30  ;;  %v6150_v15 = vmul.f32 %v6066_v6, %v6036_v36 }
 0x49d   : > { %8346 = vmatpush1.msra.mxu1 %v13195_v1  ;;  %7143 = vrot.lane.b32.xlu1 %v13753_v10, %s17511_s14  ;;  %v6062_v1 = vrot.slane %v13675_v3, %v17650_v25 }
 0x49e   : > { %8347 = vmatprep.subr.mxu1 %v13159_v21  ;;  %v13812_v30 = vpop.permute.xlu0 %7139  ;;  %v6039_v21 = vsel %vm979_vm4, %v13497_v0, %v13301_v29 }
 0x49f   : > { %17656 = vst [vmem:[#allocation172_spill] sm:$0xff] %v13812_v30  ;;  %8348 = vmatpush1.msra.mxu1 %v13116_v61  ;;  %v13823_v8 = vpop.permute.xlu1 %4825  ;;  %v13839_v61 = vld [vmem:[%s17096_s1 + $0x20] sm:$0xff]  ;;  %v6165_v47 = vmul.f32 %v6062_v1, %v6040_v31  ;;  %v6149_v38 = vmul.f32 %v6062_v1, %v6039_v21  ;;  %v5665_v31 = vsel %vm797_vm5, %v13445_v62, %v13536_v16  ;;  %v13875_v62 = vld [vmem:[%s17096_s1 + $0x10] sm:$0xff]  ;;  %v13892_v16 = vld [vmem:[%s17100_s5 + $0x8] sm:$0xff] }
 0x4a0   : > { %17657 = vst [vmem:[#allocation173_spill] sm:$0xff] %v13823_v8  ;;  %5937 = vrot.lane.b32.xlu0 %v13805_v9, %s17345_s25  ;;  %8349 = vmatprep.subr.mxu1 %v13039_v43  ;;  %v6038_v43 = vsel %vm979_vm4, %v13377_v45, %v13205_v28  ;;  %v6134_v28 = vmul.f32 %v6066_v6, %v6035_v26  ;;  %v17756_v8 = vld [vmem:[#allocation61_spill] sm:$0xff] }
 0x4a1   : > { %8350 = vmatpush1.msra.mxu1 %v17658_v63  ;;  %5931 = vrot.lane.b32.xlu1 %v13753_v10, %s17345_s25  ;;  %v5694_v36 = vrot.slane %v13839_v61, %v17649_v24  ;;  %v5690_v21 = vrot.slane %v13839_v61, %v17650_v25  ;;  %v5667_v6 = vsel %vm797_vm5, %v13520_v20, %v13310_v57 }
 0x4a2   : > { %8351 = vmatprep.subr.mxu1 %v6166_v22  ;;  %v13848_v29 = vpop.permute.xlu0 %6767  ;;  %v5664_v22 = vsel %vm797_vm5, %v13310_v57, %v13382_v33  ;;  %v4377_v33 = vpop.f32.mrf.mxu0  ;;  %v5666_v57 = vsel %vm797_vm5, %v13361_v11, %v13225_v35  ;;  %10860 = vmatprep.mubr.msk.f32.mxu1 %vm8259_vm10, %v13892_v16 }
 0x4a3   : > { %17659 = vst [vmem:[#allocation54_spill] sm:$0xff] %v13848_v29  ;;  %8352 = vmatpush1.msra.mxu1 %v6165_v47  ;;  %v13854_v63 = vpop.permute.xlu1 %5927  ;;  %v6133_v47 = vmul.f32 %v6062_v1, %v6038_v43  ;;  %v5793_v1 = vmul.f32 %v5690_v21, %v5668_v34  ;;  %v5293_v34 = vsel %vm615_vm6, %v13483_v40, %v13526_v13 }
 0x4a4   : > { %17660 = vst [vmem:[#allocation174_spill] sm:$0xff] %v13854_v63  ;;  %5565 = vrot.lane.b32.xlu0 %v13805_v9, %s17510_s30  ;;  %8353 = vmatprep.subr.mxu1 %v6150_v15  ;;  %v5794_v15 = vmul.f32 %v5694_v36, %v5665_v31  ;;  %v5778_v31 = vmul.f32 %v5694_v36, %v5664_v22 }
 0x4a5   : > { %8354 = vmatpush1.msra.mxu1 %v6149_v38  ;;  %5559 = vrot.lane.b32.xlu1 %v13753_v10, %s17510_s30  ;;  %v5663_v38 = vsel %vm797_vm5, %v13225_v35, %v13246_v2  ;;  %v17663_v2 = vld [vmem:[#allocation24_spill] sm:$0xff]  ;;  %v5296_v22 = vsel %vm615_vm6, %v13697_v27, %v13483_v40  ;;  %v5295_v40 = vsel %vm615_vm6, %v13507_v58, %v13317_v53 }
 0x4a6   : > { %8355 = vmatprep.subr.mxu1 %v6134_v28  ;;  %v13881_v26 = vpop.permute.xlu0 %5947  ;;  %v5777_v28 = vmul.f32 %v5690_v21, %v5667_v6  ;;  %v4378_v35 = vadd.f32 %v4377_v33, %v17663_v2  ;;  %v5761_v6 = vmul.f32 %v5690_v21, %v5666_v57  ;;  %v5292_v2 = vsel %vm615_vm6, %v13317_v53, %v13404_v54  ;;  %v17666_v53 = vld [vmem:[#allocation37_spill] sm:$0xff]  ;;  %v17717_v58 = vld [vmem:[#allocation40_spill] sm:$0xff] }
 0x4a7   : > { %17661 = vst [vmem:[#allocation175_spill] sm:$0xff] %v13881_v26  ;;  %8356 = vmatpush1.msra.mxu1 %v6133_v47  ;;  %v13887_v43 = vpop.permute.xlu1 %5555  ;;  %v5322_v47 = vrot.slane %v13875_v62, %v17649_v24  ;;  %10858 = vmatprep.mubr.msk.f32.mxu0 %vm8259_vm10, %v13892_v16  ;;  %v5291_v21 = vsel %vm615_vm6, %v13219_v46, %v13277_v44  ;;  %v4379_v44 = vpop.f32.mrf.mxu0  ;;  %v17718_v27 = vld [vmem:[#allocation60_spill] sm:$0xff] }
 0x4a8   : > { %17662 = vst [vmem:[#allocation176_spill] sm:$0xff] %v13887_v43  ;;  %5193 = vrot.lane.b32.xlu0 %v13805_v9, %s17427_s13  ;;  %8357 = vmatprep.subr.mxu1 %v5794_v15  ;;  %v5762_v43 = vmul.f32 %v5694_v36, %v5663_v38  ;;  %v13940_v38 = vld [vmem:[%s17096_s1] sm:$0xff]  ;;  %v4463_v11 = vadd.f32 %v17718_v27, %v17717_v58 }
 0x4a9   : > { %8358 = vmatpush1.msra.mxu1 %v5793_v1  ;;  %5187 = vrot.lane.b32.xlu1 %v13753_v10, %s17427_s13  ;;  %v5318_v1 = vrot.slane %v13875_v62, %v17650_v25  ;;  %v5422_v36 = vmul.f32 %v5322_v47, %v5293_v34 }
 0x4aa   : > { %8359 = vmatprep.subr.mxu1 %v5778_v31  ;;  %v13913_v15 = vpop.permute.xlu0 %5575  ;;  %v13945_v31 = vadd.f32 %v4378_v35, %v17666_v53  ;;  %v4924_v35 = vsel %vm434_vm7, %v13645_v55, %v13461_v4  ;;  %v4383_v53 = vpop.f32.mrf.mxu0 }
 0x4ab   : > { %17664 = vst [vmem:[#allocation24_spill] sm:$0xff] %v13913_v15  ;;  %8360 = vmatpush1.msra.mxu1 %v5777_v28  ;;  %v13923_v33 = vpop.permute.xlu1 %5183  ;;  %v5421_v57 = vmul.f32 %v5318_v1, %v5296_v22  ;;  %v5406_v28 = vmul.f32 %v5322_v47, %v5292_v2  ;;  %v5405_v54 = vmul.f32 %v5318_v1, %v5295_v40 }
 0x4ac   : > { %17665 = vst [vmem:[#allocation177_spill] sm:$0xff] %v13923_v33  ;;  %4821 = vrot.lane.b32.xlu0 %v13805_v9, %s17428_s22  ;;  %8361 = vmatprep.subr.mxu1 %v5762_v43  ;;  %17667 = vst [vmem:[#allocation37_spill] sm:$0xff] %v13945_v31  ;;  %v5294_v43 = vsel %vm615_vm6, %v13384_v7, %v13219_v46  ;;  %v4921_v22 = vsel %vm434_vm7, %v13461_v4, %v13556_v19 }
 0x4ad   : > { %8362 = vmatpush1.msra.mxu1 %v5761_v6  ;;  %4815 = vrot.lane.b32.xlu1 %v13753_v10, %s17428_s22  ;;  %v5390_v46 = vmul.f32 %v5322_v47, %v5291_v21  ;;  %v4950_v2 = vrot.slane %v13940_v38, %v17649_v24  ;;  %v4946_v40 = vrot.slane %v13940_v38, %v17650_v25 }
 0x4ae   : > { %8363 = vmatprep.subr.mxu1 %v5422_v36  ;;  %v13951_v34 = vpop.permute.xlu0 %5203  ;;  %v5389_v36 = vmul.f32 %v5318_v1, %v5294_v43  ;;  %v4923_v4 = vsel %vm434_vm7, %v13528_v51, %v13329_v50  ;;  %v4919_v1 = vsel %vm434_vm7, %v13255_v5, %v13257_v56 }
 0x4af   : > { %17668 = vst [vmem:[#allocation178_spill] sm:$0xff] %v13951_v34  ;;  %8364 = vmatpush1.msra.mxu1 %v5421_v57  ;;  %v13957_v6 = vpop.permute.xlu1 %4811  ;;  %v4920_v57 = vsel %vm434_vm7, %v13329_v50, %v13402_v52  ;;  %v5050_v21 = vmul.f32 %v4950_v2, %v4921_v22  ;;  %v5049_v43 = vmul.f32 %v4946_v40, %v4924_v35 }
 0x4b0   : > { %17669 = vst [vmem:[#allocation179_spill] sm:$0xff] %v13957_v6  ;;  %6419 = vrot.lane.b32.xlu0 %v13945_v31, %s17426_s12  ;;  %8365 = vmatprep.subr.mxu1 %v5406_v28  ;;  %v4922_v28 = vsel %vm434_vm7, %v13375_v17, %v13255_v5  ;;  %v5034_v50 = vmul.f32 %v4950_v2, %v4920_v57  ;;  %v17674_v5 = vld [vmem:[#allocation41_spill] sm:$0xff]  ;;  %v17709_v17 = vld [vmem:[#allocation44_spill] sm:$0xff] }
 0x4b1   : > { %8366 = vmatpush1.msra.mxu1 %v5405_v54  ;;  %7521 = vrot.lane.b32.xlu1 %v13805_v9, %s17509_s16  ;;  %v5033_v22 = vmul.f32 %v4946_v40, %v4923_v4  ;;  %v5018_v56 = vmul.f32 %v4950_v2, %v4919_v1  ;;  %v5017_v6 = vmul.f32 %v4946_v40, %v4922_v28  ;;  %v17683_v28 = vld [vmem:[#allocation46_spill] sm:$0xff] }
 0x4b2   : > { %8367 = vmatprep.subr.mxu1 %v5390_v46  ;;  %v13979_v47 = vpop.permute.xlu0 %4831  ;;  %v17672_v46 = vld [vmem:[#allocation25_spill] sm:$0xff] }
 0x4b3   : > { %17670 = vst [vmem:[#allocation180_spill] sm:$0xff] %v13979_v47  ;;  %8368 = vmatpush1.msra.mxu1 %v5389_v36  ;;  %v13985_v54 = vpop.permute.xlu1 %7531  ;;  %v4384_v35 = vadd.f32 %v4383_v53, %v17672_v46 }
 0x4b4   : > { %17671 = vst [vmem:[#allocation181_spill] sm:$0xff] %v13985_v54  ;;  %7535 = vrot.lane.b32.xlu0 %v13945_v31, %s17509_s16  ;;  %8369 = vmatprep.subr.mxu1 %v5050_v21  ;;  %v17676_v21 = vld [vmem:[#allocation17_spill] sm:$0xff] }
 0x4b5   : > { %8370 = vmatpush1.msra.mxu1 %v5049_v43  ;;  %7149 = vrot.lane.b32.xlu1 %v13805_v9, %s17511_s14  ;;  %v14005_v57 = vadd.f32 %v4384_v35, %v17674_v5  ;;  %v4380_v53 = vadd.f32 %v4379_v44, %v17676_v21  ;;  %v4385_v43 = vpop.f32.mrf.mxu0  ;;  %v17686_v5 = vld [vmem:[#allocation27_spill] sm:$0xff] }
 0x4b6   : > { %8371 = vmatprep.subr.mxu1 %v5034_v50  ;;  %v13996_v36 = vpop.permute.xlu0 %5933  ;;  %v14031_v50 = vadd.f32 %v13099_v12, %v17683_v28 }
 0x4b7   : > { %8372 = vmatpush1.msra.mxu1 %v5033_v22  ;;  %v13998_v52 = vpop.permute.xlu1 %7159  ;;  %17675 = vst [vmem:[#allocation41_spill] sm:$0xff] %v14005_v57  ;;  %v4389_v46 = vpop.f32.mrf.mxu0 }
 0x4b8   : > { %17673 = vst [vmem:[#allocation25_spill] sm:$0xff] %v13998_v52  ;;  %7163 = vrot.lane.b32.xlu0 %v13945_v31, %s17511_s14  ;;  %8373 = vmatprep.subr.mxu1 %v5018_v56  ;;  %17684 = vst [vmem:[#allocation46_spill] sm:$0xff] %v14031_v50  ;;  %v4390_v21 = vadd.f32 %v4389_v46, %v17686_v5  ;;  %v17691_v5 = vld [vmem:[#allocation49_spill] sm:$0xff]  ;;  %v17732_v52 = vld [vmem:[#allocation139_spill] sm:$0xff] }
 0x4b9   : > { %8374 = vmatpush1.msra.mxu1 %v5017_v6  ;;  %6777 = vrot.lane.b32.xlu1 %v13805_v9, %s17432_s24  ;;  %v17679_v6 = vld [vmem:[#allocation39_spill] sm:$0xff]  ;;  %v14063_v33 = vadd.f32 %v13109_v18, %v17691_v5  ;;  %v17696_v5 = vld [vmem:[#allocation52_spill] sm:$0xff]  ;;  %v4391_v10 = vpop.f32.mrf.mxu0 }
 0x4ba   : > { %v14007_v4 = vpop.permute.xlu0 %5561  ;;  %v14019_v40 = vadd.f32 %v4380_v53, %v17679_v6  ;;  %v17688_v6 = vld [vmem:[#allocation43_spill] sm:$0xff] }
 0x4bb   : > { %v14010_v2 = vpop.permute.xlu1 %6787  ;;  %v14051_v28 = vadd.f32 %v4390_v21, %v17688_v6  ;;  %17692 = vst [vmem:[#allocation49_spill] sm:$0xff] %v14063_v33 }
 0x4bc   : > { %17677 = vst [vmem:[#allocation17_spill] sm:$0xff] %v14010_v2  ;;  %7537 = vrot.lane.b32.xlu0 %v14005_v57, %s17509_s16  ;;  %17680 = vst [vmem:[#allocation39_spill] sm:$0xff] %v14019_v40 }
 0x4bd   : > { %6405 = vrot.lane.b32.xlu1 %v13805_v9, %s17426_s12  ;;  %17689 = vst [vmem:[#allocation43_spill] sm:$0xff] %v14051_v28  ;;  %v17705_v9 = vld [vmem:[#allocation22_spill] sm:$0xff] }
 0x4be   : > { %v14016_v56 = vpop.permute.xlu0 %5189  ;;  %v4392_v41 = vadd.f32 %v4391_v10, %v17705_v9  ;;  %v17712_v10 = vld [vmem:[#allocation20_spill] sm:$0xff] }
 0x4bf   : > { %17678 = vst [vmem:[#allocation182_spill] sm:$0xff] %v14016_v56  ;;  %v14021_v1 = vpop.permute.xlu1 %6401  ;;  %v4386_v9 = vadd.f32 %v4385_v43, %v17712_v10  ;;  %v17720_v10 = vld [vmem:[#allocation59_spill] sm:$0xff] }
 0x4c0   : > { %17681 = vst [vmem:[#allocation183_spill] sm:$0xff] %v14021_v1  ;;  %7165 = vrot.lane.b32.xlu0 %v14005_v57, %s17511_s14 }
 0x4c1   : > { %6425 = vrot.lane.b32.xlu1 %v14019_v40, %s17426_s12 }
 0x4c2   : > { %v14027_v44 = vpop.permute.xlu0 %4817 }
 0x4c3   : > { %17682 = vst [vmem:[#allocation184_spill] sm:$0xff] %v14027_v44  ;;  %v14033_v22 = vpop.permute.xlu1 %5943  ;;  %v17738_v44 = vld [vmem:[#allocation73_spill] sm:$0xff] }
 0x4c4   : > { %6793 = vrot.lane.b32.xlu0 %v14005_v57, %s17432_s24 }
 0x4c5   : > { %5621 = vrot.lane.b32.xlu1 %v14031_v50, %s17510_s30 }
 0x4c6   : > { %v14039_v35 = vpop.permute.xlu0 %7527 }
 0x4c7   : > { %17685 = vst [vmem:[#allocation185_spill] sm:$0xff] %v14039_v35  ;;  %v14042_v53 = vpop.permute.xlu1 %5571 }
 0x4c8   : > { %5993 = vrot.lane.b32.xlu0 %v14031_v50, %s17345_s25 }
 0x4c9   : > { %4877 = vrot.lane.b32.xlu1 %v14031_v50, %s17428_s22 }
 0x4ca   : > { %v14048_v12 = vpop.permute.xlu0 %7155 }
 0x4cb   : > { %17687 = vst [vmem:[#allocation27_spill] sm:$0xff] %v14048_v12  ;;  %v14053_v19 = vpop.permute.xlu1 %5199 }
 0x4cc   : > { %5249 = vrot.lane.b32.xlu0 %v14031_v50, %s17427_s13  ;;  %v4640_v50 = vpop.f32.mrf.mxu1 }
 0x4cd   : > { %5955 = vrot.lane.b32.xlu1 %v14051_v28, %s17345_s25 }
 0x4ce   : > { %v14059_v46 = vpop.permute.xlu0 %6783 }
 0x4cf   : > { %17690 = vst [vmem:[#allocation186_spill] sm:$0xff] %v14059_v46  ;;  %v14065_v13 = vpop.permute.xlu1 %7517  ;;  %v14191_v46 = vld [vmem:[%s17096_s1 + $0x80] sm:$0xff] }
 0x4d0   : > { %17693 = vst [vmem:[#allocation187_spill] sm:$0xff] %v14065_v13  ;;  %7539 = vrot.lane.b32.xlu0 %v14051_v28, %s17509_s16  ;;  %v14082_v13 = vadd.f32 %v4640_v50, %v17696_v5  ;;  %17729 = vst [vmem:[#allocation201_spill] sm:$0xff] %v14191_v46  ;;  %v7646_v12 = vrot.slane %v14191_v46, %v17650_v25 }
 0x4d1   : > { %5995 = vrot.lane.b32.xlu1 %v14063_v33, %s17345_s25 }
 0x4d2   : > { %v14071_v21 = vpop.permute.xlu0 %6411  ;;  %17697 = vst [vmem:[#allocation52_spill] sm:$0xff] %v14082_v13 }
 0x4d3   : > { %17694 = vst [vmem:[#allocation188_spill] sm:$0xff] %v14071_v21  ;;  %v14073_v6 = vpop.permute.xlu1 %4827 }
 0x4d4   : > { %7167 = vrot.lane.b32.xlu0 %v14051_v28, %s17511_s14 }
 0x4d5   : > { %5251 = vrot.lane.b32.xlu1 %v14063_v33, %s17427_s13 }
 0x4d6   : > { %v14079_v18 = vpop.permute.xlu0 %7141 }
 0x4d7   : > { %17695 = vst [vmem:[#allocation189_spill] sm:$0xff] %v14079_v18  ;;  %v14084_v63 = vpop.permute.xlu1 %7145 }
 0x4d8   : > { %17698 = vst [vmem:[#allocation190_spill] sm:$0xff] %v14084_v63  ;;  %6795 = vrot.lane.b32.xlu0 %v14051_v28, %s17432_s24 }
 0x4d9   : > { %5625 = vrot.lane.b32.xlu1 %v14082_v13, %s17510_s30 }
 0x4da   : > { %v14090_v23 = vpop.permute.xlu0 %6769 }
 0x4db   : > { %17699 = vst [vmem:[#allocation191_spill] sm:$0xff] %v14090_v23  ;;  %v14092_v59 = vpop.permute.xlu1 %6773 }
 0x4dc   : > { %17700 = vst [vmem:[#allocation192_spill] sm:$0xff] %v14092_v59  ;;  %5623 = vrot.lane.b32.xlu0 %v14063_v33, %s17510_s30 }
 0x4dd   : > { %4881 = vrot.lane.b32.xlu1 %v14082_v13, %s17428_s22 }
 0x4de   : > { %v14098_v50 = vpop.permute.xlu0 %6397 }
 0x4df   : > { %17701 = vst [vmem:[#allocation193_spill] sm:$0xff] %v14098_v50  ;;  %v14100_v5 = vpop.permute.xlu1 %7513 }
 0x4e0   : > { %17702 = vst [vmem:[#allocation194_spill] sm:$0xff] %v14100_v5  ;;  %4879 = vrot.lane.b32.xlu0 %v14063_v33, %s17428_s22  ;;  %v17708_v33 = vld [vmem:[#allocation55_spill] sm:$0xff] }
 0x4e1   : > { %6785 = vrot.lane.b32.xlu1 %v13410_v39, %s17432_s24 }
 0x4e2   : > { %v14106_v63 = vpop.permute.xlu0 %5949 }
 0x4e3   : > { %17703 = vst [vmem:[#allocation195_spill] sm:$0xff] %v14106_v63  ;;  %v14108_v59 = vpop.permute.xlu1 %5929 }
 0x4e4   : > { %17704 = vst [vmem:[#allocation196_spill] sm:$0xff] %v14108_v59  ;;  %5997 = vrot.lane.b32.xlu0 %v14082_v13, %s17345_s25  ;;  %v14124_v59 = vadd.f32 %v4392_v41, %v17709_v17  ;;  %v17715_v17 = vld [vmem:[#allocation124_spill] sm:$0xff]  ;;  %v17716_v41 = vld [vmem:[#allocation42_spill] sm:$0xff] }
 0x4e5   : > { %5953 = vrot.lane.b32.xlu1 %v14005_v57, %s17345_s25 }
 0x4e6   : > { %v14115_v1 = vpop.permute.xlu0 %5577 }
 0x4e7   : > { %17706 = vst [vmem:[#allocation22_spill] sm:$0xff] %v14115_v1  ;;  %v14117_v21 = vpop.permute.xlu1 %5557 }
 0x4e8   : > { %17707 = vst [vmem:[#allocation197_spill] sm:$0xff] %v14117_v21  ;;  %5253 = vrot.lane.b32.xlu0 %v14082_v13, %s17427_s13 }
 0x4e9   : > { %6417 = vrot.lane.b32.xlu1 %v17708_v33, %s17426_s12 }
 0x4ea   : > { %v14126_v51 = vpop.permute.xlu0 %5205 }
 0x4eb   : > { %17710 = vst [vmem:[#allocation55_spill] sm:$0xff] %v14126_v51  ;;  %v14128_v55 = vpop.permute.xlu1 %5185 }
 0x4ec   : > { %17711 = vst [vmem:[#allocation44_spill] sm:$0xff] %v14128_v55  ;;  %5961 = vrot.lane.b32.xlu0 %v14124_v59, %s17345_s25  ;;  %v14144_v55 = vadd.f32 %v4386_v9, %v17716_v41  ;;  %v4543_v41 = vpop.f32.mrf.mxu0 }
 0x4ed   : > { %5951 = vrot.lane.b32.xlu1 %v13945_v31, %s17345_s25  ;;  %v4544_v45 = vadd.f32 %v4543_v41, %v17726_v32  ;;  %v17733_v32 = vld [vmem:[#allocation115_spill] sm:$0xff] }
 0x4ee   : > { %v14135_v21 = vpop.permute.xlu0 %4833  ;;  %v7621_v41 = vsel %vm1739_vm0, %v17733_v32, %v17732_v52  ;;  %v17737_v32 = vld [vmem:[#allocation83_spill] sm:$0xff] }
 0x4ef   : > { %17713 = vst [vmem:[#allocation20_spill] sm:$0xff] %v14135_v21  ;;  %v14137_v13 = vpop.permute.xlu1 %4813 }
 0x4f0   : > { %17714 = vst [vmem:[#allocation198_spill] sm:$0xff] %v14137_v13  ;;  %6791 = vrot.lane.b32.xlu0 %v13945_v31, %s17432_s24  ;;  %v14159_v13 = vadd.f32 %v4463_v11, %v17720_v10 }
 0x4f1   : > { %6415 = vrot.lane.b32.xlu1 %v17715_v17, %s17426_s12 }
 0x4f2   : > { %v14146_v7 = vpop.permute.xlu0 %5935 }
 0x4f3   : > { %v14150_v20 = vpop.permute.xlu1 %7533 }
 0x4f4   : > { %17719 = vst [vmem:[#allocation124_spill] sm:$0xff] %v14150_v20  ;;  %5959 = vrot.lane.b32.xlu0 %v14144_v55, %s17345_s25  ;;  %v7749_v20 = vmul.f32 %v7646_v12, %v7621_v41 }
 0x4f5   : > { %5583 = vrot.lane.b32.xlu1 %v14051_v28, %s17510_s30 }
 0x4f6   : > { %v14156_v43 = vpop.permute.xlu0 %5563 }
 0x4f7   : > { %v14161_v9 = vpop.permute.xlu1 %7161 }
 0x4f8   : > { %17721 = vst [vmem:[#allocation42_spill] sm:$0xff] %v14161_v9  ;;  %6423 = vrot.lane.b32.xlu0 %v14051_v28, %s17426_s12  ;;  %v17735_v9 = vld [vmem:[#allocation104_spill] sm:$0xff] }
 0x4f9   : > { %6437 = vrot.lane.b32.xlu1 %v14159_v13, %s17426_s12  ;;  %v7617_v54 = vsel %vm1739_vm0, %v17735_v9, %v14100_v5  ;;  %v7620_v35 = vsel %vm1739_vm0, %v17737_v32, %v17735_v9  ;;  %v7616_v5 = vsel %vm1739_vm0, %v17738_v44, %v13790_v60  ;;  %v14245_v32 = vld [vmem:[%s17096_s1 + $0x70] sm:$0xff] }
 0x4fa   : > { %v14167_v27 = vpop.permute.xlu0 %5191  ;;  %17742 = vst [vmem:[#allocation203_spill] sm:$0xff] %v14245_v32 }
 0x4fb   : > { %17722 = vst [vmem:[#allocation40_spill] sm:$0xff] %v14167_v27  ;;  %v14169_v58 = vpop.permute.xlu1 %6789 }
 0x4fc   : > { %17723 = vst [vmem:[#allocation60_spill] sm:$0xff] %v14169_v58  ;;  %5957 = vrot.lane.b32.xlu0 %v14019_v40, %s17345_s25 }
 0x4fd   : > { %5581 = vrot.lane.b32.xlu1 %v14005_v57, %s17510_s30 }
 0x4fe   : > { %v14175_v11 = vpop.permute.xlu0 %4819 }
 0x4ff   : > { %17724 = vst [vmem:[#allocation59_spill] sm:$0xff] %v14175_v11  ;;  %v14177_v10 = vpop.permute.xlu1 %7519  ;;  %v17752_v11 = vld [vmem:[#allocation70_spill] sm:$0xff] }
 0x500   : > { %17725 = vst [vmem:[#allocation199_spill] sm:$0xff] %v14177_v10  ;;  %6421 = vrot.lane.b32.xlu0 %v14005_v57, %s17426_s12  ;;  %v17730_v10 = vld [vmem:[#allocation45_spill] sm:$0xff] }
 0x501   : > { %5579 = vrot.lane.b32.xlu1 %v13945_v31, %s17510_s30  ;;  %v14198_v58 = vadd.f32 %v4544_v45, %v17730_v10 }
 0x502   : > { %v14184_v0 = vpop.permute.xlu0 %6431 }
 0x503   : > { %17727 = vst [vmem:[#allocation29_spill] sm:$0xff] %v14184_v0  ;;  %v14186_v2 = vpop.permute.xlu1 %7147  ;;  %17731 = vst [vmem:[#allocation45_spill] sm:$0xff] %v14198_v58  ;;  %v7650_v0 = vrot.slane %v14191_v46, %v17649_v24 }
 0x504   : > { %17728 = vst [vmem:[#allocation200_spill] sm:$0xff] %v14186_v2  ;;  %5589 = vrot.lane.b32.xlu0 %v14124_v59, %s17510_s30 }
 0x505   : > { %5211 = vrot.lane.b32.xlu1 %v14051_v28, %s17427_s13 }
 0x506   : > { %v14204_v2 = vpop.permute.xlu0 %7515 }
 0x507   : > { %17734 = vst [vmem:[#allocation139_spill] sm:$0xff] %v14204_v2  ;;  %v7618_v45 = vsel %vm1739_vm0, %v17732_v52, %v14204_v2  ;;  %v14218_v10 = vpop.permute.xlu1 %6775  ;;  %v17739_v52 = vld [vmem:[#allocation68_spill] sm:$0xff]  ;;  %v7734_v2 = vmul.f32 %v7650_v0, %v7617_v54 }
 0x508   : > { %17736 = vst [vmem:[#allocation104_spill] sm:$0xff] %v14218_v10  ;;  %6443 = vrot.lane.b32.xlu0 %v14198_v58, %s17426_s12  ;;  %v7750_v46 = vmul.f32 %v7650_v0, %v7618_v45  ;;  %v7619_v10 = vsel %vm1739_vm0, %v17739_v52, %v17738_v44  ;;  %v7733_v58 = vmul.f32 %v7646_v12, %v7620_v35  ;;  %v17743_v44 = vld [vmem:[#allocation63_spill] sm:$0xff]  ;;  %v17746_v35 = vld [vmem:[#allocation112_spill] sm:$0xff] }
 0x509   : > { %5209 = vrot.lane.b32.xlu1 %v14005_v57, %s17427_s13  ;;  %v7718_v45 = vmul.f32 %v7650_v0, %v7616_v5  ;;  %v7717_v60 = vmul.f32 %v7646_v12, %v7619_v10  ;;  %v7274_v12 = vrot.slane %v14245_v32, %v17650_v25  ;;  %v17748_v5 = vld [vmem:[#allocation105_spill] sm:$0xff]  ;;  %v17749_v10 = vld [vmem:[#allocation84_spill] sm:$0xff] }
 0x50a   : > { %8385 = vmatprep.subr.mxu1 %v7750_v46  ;;  %v14236_v9 = vpop.permute.xlu0 %6771 }
 0x50b   : > { %17740 = vst [vmem:[#allocation73_spill] sm:$0xff] %v14236_v9  ;;  %8386 = vmatpush2.msra.mxu1 %v7749_v20  ;;  %v14238_v41 = vpop.permute.xlu1 %6403  ;;  %v17745_v20 = vld [vmem:[#allocation134_spill] sm:$0xff] }
 0x50c   : > { %17741 = vst [vmem:[#allocation202_spill] sm:$0xff] %v14238_v41  ;;  %5587 = vrot.lane.b32.xlu0 %v14144_v55, %s17510_s30  ;;  %8387 = vmatprep.subr.mxu1 %v7734_v2  ;;  %v7249_v46 = vsel %vm1557_vm1, %v17746_v35, %v17745_v20  ;;  %v7278_v2 = vrot.slane %v14245_v32, %v17649_v24 }
 0x50d   : > { %8388 = vmatpush2.msra.mxu1 %v7733_v58  ;;  %5967 = vrot.lane.b32.xlu1 %v17743_v44, %s17345_s25  ;;  %v7245_v58 = vsel %vm1557_vm1, %v17748_v5, %v14079_v18  ;;  %v7377_v35 = vmul.f32 %v7274_v12, %v7249_v46  ;;  %v17750_v18 = vld [vmem:[#allocation75_spill] sm:$0xff] }
 0x50e   : > { %8389 = vmatprep.subr.mxu1 %v7718_v45  ;;  %v14249_v54 = vpop.permute.xlu0 %6399  ;;  %v7248_v45 = vsel %vm1557_vm1, %v17749_v10, %v17748_v5  ;;  %v7244_v52 = vsel %vm1557_vm1, %v17750_v18, %v13812_v30  ;;  %v14290_v5 = vld [vmem:[%s17096_s1 + $0x60] sm:$0xff]  ;;  %v7362_v46 = vmul.f32 %v7278_v2, %v7245_v58 }
 0x50f   : > { %17744 = vst [vmem:[#allocation63_spill] sm:$0xff] %v14249_v54  ;;  %8390 = vmatpush2.msra.mxu1 %v7717_v60  ;;  %v14255_v0 = vpop.permute.xlu1 %7143  ;;  %v17754_v10 = vld [vmem:[#allocation142_spill] sm:$0xff]  ;;  %v6906_v58 = vrot.slane %v14290_v5, %v17649_v24 }
 0x510   : > { %17747 = vst [vmem:[#allocation134_spill] sm:$0xff] %v14255_v0  ;;  %5585 = vrot.lane.b32.xlu0 %v14019_v40, %s17510_s30  ;;  %v7246_v60 = vsel %vm1557_vm1, %v17745_v20, %v14255_v0  ;;  %v7247_v20 = vsel %vm1557_vm1, %v17752_v11, %v17750_v18  ;;  %v6874_v30 = vsel %vm1375_vm2, %v17754_v10, %v14236_v9  ;;  %v17755_v18 = vld [vmem:[#allocation121_spill] sm:$0xff] }
 0x511   : > { %5207 = vrot.lane.b32.xlu1 %v13945_v31, %s17427_s13  ;;  %v7378_v41 = vmul.f32 %v7278_v2, %v7246_v60  ;;  %v7361_v60 = vmul.f32 %v7274_v12, %v7248_v45  ;;  %v6877_v11 = vsel %vm1375_vm2, %v17755_v18, %v17754_v10  ;;  %v7345_v45 = vmul.f32 %v7274_v12, %v7247_v20  ;;  %v17758_v10 = vld [vmem:[#allocation87_spill] sm:$0xff] }
 0x512   : > { %v14281_v32 = vpop.permute.xlu0 %5937  ;;  %v6902_v9 = vrot.slane %v14290_v5, %v17650_v25  ;;  %v7006_v12 = vmul.f32 %v6906_v58, %v6874_v30 }
 0x513   : > { %17751 = vst [vmem:[#allocation105_spill] sm:$0xff] %v14281_v32  ;;  %v14292_v0 = vpop.permute.xlu1 %5931  ;;  %8391 = vmatprep.subr.mxu1 %v7378_v41  ;;  %v7346_v41 = vmul.f32 %v7278_v2, %v7244_v52 }
 0x514   : > { %17753 = vst [vmem:[#allocation75_spill] sm:$0xff] %v14292_v0  ;;  %5217 = vrot.lane.b32.xlu0 %v14124_v59, %s17427_s13  ;;  %8392 = vmatpush2.msra.mxu1 %v7377_v35  ;;  %v17757_v0 = vld [vmem:[#allocation107_spill] sm:$0xff]  ;;  %v7005_v20 = vmul.f32 %v6902_v9, %v6877_v11 }
 0x515   : > { %5965 = vrot.lane.b32.xlu1 %v17756_v8, %s17345_s25  ;;  %8393 = vmatprep.subr.mxu1 %v7362_v46  ;;  %v6873_v35 = vsel %vm1375_vm2, %v17757_v0, %v14090_v23  ;;  %v6876_v52 = vsel %vm1375_vm2, %v17758_v10, %v17757_v0  ;;  %v17760_v46 = vld [vmem:[#allocation77_spill] sm:$0xff]  ;;  %v17762_v0 = vld [vmem:[#allocation144_spill] sm:$0xff] }
 0x516   : > { %v14314_v47 = vpop.permute.xlu0 %5565  ;;  %8394 = vmatpush2.msra.mxu1 %v7361_v60  ;;  %v6872_v25 = vsel %vm1375_vm2, %v17760_v46, %v13848_v29  ;;  %v17761_v60 = vld [vmem:[#allocation69_spill] sm:$0xff]  ;;  %v6990_v30 = vmul.f32 %v6906_v58, %v6873_v35  ;;  %v6989_v11 = vmul.f32 %v6902_v9, %v6876_v52 }
 0x517   : > { %v14320_v2 = vpop.permute.xlu1 %5559  ;;  %8395 = vmatprep.subr.mxu1 %v7346_v41  ;;  %v6875_v23 = vsel %vm1375_vm2, %v17761_v60, %v17760_v46  ;;  %v6502_v41 = vsel %vm1193_vm3, %v17762_v0, %v14249_v54  ;;  %v17766_v35 = vld [vmem:[#allocation109_spill] sm:$0xff]  ;;  %v17767_v54 = vld [vmem:[#allocation64_spill] sm:$0xff] }
 0x518   : > { %17759 = vst [vmem:[#allocation142_spill] sm:$0xff] %v14320_v2  ;;  %5215 = vrot.lane.b32.xlu0 %v14144_v55, %s17427_s13  ;;  %8396 = vmatpush2.msra.mxu1 %v7345_v45  ;;  %v17764_v45 = vld [vmem:[#allocation117_spill] sm:$0xff]  ;;  %v6501_v52 = vsel %vm1193_vm3, %v17766_v35, %v14098_v50 }
 0x519   : > { %4839 = vrot.lane.b32.xlu1 %v14051_v28, %s17428_s22  ;;  %8397 = vmatprep.subr.mxu1 %v7006_v12  ;;  %v6505_v2 = vsel %vm1193_vm3, %v17764_v45, %v17762_v0  ;;  %v6974_v28 = vmul.f32 %v6906_v58, %v6872_v25  ;;  %v6973_v12 = vmul.f32 %v6902_v9, %v6875_v23  ;;  %v17769_v0 = vld [vmem:[#allocation57_spill] sm:$0xff] }
 0x51a   : > { %v14338_v29 = vpop.permute.xlu0 %5193  ;;  %8398 = vmatpush2.msra.mxu1 %v7005_v20  ;;  %v17768_v20 = vld [vmem:[#allocation90_spill] sm:$0xff]  ;;  %v6634_v23 = vmul.f32 %v13763_v48, %v6502_v41  ;;  %v6633_v25 = vmul.f32 %v13767_v37, %v6505_v2  ;;  %v17772_v2 = vld [vmem:[#allocation12_spill] sm:$0xff] }
 0x51b   : > { %17763 = vst [vmem:[#allocation121_spill] sm:$0xff] %v14338_v29  ;;  %v14344_v46 = vpop.permute.xlu1 %5187  ;;  %8399 = vmatprep.subr.mxu1 %v6990_v30  ;;  %v6504_v60 = vsel %vm1193_vm3, %v17768_v20, %v17766_v35  ;;  %v6618_v30 = vmul.f32 %v13763_v48, %v6501_v52  ;;  %v17773_v48 = vld [vmem:[#allocation13_spill] sm:$0xff]  ;;  %v17774_v35 = vld [vmem:[#allocation168_spill] sm:$0xff] }
 0x51c   : > { %17765 = vst [vmem:[#allocation61_spill] sm:$0xff] %v14344_v46  ;;  %5973 = vrot.lane.b32.xlu0 %v17767_v54, %s17345_s25  ;;  %8400 = vmatpush2.msra.mxu1 %v6989_v11  ;;  %v6617_v11 = vmul.f32 %v13767_v37, %v6504_v60  ;;  %v14391_v60 = vld [vmem:[%s17100_s5 + $0x18] sm:$0xff] }
 0x51d   : > { %5963 = vrot.lane.b32.xlu1 %v17769_v0, %s17345_s25  ;;  %8401 = vmatprep.subr.mxu1 %v6974_v28  ;;  %v14371_v28 = vld [vmem:[%s17096_s1 + $0x50] sm:$0xff]  ;;  %v17775_v52 = vld [vmem:[#allocation145_spill] sm:$0xff] }
 0x51e   : > { %v14360_v9 = vpop.permute.xlu0 %4821  ;;  %8402 = vmatpush2.msra.mxu1 %v6973_v12  ;;  %v14375_v41 = vrot.slane %v14371_v28, %v17772_v2  ;;  %v14380_v12 = vld [vmem:[%s17100_s5] sm:$0xff]  ;;  %v14384_v37 = vrot.slane %v14371_v28, %v17773_v48 }
 0x51f   : > { %17770 = vst [vmem:[#allocation107_spill] sm:$0xff] %v14360_v9  ;;  %v14362_v58 = vpop.permute.xlu1 %4815  ;;  %8403 = vmatprep.subr.mxu1 %v6634_v23  ;;  %v6491_v23 = vsel %vm1193_vm3, %v17775_v52, %v17774_v35 }
 0x520   : > { %17771 = vst [vmem:[#allocation87_spill] sm:$0xff] %v14362_v58  ;;  %5213 = vrot.lane.b32.xlu0 %v14019_v40, %s17427_s13  ;;  %8404 = vmatpush2.msra.mxu1 %v6633_v25  ;;  %v6605_v46 = vmul.f32 %v14384_v37, %v6491_v23  ;;  %v17782_v23 = vld [vmem:[#allocation141_spill] sm:$0xff] }
 0x521   : > { %4837 = vrot.lane.b32.xlu1 %v14005_v57, %s17428_s22  ;;  %8405 = vmatprep.subr.mxu1 %v6618_v30  ;;  %v17779_v30 = vld [vmem:[#allocation62_spill] sm:$0xff] }
 0x522   : > { %v14397_v25 = vpop.permute.xlu0 %6419  ;;  %8406 = vmatpush2.msra.mxu1 %v6617_v11 }
 0x523   : > { %17776 = vst [vmem:[#allocation77_spill] sm:$0xff] %v14397_v25  ;;  %v6488_v50 = vsel %vm1193_vm3, %v17774_v35, %v14397_v25  ;;  %v14403_v57 = vpop.permute.xlu1 %7521  ;;  %8408 = vmatmul.mubr.f32.vlgmr.msra.gmra.mxu1 %v14380_v12  ;;  %v14421_v25 = vld [vmem:[%s17100_s5 + $0x10] sm:$0xff] }
 0x524   : > { %17777 = vst [vmem:[#allocation144_spill] sm:$0xff] %v14403_v57  ;;  %5971 = vrot.lane.b32.xlu0 %v17779_v30, %s17778_s0  ;;  %v6606_v58 = vmul.f32 %v14375_v41, %v6488_v50  ;;  %10861 = vmatprep.mubr.msk.f32.mxu1 %vm8259_vm10, %v14391_v60  ;;  %v6025_v50 = vsel %vm979_vm4, %v14033_v22, %v14106_v63  ;;  %v17784_v63 = vld [vmem:[#allocation171_spill] sm:$0xff]  ;;  %v17787_v57 = vld [vmem:[#allocation160_spill] sm:$0xff] }
 0x525   : > { %5595 = vrot.lane.b32.xlu1 %v17743_v44, %s17510_s30 }
 0x526   : > { %v14414_v11 = vpop.permute.xlu0 %7535  ;;  %8497 = vmatprep.subr.mxu1 %v6606_v58 }
 0x527   : > { %17780 = vst [vmem:[#allocation117_spill] sm:$0xff] %v14414_v11  ;;  %8498 = vmatpush1.msra.mxu1 %v6605_v46  ;;  %v14416_v35 = vpop.permute.xlu1 %7149  ;;  %v6028_v46 = vsel %vm979_vm4, %v14281_v32, %v14033_v22  ;;  %v17789_v32 = vld [vmem:[#allocation85_spill] sm:$0xff] }
 0x528   : > { %17781 = vst [vmem:[#allocation109_spill] sm:$0xff] %v14416_v35  ;;  %4845 = vrot.lane.b32.xlu0 %v14124_v59, %s17428_s22  ;;  %8499 = vmatprep.subr.mxu1 %v17708_v33  ;;  %v6082_v33 = vrot.slane %v13675_v3, %v17772_v2  ;;  %v17785_v35 = vld [vmem:[#allocation110_spill] sm:$0xff] }
 0x529   : > { %8500 = vmatpush1.msra.mxu1 %v17782_v23  ;;  %4835 = vrot.lane.b32.xlu1 %v13945_v31, %s17428_s22  ;;  %v6024_v23 = vsel %vm979_vm4, %v17784_v63, %v13881_v26  ;;  %v6078_v31 = vrot.slane %v13675_v3, %v17773_v48  ;;  %v17788_v3 = vld [vmem:[#allocation155_spill] sm:$0xff] }
 0x52a   : > { %v14437_v58 = vpop.permute.xlu0 %7163  ;;  %8501 = vmatprep.subr.mxu1 %v17715_v17  ;;  %8414 = vmatmul.mubr.f32.gmra.mxu1 %v14421_v25  ;;  %v6027_v17 = vsel %vm979_vm4, %v14146_v7, %v17784_v63  ;;  %v6170_v26 = vmul.f32 %v6082_v33, %v6025_v50  ;;  %v5653_v50 = vsel %vm797_vm5, %v14042_v53, %v14115_v1  ;;  %v17794_v1 = vld [vmem:[#allocation56_spill] sm:$0xff] }
 0x52b   : > { %17783 = vst [vmem:[#allocation64_spill] sm:$0xff] %v14437_v58  ;;  %8502 = vmatpush1.msra.mxu1 %v17785_v35  ;;  %v14450_v22 = vpop.permute.xlu1 %6777  ;;  %10864 = vmatprep.mubr.msk.f32.mxu1 %vm8259_vm10, %v13892_v16  ;;  %v6023_v35 = vsel %vm979_vm4, %v17788_v3, %v17787_v57  ;;  %v6026_v16 = vsel %vm979_vm4, %v13996_v36, %v17788_v3 }
 0x52c   : > { %17786 = vst [vmem:[#allocation90_spill] sm:$0xff] %v14450_v22  ;;  %5969 = vrot.lane.b32.xlu0 %v14159_v13, %s17778_s0  ;;  %8503 = vmatprep.subr.mxu1 %v13410_v39  ;;  %v6169_v22 = vmul.f32 %v6078_v31, %v6028_v46  ;;  %v6154_v39 = vmul.f32 %v6082_v33, %v6024_v23 }
 0x52d   : > { %8504 = vmatpush1.msra.mxu1 %v17789_v32  ;;  %5593 = vrot.lane.b32.xlu1 %v17756_v8, %s17510_s30  ;;  %v6153_v46 = vmul.f32 %v6078_v31, %v6027_v17  ;;  %v5656_v57 = vsel %vm797_vm5, %v14314_v47, %v14042_v53  ;;  %v5710_v23 = vrot.slane %v13839_v61, %v17772_v2 }
 0x52e   : > { %v14472_v63 = vpop.permute.xlu0 %7537  ;;  %8505 = vmatprep.subr.mxu1 %v6170_v26  ;;  %v6138_v26 = vmul.f32 %v6082_v33, %v6023_v35  ;;  %v6137_v17 = vmul.f32 %v6078_v31, %v6026_v16  ;;  %v5706_v3 = vrot.slane %v13839_v61, %v17773_v48  ;;  %v5655_v53 = vsel %vm797_vm5, %v14156_v43, %v13781_v42 }
 0x52f   : > { %17790 = vst [vmem:[#allocation57_spill] sm:$0xff] %v14472_v63  ;;  %8506 = vmatpush1.msra.mxu1 %v6169_v22  ;;  %v14478_v32 = vpop.permute.xlu1 %6405  ;;  %v5652_v22 = vsel %vm797_vm5, %v13781_v42, %v13913_v15  ;;  %v5798_v35 = vmul.f32 %v5710_v23, %v5653_v50  ;;  %v5281_v50 = vsel %vm615_vm6, %v14053_v19, %v14126_v51 }
 0x530   : > { %17791 = vst [vmem:[#allocation168_spill] sm:$0xff] %v14478_v32  ;;  %4843 = vrot.lane.b32.xlu0 %v14144_v55, %s17428_s22  ;;  %8507 = vmatprep.subr.mxu1 %v6154_v39  ;;  %v17793_v39 = vld [vmem:[#allocation16_spill] sm:$0xff]  ;;  %v5797_v16 = vmul.f32 %v5706_v3, %v5656_v57  ;;  %v5782_v42 = vmul.f32 %v5710_v23, %v5652_v22 }
 0x531   : > { %8508 = vmatpush1.msra.mxu1 %v6153_v46  ;;  %5591 = vrot.lane.b32.xlu1 %v17769_v0, %s17510_s30  ;;  %v5651_v31 = vsel %vm797_vm5, %v17794_v1, %v17793_v39  ;;  %v5654_v46 = vsel %vm797_vm5, %v14007_v4, %v17794_v1  ;;  %v5284_v57 = vsel %vm615_vm6, %v14338_v29, %v14053_v19  ;;  %v17807_v39 = vld [vmem:[#allocation159_spill] sm:$0xff] }
 0x532   : > { %v14500_v33 = vpop.permute.xlu0 %7165  ;;  %8509 = vmatprep.subr.mxu1 %v6138_v26  ;;  %v5781_v26 = vmul.f32 %v5706_v3, %v5655_v53  ;;  %v5338_v22 = vrot.slane %v13875_v62, %v17772_v2  ;;  %v5280_v53 = vsel %vm615_vm6, %v13792_v49, %v13951_v34  ;;  %v5283_v19 = vsel %vm615_vm6, %v14167_v27, %v13792_v49  ;;  %v17806_v34 = vld [vmem:[#allocation165_spill] sm:$0xff] }
 0x533   : > { %17792 = vst [vmem:[#allocation145_spill] sm:$0xff] %v14500_v33  ;;  %8510 = vmatpush1.msra.mxu1 %v6137_v17  ;;  %v14506_v61 = vpop.permute.xlu1 %6425  ;;  %v5766_v17 = vmul.f32 %v5710_v23, %v5651_v31  ;;  %v17798_v31 = vld [vmem:[#allocation163_spill] sm:$0xff] }
 0x534   : > { %17795 = vst [vmem:[#allocation62_spill] sm:$0xff] %v14506_v61  ;;  %5601 = vrot.lane.b32.xlu0 %v17767_v54, %s17510_s30  ;;  %8511 = vmatprep.subr.mxu1 %v5798_v35  ;;  %v5765_v35 = vmul.f32 %v5706_v3, %v5654_v46  ;;  %v5426_v23 = vmul.f32 %v5338_v22, %v5281_v50 }
 0x535   : > { %8512 = vmatpush1.msra.mxu1 %v5797_v16  ;;  %7545 = vrot.lane.b32.xlu1 %v14124_v59, %s17509_s16  ;;  %v5334_v16 = vrot.slane %v13875_v62, %v17773_v48  ;;  %v4909_v50 = vsel %vm434_vm7, %v14073_v6, %v14135_v21  ;;  %v4962_v21 = vrot.slane %v13940_v38, %v17773_v48 }
 0x536   : > { %v14524_v1 = vpop.permute.xlu0 %6793  ;;  %8513 = vmatprep.subr.mxu1 %v5782_v42  ;;  %v17799_v42 = vld [vmem:[#allocation157_spill] sm:$0xff] }
 0x537   : > { %17796 = vst [vmem:[#allocation141_spill] sm:$0xff] %v14524_v1  ;;  %8514 = vmatpush1.msra.mxu1 %v5781_v26  ;;  %v14534_v51 = vpop.permute.xlu1 %5621  ;;  %v5279_v3 = vsel %vm615_vm6, %v17799_v42, %v17798_v31  ;;  %v5425_v46 = vmul.f32 %v5334_v16, %v5284_v57  ;;  %v5282_v49 = vsel %vm615_vm6, %v14016_v56, %v17799_v42  ;;  %v17802_v42 = vld [vmem:[#allocation180_spill] sm:$0xff]  ;;  %v17803_v31 = vld [vmem:[#allocation173_spill] sm:$0xff] }
 0x538   : > { %17797 = vst [vmem:[#allocation171_spill] sm:$0xff] %v14534_v51  ;;  %4841 = vrot.lane.b32.xlu0 %v14019_v40, %s17428_s22  ;;  %8515 = vmatprep.subr.mxu1 %v5766_v17  ;;  %v5410_v26 = vmul.f32 %v5338_v22, %v5280_v53  ;;  %v5409_v17 = vmul.f32 %v5334_v16, %v5283_v19 }
 0x539   : > { %8516 = vmatpush1.msra.mxu1 %v5765_v35  ;;  %5223 = vrot.lane.b32.xlu1 %v17743_v44, %s17427_s13  ;;  %v4912_v35 = vsel %vm434_vm7, %v14360_v9, %v14073_v6  ;;  %v4966_v53 = vrot.slane %v13940_v38, %v17772_v2  ;;  %v4908_v19 = vsel %vm434_vm7, %v17803_v31, %v17802_v42  ;;  %v17804_v6 = vld [vmem:[#allocation59_spill] sm:$0xff] }
 0x53a   : > { %v14552_v62 = vpop.permute.xlu0 %5993  ;;  %8517 = vmatprep.subr.mxu1 %v5426_v23  ;;  %v5394_v23 = vmul.f32 %v5338_v22, %v5279_v3  ;;  %v4911_v22 = vsel %vm434_vm7, %v17804_v6, %v17803_v31  ;;  %v17851_v6 = vld [vmem:[#allocation106_spill] sm:$0xff] }
 0x53b   : > { %17800 = vst [vmem:[#allocation110_spill] sm:$0xff] %v14552_v62  ;;  %8518 = vmatpush1.msra.mxu1 %v5425_v46  ;;  %v14558_v57 = vpop.permute.xlu1 %4877  ;;  %v5393_v46 = vmul.f32 %v5334_v16, %v5282_v49  ;;  %v4907_v16 = vsel %vm434_vm7, %v17807_v39, %v17806_v34  ;;  %v5053_v49 = vmul.f32 %v4962_v21, %v4912_v35  ;;  %v17811_v35 = vld [vmem:[#allocation185_spill] sm:$0xff] }
 0x53c   : > { %17801 = vst [vmem:[#allocation155_spill] sm:$0xff] %v14558_v57  ;;  %5599 = vrot.lane.b32.xlu0 %v17779_v30, %s17510_s30  ;;  %8519 = vmatprep.subr.mxu1 %v5410_v26  ;;  %v5054_v26 = vmul.f32 %v4966_v53, %v4909_v50  ;;  %v5038_v31 = vmul.f32 %v4966_v53, %v4908_v19 }
 0x53d   : > { %8520 = vmatpush1.msra.mxu1 %v5409_v17  ;;  %7543 = vrot.lane.b32.xlu1 %v14144_v55, %s17509_s16  ;;  %v17809_v17 = vld [vmem:[#allocation184_spill] sm:$0xff]  ;;  %v5037_v50 = vmul.f32 %v4962_v21, %v4911_v22  ;;  %v5022_v15 = vmul.f32 %v4966_v53, %v4907_v16  ;;  %v17816_v53 = vld [vmem:[#allocation167_spill] sm:$0xff] }
 0x53e   : > { %v14580_v3 = vpop.permute.xlu0 %5249  ;;  %8521 = vmatprep.subr.mxu1 %v5394_v23  ;;  %v4910_v42 = vsel %vm434_vm7, %v17809_v17, %v17807_v39  ;;  %v17810_v23 = vld [vmem:[#allocation124_spill] sm:$0xff]  ;;  %v17813_v39 = vld [vmem:[#allocation201_spill] sm:$0xff] }
 0x53f   : > { %17805 = vst [vmem:[#allocation85_spill] sm:$0xff] %v14580_v3  ;;  %8522 = vmatpush1.msra.mxu1 %v5393_v46  ;;  %v14586_v38 = vpop.permute.xlu1 %5955  ;;  %v7609_v46 = vsel %vm1739_vm0, %v17811_v35, %v17810_v23  ;;  %v7662_v19 = vrot.slane %v17813_v39, %v17773_v48  ;;  %v5021_v22 = vmul.f32 %v4962_v21, %v4910_v42 }
 0x540   : > { %17808 = vst [vmem:[#allocation56_spill] sm:$0xff] %v14586_v38  ;;  %5597 = vrot.lane.b32.xlu0 %v14159_v13, %s17510_s30  ;;  %8523 = vmatprep.subr.mxu1 %v5054_v26  ;;  %v7666_v38 = vrot.slane %v17813_v39, %v17772_v2  ;;  %v17814_v26 = vld [vmem:[#allocation181_spill] sm:$0xff] }
 0x541   : > { %8524 = vmatpush1.msra.mxu1 %v5053_v49  ;;  %5221 = vrot.lane.b32.xlu1 %v17756_v8, %s17427_s13  ;;  %v7605_v49 = vsel %vm1739_vm0, %v17814_v26, %v14472_v63  ;;  %v7608_v16 = vsel %vm1739_vm0, %v17816_v53, %v17814_v26  ;;  %v7753_v42 = vmul.f32 %v7662_v19, %v7609_v46  ;;  %v17817_v63 = vld [vmem:[#allocation58_spill] sm:$0xff] }
 0x542   : > { %v14600_v34 = vpop.permute.xlu0 %7539  ;;  %8525 = vmatprep.subr.mxu1 %v5038_v31  ;;  %v7604_v32 = vsel %vm1739_vm0, %v17817_v63, %v14414_v11  ;;  %v17820_v46 = vld [vmem:[#allocation42_spill] sm:$0xff]  ;;  %v17822_v11 = vld [vmem:[#allocation27_spill] sm:$0xff] }
 0x543   : > { %17812 = vst [vmem:[#allocation157_spill] sm:$0xff] %v14600_v34  ;;  %v7606_v61 = vsel %vm1739_vm0, %v17810_v23, %v14600_v34  ;;  %8526 = vmatpush1.msra.mxu1 %v5037_v50  ;;  %v14614_v31 = vpop.permute.xlu1 %5995  ;;  %v17818_v50 = vld [vmem:[#allocation147_spill] sm:$0xff]  ;;  %v7237_v53 = vsel %vm1557_vm1, %v17822_v11, %v17820_v46 }
 0x544   : > { %17815 = vst [vmem:[#allocation173_spill] sm:$0xff] %v14614_v31  ;;  %7551 = vrot.lane.b32.xlu0 %v17743_v44, %s17509_s16  ;;  %8527 = vmatprep.subr.mxu1 %v5022_v15  ;;  %v7754_v21 = vmul.f32 %v7666_v38, %v7606_v61  ;;  %v7607_v23 = vsel %vm1739_vm0, %v17818_v50, %v17817_v63 }
 0x545   : > { %8528 = vmatpush1.msra.mxu1 %v5021_v22  ;;  %7541 = vrot.lane.b32.xlu1 %v14019_v40, %s17509_s16  ;;  %v7738_v15 = vmul.f32 %v7666_v38, %v7605_v49  ;;  %v7737_v61 = vmul.f32 %v7662_v19, %v7608_v16  ;;  %v7722_v63 = vmul.f32 %v7666_v38, %v7604_v32  ;;  %v17823_v49 = vld [vmem:[#allocation203_spill] sm:$0xff] }
 0x546   : > { %v14632_v26 = vpop.permute.xlu0 %7167  ;;  %8539 = vmatprep.subr.mxu1 %v7754_v21  ;;  %v7294_v16 = vrot.slane %v17823_v49, %v17772_v2  ;;  %v7721_v21 = vmul.f32 %v7662_v19, %v7607_v23 }
 0x547   : > { %17819 = vst [vmem:[#allocation159_spill] sm:$0xff] %v14632_v26  ;;  %v7234_v34 = vsel %vm1557_vm1, %v17820_v46, %v14632_v26  ;;  %8540 = vmatpush2.msra.mxu1 %v7753_v42  ;;  %v14638_v22 = vpop.permute.xlu1 %5251  ;;  %v7290_v26 = vrot.slane %v17823_v49, %v17773_v48  ;;  %v17824_v42 = vld [vmem:[#allocation25_spill] sm:$0xff]  ;;  %v17825_v46 = vld [vmem:[#allocation38_spill] sm:$0xff] }
 0x548   : > { %17821 = vst [vmem:[#allocation124_spill] sm:$0xff] %v14638_v22  ;;  %5229 = vrot.lane.b32.xlu0 %v17767_v54, %s17427_s13  ;;  %8541 = vmatprep.subr.mxu1 %v7738_v15  ;;  %v7233_v50 = vsel %vm1557_vm1, %v17824_v42, %v14500_v33  ;;  %v7236_v32 = vsel %vm1557_vm1, %v17825_v46, %v17824_v42  ;;  %v17827_v15 = vld [vmem:[#allocation169_spill] sm:$0xff] }
 0x549   : > { %8542 = vmatpush2.msra.mxu1 %v7737_v61  ;;  %5219 = vrot.lane.b32.xlu1 %v17769_v0, %s17427_s13  ;;  %v7382_v19 = vmul.f32 %v7294_v16, %v7234_v34  ;;  %v7381_v23 = vmul.f32 %v7290_v26, %v7237_v53  ;;  %v7232_v11 = vsel %vm1557_vm1, %v17827_v15, %v14437_v58  ;;  %v17829_v33 = vld [vmem:[#allocation149_spill] sm:$0xff]  ;;  %v17830_v53 = vld [vmem:[#allocation60_spill] sm:$0xff] }
 0x54a   : > { %v14660_v38 = vpop.permute.xlu0 %6795  ;;  %8543 = vmatprep.subr.mxu1 %v7722_v63  ;;  %v7235_v35 = vsel %vm1557_vm1, %v17829_v33, %v17827_v15  ;;  %v7366_v63 = vmul.f32 %v7294_v16, %v7233_v50  ;;  %v7365_v34 = vmul.f32 %v7290_v26, %v7236_v32  ;;  %v14688_v50 = vrot.slane %v14290_v5, %v17772_v2  ;;  %v17843_v2 = vld [vmem:[#allocation95_spill] sm:$0xff] }
 0x54b   : > { %17826 = vst [vmem:[#allocation201_spill] sm:$0xff] %v14660_v38  ;;  %8544 = vmatpush2.msra.mxu1 %v7721_v21  ;;  %v14666_v61 = vpop.permute.xlu1 %5625  ;;  %v6862_v42 = vsel %vm1375_vm2, %v17830_v53, %v14660_v38  ;;  %v17831_v21 = vld [vmem:[#allocation186_spill] sm:$0xff]  ;;  %v7349_v32 = vmul.f32 %v7290_v26, %v7235_v35  ;;  %v17833_v38 = vld [vmem:[#allocation17_spill] sm:$0xff] }
 0x54c   : > { %17828 = vst [vmem:[#allocation181_spill] sm:$0xff] %v14666_v61  ;;  %7549 = vrot.lane.b32.xlu0 %v17756_v8, %s17509_s16  ;;  %8545 = vmatprep.subr.mxu1 %v7382_v19  ;;  %v6865_v15 = vsel %vm1375_vm2, %v17831_v21, %v17830_v53  ;;  %v7350_v19 = vmul.f32 %v7294_v16, %v7232_v11 }
 0x54d   : > { %8546 = vmatpush2.msra.mxu1 %v7381_v23  ;;  %7173 = vrot.lane.b32.xlu1 %v14124_v59, %s17511_s14  ;;  %v14692_v23 = vrot.slane %v14290_v5, %v17773_v48  ;;  %v6861_v33 = vsel %vm1375_vm2, %v17833_v38, %v14524_v1  ;;  %v7010_v35 = vmul.f32 %v14688_v50, %v6862_v42  ;;  %v17837_v42 = vld [vmem:[#allocation120_spill] sm:$0xff]  ;;  %v17844_v1 = vld [vmem:[#allocation78_spill] sm:$0xff] }
 0x54e   : > { %v14684_v58 = vpop.permute.xlu0 %5623  ;;  %8547 = vmatprep.subr.mxu1 %v7366_v63  ;;  %v17835_v63 = vld [vmem:[#allocation19_spill] sm:$0xff] }
 0x54f   : > { %17832 = vst [vmem:[#allocation58_spill] sm:$0xff] %v14684_v58  ;;  %8548 = vmatpush2.msra.mxu1 %v7365_v34  ;;  %v14698_v53 = vpop.permute.xlu1 %4881  ;;  %v6864_v11 = vsel %vm1375_vm2, %v17835_v63, %v17833_v38  ;;  %v7009_v26 = vmul.f32 %v14692_v23, %v6865_v15  ;;  %v6994_v34 = vmul.f32 %v14688_v50, %v6861_v33  ;;  %v17838_v15 = vld [vmem:[#allocation111_spill] sm:$0xff] }
 0x550   : > { %17834 = vst [vmem:[#allocation42_spill] sm:$0xff] %v14698_v53  ;;  %5227 = vrot.lane.b32.xlu0 %v17779_v30, %s17427_s13  ;;  %8549 = vmatprep.subr.mxu1 %v7350_v19  ;;  %v6993_v48 = vmul.f32 %v14692_v23, %v6864_v11  ;;  %v6042_v19 = vsel %vm979_vm4, %v17838_v15, %v17837_v42  ;;  %v14727_v33 = vld [vmem:[%s17096_s1 + $0x30] sm:$0xff] }
 0x551   : > { %8550 = vmatpush2.msra.mxu1 %v7349_v32  ;;  %4851 = vrot.lane.b32.xlu1 %v17743_v44, %s17428_s22  ;;  %v17839_v32 = vld [vmem:[#allocation15_spill] sm:$0xff]  ;;  %v6041_v63 = vsel %vm979_vm4, %v17844_v1, %v17843_v2 }
 0x552   : > { %v14710_v16 = vpop.permute.xlu0 %4879  ;;  %8551 = vmatprep.subr.mxu1 %v7010_v35  ;;  %v6054_v11 = vrot.slane %v14727_v33, %v17839_v32 }
 0x553   : > { %17836 = vst [vmem:[#allocation203_spill] sm:$0xff] %v14710_v16  ;;  %8552 = vmatpush2.msra.mxu1 %v7009_v26  ;;  %v14714_v38 = vpop.permute.xlu1 %6785  ;;  %v17841_v26 = vld [vmem:[#allocation136_spill] sm:$0xff] }
 0x554   : > { %7547 = vrot.lane.b32.xlu0 %v17769_v0, %s17509_s16  ;;  %8553 = vmatprep.subr.mxu1 %v6994_v34 }
 0x555   : > { %8554 = vmatpush2.msra.mxu1 %v6993_v48  ;;  %7171 = vrot.lane.b32.xlu1 %v14144_v55, %s17511_s14  ;;  %v6045_v48 = vsel %vm979_vm4, %v14614_v31, %v17838_v15  ;;  %v6044_v15 = vsel %vm979_vm4, %v14552_v62, %v17844_v1  ;;  %v17845_v31 = vld [vmem:[#allocation161_spill] sm:$0xff]  ;;  %v17849_v62 = vld [vmem:[#allocation14_spill] sm:$0xff] }
 0x556   : > { %v14731_v35 = vpop.permute.xlu0 %5997  ;;  %v6148_v46 = vmul.f32 %v17845_v31, %v6042_v19  ;;  %v6147_v2 = vmul.f32 %v6054_v11, %v6045_v48  ;;  %v6132_v1 = vmul.f32 %v17845_v31, %v6041_v63  ;;  %v14770_v19 = vld [vmem:[%s17096_s1 + $0x20] sm:$0xff]  ;;  %v6131_v56 = vmul.f32 %v6054_v11, %v6044_v15 }
 0x557   : > { %17840 = vst [vmem:[#allocation25_spill] sm:$0xff] %v14731_v35  ;;  %v6046_v34 = vsel %vm979_vm4, %v14731_v35, %v17841_v26  ;;  %v14741_v42 = vpop.permute.xlu1 %5953  ;;  %v17846_v26 = vld [vmem:[#allocation154_spill] sm:$0xff]  ;;  %v5673_v31 = vsel %vm797_vm5, %v14684_v58, %v17851_v6 }
 0x558   : > { %17842 = vst [vmem:[#allocation169_spill] sm:$0xff] %v14741_v42  ;;  %v6163_v21 = vmul.f32 %v6054_v11, %v6046_v34  ;;  %5225 = vrot.lane.b32.xlu0 %v14159_v13, %s17427_s13  ;;  %v17847_v35 = vld [vmem:[#allocation146_spill] sm:$0xff] }
 0x559   : > { %4849 = vrot.lane.b32.xlu1 %v17756_v8, %s17428_s22  ;;  %v5671_v42 = vsel %vm797_vm5, %v17847_v35, %v17846_v26  ;;  %v5674_v17 = vsel %vm797_vm5, %v14666_v61, %v17847_v35  ;;  %v5686_v26 = vrot.slane %v14770_v19, %v17849_v62  ;;  %v17852_v35 = vld [vmem:[#allocation93_spill] sm:$0xff]  ;;  %v17856_v58 = vld [vmem:[#allocation138_spill] sm:$0xff] }
 0x55a   : > { %8275 = vmatpush1.msra.mxu0 %v6163_v21  ;;  %v14760_v34 = vpop.permute.xlu0 %5253  ;;  %v17850_v21 = vld [vmem:[#allocation126_spill] sm:$0xff] }
 0x55b   : > { %17848 = vst [vmem:[#allocation60_spill] sm:$0xff] %v14760_v34  ;;  %8276 = vmatprep.subr.mxu0 %v6148_v46  ;;  %v14774_v48 = vpop.permute.xlu1 %6417  ;;  %v5670_v9 = vsel %vm797_vm5, %v17851_v6, %v17850_v21  ;;  %v5682_v46 = vrot.slane %v14770_v19, %v17839_v32  ;;  %v5792_v63 = vmul.f32 %v5686_v26, %v5671_v42  ;;  %v17853_v21 = vld [vmem:[#allocation81_spill] sm:$0xff] }
 0x55c   : > { %7179 = vrot.lane.b32.xlu0 %v17743_v44, %s17511_s14  ;;  %8277 = vmatpush1.msra.mxu0 %v6147_v2  ;;  %v5669_v11 = vsel %vm797_vm5, %v17853_v21, %v17852_v35  ;;  %v5672_v2 = vsel %vm797_vm5, %v14534_v51, %v17853_v21  ;;  %v5776_v6 = vmul.f32 %v5686_v26, %v5670_v9  ;;  %v14815_v9 = vld [vmem:[%s17096_s1 + $0x10] sm:$0xff]  ;;  %v17857_v35 = vld [vmem:[#allocation122_spill] sm:$0xff]  ;;  %v17858_v21 = vld [vmem:[#allocation113_spill] sm:$0xff] }
 0x55d   : > { %8278 = vmatprep.subr.mxu0 %v6132_v1  ;;  %7169 = vrot.lane.b32.xlu1 %v14019_v40, %s17511_s14  ;;  %v5791_v15 = vmul.f32 %v5682_v46, %v5674_v17  ;;  %v17855_v1 = vld [vmem:[#allocation162_spill] sm:$0xff]  ;;  %v5775_v29 = vmul.f32 %v5682_v46, %v5673_v31  ;;  %v5760_v17 = vmul.f32 %v5686_v26, %v5669_v11  ;;  %v14821_v31 = vpop.f32.mrf.mxu0  ;;  %v17859_v11 = vld [vmem:[#allocation152_spill] sm:$0xff]  ;;  %v17861_v51 = vld [vmem:[#allocation97_spill] sm:$0xff] }
 0x55e   : > { %8279 = vmatpush1.msra.mxu0 %v6131_v56  ;;  %v14794_v61 = vpop.permute.xlu0 %5961  ;;  %v5299_v27 = vsel %vm615_vm6, %v17856_v58, %v17855_v1  ;;  %v5302_v56 = vsel %vm615_vm6, %v14760_v34, %v17856_v58  ;;  %v5298_v58 = vsel %vm615_vm6, %v17858_v21, %v17857_v35  ;;  %v5310_v26 = vrot.slane %v14815_v9, %v17839_v32 }
 0x55f   : > { %8280 = vmatprep.subr.mxu0 %v5792_v63  ;;  %v14800_v42 = vpop.permute.xlu1 %5951  ;;  %v5314_v63 = vrot.slane %v14815_v9, %v17849_v62  ;;  %v5301_v34 = vsel %vm615_vm6, %v14638_v22, %v17858_v21  ;;  %v17864_v22 = vld [vmem:[#allocation148_spill] sm:$0xff] }
 0x560   : > { %17854 = vst [vmem:[#allocation17_spill] sm:$0xff] %v14800_v42  ;;  %4857 = vrot.lane.b32.xlu0 %v17767_v54, %s17428_s22  ;;  %8281 = vmatpush1.msra.mxu0 %v5791_v15  ;;  %v5759_v15 = vmul.f32 %v5682_v46, %v5672_v2  ;;  %v17862_v42 = vld [vmem:[#allocation80_spill] sm:$0xff] }
 0x561   : > { %8282 = vmatprep.subr.mxu0 %v5776_v6  ;;  %4847 = vrot.lane.b32.xlu1 %v17769_v0, %s17428_s22  ;;  %v6863_v6 = vsel %vm1375_vm2, %v17859_v11, %v14714_v38  ;;  %v5420_v2 = vmul.f32 %v5314_v63, %v5299_v27  ;;  %v5419_v11 = vmul.f32 %v5310_v26, %v5302_v56  ;;  %v17863_v56 = vld [vmem:[#allocation36_spill] sm:$0xff] }
 0x562   : > { %8283 = vmatpush1.msra.mxu0 %v5775_v29  ;;  %v14833_v1 = vpop.permute.xlu0 %6791  ;;  %v5297_v29 = vsel %vm615_vm6, %v17862_v42, %v17861_v51  ;;  %v6977_v27 = vmul.f32 %v14692_v23, %v6863_v6  ;;  %v14859_v51 = vpop.f32.mrf.mxu0  ;;  %v4930_v23 = vsel %vm434_vm7, %v14698_v53, %v17864_v22  ;;  %v17866_v6 = vld [vmem:[#allocation128_spill] sm:$0xff] }
 0x563   : > { %17860 = vst [vmem:[#allocation120_spill] sm:$0xff] %v14833_v1  ;;  %v6860_v46 = vsel %vm1375_vm2, %v14714_v38, %v14833_v1  ;;  %8284 = vmatprep.subr.mxu0 %v5760_v17  ;;  %v14843_v35 = vpop.permute.xlu1 %6415  ;;  %v5300_v38 = vsel %vm615_vm6, %v14580_v3, %v17862_v42  ;;  %v5404_v17 = vmul.f32 %v5314_v63, %v5298_v58  ;;  %v14874_v58 = vld [vmem:[%s17096_s1] sm:$0xff]  ;;  %v17873_v53 = vld [vmem:[#allocation156_spill] sm:$0xff] }
 0x564   : > { %7177 = vrot.lane.b32.xlu0 %v17756_v8, %s17511_s14  ;;  %8285 = vmatpush1.msra.mxu0 %v5759_v15  ;;  %v6978_v21 = vmul.f32 %v14688_v50, %v6860_v46  ;;  %v4927_v15 = vsel %vm434_vm7, %v17864_v22, %v17863_v56  ;;  %v5403_v50 = vmul.f32 %v5310_v26, %v5301_v34 }
 0x565   : > { %8286 = vmatprep.subr.mxu0 %v5420_v2  ;;  %6801 = vrot.lane.b32.xlu1 %v14124_v59, %s17432_s24  ;;  %v5388_v42 = vmul.f32 %v5314_v63, %v5297_v29  ;;  %v4942_v34 = vrot.slane %v14874_v58, %v17849_v62  ;;  %v17867_v2 = vld [vmem:[#allocation108_spill] sm:$0xff]  ;;  %v5387_v56 = vmul.f32 %v5310_v26, %v5300_v38  ;;  %v17868_v26 = vld [vmem:[#allocation94_spill] sm:$0xff] }
 0x566   : > { %8287 = vmatpush1.msra.mxu0 %v5419_v11  ;;  %8555 = vmatprep.subr.mxu1 %v6978_v21  ;;  %v14865_v46 = vpop.permute.xlu0 %5959  ;;  %v4926_v21 = vsel %vm434_vm7, %v17867_v2, %v17866_v6  ;;  %v4938_v22 = vrot.slane %v14874_v58, %v17839_v32  ;;  %v4929_v63 = vsel %vm434_vm7, %v14710_v16, %v17867_v2  ;;  %v17869_v38 = vld [vmem:[#allocation82_spill] sm:$0xff] }
 0x567   : > { %8288 = vmatprep.subr.mxu0 %v5404_v17  ;;  %8556 = vmatpush2.msra.mxu1 %v6977_v27  ;;  %v14878_v11 = vpop.permute.xlu1 %5583  ;;  %v5048_v29 = vmul.f32 %v4942_v34, %v4927_v15  ;;  %v14894_v27 = vpop.f32.mrf.mxu0  ;;  %v4925_v17 = vsel %vm434_vm7, %v17869_v38, %v17868_v26  ;;  %v4928_v15 = vsel %vm434_vm7, %v14558_v57, %v17869_v38 }
 0x568   : > { %17865 = vst [vmem:[#allocation111_spill] sm:$0xff] %v14878_v11  ;;  %4855 = vrot.lane.b32.xlu0 %v17779_v30, %s17428_s22  ;;  %8289 = vmatpush1.msra.mxu0 %v5403_v50  ;;  %v5047_v6 = vmul.f32 %v4938_v22, %v4930_v23  ;;  %v17870_v50 = vld [vmem:[#allocation188_spill] sm:$0xff]  ;;  %v5032_v23 = vmul.f32 %v4942_v34, %v4926_v21 }
 0x569   : > { %8290 = vmatprep.subr.mxu0 %v5388_v42  ;;  %6799 = vrot.lane.b32.xlu1 %v14144_v55, %s17432_s24  ;;  %v6493_v3 = vsel %vm1193_vm3, %v17870_v50, %v14774_v48  ;;  %v7642_v16 = vrot.slane %v17813_v39, %v17849_v62  ;;  %v5031_v11 = vmul.f32 %v4938_v22, %v4929_v63 }
 0x56a   : > { %8291 = vmatpush1.msra.mxu0 %v5387_v56  ;;  %v14904_v2 = vpop.permute.xlu0 %6423  ;;  %v17872_v56 = vld [vmem:[#allocation115_spill] sm:$0xff]  ;;  %v5016_v57 = vmul.f32 %v4942_v34, %v4925_v17  ;;  %v7638_v63 = vrot.slane %v17813_v39, %v17839_v32  ;;  %v5015_v50 = vmul.f32 %v4938_v22, %v4928_v15  ;;  %v17879_v39 = vld [vmem:[#allocation68_spill] sm:$0xff] }
 0x56b   : > { %17871 = vst [vmem:[#allocation136_spill] sm:$0xff] %v14904_v2  ;;  %v6490_v42 = vsel %vm1193_vm3, %v14774_v48, %v14904_v2  ;;  %8292 = vmatprep.subr.mxu0 %v5048_v29  ;;  %v14914_v26 = vpop.permute.xlu1 %6437  ;;  %v7624_v1 = vsel %vm1739_vm0, %v17873_v53, %v17872_v56  ;;  %v17874_v48 = vld [vmem:[#allocation140_spill] sm:$0xff]  ;;  %v6637_v29 = vmul.f32 %v14384_v37, %v6493_v3  ;;  %v4555_v56 = vpop.f32.mrf.mxu0  ;;  %v17875_v2 = vld [vmem:[#allocation83_spill] sm:$0xff] }
 0x56c   : > { %7175 = vrot.lane.b32.xlu0 %v17769_v0, %s17511_s14  ;;  %8293 = vmatpush1.msra.mxu0 %v5047_v6  ;;  %v6638_v38 = vmul.f32 %v14375_v41, %v6490_v42  ;;  %v7627_v21 = vsel %vm1739_vm0, %v17874_v48, %v17873_v53  ;;  %v17876_v6 = vld [vmem:[#allocation132_spill] sm:$0xff]  ;;  %v17877_v3 = vld [vmem:[#allocation119_spill] sm:$0xff]  ;;  %v7748_v17 = vmul.f32 %v7642_v16, %v7624_v1  ;;  %v17880_v48 = vld [vmem:[#allocation98_spill] sm:$0xff] }
 0x56d   : > { %8294 = vmatprep.subr.mxu0 %v5032_v23  ;;  %7557 = vrot.lane.b32.xlu1 %v17767_v54, %s17509_s16  ;;  %v7623_v42 = vsel %vm1739_vm0, %v17876_v6, %v17875_v2  ;;  %v7626_v34 = vsel %vm1739_vm0, %v17877_v3, %v17876_v6  ;;  %v7622_v2 = vsel %vm1739_vm0, %v17880_v48, %v17879_v39  ;;  %v17881_v15 = vld [vmem:[#allocation28_spill] sm:$0xff]  ;;  %v17882_v1 = vld [vmem:[#allocation86_spill] sm:$0xff] }
 0x56e   : > { %8295 = vmatpush1.msra.mxu0 %v5031_v11  ;;  %8557 = vmatprep.subr.mxu1 %v6638_v38  ;;  %v14938_v53 = vpop.permute.xlu0 %5957  ;;  %v14952_v11 = vrot.slane %v14290_v5, %v17839_v32  ;;  %v7747_v22 = vmul.f32 %v7638_v63, %v7627_v21  ;;  %v7625_v38 = vsel %vm1739_vm0, %v17882_v1, %v17880_v48  ;;  %v17883_v39 = vld [vmem:[#allocation112_spill] sm:$0xff] }
 0x56f   : > { %8296 = vmatprep.subr.mxu0 %v5016_v57  ;;  %8558 = vmatpush2.msra.mxu1 %v6637_v29  ;;  %v14944_v23 = vpop.permute.xlu1 %5581  ;;  %v4556_v57 = vadd.f32 %v4555_v56, %v17881_v15  ;;  %v7732_v29 = vmul.f32 %v7642_v16, %v7623_v42  ;;  %v7266_v6 = vrot.slane %v17823_v49, %v17839_v32  ;;  %v17884_v3 = vld [vmem:[#allocation164_spill] sm:$0xff]  ;;  %v17885_v56 = vld [vmem:[#allocation170_spill] sm:$0xff]  ;;  %v17889_v32 = vld [vmem:[#allocation129_spill] sm:$0xff] }
 0x570   : > { %17878 = vst [vmem:[#allocation95_spill] sm:$0xff] %v14944_v23  ;;  %4853 = vrot.lane.b32.xlu0 %v14159_v13, %s17428_s22  ;;  %8297 = vmatpush1.msra.mxu0 %v5015_v50  ;;  %v7731_v21 = vmul.f32 %v7638_v63, %v7626_v34  ;;  %v7252_v50 = vsel %vm1557_vm1, %v17884_v3, %v17883_v39  ;;  %v17887_v42 = vld [vmem:[#allocation150_spill] sm:$0xff] }
 0x571   : > { %8308 = vmatprep.subr.mxu0 %v7748_v17  ;;  %6797 = vrot.lane.b32.xlu1 %v14019_v40, %s17432_s24  ;;  %v6492_v15 = vsel %vm1193_vm3, %v17885_v56, %v14843_v35  ;;  %v7255_v17 = vsel %vm1557_vm1, %v17887_v42, %v17884_v3  ;;  %v7716_v39 = vmul.f32 %v7642_v16, %v7622_v2  ;;  %v17888_v40 = vld [vmem:[#allocation84_spill] sm:$0xff]  ;;  %v17891_v2 = vld [vmem:[#allocation70_spill] sm:$0xff] }
 0x572   : > { %8309 = vmatpush2.msra.mxu0 %v7747_v22  ;;  %v14973_v48 = vpop.permute.xlu0 %6421  ;;  %v7270_v1 = vrot.slane %v17823_v49, %v17849_v62  ;;  %v7715_v22 = vmul.f32 %v7638_v63, %v7625_v38  ;;  %v7251_v56 = vsel %vm1557_vm1, %v17889_v32, %v17888_v40  ;;  %v6621_v49 = vmul.f32 %v14384_v37, %v6492_v15  ;;  %v17892_v40 = vld [vmem:[#allocation103_spill] sm:$0xff] }
 0x573   : > { %17886 = vst [vmem:[#allocation78_spill] sm:$0xff] %v14973_v48  ;;  %v6489_v34 = vsel %vm1193_vm3, %v14843_v35, %v14973_v48  ;;  %8310 = vmatprep.subr.mxu0 %v7732_v29  ;;  %v14985_v23 = vpop.permute.xlu1 %5579  ;;  %v17890_v35 = vld [vmem:[#allocation114_spill] sm:$0xff]  ;;  %v7250_v38 = vsel %vm1557_vm1, %v17892_v40, %v17891_v2  ;;  %v7375_v29 = vmul.f32 %v7266_v6, %v7255_v17 }
 0x574   : > { %6807 = vrot.lane.b32.xlu0 %v17743_v44, %s17432_s24  ;;  %8311 = vmatpush2.msra.mxu0 %v7731_v21  ;;  %v6622_v3 = vmul.f32 %v14375_v41, %v6489_v34  ;;  %v7254_v16 = vsel %vm1557_vm1, %v17890_v35, %v17889_v32  ;;  %v7376_v63 = vmul.f32 %v7270_v1, %v7252_v50  ;;  %v17893_v21 = vld [vmem:[#allocation51_spill] sm:$0xff]  ;;  %v17894_v50 = vld [vmem:[#allocation88_spill] sm:$0xff]  ;;  %v17935_v48 = vld [vmem:[#allocation74_spill] sm:$0xff] }
 0x575   : > { %8312 = vmatprep.subr.mxu0 %v7716_v39  ;;  %7555 = vrot.lane.b32.xlu1 %v17779_v30, %s17509_s16  ;;  %v6898_v32 = vrot.slane %v14290_v5, %v17849_v62  ;;  %v15010_v37 = vadd.f32 %v4556_v57, %v17893_v21  ;;  %v7253_v15 = vsel %vm1557_vm1, %v17894_v50, %v17892_v40  ;;  %v15019_v34 = vld [vmem:[%s17096_s1 + $0x58] sm:$0xff]  ;;  %v17895_v5 = vld [vmem:[#allocation158_spill] sm:$0xff] }
 0x576   : > { %8313 = vmatpush2.msra.mxu0 %v7715_v22  ;;  %8559 = vmatprep.subr.mxu1 %v6622_v3  ;;  %v15005_v41 = vpop.permute.xlu0 %5589  ;;  %v7360_v17 = vmul.f32 %v7270_v1, %v7251_v56  ;;  %v7359_v22 = vmul.f32 %v7266_v6, %v7254_v16  ;;  %v6880_v57 = vsel %vm1375_vm2, %v17895_v5, %v17755_v18  ;;  %v17900_v40 = vld [vmem:[#allocation137_spill] sm:$0xff] }
 0x577   : > { %8314 = vmatprep.subr.mxu0 %v7376_v63  ;;  %8560 = vmatpush2.msra.mxu1 %v6621_v49  ;;  %v15021_v39 = vpop.permute.xlu1 %5211  ;;  %v15031_v3 = vrot.slane %v15019_v34, %v17649_v24  ;;  %v17897_v63 = vld [vmem:[#allocation143_spill] sm:$0xff]  ;;  %v7344_v2 = vmul.f32 %v7270_v1, %v7250_v38  ;;  %v7343_v18 = vmul.f32 %v7266_v6, %v7253_v15  ;;  %v17901_v21 = vld [vmem:[#allocation29_spill] sm:$0xff] }
 0x578   : > { %6805 = vrot.lane.b32.xlu0 %v17756_v8, %s17432_s24  ;;  %8315 = vmatpush2.msra.mxu0 %v7375_v29  ;;  %v6883_v56 = vsel %vm1375_vm2, %v17897_v63, %v17895_v5  ;;  %v17898_v49 = vld [vmem:[#allocation11_spill] sm:$0xff]  ;;  %v6879_v29 = vsel %vm1375_vm2, %v17900_v40, %v17758_v10  ;;  %v6479_v5 = vsel %vm1193_vm3, %v17901_v21, %v14914_v26 }
 0x579   : > { %17896 = vst [vmem:[#allocation161_spill] sm:$0xff] %v15031_v3  ;;  %v15039_v16 = vrot.slane %v15019_v34, %v17898_v49  ;;  %8316 = vmatprep.subr.mxu0 %v7360_v17  ;;  %6429 = vrot.lane.b32.xlu1 %v14124_v59, %s17426_s12  ;;  %v17903_v1 = vld [vmem:[#allocation123_spill] sm:$0xff]  ;;  %v7004_v38 = vmul.f32 %v6898_v32, %v6880_v57  ;;  %v17904_v17 = vld [vmem:[#allocation69_spill] sm:$0xff] }
 0x57a   : > { %8317 = vmatpush2.msra.mxu0 %v7359_v22  ;;  %v15051_v63 = vpop.permute.xlu0 %6443  ;;  %8562 = vmatmul.mubr.f32.vlgmr.msra.gmra.mxu1 %v14380_v12  ;;  %v6882_v6 = vsel %vm1375_vm2, %v17903_v1, %v17900_v40  ;;  %v17905_v22 = vld [vmem:[#allocation102_spill] sm:$0xff]  ;;  %v7003_v50 = vmul.f32 %v14952_v11, %v6883_v56  ;;  %v17906_v57 = vld [vmem:[#allocation89_spill] sm:$0xff]  ;;  %v6988_v1 = vmul.f32 %v6898_v32, %v6879_v29 }
 0x57b   : > { %17899 = vst [vmem:[#allocation154_spill] sm:$0xff] %v15039_v16  ;;  %17902 = vst [vmem:[#allocation146_spill] sm:$0xff] %v15051_v63  ;;  %v6476_v10 = vsel %vm1193_vm3, %v14914_v26, %v15051_v63  ;;  %8318 = vmatprep.subr.mxu0 %v7344_v2  ;;  %v15062_v15 = vpop.permute.xlu1 %5209  ;;  %10865 = vmatprep.mubr.msk.f32.mxu1 %vm8259_vm10, %v14391_v60  ;;  %v6878_v35 = vsel %vm1375_vm2, %v17905_v22, %v17904_v17  ;;  %v17907_v17 = vld [vmem:[#allocation18_spill] sm:$0xff]  ;;  %v17934_v63 = vld [vmem:[#allocation116_spill] sm:$0xff] }
 0x57c   : > { %7563 = vrot.lane.b32.xlu0 %v15010_v37, %s17509_s16  ;;  %8319 = vmatpush2.msra.mxu0 %v7343_v18  ;;  %v6610_v26 = vmul.f32 %v15031_v3, %v6476_v10  ;;  %v6881_v2 = vsel %vm1375_vm2, %v17906_v57, %v17905_v22  ;;  %v6609_v40 = vmul.f32 %v15039_v16, %v6479_v5  ;;  %v17908_v18 = vld [vmem:[#allocation166_spill] sm:$0xff] }
 0x57d   : > { %8320 = vmatprep.subr.mxu0 %v7004_v38  ;;  %7553 = vrot.lane.b32.xlu1 %v14159_v13, %s17509_s16  ;;  %v4550_v56 = vadd.f32 %v14859_v51, %v17907_v17  ;;  %v6987_v42 = vmul.f32 %v14952_v11, %v6882_v6  ;;  %v6508_v10 = vsel %vm1193_vm3, %v17908_v18, %v17764_v45  ;;  %v17909_v51 = vld [vmem:[#allocation153_spill] sm:$0xff]  ;;  %v17910_v45 = vld [vmem:[#allocation131_spill] sm:$0xff] }
 0x57e   : > { %8321 = vmatpush2.msra.mxu0 %v7003_v50  ;;  %8651 = vmatprep.subr.mxu1 %v6610_v26  ;;  %v15088_v22 = vpop.permute.xlu0 %5587  ;;  %v6972_v29 = vmul.f32 %v6898_v32, %v6878_v35  ;;  %v6971_v38 = vmul.f32 %v14952_v11, %v6881_v2  ;;  %v6511_v6 = vsel %vm1193_vm3, %v17909_v51, %v17908_v18  ;;  %v17911_v35 = vld [vmem:[#allocation92_spill] sm:$0xff]  ;;  %v17913_v26 = vld [vmem:[#allocation118_spill] sm:$0xff]  ;;  %v17915_v17 = vld [vmem:[#allocation91_spill] sm:$0xff] }
 0x57f   : > { %8322 = vmatprep.subr.mxu0 %v6988_v1  ;;  %8652 = vmatpush1.msra.mxu1 %v6609_v40  ;;  %v15090_v5 = vpop.permute.xlu1 %5967  ;;  %v6507_v50 = vsel %vm1193_vm3, %v17910_v45, %v17768_v20  ;;  %v6632_v32 = vmul.f32 %v17911_v35, %v6508_v10  ;;  %v17912_v11 = vld [vmem:[#allocation48_spill] sm:$0xff]  ;;  %v6510_v2 = vsel %vm1193_vm3, %v17913_v26, %v17910_v45  ;;  %v17914_v40 = vld [vmem:[#allocation33_spill] sm:$0xff]  ;;  %v17916_v10 = vld [vmem:[#allocation183_spill] sm:$0xff] }
 0x580   : > { %6803 = vrot.lane.b32.xlu0 %v17769_v0, %s17432_s24  ;;  %8323 = vmatpush2.msra.mxu0 %v6987_v42  ;;  %v15106_v1 = vadd.f32 %v4550_v56, %v17912_v11  ;;  %v15117_v20 = vrot.slane %v14371_v28, %v17914_v40  ;;  %v6631_v18 = vmul.f32 %v17915_v17, %v6511_v6  ;;  %v17917_v45 = vld [vmem:[#allocation32_spill] sm:$0xff]  ;;  %v17933_v51 = vld [vmem:[#allocation174_spill] sm:$0xff] }
 0x581   : > { %8653 = vmatprep.subr.mxu1 %v17767_v54  ;;  %8324 = vmatprep.subr.mxu0 %v6972_v29  ;;  %v6494_v56 = vsel %vm1193_vm3, %v17916_v10, %v17775_v52  ;;  %v6616_v6 = vmul.f32 %v17911_v35, %v6507_v50  ;;  %v6615_v11 = vmul.f32 %v17915_v17, %v6510_v2  ;;  %v17918_v52 = vld [vmem:[#allocation10_spill] sm:$0xff]  ;;  %v17919_v35 = vld [vmem:[#allocation23_spill] sm:$0xff] }
 0x582   : > { %8654 = vmatpush1.msra.mxu1 %v17743_v44  ;;  %8325 = vmatpush2.msra.mxu0 %v6971_v38  ;;  %v15113_v42 = vpop.permute.xlu0 %5585  ;;  %v15129_v38 = vrot.slane %v14371_v28, %v17917_v45  ;;  %v6604_v26 = vmul.f32 %v15117_v20, %v6494_v56  ;;  %v4546_v2 = vadd.f32 %v14821_v31, %v17919_v35  ;;  %v15163_v31 = vld [vmem:[%s17096_s1 + $0x38] sm:$0xff]  ;;  %v17923_v56 = vld [vmem:[#allocation75_spill] sm:$0xff] }
 0x583   : > { %8655 = vmatprep.subr.mxu1 %v17779_v30  ;;  %8326 = vmatprep.subr.mxu0 %v6632_v32  ;;  %v15125_v29 = vpop.permute.xlu1 %5207  ;;  %v6497_v32 = vsel %vm1193_vm3, %v17918_v52, %v17916_v10  ;;  %v17922_v10 = vld [vmem:[#allocation105_spill] sm:$0xff]  ;;  %v15182_v52 = vrot.slane %v15163_v31, %v17649_v24  ;;  %v6029_v16 = vsel %vm979_vm4, %v17933_v51, %v13996_v36  ;;  %v17936_v36 = vld [vmem:[#allocation142_spill] sm:$0xff] }
 0x584   : > { %8656 = vmatpush1.msra.mxu1 %v17756_v8  ;;  %7561 = vrot.lane.b32.xlu0 %v15106_v1, %s17509_s16  ;;  %v6603_v17 = vmul.f32 %v15129_v38, %v6497_v32  ;;  %v6070_v32 = vrot.slane %v14727_v33, %v17917_v45  ;;  %v17926_v35 = vld [vmem:[#allocation125_spill] sm:$0xff] }
 0x585   : > { %8327 = vmatpush2.msra.mxu0 %v6631_v18  ;;  %8657 = vmatprep.subr.mxu1 %v14159_v13  ;;  %v17920_v18 = vld [vmem:[#allocation35_spill] sm:$0xff] }
 0x586   : > { %8328 = vmatprep.subr.mxu0 %v6616_v6  ;;  %8658 = vmatpush1.msra.mxu1 %v17769_v0  ;;  %v15142_v28 = vpop.permute.xlu0 %5217  ;;  %v17924_v6 = vld [vmem:[#allocation34_spill] sm:$0xff] }
 0x587   : > { %6427 = vrot.lane.b32.xlu1 %v14144_v55, %s17426_s12  ;;  %8329 = vmatpush2.msra.mxu0 %v6615_v11  ;;  %v15147_v50 = vpop.permute.xlu1 %5965  ;;  %v17925_v11 = vld [vmem:[#allocation45_spill] sm:$0xff] }
 0x588   : > { %8420 = vmatprep.subr.mxu0 %v6604_v26  ;;  %6435 = vrot.lane.b32.xlu0 %v17743_v44, %s17426_s12 }
 0x589   : > { %8331 = vmatmul.mubr.f32.vlgmr.msra.gmra.mxu0 %v14380_v12  ;;  %8568 = vmatmul.mubr.f32.gmra.mxu1 %v14421_v25  ;;  %v17921_v12 = vld [vmem:[#allocation47_spill] sm:$0xff] }
 0x58a   : > { %8421 = vmatpush1.msra.mxu0 %v6603_v17  ;;  %v15156_v0 = vpop.permute.xlu0 %5215  ;;  %10859 = vmatprep.mubr.msk.f32.mxu0 %vm8259_vm10, %v14391_v60  ;;  %v15171_v26 = vadd.f32 %v4546_v2, %v17921_v12  ;;  %v6031_v60 = vsel %vm979_vm4, %v17923_v56, %v17922_v10  ;;  %v6034_v2 = vsel %vm979_vm4, %v17926_v35, %v17923_v56  ;;  %v17927_v17 = vld [vmem:[#allocation31_spill] sm:$0xff]  ;;  %v17928_v12 = vld [vmem:[#allocation196_spill] sm:$0xff] }
 0x58b   : > { %8422 = vmatprep.subr.mxu0 %v17920_v18  ;;  %7185 = vrot.lane.b32.xlu1 %v17767_v54, %s17511_s14  ;;  %v15168_v44 = vpop.permute.xlu1 %4839  ;;  %v6074_v18 = vrot.slane %v14727_v33, %v17914_v40  ;;  %v17929_v10 = vld [vmem:[#allocation99_spill] sm:$0xff]  ;;  %v6030_v57 = vsel %vm979_vm4, %v17928_v12, %v14146_v7  ;;  %v15204_v56 = vrot.slane %v15163_v31, %v17898_v49  ;;  %v17932_v33 = vld [vmem:[#allocation133_spill] sm:$0xff] }
 0x58c   : > { %8423 = vmatpush1.msra.mxu0 %v17924_v6  ;;  %7559 = vrot.lane.b32.xlu0 %v17925_v11, %s17509_s16  ;;  %v6033_v6 = vsel %vm979_vm4, %v17929_v10, %v17928_v12  ;;  %v17930_v35 = vld [vmem:[#allocation151_spill] sm:$0xff]  ;;  %v6016_v7 = vsel %vm979_vm4, %v14794_v61, %v15090_v5  ;;  %v6167_v3 = vmul.f32 %v6070_v32, %v6034_v2 }
 0x58d   : > { %8424 = vmatprep.subr.mxu0 %v17927_v17  ;;  %8337 = vmatmul.mubr.f32.gmra.mxu0 %v14421_v25  ;;  %v15212_v25 = vld [vmem:[%s17100_s5 + $0x8] sm:$0xff]  ;;  %v6168_v10 = vmul.f32 %v6074_v18, %v6031_v60  ;;  %v6152_v60 = vmul.f32 %v6074_v18, %v6030_v57  ;;  %v6136_v57 = vmul.f32 %v6074_v18, %v6029_v16  ;;  %v17941_v18 = vld [vmem:[#allocation176_spill] sm:$0xff] }
 0x58e   : > { %8425 = vmatpush1.msra.mxu0 %v17930_v35  ;;  %v15207_v17 = vpop.permute.xlu0 %5973  ;;  %10862 = vmatprep.mubr.msk.f32.mxu0 %vm8259_vm10, %v15212_v25 }
 0x58f   : > { %17931 = vst [vmem:[#allocation14_spill] sm:$0xff] %v15207_v17  ;;  %8426 = vmatprep.subr.mxu0 %v17932_v33  ;;  %6449 = vrot.lane.b32.xlu1 %v15171_v26, %s17426_s12  ;;  %v6013_v12 = vsel %vm979_vm4, %v15090_v5, %v15207_v17  ;;  %v15227_v35 = vpop.permute.xlu1 %5963  ;;  %v6032_v5 = vsel %vm979_vm4, %v17935_v48, %v17933_v51 }
 0x590   : > { %8427 = vmatpush1.msra.mxu0 %v17934_v63  ;;  %6433 = vrot.lane.b32.xlu0 %v17756_v8, %s17426_s12  ;;  %v6174_v33 = vmul.f32 %v15182_v52, %v6013_v12  ;;  %v6151_v17 = vmul.f32 %v6070_v32, %v6033_v6  ;;  %v5659_v63 = vsel %vm797_vm5, %v17936_v36, %v14314_v47  ;;  %v17937_v12 = vld [vmem:[#allocation130_spill] sm:$0xff] }
 0x591   : > { %8428 = vmatprep.subr.mxu0 %v6168_v10  ;;  %10868 = vmatprep.mubr.msk.f32.mxu1 %vm8259_vm10, %v15212_v25  ;;  %v6173_v8 = vmul.f32 %v15204_v56, %v6016_v7  ;;  %v5662_v48 = vsel %vm797_vm5, %v17937_v12, %v17936_v36  ;;  %v5702_v51 = vrot.slane %v14770_v19, %v17914_v40  ;;  %v17939_v7 = vld [vmem:[#allocation197_spill] sm:$0xff] }
 0x592   : > { %8429 = vmatpush1.msra.mxu0 %v6167_v3  ;;  %8659 = vmatprep.subr.mxu1 %v6174_v33  ;;  %v15248_v2 = vpop.permute.xlu0 %5213  ;;  %v6135_v6 = vmul.f32 %v6070_v32, %v6032_v5  ;;  %v5698_v3 = vrot.slane %v14770_v19, %v17917_v45  ;;  %v5658_v10 = vsel %vm797_vm5, %v17939_v7, %v14156_v43  ;;  %v17940_v33 = vld [vmem:[#allocation96_spill] sm:$0xff]  ;;  %v17942_v5 = vld [vmem:[#allocation71_spill] sm:$0xff] }
 0x593   : > { %8430 = vmatprep.subr.mxu0 %v6152_v60  ;;  %7183 = vrot.lane.b32.xlu1 %v17779_v30, %s17511_s14  ;;  %v15258_v47 = vpop.permute.xlu1 %4837  ;;  %v5661_v16 = vsel %vm797_vm5, %v17940_v33, %v17939_v7  ;;  %v5796_v32 = vmul.f32 %v5702_v51, %v5659_v63  ;;  %v5660_v19 = vsel %vm797_vm5, %v17942_v5, %v17941_v18 }
 0x594   : > { %17938 = vst [vmem:[#allocation126_spill] sm:$0xff] %v15258_v47  ;;  %8431 = vmatpush1.msra.mxu0 %v6151_v17  ;;  %8660 = vmatpush1.msra.mxu1 %v6173_v8  ;;  %v5657_v43 = vsel %vm797_vm5, %v17941_v18, %v14007_v4  ;;  %v5795_v17 = vmul.f32 %v5698_v3, %v5662_v48  ;;  %v17949_v47 = vld [vmem:[#allocation44_spill] sm:$0xff] }
 0x595   : > { %8432 = vmatprep.subr.mxu0 %v6136_v57  ;;  %7191 = vrot.lane.b32.xlu0 %v15010_v37, %s17511_s14  ;;  %v6015_v36 = vsel %vm979_vm4, %v14865_v46, %v15147_v50  ;;  %v5780_v8 = vmul.f32 %v5702_v51, %v5658_v10  ;;  %v5326_v12 = vrot.slane %v14815_v9, %v17917_v45  ;;  %v17944_v57 = vld [vmem:[#allocation121_spill] sm:$0xff] }
 0x596   : > { %8433 = vmatpush1.msra.mxu0 %v6135_v6  ;;  %v15280_v60 = vpop.permute.xlu0 %5971  ;;  %v5779_v48 = vmul.f32 %v5698_v3, %v5661_v16  ;;  %v17945_v6 = vld [vmem:[#allocation61_spill] sm:$0xff]  ;;  %v5764_v18 = vmul.f32 %v5702_v51, %v5657_v43  ;;  %v5330_v16 = vrot.slane %v14815_v9, %v17914_v40  ;;  %v5763_v5 = vmul.f32 %v5698_v3, %v5660_v19 }
 0x597   : > { %17943 = vst [vmem:[#allocation106_spill] sm:$0xff] %v15280_v60  ;;  %8434 = vmatprep.subr.mxu0 %v5796_v32  ;;  %7181 = vrot.lane.b32.xlu1 %v14159_v13, %s17511_s14  ;;  %v6012_v63 = vsel %vm979_vm4, %v15147_v50, %v15280_v60  ;;  %v15292_v4 = vpop.permute.xlu1 %5595  ;;  %v5287_v7 = vsel %vm615_vm6, %v17945_v6, %v17944_v57  ;;  %v17946_v32 = vld [vmem:[#allocation127_spill] sm:$0xff]  ;;  %v17947_v10 = vld [vmem:[#allocation65_spill] sm:$0xff]  ;;  %v17948_v60 = vld [vmem:[#allocation40_spill] sm:$0xff] }
 0x598   : > { %8435 = vmatpush1.msra.mxu0 %v5795_v17  ;;  %v6158_v33 = vmul.f32 %v15182_v52, %v6012_v63  ;;  %v5290_v50 = vsel %vm615_vm6, %v17946_v32, %v17945_v6  ;;  %v5286_v17 = vsel %vm615_vm6, %v17949_v47, %v17948_v60  ;;  %v6157_v63 = vmul.f32 %v15204_v56, %v6015_v36  ;;  %v17951_v6 = vld [vmem:[#allocation177_spill] sm:$0xff]  ;;  %v17954_v36 = vld [vmem:[#allocation76_spill] sm:$0xff] }
 0x599   : > { %8436 = vmatprep.subr.mxu0 %v5780_v8  ;;  %6455 = vrot.lane.b32.xlu0 %v17947_v10, %s17426_s12  ;;  %v17950_v8 = vld [vmem:[#allocation182_spill] sm:$0xff]  ;;  %v17952_v43 = vld [vmem:[#allocation101_spill] sm:$0xff]  ;;  %v5424_v3 = vmul.f32 %v5330_v16, %v5287_v7  ;;  %v5423_v60 = vmul.f32 %v5326_v12, %v5290_v50  ;;  %v17962_v10 = vld [vmem:[#allocation100_spill] sm:$0xff] }
 0x59a   : > { %8437 = vmatpush1.msra.mxu0 %v5779_v48  ;;  %8661 = vmatprep.subr.mxu1 %v6158_v33  ;;  %v15314_v57 = vpop.permute.xlu0 %4845  ;;  %v5285_v51 = vsel %vm615_vm6, %v17951_v6, %v17950_v8  ;;  %v5289_v9 = vsel %vm615_vm6, %v17952_v43, %v17949_v47  ;;  %v5288_v48 = vsel %vm615_vm6, %v17954_v36, %v17951_v6  ;;  %v4557_v33 = vpop.f32.mrf.mxu0  ;;  %v17956_v8 = vld [vmem:[#allocation87_spill] sm:$0xff]  ;;  %v17960_v36 = vld [vmem:[#allocation198_spill] sm:$0xff] }
 0x59b   : > { %8438 = vmatprep.subr.mxu0 %v5764_v18  ;;  %6813 = vrot.lane.b32.xlu1 %v17767_v54, %s17432_s24  ;;  %v15326_v19 = vpop.permute.xlu1 %4835  ;;  %v5408_v47 = vmul.f32 %v5330_v16, %v5286_v17  ;;  %v5407_v32 = vmul.f32 %v5326_v12, %v5289_v9  ;;  %v17955_v18 = vld [vmem:[#allocation107_spill] sm:$0xff]  ;;  %v6014_v17 = vsel %vm979_vm4, %v14938_v53, %v15227_v35 }
 0x59c   : > { %17953 = vst [vmem:[#allocation93_spill] sm:$0xff] %v15326_v19  ;;  %8439 = vmatpush1.msra.mxu0 %v5763_v5  ;;  %8662 = vmatpush1.msra.mxu1 %v6157_v63  ;;  %v4915_v7 = vsel %vm434_vm7, %v17956_v8, %v17955_v18  ;;  %v5392_v5 = vmul.f32 %v5330_v16, %v5285_v51  ;;  %v17958_v6 = vld [vmem:[#allocation135_spill] sm:$0xff] }
 0x59d   : > { %8440 = vmatprep.subr.mxu0 %v5424_v3  ;;  %7189 = vrot.lane.b32.xlu0 %v15106_v1, %s17511_s14  ;;  %v4958_v63 = vrot.slane %v14874_v58, %v17914_v40  ;;  %v4918_v43 = vsel %vm434_vm7, %v17958_v6, %v17956_v8  ;;  %v5391_v9 = vmul.f32 %v5326_v12, %v5288_v48  ;;  %v17961_v8 = vld [vmem:[#allocation30_spill] sm:$0xff]  ;;  %v17963_v12 = vld [vmem:[#allocation184_spill] sm:$0xff]  ;;  %v17964_v48 = vld [vmem:[#allocation179_spill] sm:$0xff] }
 0x59e   : > { %8441 = vmatpush1.msra.mxu0 %v5423_v60  ;;  %v15338_v50 = vpop.permute.xlu0 %5969  ;;  %v4954_v3 = vrot.slane %v14874_v58, %v17917_v45  ;;  %v17959_v60 = vld [vmem:[#allocation59_spill] sm:$0xff]  ;;  %v4558_v6 = vadd.f32 %v4557_v33, %v17961_v8 }
 0x59f   : > { %17957 = vst [vmem:[#allocation81_spill] sm:$0xff] %v15338_v50  ;;  %8442 = vmatprep.subr.mxu0 %v5408_v47  ;;  %6811 = vrot.lane.b32.xlu1 %v17779_v30, %s17432_s24  ;;  %v6011_v16 = vsel %vm979_vm4, %v15227_v35, %v15338_v50  ;;  %v15356_v51 = vpop.permute.xlu1 %5593  ;;  %v4914_v18 = vsel %vm434_vm7, %v17960_v36, %v17959_v60  ;;  %v17972_v50 = vld [vmem:[#allocation194_spill] sm:$0xff] }
 0x5a0   : > { %8443 = vmatpush1.msra.mxu0 %v5407_v32  ;;  %v6142_v47 = vmul.f32 %v15182_v52, %v6011_v16  ;;  %v4917_v35 = vsel %vm434_vm7, %v17962_v10, %v17960_v36  ;;  %v5052_v58 = vmul.f32 %v4958_v63, %v4915_v7  ;;  %v4913_v60 = vsel %vm434_vm7, %v17964_v48, %v17963_v12  ;;  %v17966_v16 = vld [vmem:[#allocation72_spill] sm:$0xff]  ;;  %v10961_v7 = vld [vmem:[%s17096_s1 + $0x80] sm:$0xff] }
 0x5a1   : > { %8444 = vmatprep.subr.mxu0 %v5392_v5  ;;  %7187 = vrot.lane.b32.xlu0 %v17925_v11, %s17511_s14  ;;  %v5051_v32 = vmul.f32 %v4954_v3, %v4918_v43  ;;  %v6141_v52 = vmul.f32 %v15204_v56, %v6014_v17  ;;  %v4916_v10 = vsel %vm434_vm7, %v17966_v16, %v17964_v48  ;;  %v15390_v43 = vld [vmem:[%s17096_s1 + $0x28] sm:$0xff]  ;;  %v17967_v36 = vld [vmem:[#allocation185_spill] sm:$0xff] }
 0x5a2   : > { %8445 = vmatpush1.msra.mxu0 %v5391_v9  ;;  %8663 = vmatprep.subr.mxu1 %v6142_v47  ;;  %v15377_v33 = vpop.permute.xlu0 %4843  ;;  %v7654_v5 = vrot.slane %v10961_v7, %v17917_v45  ;;  %v5036_v56 = vmul.f32 %v4958_v63, %v4914_v18  ;;  %v5035_v9 = vmul.f32 %v4954_v3, %v4917_v35  ;;  %v17968_v47 = vld [vmem:[#allocation144_spill] sm:$0xff] }
 0x5a3   : > { %17965 = vst [vmem:[#allocation162_spill] sm:$0xff] %v15377_v33  ;;  %8446 = vmatprep.subr.mxu0 %v5052_v58  ;;  %5979 = vrot.lane.b32.xlu1 %v15010_v37, %s17778_s0  ;;  %v15394_v17 = vpop.permute.xlu1 %5591  ;;  %v7612_v8 = vsel %vm1739_vm0, %v17968_v47, %v17967_v36  ;;  %v15402_v12 = vrot.slane %v15390_v43, %v17649_v24  ;;  %v17969_v58 = vld [vmem:[#allocation139_spill] sm:$0xff] }
 0x5a4   : > { %8447 = vmatpush1.msra.mxu0 %v5051_v32  ;;  %8664 = vmatpush1.msra.mxu1 %v6141_v52  ;;  %v7615_v48 = vsel %vm1739_vm0, %v17969_v58, %v17968_v47  ;;  %v5020_v18 = vmul.f32 %v4958_v63, %v4913_v60  ;;  %v7658_v35 = vrot.slane %v10961_v7, %v17914_v40  ;;  %v17970_v36 = vld [vmem:[#allocation167_spill] sm:$0xff] }
 0x5a5   : > { %8448 = vmatprep.subr.mxu0 %v5036_v56  ;;  %6819 = vrot.lane.b32.xlu0 %v15010_v37, %s17432_s24  ;;  %v5019_v16 = vmul.f32 %v4954_v3, %v4916_v10  ;;  %v17971_v32 = vld [vmem:[#allocation199_spill] sm:$0xff]  ;;  %v15421_v56 = vrot.slane %v15390_v43, %v17898_v49  ;;  %v5644_v63 = vsel %vm797_vm5, %v15005_v41, %v15292_v4  ;;  %v17975_v10 = vld [vmem:[#allocation26_spill] sm:$0xff] }
 0x5a6   : > { %v7611_v52 = vsel %vm1739_vm0, %v17971_v32, %v17970_v36  ;;  %v7614_v19 = vsel %vm1739_vm0, %v17972_v50, %v17971_v32  ;;  %8449 = vmatpush1.msra.mxu0 %v5035_v9  ;;  %v15423_v47 = vpop.permute.xlu0 %5601  ;;  %v7752_v3 = vmul.f32 %v7658_v35, %v7612_v8  ;;  %v4552_v7 = vadd.f32 %v14894_v27, %v17975_v10  ;;  %v17976_v9 = vld [vmem:[#allocation147_spill] sm:$0xff]  ;;  %v17978_v32 = vld [vmem:[#allocation53_spill] sm:$0xff] }
 0x5a7   : > { %17973 = vst [vmem:[#allocation138_spill] sm:$0xff] %v15423_v47  ;;  %8450 = vmatprep.subr.mxu0 %v5020_v18  ;;  %6809 = vrot.lane.b32.xlu1 %v14159_v13, %s17432_s24  ;;  %v5641_v50 = vsel %vm797_vm5, %v15292_v4, %v15423_v47  ;;  %v15435_v60 = vpop.permute.xlu1 %7545  ;;  %v17977_v58 = vld [vmem:[#allocation187_spill] sm:$0xff]  ;;  %v7751_v18 = vmul.f32 %v7654_v5, %v7615_v48  ;;  %v17979_v4 = vld [vmem:[#allocation21_spill] sm:$0xff] }
 0x5a8   : > { %17974 = vst [vmem:[#allocation122_spill] sm:$0xff] %v15435_v60  ;;  %v7610_v36 = vsel %vm1739_vm0, %v17977_v58, %v17976_v9  ;;  %8451 = vmatpush1.msra.mxu0 %v5019_v16  ;;  %v5802_v13 = vmul.f32 %v15402_v12, %v5641_v50  ;;  %v15445_v33 = vadd.f32 %v4558_v6, %v17978_v32  ;;  %v17980_v47 = vld [vmem:[#allocation27_spill] sm:$0xff]  ;;  %v17981_v9 = vld [vmem:[#allocation109_spill] sm:$0xff]  ;;  %v17982_v50 = vld [vmem:[#allocation134_spill] sm:$0xff] }
 0x5a9   : > { %v7613_v8 = vsel %vm1739_vm0, %v17979_v4, %v17977_v58  ;;  %8462 = vmatprep.subr.mxu0 %v7752_v3  ;;  %6817 = vrot.lane.b32.xlu0 %v15106_v1, %s17432_s24  ;;  %v7736_v27 = vmul.f32 %v7658_v35, %v7611_v52  ;;  %v7735_v10 = vmul.f32 %v7654_v5, %v7614_v19  ;;  %v10962_v52 = vld [vmem:[%s17096_s1 + $0x70] sm:$0xff]  ;;  %v17993_v60 = vld [vmem:[#allocation73_spill] sm:$0xff] }
 0x5aa   : > { %v7240_v48 = vsel %vm1557_vm1, %v17981_v9, %v17980_v47  ;;  %v5801_v16 = vmul.f32 %v15421_v56, %v5644_v63  ;;  %8463 = vmatpush2.msra.mxu0 %v7751_v18  ;;  %8665 = vmatprep.subr.mxu1 %v5802_v13  ;;  %v15458_v6 = vpop.permute.xlu0 %4841  ;;  %v7243_v3 = vsel %vm1557_vm1, %v17982_v50, %v17981_v9  ;;  %v17983_v13 = vld [vmem:[#allocation38_spill] sm:$0xff]  ;;  %v17984_v32 = vld [vmem:[#allocation200_spill] sm:$0xff] }
 0x5ab   : > { %8464 = vmatprep.subr.mxu0 %v7736_v27  ;;  %5977 = vrot.lane.b32.xlu1 %v15106_v1, %s17778_s0  ;;  %v7720_v19 = vmul.f32 %v7658_v35, %v7610_v36  ;;  %v7286_v47 = vrot.slane %v10962_v52, %v17914_v40  ;;  %v15470_v63 = vpop.permute.xlu1 %5223  ;;  %v7719_v58 = vmul.f32 %v7654_v5, %v7613_v8  ;;  %v17985_v27 = vld [vmem:[#allocation50_spill] sm:$0xff]  ;;  %v17986_v36 = vld [vmem:[#allocation189_spill] sm:$0xff] }
 0x5ac   : > { %v7282_v18 = vrot.slane %v10962_v52, %v17917_v45  ;;  %v7239_v4 = vsel %vm1557_vm1, %v17984_v32, %v17983_v13  ;;  %8465 = vmatpush2.msra.mxu0 %v7735_v10  ;;  %8666 = vmatpush1.msra.mxu1 %v5801_v16  ;;  %v15478_v35 = vadd.f32 %v4552_v7, %v17985_v27  ;;  %v17987_v8 = vld [vmem:[#allocation149_spill] sm:$0xff]  ;;  %v17988_v50 = vld [vmem:[#allocation190_spill] sm:$0xff]  ;;  %v17989_v10 = vld [vmem:[#allocation172_spill] sm:$0xff] }
 0x5ad   : > { %v7242_v9 = vsel %vm1557_vm1, %v17986_v36, %v17984_v32  ;;  %8466 = vmatprep.subr.mxu0 %v7720_v19  ;;  %5985 = vrot.lane.b32.xlu0 %v15445_v33, %s17778_s0  ;;  %v7380_v5 = vmul.f32 %v7286_v47, %v7240_v48  ;;  %v7238_v52 = vsel %vm1557_vm1, %v17988_v50, %v17987_v8  ;;  %v10963_v16 = vld [vmem:[%s17096_s1 + $0x60] sm:$0xff] }
 0x5ae   : > { %v7241_v7 = vsel %vm1557_vm1, %v17989_v10, %v17988_v50  ;;  %v6910_v19 = vrot.slane %v10963_v16, %v17917_v45  ;;  %v7379_v13 = vmul.f32 %v7282_v18, %v7243_v3  ;;  %8467 = vmatpush2.msra.mxu0 %v7719_v58  ;;  %v15498_v32 = vpop.permute.xlu0 %5599  ;;  %v5643_v48 = vsel %vm797_vm5, %v15088_v22, %v15356_v51  ;;  %v17991_v58 = vld [vmem:[#allocation186_spill] sm:$0xff] }
 0x5af   : > { %17990 = vst [vmem:[#allocation113_spill] sm:$0xff] %v15498_v32  ;;  %8468 = vmatprep.subr.mxu0 %v7380_v5  ;;  %6441 = vrot.lane.b32.xlu1 %v17767_v54, %s17426_s12  ;;  %v5640_v27 = vsel %vm797_vm5, %v15356_v51, %v15498_v32  ;;  %v7364_v36 = vmul.f32 %v7286_v47, %v7239_v4  ;;  %v15510_v8 = vpop.permute.xlu1 %7543  ;;  %v17992_v50 = vld [vmem:[#allocation90_spill] sm:$0xff]  ;;  %v17995_v32 = vld [vmem:[#allocation104_spill] sm:$0xff] }
 0x5b0   : > { %v7363_v3 = vmul.f32 %v7282_v18, %v7242_v9  ;;  %v6868_v10 = vsel %vm1375_vm2, %v17992_v50, %v17991_v58  ;;  %8469 = vmatpush2.msra.mxu0 %v7379_v13  ;;  %v5786_v5 = vmul.f32 %v15402_v12, %v5640_v27  ;;  %v6914_v45 = vrot.slane %v10963_v16, %v17914_v40  ;;  %v17994_v9 = vld [vmem:[#allocation19_spill] sm:$0xff] }
 0x5b1   : > { %v7347_v54 = vmul.f32 %v7282_v18, %v7241_v7  ;;  %v6871_v51 = vsel %vm1375_vm2, %v17993_v60, %v17992_v50  ;;  %8470 = vmatprep.subr.mxu0 %v7364_v36  ;;  %6815 = vrot.lane.b32.xlu0 %v17925_v11, %s17432_s24  ;;  %v7348_v4 = vmul.f32 %v7286_v47, %v7238_v52  ;;  %v17996_v27 = vld [vmem:[#allocation191_spill] sm:$0xff]  ;;  %v17998_v36 = vld [vmem:[#allocation192_spill] sm:$0xff] }
 0x5b2   : > { %v6867_v13 = vsel %vm1375_vm2, %v17995_v32, %v17994_v9  ;;  %v6870_v18 = vsel %vm1375_vm2, %v17996_v27, %v17995_v32  ;;  %v5785_v7 = vmul.f32 %v15421_v56, %v5643_v48  ;;  %8471 = vmatpush2.msra.mxu0 %v7363_v3  ;;  %8667 = vmatprep.subr.mxu1 %v5786_v5  ;;  %v15533_v60 = vpop.permute.xlu0 %5597  ;;  %v17997_v48 = vld [vmem:[#allocation152_spill] sm:$0xff]  ;;  %v17999_v5 = vld [vmem:[#allocation54_spill] sm:$0xff] }
 0x5b3   : > { %v5642_v47 = vsel %vm797_vm5, %v15113_v42, %v15394_v17  ;;  %8472 = vmatprep.subr.mxu0 %v7348_v4  ;;  %5975 = vrot.lane.b32.xlu1 %v17925_v11, %s17778_s0  ;;  %v5639_v52 = vsel %vm797_vm5, %v15394_v17, %v15533_v60  ;;  %v7008_v16 = vmul.f32 %v6914_v45, %v6868_v10  ;;  %v15545_v32 = vpop.permute.xlu1 %5221  ;;  %v18000_v9 = vld [vmem:[#allocation188_spill] sm:$0xff] }
 0x5b4   : > { %v6866_v3 = vsel %vm1375_vm2, %v17998_v36, %v17997_v48  ;;  %v7007_v58 = vmul.f32 %v6910_v19, %v6871_v51  ;;  %8473 = vmatpush2.msra.mxu0 %v7347_v54  ;;  %8668 = vmatpush1.msra.mxu1 %v5785_v7  ;;  %v5770_v50 = vmul.f32 %v15402_v12, %v5639_v52  ;;  %v18001_v27 = vld [vmem:[#allocation168_spill] sm:$0xff]  ;;  %v18002_v7 = vld [vmem:[#allocation63_spill] sm:$0xff]  ;;  %v18004_v48 = vld [vmem:[#allocation202_spill] sm:$0xff] }
 0x5b5   : > { %v6869_v4 = vsel %vm1375_vm2, %v17999_v5, %v17998_v36  ;;  %8474 = vmatprep.subr.mxu0 %v7008_v16  ;;  %5983 = vrot.lane.b32.xlu0 %v15478_v35, %s17778_s0  ;;  %v6992_v17 = vmul.f32 %v6914_v45, %v6867_v13  ;;  %v6991_v10 = vmul.f32 %v6910_v19, %v6870_v18  ;;  %v15572_v13 = vld [vmem:[%s17096_s1 + $0x18] sm:$0xff]  ;;  %v18003_v16 = vld [vmem:[#allocation170_spill] sm:$0xff]  ;;  %v18006_v5 = vld [vmem:[#allocation15_spill] sm:$0xff] }
 0x5b6   : > { %v6496_v51 = vsel %vm1193_vm3, %v18001_v27, %v18000_v9  ;;  %v5769_v54 = vmul.f32 %v15421_v56, %v5642_v47  ;;  %8475 = vmatpush2.msra.mxu0 %v7007_v58  ;;  %8669 = vmatprep.subr.mxu1 %v5770_v50  ;;  %v15563_v12 = vpop.permute.xlu0 %7551  ;;  %v6499_v52 = vsel %vm1193_vm3, %v18002_v7, %v18001_v27  ;;  %v18005_v50 = vld [vmem:[#allocation193_spill] sm:$0xff] }
 0x5b7   : > { %8476 = vmatprep.subr.mxu0 %v6992_v17  ;;  %6439 = vrot.lane.b32.xlu1 %v17779_v30, %s17426_s12  ;;  %v6976_v18 = vmul.f32 %v6914_v45, %v6866_v3  ;;  %v15576_v56 = vpop.permute.xlu1 %7541  ;;  %v6975_v47 = vmul.f32 %v6910_v19, %v6869_v4  ;;  %v6495_v36 = vsel %vm1193_vm3, %v18004_v48, %v18003_v16  ;;  %v18007_v17 = vld [vmem:[#allocation62_spill] sm:$0xff] }
 0x5b8   : > { %8477 = vmatpush2.msra.mxu0 %v6991_v10  ;;  %8670 = vmatpush1.msra.mxu1 %v5769_v54  ;;  %v15584_v58 = vrot.slane %v15572_v13, %v17649_v24  ;;  %v6498_v30 = vsel %vm1193_vm3, %v18005_v50, %v18004_v48  ;;  %v6636_v45 = vmul.f32 %v15117_v20, %v6496_v51  ;;  %v18010_v48 = vld [vmem:[#allocation46_spill] sm:$0xff] }
 0x5b9   : > { %8478 = vmatprep.subr.mxu0 %v6976_v18  ;;  %6447 = vrot.lane.b32.xlu0 %v15010_v37, %s17426_s12  ;;  %v15595_v19 = vrot.slane %v15019_v34, %v17849_v62  ;;  %v6635_v3 = vmul.f32 %v15129_v38, %v6499_v52  ;;  %v15600_v4 = vrot.slane %v15019_v34, %v18006_v5  ;;  %v18009_v52 = vld [vmem:[#allocation77_spill] sm:$0xff] }
 0x5ba   : > { %v6482_v10 = vsel %vm1193_vm3, %v18007_v17, %v17901_v21  ;;  %v15608_v9 = vrot.slane %v15572_v13, %v17898_v49  ;;  %8479 = vmatpush2.msra.mxu0 %v6975_v47  ;;  %v15610_v27 = vpop.permute.xlu0 %5229  ;;  %v5272_v51 = vsel %vm615_vm6, %v15142_v28, %v15470_v63  ;;  %v6620_v21 = vmul.f32 %v15117_v20, %v6495_v36  ;;  %v15645_v50 = vld [vmem:[%s17100_s5] sm:$0xff] }
 0x5bb   : > { %18008 = vst [vmem:[#allocation97_spill] sm:$0xff] %v15610_v27  ;;  %8480 = vmatprep.subr.mxu0 %v6636_v45  ;;  %5607 = vrot.lane.b32.xlu1 %v15010_v37, %s17510_s30  ;;  %v5269_v34 = vsel %vm615_vm6, %v15470_v63, %v15610_v27  ;;  %v15623_v54 = vpop.permute.xlu1 %5219  ;;  %v6619_v7 = vmul.f32 %v15129_v38, %v6498_v30 }
 0x5bc   : > { %v6485_v18 = vsel %vm1193_vm3, %v18009_v52, %v18007_v17  ;;  %8481 = vmatpush2.msra.mxu0 %v6635_v3  ;;  %v5430_v47 = vmul.f32 %v15584_v58, %v5269_v34  ;;  %v6608_v63 = vmul.f32 %v15595_v19, %v6482_v10  ;;  %v5429_v20 = vmul.f32 %v15608_v9, %v5272_v51  ;;  %v15660_v17 = vld [vmem:[%s17100_s5 + $0x18] sm:$0xff]  ;;  %v18013_v34 = vld [vmem:[#allocation43_spill] sm:$0xff] }
 0x5bd   : > { %8482 = vmatprep.subr.mxu0 %v6620_v21  ;;  %5981 = vrot.lane.b32.xlu0 %v15171_v26, %s17778_s0  ;;  %v6607_v38 = vmul.f32 %v15600_v4, %v6485_v18  ;;  %v6086_v30 = vrot.slane %v15163_v31, %v18006_v5  ;;  %v6090_v3 = vrot.slane %v15163_v31, %v17849_v62  ;;  %v18012_v10 = vld [vmem:[#allocation56_spill] sm:$0xff] }
 0x5be   : > { %8483 = vmatpush2.msra.mxu0 %v6619_v7  ;;  %8671 = vmatprep.subr.mxu1 %v5430_v47  ;;  %v15635_v16 = vpop.permute.xlu0 %7549  ;;  %v6019_v51 = vsel %vm979_vm4, %v18012_v10, %v14794_v61  ;;  %v18014_v7 = vld [vmem:[#allocation195_spill] sm:$0xff] }
 0x5bf   : > { %8574 = vmatprep.subr.mxu0 %v6608_v63  ;;  %6461 = vrot.lane.b32.xlu1 %v18010_v48, %s17426_s12  ;;  %v15640_v36 = vpop.permute.xlu1 %7173  ;;  %v6022_v61 = vsel %vm979_vm4, %v18014_v7, %v18012_v10  ;;  %v15690_v18 = vld [vmem:[%s17100_s5 + $0x10] sm:$0xff]  ;;  %v18016_v63 = vld [vmem:[#allocation41_spill] sm:$0xff] }
 0x5c0   : > { %8485 = vmatmul.mubr.f32.vlgmr.msra.gmra.mxu0 %v15645_v50  ;;  %8672 = vmatpush1.msra.mxu1 %v5429_v20  ;;  %v18018_v10 = vld [vmem:[#allocation39_spill] sm:$0xff]  ;;  %v6171_v7 = vmul.f32 %v6086_v30, %v6022_v61  ;;  %v5718_v61 = vrot.slane %v15390_v43, %v17849_v62 }
 0x5c1   : > { %8575 = vmatpush1.msra.mxu0 %v6607_v38  ;;  %6445 = vrot.lane.b32.xlu0 %v15106_v1, %s17426_s12 }
 0x5c2   : > { %8576 = vmatprep.subr.mxu0 %v14124_v59  ;;  %v15653_v45 = vpop.permute.xlu0 %5227  ;;  %10863 = vmatprep.mubr.msk.f32.mxu0 %vm8259_vm10, %v15660_v17  ;;  %v5271_v59 = vsel %vm615_vm6, %v15156_v0, %v15545_v32 }
 0x5c3   : > { %18011 = vst [vmem:[#allocation80_spill] sm:$0xff] %v15653_v45  ;;  %8577 = vmatpush1.msra.mxu0 %v18013_v34  ;;  %5611 = vrot.lane.b32.xlu1 %v15478_v35, %s17510_s30  ;;  %v5268_v31 = vsel %vm615_vm6, %v15545_v32, %v15653_v45  ;;  %v15679_v21 = vpop.permute.xlu1 %4851  ;;  %v18015_v32 = vld [vmem:[#allocation169_spill] sm:$0xff]  ;;  %v5413_v38 = vmul.f32 %v15608_v9, %v5271_v59  ;;  %v18020_v45 = vld [vmem:[#allocation160_spill] sm:$0xff] }
 0x5c4   : > { %8578 = vmatprep.subr.mxu0 %v14144_v55  ;;  %v5414_v52 = vmul.f32 %v15584_v58, %v5268_v31  ;;  %8491 = vmatmul.mubr.f32.gmra.mxu0 %v15690_v18  ;;  %v6018_v47 = vsel %vm979_vm4, %v18015_v32, %v14865_v46  ;;  %v18017_v55 = vld [vmem:[#allocation175_spill] sm:$0xff]  ;;  %v6172_v34 = vmul.f32 %v6090_v3, %v6019_v51  ;;  %v18019_v46 = vld [vmem:[#allocation17_spill] sm:$0xff] }
 0x5c5   : > { %8579 = vmatpush1.msra.mxu0 %v18016_v63  ;;  %5613 = vrot.lane.b32.xlu0 %v15445_v33, %s17510_s30  ;;  %v6021_v20 = vsel %vm979_vm4, %v18017_v55, %v18015_v32  ;;  %v6020_v63 = vsel %vm979_vm4, %v18020_v45, %v18019_v46  ;;  %v6017_v27 = vsel %vm979_vm4, %v18019_v46, %v14938_v53  ;;  %v18021_v32 = vld [vmem:[#allocation37_spill] sm:$0xff]  ;;  %v18022_v55 = vld [vmem:[#allocation111_spill] sm:$0xff] }
 0x5c6   : > { %8580 = vmatprep.subr.mxu0 %v18018_v10  ;;  %8673 = vmatprep.subr.mxu1 %v5414_v52  ;;  %v15706_v31 = vpop.permute.xlu0 %7547  ;;  %v6156_v59 = vmul.f32 %v6090_v3, %v6018_v47  ;;  %v6155_v52 = vmul.f32 %v6086_v30, %v6021_v20  ;;  %v5714_v45 = vrot.slane %v15390_v43, %v18006_v5  ;;  %v18023_v47 = vld [vmem:[#allocation22_spill] sm:$0xff]  ;;  %v18024_v43 = vld [vmem:[#allocation95_spill] sm:$0xff] }
 0x5c7   : > { %8581 = vmatpush1.msra.mxu0 %v18021_v32  ;;  %5609 = vrot.lane.b32.xlu1 %v15171_v26, %s17510_s30  ;;  %v15719_v51 = vpop.permute.xlu1 %7171  ;;  %v5647_v53 = vsel %vm797_vm5, %v18022_v55, %v15005_v41  ;;  %v6139_v10 = vmul.f32 %v6086_v30, %v6020_v63  ;;  %v6140_v20 = vmul.f32 %v6090_v3, %v6017_v27  ;;  %v18025_v3 = vld [vmem:[#allocation24_spill] sm:$0xff] }
 0x5c8   : > { %8582 = vmatprep.subr.mxu0 %v6172_v34  ;;  %8674 = vmatpush1.msra.mxu1 %v5413_v38  ;;  %v5650_v38 = vsel %vm797_vm5, %v18023_v47, %v18022_v55  ;;  %v5646_v41 = vsel %vm797_vm5, %v18024_v43, %v15088_v22  ;;  %v5270_v30 = vsel %vm615_vm6, %v15248_v2, %v15623_v54 }
 0x5c9   : > { %8583 = vmatpush1.msra.mxu0 %v6171_v7  ;;  %5605 = vrot.lane.b32.xlu0 %v15106_v1, %s17510_s30  ;;  %v5649_v22 = vsel %vm797_vm5, %v18025_v3, %v18024_v43  ;;  %v5342_v7 = vrot.slane %v15572_v13, %v18006_v5  ;;  %v5800_v46 = vmul.f32 %v5718_v61, %v5647_v53 }
 0x5ca   : > { %8584 = vmatprep.subr.mxu0 %v6156_v59  ;;  %v15735_v34 = vpop.permute.xlu0 %5225  ;;  %10866 = vmatprep.mubr.msk.f32.mxu0 %vm8259_vm10, %v15212_v25  ;;  %v5799_v32 = vmul.f32 %v5714_v45, %v5650_v38  ;;  %v5346_v59 = vrot.slane %v15572_v13, %v17849_v62  ;;  %v5784_v53 = vmul.f32 %v5718_v61, %v5646_v41 }
 0x5cb   : > { %8585 = vmatpush1.msra.mxu0 %v6155_v52  ;;  %5241 = vrot.lane.b32.xlu1 %v15445_v33, %s17427_s13  ;;  %v5267_v27 = vsel %vm615_vm6, %v15623_v54, %v15735_v34  ;;  %v15753_v25 = vpop.permute.xlu1 %4849  ;;  %v5645_v54 = vsel %vm797_vm5, %v14985_v23, %v15113_v42  ;;  %v18026_v52 = vld [vmem:[#allocation16_spill] sm:$0xff]  ;;  %v5783_v42 = vmul.f32 %v5714_v45, %v5649_v22 }
 0x5cc   : > { %8586 = vmatprep.subr.mxu0 %v6140_v20  ;;  %v5398_v63 = vmul.f32 %v15584_v58, %v5267_v27  ;;  %v5648_v55 = vsel %vm797_vm5, %v18026_v52, %v14985_v23  ;;  %v5397_v58 = vmul.f32 %v15608_v9, %v5270_v30  ;;  %v5275_v20 = vsel %vm615_vm6, %v15021_v39, %v15142_v28  ;;  %v15788_v23 = vld [vmem:[%s17096_s1 + $0x8] sm:$0xff] }
 0x5cd   : > { %8587 = vmatpush1.msra.mxu0 %v6139_v10  ;;  %5603 = vrot.lane.b32.xlu0 %v17925_v11, %s17510_s30  ;;  %v18027_v10 = vld [vmem:[#allocation55_spill] sm:$0xff]  ;;  %v5768_v43 = vmul.f32 %v5718_v61, %v5645_v54  ;;  %v15796_v41 = vrot.slane %v15788_v23, %v17649_v24  ;;  %v5767_v30 = vmul.f32 %v5714_v45, %v5648_v55  ;;  %v18028_v27 = vld [vmem:[#allocation178_spill] sm:$0xff] }
 0x5ce   : > { %8588 = vmatprep.subr.mxu0 %v5800_v46  ;;  %8675 = vmatprep.subr.mxu1 %v5398_v63  ;;  %v15775_v47 = vpop.permute.xlu0 %7179  ;;  %v5278_v38 = vsel %vm615_vm6, %v18027_v10, %v15021_v39  ;;  %v5274_v39 = vsel %vm615_vm6, %v15062_v15, %v15156_v0  ;;  %v5277_v61 = vsel %vm615_vm6, %v18028_v27, %v15062_v15  ;;  %v15852_v10 = vld [vmem:[%s17096_s1 + $0x88] sm:$0xff] }
 0x5cf   : > { %8589 = vmatpush1.msra.mxu0 %v5799_v32  ;;  %5239 = vrot.lane.b32.xlu1 %v15478_v35, %s17427_s13  ;;  %v15792_v9 = vpop.permute.xlu1 %7169  ;;  %v5427_v28 = vmul.f32 %v5342_v7, %v5278_v38  ;;  %v15810_v3 = vrot.slane %v15788_v23, %v17898_v49  ;;  %v5428_v45 = vmul.f32 %v5346_v59, %v5275_v20  ;;  %v18029_v32 = vld [vmem:[#allocation163_spill] sm:$0xff]  ;;  %v18033_v27 = vld [vmem:[#allocation162_spill] sm:$0xff] }
 0x5d0   : > { %8590 = vmatprep.subr.mxu0 %v5784_v53  ;;  %8676 = vmatpush1.msra.mxu1 %v5397_v58  ;;  %v5273_v0 = vsel %vm615_vm6, %v15125_v29, %v15248_v2  ;;  %v4900_v46 = vsel %vm434_vm7, %v15314_v57, %v15679_v21  ;;  %v5276_v2 = vsel %vm615_vm6, %v18029_v32, %v15125_v29  ;;  %v18030_v29 = vld [vmem:[#allocation20_spill] sm:$0xff]  ;;  %v18036_v32 = vld [vmem:[#allocation67_spill] sm:$0xff] }
 0x5d1   : > { %8591 = vmatpush1.msra.mxu0 %v5783_v42  ;;  %5235 = vrot.lane.b32.xlu0 %v15010_v37, %s17427_s13  ;;  %v5412_v54 = vmul.f32 %v5346_v59, %v5274_v39  ;;  %v4974_v55 = vrot.slane %v15788_v23, %v17849_v62  ;;  %v5411_v58 = vmul.f32 %v5342_v7, %v5277_v61  ;;  %v18032_v39 = vld [vmem:[#allocation180_spill] sm:$0xff]  ;;  %v18034_v61 = vld [vmem:[#allocation66_spill] sm:$0xff] }
 0x5d2   : > { %8592 = vmatprep.subr.mxu0 %v5768_v43  ;;  %v15812_v22 = vpop.permute.xlu0 %4857  ;;  %v4970_v53 = vrot.slane %v15788_v23, %v18006_v5  ;;  %v4906_v42 = vsel %vm434_vm7, %v18030_v29, %v15168_v44  ;;  %v5057_v38 = vmul.f32 %v15810_v3, %v4900_v46  ;;  %v5396_v20 = vmul.f32 %v5346_v59, %v5273_v0  ;;  %v18035_v0 = vld [vmem:[#allocation93_spill] sm:$0xff] }
 0x5d3   : > { %8593 = vmatpush1.msra.mxu0 %v5767_v30  ;;  %5231 = vrot.lane.b32.xlu1 %v17925_v11, %s17427_s13  ;;  %v4897_v15 = vsel %vm434_vm7, %v15679_v21, %v15812_v22  ;;  %v15828_v63 = vpop.permute.xlu1 %4847  ;;  %v4903_v21 = vsel %vm434_vm7, %v15168_v44, %v15314_v57  ;;  %v5395_v43 = vmul.f32 %v5342_v7, %v5276_v2  ;;  %v18031_v30 = vld [vmem:[#allocation126_spill] sm:$0xff] }
 0x5d4   : > { %8594 = vmatprep.subr.mxu0 %v5428_v45  ;;  %v5058_v52 = vmul.f32 %v15796_v41, %v4897_v15  ;;  %v4902_v44 = vsel %vm434_vm7, %v18031_v30, %v18033_v27  ;;  %v5056_v59 = vmul.f32 %v4974_v55, %v4903_v21  ;;  %v5055_v7 = vmul.f32 %v4970_v53, %v4906_v42  ;;  %v18038_v42 = vld [vmem:[#allocation122_spill] sm:$0xff] }
 0x5d5   : > { %8595 = vmatpush1.msra.mxu0 %v5427_v28  ;;  %5233 = vrot.lane.b32.xlu0 %v15106_v1, %s17427_s13  ;;  %v4905_v28 = vsel %vm434_vm7, %v18032_v39, %v18031_v30  ;;  %v4901_v46 = vsel %vm434_vm7, %v18035_v0, %v15458_v6  ;;  %v7670_v15 = vrot.slane %v15852_v10, %v18006_v5  ;;  %v18039_v39 = vld [vmem:[#allocation157_spill] sm:$0xff] }
 0x5d6   : > { %8596 = vmatprep.subr.mxu0 %v5412_v54  ;;  %8677 = vmatprep.subr.mxu1 %v5058_v52  ;;  %v15855_v57 = vpop.permute.xlu0 %7177  ;;  %v5039_v2 = vmul.f32 %v4970_v53, %v4905_v28  ;;  %v18037_v54 = vld [vmem:[#allocation165_spill] sm:$0xff]  ;;  %v7674_v29 = vrot.slane %v15852_v10, %v17849_v62  ;;  %v7603_v28 = vsel %vm1739_vm0, %v18039_v39, %v18038_v42 }
 0x5d7   : > { %8597 = vmatpush1.msra.mxu0 %v5411_v58  ;;  %5989 = vrot.lane.b32.xlu1 %v18034_v61, %s17778_s0  ;;  %v15867_v45 = vpop.permute.xlu1 %6801  ;;  %v4904_v52 = vsel %vm434_vm7, %v18037_v54, %v18035_v0  ;;  %v5040_v58 = vmul.f32 %v4974_v55, %v4902_v44  ;;  %v5024_v44 = vmul.f32 %v4974_v55, %v4901_v46  ;;  %v15919_v55 = vld [vmem:[%s17096_s1 + $0x78] sm:$0xff] }
 0x5d8   : > { %8598 = vmatprep.subr.mxu0 %v5396_v20  ;;  %8678 = vmatpush1.msra.mxu1 %v5057_v38  ;;  %v7600_v38 = vsel %vm1739_vm0, %v18038_v42, %v15563_v12  ;;  %v4899_v20 = vsel %vm434_vm7, %v18033_v27, %v15753_v25  ;;  %v7298_v39 = vrot.slane %v15919_v55, %v18006_v5 }
 0x5d9   : > { %8599 = vmatpush1.msra.mxu0 %v5395_v43  ;;  %5991 = vrot.lane.b32.xlu0 %v18036_v32, %s17778_s0  ;;  %v7756_v46 = vmul.f32 %v7674_v29, %v7600_v38 }
 0x5da   : > { %8600 = vmatprep.subr.mxu0 %v5056_v59  ;;  %v15881_v21 = vpop.permute.xlu0 %4855  ;;  %v5023_v59 = vmul.f32 %v4970_v53, %v4904_v52  ;;  %v5041_v53 = vmul.f32 %v15810_v3, %v4899_v20  ;;  %v18041_v52 = vld [vmem:[#allocation117_spill] sm:$0xff]  ;;  %v7302_v20 = vrot.slane %v15919_v55, %v17849_v62 }
 0x5db   : > { %8601 = vmatpush1.msra.mxu0 %v5055_v7  ;;  %4869 = vrot.lane.b32.xlu1 %v15445_v33, %s17428_s22  ;;  %v4896_v43 = vsel %vm434_vm7, %v15753_v25, %v15881_v21  ;;  %v15899_v30 = vpop.permute.xlu1 %6799  ;;  %v7599_v7 = vsel %vm1739_vm0, %v15510_v8, %v15635_v16  ;;  %v18040_v25 = vld [vmem:[#allocation57_spill] sm:$0xff] }
 0x5dc   : > { %8602 = vmatprep.subr.mxu0 %v5040_v58  ;;  %v5042_v27 = vmul.f32 %v15796_v41, %v4896_v43  ;;  %v7602_v0 = vsel %vm1739_vm0, %v18040_v25, %v15510_v8  ;;  %v7601_v58 = vsel %vm1739_vm0, %v18041_v52, %v15576_v56  ;;  %v7598_v8 = vsel %vm1739_vm0, %v15576_v56, %v15706_v31 }
 0x5dd   : > { %8603 = vmatpush1.msra.mxu0 %v5039_v2  ;;  %5237 = vrot.lane.b32.xlu0 %v15171_v26, %s17427_s13  ;;  %v7755_v2 = vmul.f32 %v7670_v15, %v7603_v28  ;;  %v7740_v38 = vmul.f32 %v7674_v29, %v7599_v7  ;;  %v7739_v43 = vmul.f32 %v7670_v15, %v7602_v0 }
 0x5de   : > { %8604 = vmatprep.subr.mxu0 %v5024_v44  ;;  %8679 = vmatprep.subr.mxu1 %v5042_v27  ;;  %v15922_v54 = vpop.permute.xlu0 %7175  ;;  %v7228_v56 = vsel %vm1557_vm1, %v15640_v36, %v15775_v47  ;;  %v7723_v28 = vmul.f32 %v7670_v15, %v7601_v58  ;;  %v18042_v44 = vld [vmem:[#allocation159_spill] sm:$0xff]  ;;  %v7227_v25 = vsel %vm1557_vm1, %v15719_v51, %v15855_v57 }
 0x5df   : > { %8605 = vmatpush1.msra.mxu0 %v5023_v59  ;;  %4861 = vrot.lane.b32.xlu1 %v15106_v1, %s17428_s22  ;;  %v15934_v42 = vpop.permute.xlu1 %7557  ;;  %v7231_v27 = vsel %vm1557_vm1, %v18042_v44, %v15640_v36  ;;  %v7724_v59 = vmul.f32 %v7674_v29, %v7598_v8  ;;  %v4898_v0 = vsel %vm434_vm7, %v15458_v6, %v15828_v63  ;;  %v15963_v15 = vld [vmem:[%s17096_s1 + $0x68] sm:$0xff] }
 0x5e0   : > { %8616 = vmatprep.subr.mxu0 %v7756_v46  ;;  %8680 = vmatpush1.msra.mxu1 %v5041_v53  ;;  %v18043_v53 = vld [vmem:[#allocation145_spill] sm:$0xff]  ;;  %v7384_v46 = vmul.f32 %v7302_v20, %v7228_v56  ;;  %v6930_v52 = vrot.slane %v15963_v15, %v17849_v62  ;;  %v7383_v58 = vmul.f32 %v7298_v39, %v7231_v27 }
 0x5e1   : > { %8617 = vmatpush2.msra.mxu0 %v7755_v2  ;;  %4863 = vrot.lane.b32.xlu0 %v15010_v37, %s17428_s22  ;;  %v7230_v6 = vsel %vm1557_vm1, %v18043_v53, %v15719_v51  ;;  %v7226_v8 = vsel %vm1557_vm1, %v15792_v9, %v15922_v54  ;;  %v6926_v44 = vrot.slane %v15963_v15, %v18006_v5 }
 0x5e2   : > { %8618 = vmatprep.subr.mxu0 %v7740_v38  ;;  %v15950_v7 = vpop.permute.xlu0 %4853  ;;  %v18045_v38 = vld [vmem:[#allocation64_spill] sm:$0xff]  ;;  %v7367_v56 = vmul.f32 %v7298_v39, %v7230_v6 }
 0x5e3   : > { %8619 = vmatpush2.msra.mxu0 %v7739_v43  ;;  %5619 = vrot.lane.b32.xlu1 %v18036_v32, %s17510_s30  ;;  %v4895_v36 = vsel %vm434_vm7, %v15828_v63, %v15950_v7  ;;  %v6798_v29 = vpop.permute.xlu1 %6797  ;;  %v18044_v63 = vld [vmem:[#allocation65_spill] sm:$0xff]  ;;  %v7229_v51 = vsel %vm1557_vm1, %v18045_v38, %v15792_v9  ;;  %v7368_v43 = vmul.f32 %v7302_v20, %v7227_v25 }
 0x5e4   : > { %8620 = vmatprep.subr.mxu0 %v7724_v59  ;;  %v5026_v2 = vmul.f32 %v15796_v41, %v4895_v36  ;;  %v5025_v41 = vmul.f32 %v15810_v3, %v4898_v0  ;;  %v18046_v3 = vld [vmem:[#allocation201_spill] sm:$0xff]  ;;  %v7352_v59 = vmul.f32 %v7302_v20, %v7226_v8  ;;  %v7351_v5 = vmul.f32 %v7298_v39, %v7229_v51 }
 0x5e5   : > { %8621 = vmatpush2.msra.mxu0 %v7723_v28  ;;  %5987 = vrot.lane.b32.xlu0 %v18044_v63, %s17778_s0  ;;  %v6859_v27 = vsel %vm1375_vm2, %v18046_v3, %v15867_v45  ;;  %v18047_v0 = vld [vmem:[#allocation141_spill] sm:$0xff]  ;;  %v7682_v39 = vrot.slane %v15852_v10, %v17649_v24  ;;  %v7597_v8 = vsel %vm1739_vm0, %v15563_v12, %v15934_v42  ;;  %s11051_s0 = smov [#allocation7]  }
 0x5e6   : > { %8622 = vmatprep.subr.mxu0 %v7384_v46  ;;  %8681 = vmatprep.subr.mxu1 %v5026_v2  ;;  %v15989_v62 = vpop.permute.xlu0 %6807  ;;  %v6858_v36 = vsel %vm1375_vm2, %v18047_v0, %v15899_v30  ;;  %v7011_v6 = vmul.f32 %v6926_v44, %v6859_v27  ;;  %v7678_v2 = vrot.slane %v15852_v10, %v17898_v49  ;;  %v18049_v0 = vld [vmem:[#allocation136_spill] sm:$0xff] }
 0x5e7   : > { %8623 = vmatpush2.msra.mxu0 %v7383_v58  ;;  %4865 = vrot.lane.b32.xlu1 %v15171_v26, %s17428_s22  ;;  %v6856_v9 = vsel %vm1375_vm2, %v15867_v45, %v15989_v62  ;;  %v7556_v28 = vpop.permute.xlu1 %7555  ;;  %v6995_v46 = vmul.f32 %v6926_v44, %v6858_v36 }
 0x5e8   : > { %8624 = vmatprep.subr.mxu0 %v7368_v43  ;;  %8682 = vmatpush1.msra.mxu1 %v5025_v41  ;;  %v7012_v25 = vmul.f32 %v6930_v52, %v6856_v9  ;;  %v7757_v41 = vmul.f32 %v7678_v2, %v7597_v8  ;;  %v18048_v43 = vld [vmem:[#allocation120_spill] sm:$0xff] }
 0x5e9   : > { %8625 = vmatpush2.msra.mxu0 %v7367_v56  ;;  %4867 = vrot.lane.b32.xlu0 %v15478_v35, %s17428_s22  ;;  %v6857_v12 = vsel %vm1375_vm2, %v18048_v43, %v6798_v29  ;;  %v18050_v43 = vld [vmem:[#allocation78_spill] sm:$0xff] }
 0x5ea   : > { %8626 = vmatprep.subr.mxu0 %v7352_v59  ;;  %v16009_v53 = vpop.permute.xlu0 %6805  ;;  %v6979_v27 = vmul.f32 %v6926_v44, %v6857_v12  ;;  %v7596_v59 = vsel %vm1739_vm0, %v15635_v16, %v7556_v28 }
 0x5eb   : > { %8627 = vmatpush2.msra.mxu0 %v7351_v5  ;;  %5615 = vrot.lane.b32.xlu1 %v18044_v63, %s17510_s30  ;;  %v6855_v45 = vsel %vm1375_vm2, %v15899_v30, %v16009_v53  ;;  %v6430_v58 = vpop.permute.xlu1 %6429  ;;  %v7741_v44 = vmul.f32 %v7678_v2, %v7596_v59 }
 0x5ec   : > { %8628 = vmatprep.subr.mxu0 %v7012_v25  ;;  %v6996_v20 = vmul.f32 %v6930_v52, %v6855_v45  ;;  %v6487_v16 = vsel %vm1193_vm3, %v18049_v0, %v6430_v58  ;;  %v18051_v0 = vld [vmem:[#allocation32_spill] sm:$0xff] }
 0x5ed   : > { %8629 = vmatpush2.msra.mxu0 %v7011_v6  ;;  %4859 = vrot.lane.b32.xlu0 %v17925_v11, %s17428_s22  ;;  %v6639_v45 = vmul.f32 %v15600_v4, %v6487_v16 }
 0x5ee   : > { %8630 = vmatprep.subr.mxu0 %v6996_v20  ;;  %v16027_v30 = vpop.permute.xlu0 %7563 }
 0x5ef   : > { %7575 = vrot.lane.b32.xlu1 %v18036_v32, %s17509_s16  ;;  %v7594_v38 = vsel %vm1739_vm0, %v15934_v42, %v16027_v30  ;;  %8631 = vmatpush2.msra.mxu0 %v6995_v46  ;;  %v7554_v9 = vpop.permute.xlu1 %7553 }
 0x5f0   : > { %v7758_v51 = vmul.f32 %v7682_v39, %v7594_v38  ;;  %v7595_v46 = vsel %vm1739_vm0, %v15706_v31, %v7554_v9 }
 0x5f1   : > { %5617 = vrot.lane.b32.xlu0 %v18034_v61, %s17510_s30  ;;  %s10669_s30 = scalar_lea.sflag [#allocation8], %s377_s2 }
 0x5f2   : > { %8693 = vmatprep.subr.mxu1 %v7758_v51  ;;  %v16040_v56 = vpop.permute.xlu0 %6803  ;;  %v7725_v51 = vmul.f32 %v7678_v2, %v7595_v46 }
 0x5f3   : > { %7567 = vrot.lane.b32.xlu1 %v15478_v35, %s17509_s16  ;;  %v6854_v42 = vsel %vm1375_vm2, %v6798_v29, %v16040_v56  ;;  %8694 = vmatpush2.msra.mxu1 %v7757_v41 }
 0x5f4   : > { %v6980_v3 = vmul.f32 %v6930_v52, %v6854_v42 }
 0x5f5   : > { %7569 = vrot.lane.b32.xlu0 %v15445_v33, %s17509_s16 }
 0x5f6   : > { %8632 = vmatprep.subr.mxu0 %v6980_v3  ;;  %v16052_v25 = vpop.permute.xlu0 %7561  ;;  %v7310_v3 = vrot.slane %v15919_v55, %v17649_v24 }
 0x5f7   : > { %5245 = vrot.lane.b32.xlu1 %v18034_v61, %s17427_s13  ;;  %v7593_v29 = vsel %vm1739_vm0, %v7556_v28, %v16052_v25  ;;  %8633 = vmatpush2.msra.mxu0 %v6979_v27  ;;  %v7306_v27 = vrot.slane %v15919_v55, %v17898_v49 }
 0x5f8   : > { %v7742_v52 = vmul.f32 %v7682_v39, %v7593_v29 }
 0x5f9   : > { %v6428_v5 = vpop.permute.xlu1 %6427  ;;  %5247 = vrot.lane.b32.xlu0 %v18036_v32, %s17427_s13 }
 0x5fa   : > { %8695 = vmatprep.subr.mxu1 %v7742_v52  ;;  %v16064_v36 = vpop.permute.xlu0 %6435  ;;  %v6486_v31 = vsel %vm1193_vm3, %v18050_v43, %v6428_v5 }
 0x5fb   : > { %7571 = vrot.lane.b32.xlu1 %v18044_v63, %s17509_s16  ;;  %v6484_v28 = vsel %vm1193_vm3, %v6430_v58, %v16064_v36  ;;  %8696 = vmatpush2.msra.mxu1 %v7741_v44  ;;  %v6623_v2 = vmul.f32 %v15600_v4, %v6486_v31 }
 0x5fc   : > { %v6640_v6 = vmul.f32 %v15595_v19, %v6484_v28  ;;  %v18052_v28 = vld [vmem:[#allocation146_spill] sm:$0xff] }
 0x5fd   : > { %v7186_v20 = vpop.permute.xlu1 %7185  ;;  %7573 = vrot.lane.b32.xlu0 %v18034_v61, %s17509_s16 }
 0x5fe   : > { %8634 = vmatprep.subr.mxu0 %v6640_v6  ;;  %v16078_v8 = vpop.permute.xlu0 %7559  ;;  %v7225_v59 = vsel %vm1557_vm1, %v15775_v47, %v7186_v20  ;;  %v16121_v47 = vld [vmem:[%s17096_s1 + $0x58] sm:$0xff] }
 0x5ff   : > { %7197 = vrot.lane.b32.xlu1 %v15445_v33, %s17511_s14  ;;  %v7592_v58 = vsel %vm1739_vm0, %v7554_v9, %v16078_v8  ;;  %8635 = vmatpush2.msra.mxu0 %v6639_v45  ;;  %v16125_v44 = vrot.slane %v16121_v47, %v17914_v40  ;;  %v16131_v16 = vrot.slane %v16121_v47, %v18051_v0 }
 0x600   : > { %v7726_v38 = vmul.f32 %v7682_v39, %v7592_v58 }
 0x601   : > { %v6450_v41 = vpop.permute.xlu1 %6449  ;;  %7565 = vrot.lane.b32.xlu0 %v15171_v26, %s17509_s16 }
 0x602   : > { %8697 = vmatprep.subr.mxu1 %v7726_v38  ;;  %v16090_v12 = vpop.permute.xlu0 %6433  ;;  %v6473_v6 = vsel %vm1193_vm3, %v18052_v28, %v6450_v41  ;;  %v16150_v38 = vld [vmem:[%s17100_s5 + $0x8] sm:$0xff] }
 0x603   : > { %4875 = vrot.lane.b32.xlu1 %v18036_v32, %s17428_s22  ;;  %v6483_v42 = vsel %vm1193_vm3, %v6428_v5, %v16090_v12  ;;  %8698 = vmatpush2.msra.mxu1 %v7725_v51  ;;  %v7385_v5 = vmul.f32 %v7306_v27, %v7225_v59  ;;  %v6611_v51 = vmul.f32 %v16131_v16, %v6473_v6 }
 0x604   : > { %v6624_v39 = vmul.f32 %v15595_v19, %v6483_v42 }
 0x605   : > { %v7184_v9 = vpop.permute.xlu1 %7183  ;;  %5243 = vrot.lane.b32.xlu0 %v18044_v63, %s17427_s13  ;;  %s10679_s13 = scalar_lea.hbm %s17106_s11, %s10898_s15 }
 0x606   : > { %8636 = vmatprep.subr.mxu0 %v6624_v39 }
 0x607   : > { %7201 = vrot.lane.b32.xlu1 %v18034_v61, %s17511_s14  ;;  %v16110_v19 = vpop.permute.xlu0 %7191  ;;  %8637 = vmatpush2.msra.mxu0 %v6623_v2 }
 0x608   : > { %v7222_v4 = vsel %vm1557_vm1, %v7186_v20, %v16110_v19  ;;  %8639 = vmatmul.mubr.f32.vlgmr.msra.gmra.mxu0 %v15645_v50 }
 0x609   : > { %v7386_v29 = vmul.f32 %v7310_v3, %v7222_v4  ;;  %v7182_v52 = vpop.permute.xlu1 %7181  ;;  %7203 = vrot.lane.b32.xlu0 %v18036_v32, %s17511_s14  ;;  %10867 = vmatprep.mubr.msk.f32.mxu0 %vm8259_vm10, %v15660_v17 }
 0x60b   : > { %7193 = vrot.lane.b32.xlu1 %v15171_v26, %s17511_s14  ;;  %8699 = vmatprep.subr.mxu1 %v7386_v29  ;;  %v16138_v45 = vpop.permute.xlu0 %6455  ;;  %v6938_v29 = vrot.slane %v15963_v15, %v17649_v24 }
 0x60c   : > { %v6470_v20 = vsel %vm1193_vm3, %v6450_v41, %v16138_v45  ;;  %8700 = vmatpush2.msra.mxu1 %v7385_v5  ;;  %8645 = vmatmul.mubr.f32.gmra.mxu0 %v15690_v18  ;;  %v7224_v41 = vsel %vm1557_vm1, %v15855_v57, %v7184_v9 }
 0x60d   : > { %v6612_v46 = vmul.f32 %v16125_v44, %v6470_v20  ;;  %v6814_v58 = vpop.permute.xlu1 %6813  ;;  %7195 = vrot.lane.b32.xlu0 %v15478_v35, %s17511_s14  ;;  %10870 = vmatprep.mubr.msk.f32.mxu0 %vm8259_vm10, %v16150_v38  ;;  %v7369_v2 = vmul.f32 %v7306_v27, %v7224_v41 }
 0x60f   : > { %4871 = vrot.lane.b32.xlu1 %v18044_v63, %s17428_s22  ;;  %8728 = vmatprep.subr.mxu0 %v6612_v46  ;;  %v16160_v43 = vpop.permute.xlu0 %7189 }
 0x610   : > { %v7221_v31 = vsel %vm1557_vm1, %v7184_v9, %v16160_v43  ;;  %8729 = vmatpush1.msra.mxu0 %v6611_v51  ;;  %v7223_v9 = vsel %vm1557_vm1, %v15922_v54, %v7182_v52  ;;  %v6934_v54 = vrot.slane %v15963_v15, %v17898_v49  ;;  %v18053_v51 = vld [vmem:[#allocation14_spill] sm:$0xff] }
 0x611   : > { %v7370_v42 = vmul.f32 %v7310_v3, %v7221_v31  ;;  %v6812_v39 = vpop.permute.xlu1 %6811  ;;  %4873 = vrot.lane.b32.xlu0 %v18034_v61, %s17428_s22  ;;  %8730 = vmatprep.subr.mxu0 %v15445_v33  ;;  %v7353_v5 = vmul.f32 %v7306_v27, %v7223_v9  ;;  %v18054_v31 = vld [vmem:[#allocation49_spill] sm:$0xff]  ;;  %s10983_s22 = sshll.u32 %s11051_s0, 4  ;;  %s10984_s22 = int_to_ptr.vmem [resolvable:$false] %s10983_s22 }
 0x612   : > { %8731 = vmatpush1.msra.mxu0 %v15010_v37  ;;  %s10985_s21 = scalar_lea.vmem %s10984_s22, 32 }
 0x613   : > { %6831 = vrot.lane.b32.xlu1 %v18036_v32, %s17432_s24  ;;  %8701 = vmatprep.subr.mxu1 %v7370_v42  ;;  %v16171_v57 = vpop.permute.xlu0 %7187 }
 0x614   : > { %8732 = vmatprep.subr.mxu0 %v15478_v35  ;;  %v7220_v59 = vsel %vm1557_vm1, %v7182_v52, %v16171_v57  ;;  %8702 = vmatpush2.msra.mxu1 %v7369_v2  ;;  %v6853_v52 = vsel %vm1375_vm2, %v15989_v62, %v6814_v58 }
 0x615   : > { %v7354_v4 = vmul.f32 %v7310_v3, %v7220_v59  ;;  %8733 = vmatpush1.msra.mxu0 %v15106_v1  ;;  %v5980_v37 = vpop.permute.xlu1 %5979  ;;  %7199 = vrot.lane.b32.xlu0 %v18044_v63, %s17511_s14  ;;  %v7013_v27 = vmul.f32 %v6934_v54, %v6853_v52  ;;  %v18055_v59 = vld [vmem:[#allocation52_spill] sm:$0xff] }
 0x616   : > { %8734 = vmatprep.subr.mxu0 %v15171_v26  ;;  %v6010_v41 = vsel %vm979_vm4, %v18053_v51, %v5980_v37  ;;  %v18057_v51 = vld [vmem:[#allocation161_spill] sm:$0xff] }
 0x617   : > { %8735 = vmatpush1.msra.mxu0 %v17925_v11  ;;  %6829 = vrot.lane.b32.xlu1 %v18034_v61, %s17432_s24  ;;  %v16194_v1 = vpop.permute.xlu0 %6819  ;;  %v6852_v11 = vsel %vm1375_vm2, %v16009_v53, %v6812_v39  ;;  %v16216_v53 = vld [vmem:[%s17096_s1 + $0x38] sm:$0xff] }
 0x618   : > { %8703 = vmatprep.subr.mxu1 %v7354_v4  ;;  %v6850_v24 = vsel %vm1375_vm2, %v6814_v58, %v16194_v1  ;;  %v6997_v46 = vmul.f32 %v6934_v54, %v6852_v11  ;;  %v6102_v58 = vrot.slane %v16216_v53, %v18051_v0  ;;  %v18056_v11 = vld [vmem:[#allocation106_spill] sm:$0xff] }
 0x619   : > { %v7014_v49 = vmul.f32 %v6938_v29, %v6850_v24  ;;  %8704 = vmatpush2.msra.mxu1 %v7353_v5  ;;  %v6810_v3 = vpop.permute.xlu1 %6809  ;;  %6825 = vrot.lane.b32.xlu0 %v15445_v33, %s17432_s24 }
 0x61a   : > { %v6175_v4 = vmul.f32 %v6102_v58, %v6010_v41  ;;  %v6851_v5 = vsel %vm1375_vm2, %v16040_v56, %v6810_v3 }
 0x61b   : > { %6821 = vrot.lane.b32.xlu1 %v15171_v26, %s17432_s24  ;;  %8705 = vmatprep.subr.mxu1 %v7014_v49  ;;  %v16206_v62 = vpop.permute.xlu0 %6817  ;;  %v6106_v26 = vrot.slane %v16216_v53, %v17914_v40 }
 0x61c   : > { %v6849_v28 = vsel %vm1375_vm2, %v6812_v39, %v16206_v62  ;;  %8706 = vmatpush2.msra.mxu1 %v7013_v27  ;;  %v6981_v27 = vmul.f32 %v6934_v54, %v6851_v5 }
 0x61d   : > { %v6998_v6 = vmul.f32 %v6938_v29, %v6849_v28  ;;  %v5978_v20 = vpop.permute.xlu1 %5977  ;;  %6823 = vrot.lane.b32.xlu0 %v15478_v35, %s17432_s24 }
 0x61e   : > { %v6009_v56 = vsel %vm979_vm4, %v18056_v11, %v5978_v20 }
 0x61f   : > { %7579 = vrot.lane.b32.xlu1 %v18054_v31, %s17509_s16  ;;  %8707 = vmatprep.subr.mxu1 %v6998_v6  ;;  %v16227_v42 = vpop.permute.xlu0 %5985  ;;  %v6159_v54 = vmul.f32 %v6102_v58, %v6009_v56 }
 0x620   : > { %v6007_v39 = vsel %vm979_vm4, %v5980_v37, %v16227_v42  ;;  %8708 = vmatpush2.msra.mxu1 %v6997_v46 }
 0x621   : > { %v6176_v2 = vmul.f32 %v6106_v26, %v6007_v39  ;;  %v6442_v9 = vpop.permute.xlu1 %6441  ;;  %7581 = vrot.lane.b32.xlu0 %v18055_v59, %s17509_s16 }
 0x622   : > { %v6481_v46 = vsel %vm1193_vm3, %v16064_v36, %v6442_v9  ;;  %v18059_v36 = vld [vmem:[#allocation81_spill] sm:$0xff] }
 0x623   : > { %6459 = vrot.lane.b32.xlu1 %v18036_v32, %s17426_s12  ;;  %8736 = vmatprep.subr.mxu0 %v6176_v2  ;;  %v16239_v52 = vpop.permute.xlu0 %6815 }
 0x624   : > { %v6848_v37 = vsel %vm1375_vm2, %v6810_v3, %v16239_v52  ;;  %8737 = vmatpush1.msra.mxu0 %v6175_v4 }
 0x625   : > { %v6982_v24 = vmul.f32 %v6938_v29, %v6848_v37  ;;  %v5976_v49 = vpop.permute.xlu1 %5975  ;;  %6827 = vrot.lane.b32.xlu0 %v18044_v63, %s17432_s24 }
 0x626   : > { %v6008_v4 = vsel %vm979_vm4, %v18059_v36, %v5976_v49 }
 0x627   : > { %6451 = vrot.lane.b32.xlu1 %v15478_v35, %s17426_s12  ;;  %8709 = vmatprep.subr.mxu1 %v6982_v24  ;;  %v16251_v28 = vpop.permute.xlu0 %5983 }
 0x628   : > { %v6006_v3 = vsel %vm979_vm4, %v5978_v20, %v16251_v28  ;;  %8710 = vmatpush2.msra.mxu1 %v6981_v27  ;;  %v6143_v27 = vmul.f32 %v6102_v58, %v6008_v4  ;;  %v18061_v58 = vld [vmem:[#allocation13_spill] sm:$0xff]  ;;  %v18063_v4 = vld [vmem:[#allocation138_spill] sm:$0xff] }
 0x629   : > { %v6160_v29 = vmul.f32 %v6106_v26, %v6006_v3  ;;  %v6440_v6 = vpop.permute.xlu1 %6439  ;;  %6453 = vrot.lane.b32.xlu0 %v15445_v33, %s17426_s12  ;;  %v18058_v33 = vld [vmem:[#allocation154_spill] sm:$0xff]  ;;  %v18060_v3 = vld [vmem:[#allocation12_spill] sm:$0xff] }
 0x62a   : > { %v6641_v2 = vmul.f32 %v18058_v33, %v6481_v46  ;;  %v6480_v11 = vsel %vm1193_vm3, %v16090_v12, %v6440_v6  ;;  %v18062_v12 = vld [vmem:[#allocation79_spill] sm:$0xff] }
 0x62b   : > { %7209 = vrot.lane.b32.xlu1 %v18055_v59, %s17511_s14  ;;  %8738 = vmatprep.subr.mxu0 %v6160_v29  ;;  %v16263_v35 = vpop.permute.xlu0 %6447  ;;  %v16300_v29 = vrot.slane %v16121_v47, %v18061_v58 }
 0x62c   : > { %v6478_v20 = vsel %vm1193_vm3, %v6442_v9, %v16263_v35  ;;  %8739 = vmatpush1.msra.mxu0 %v6159_v54 }
 0x62d   : > { %v6642_v41 = vmul.f32 %v18057_v51, %v6478_v20  ;;  %v5608_v39 = vpop.permute.xlu1 %5607  ;;  %7577 = vrot.lane.b32.xlu0 %v18010_v48, %s17509_s16  ;;  %s378_s16 = scalar_lea.vmem [#allocation7], %s377_s2 }
 0x62e   : > { %s10681_s29 = sshll.u32 %s378_s16, 4  ;;  %s10682_s29 = int_to_ptr.vmem [resolvable:$true] %s10681_s29 }
 0x62f   : > { %7205 = vrot.lane.b32.xlu1 %v18010_v48, %s17511_s14  ;;  %8711 = vmatprep.subr.mxu1 %v6642_v41  ;;  %v16277_v5 = vpop.permute.xlu0 %5981  ;;  %v6625_v41 = vmul.f32 %v18058_v33, %v6480_v11  ;;  %p10986_p0 = scmp.lt.s32.totalorder %s10682_s29, %s10984_s22 }
 0x630   : > { %v6005_v9 = vsel %vm979_vm4, %v5976_v49, %v16277_v5  ;;  %8712 = vmatpush2.msra.mxu1 %v6641_v2  ;;  %v16293_v49 = vrot.slane %v16121_v47, %v18060_v3 }
 0x631   : > { %v6144_v37 = vmul.f32 %v6106_v26, %v6005_v9  ;;  %v6462_v24 = vpop.permute.xlu1 %6461  ;;  %6457 = vrot.lane.b32.xlu0 %v18034_v61, %s17426_s12  ;;  %v5638_v9 = vsel %vm797_vm5, %v18063_v4, %v5608_v39 }
 0x632   : > { %v6512_v54 = vsel %vm1193_vm3, %v6462_v24, %v18062_v12  ;;  %v6467_v2 = vsel %vm1193_vm3, %v16138_v45, %v6462_v24  ;;  %v8248_v45 = vld [vmem:[%s17101_s6 + $0x8] sm:$0xff] }
 0x633   : > { %6835 = vrot.lane.b32.xlu1 %v18054_v31, %s17432_s24  ;;  %8740 = vmatprep.subr.mxu0 %v6144_v37  ;;  %v16289_v56 = vpop.permute.xlu0 %6445  ;;  %v6614_v37 = vmul.f32 %v16293_v49, %v6512_v54  ;;  %v6613_v24 = vmul.f32 %v16300_v29, %v6467_v2  ;;  %v18064_v54 = vld [vmem:[#allocation113_spill] sm:$0xff] }
 0x634   : > { %v6477_v26 = vsel %vm1193_vm3, %v6440_v6, %v16289_v56  ;;  %8741 = vmatpush1.msra.mxu0 %v6143_v27  ;;  %v16313_v6 = vld [vmem:[%s17096_s1 + $0x28] sm:$0xff] }
 0x635   : > { %v6626_v46 = vmul.f32 %v18057_v51, %v6477_v26  ;;  %v16306_v20 = vpop.permute.xlu1 %5611  ;;  %7207 = vrot.lane.b32.xlu0 %v18054_v31, %s17511_s14  ;;  %v5734_v47 = vrot.slane %v16313_v6, %v17914_v40  ;;  %v5730_v51 = vrot.slane %v16313_v6, %v18051_v0 }
 0x637   : > { %6465 = vrot.lane.b32.xlu1 %v18055_v59, %s17426_s12  ;;  %8713 = vmatprep.subr.mxu1 %v6626_v46  ;;  %v16325_v36 = vpop.permute.xlu0 %5613 }
 0x638   : > { %v5635_v33 = vsel %vm797_vm5, %v5608_v39, %v16325_v36  ;;  %8714 = vmatpush2.msra.mxu1 %v6625_v41  ;;  %v5803_v39 = vmul.f32 %v5730_v51, %v5638_v9  ;;  %v5358_v9 = vrot.slane %v15572_v13, %v18051_v0  ;;  %v8247_v13 = vld [vmem:[%s17101_s6] sm:$0xff] }
 0x639   : > { %v5804_v27 = vmul.f32 %v5734_v47, %v5635_v33  ;;  %v16338_v11 = vpop.permute.xlu1 %5609  ;;  %6837 = vrot.lane.b32.xlu0 %v18055_v59, %s17432_s24  ;;  %8716 = vmatmul.mubr.f32.vlgmr.msra.gmra.mxu1 %v15645_v50  ;;  %v10598_v50 = vld [vmem:[%s17103_s8] sm:$0xff] }
 0x63a   : > { %8805 = vmatprep.subr.mxu1 %v6614_v37  ;;  %10869 = vmatprep.mubr.msk.f32.mxu1 %vm8259_vm10, %v15660_v17 }
 0x63b   : > { %8806 = vmatpush1.msra.mxu1 %v6613_v24  ;;  %8256 = vperm.xlu1 %10952, %v8248_v45   ;;  %v5606_v26 = vpop.permute.xlu0 %5605 }
 0x63c   : > { %8742 = vmatprep.subr.mxu0 %v5804_v27  ;;  %8807 = vmatprep.subr.mxu1 %v18055_v59  ;;  %v5634_v12 = vsel %vm797_vm5, %v5606_v26, %v16306_v20  ;;  %v5637_v46 = vsel %vm797_vm5, %v18064_v54, %v5606_v26 }
 0x63d   : > { %v5787_v17 = vmul.f32 %v5730_v51, %v5637_v46  ;;  %v5788_v41 = vmul.f32 %v5734_v47, %v5634_v12  ;;  %8743 = vmatpush1.msra.mxu0 %v5803_v39  ;;  %8808 = vmatpush1.msra.mxu1 %v18036_v32  ;;  %v16356_v2 = vpop.permute.xlu1 %5241 }
 0x63e   : > { %6833 = vrot.lane.b32.xlu0 %v18010_v48, %s17432_s24  ;;  %8722 = vmatmul.mubr.f32.gmra.mxu1 %v15690_v18  ;;  %s10979_s24 = scalar_lea.vmem %s10682_s29, 16 }
 0x63f   : > { %8809 = vmatprep.subr.mxu1 %v18054_v31  ;;  %10601 = vperm.xlu1 %10952, %v10598_v50   ;;  %v5604_v59 = vpop.permute.xlu0 %5603  ;;  %v6110_v50 = vrot.slane %v16216_v53, %v18061_v58  ;;  %p10980_p11 = scmp.ne.s32.totalorder %s10682_s29, %s10979_s24  ;;  %p10987_p1 = scmp.lt.s32.totalorder %s10985_s21, %s10979_s24 }
 0x640   : > { %8810 = vmatpush1.msra.mxu1 %v18034_v61  ;;  %8744 = vmatprep.subr.mxu0 %v5788_v41  ;;  %v5633_v4 = vsel %vm797_vm5, %v5604_v59, %v16338_v11  ;;  %v5636_v32 = vsel %vm797_vm5, %v15533_v60, %v5604_v59  ;;  %v16377_v61 = vld [vmem:[%s17096_s1 + $0x18] sm:$0xff] }
 0x641   : > { %8811 = vmatprep.subr.mxu1 %v18010_v48  ;;  %v5771_v18 = vmul.f32 %v5730_v51, %v5636_v32  ;;  %v5772_v37 = vmul.f32 %v5734_v47, %v5633_v4  ;;  %8745 = vmatpush1.msra.mxu0 %v5787_v17  ;;  %v16372_v33 = vpop.permute.xlu1 %5239  ;;  %v5362_v45 = vrot.slane %v16377_v61, %v17914_v40  ;;  %v18065_v47 = vld [vmem:[#allocation97_spill] sm:$0xff]  ;;  %p10981_p12 = pnand %p10980_p11, %p11150_p5  ;;  %p10988_p2 = por %p10987_p1, %p10986_p0 }
 0x642   : > { %8812 = vmatpush1.msra.mxu1 %v18044_v63  ;;  %6463 = vrot.lane.b32.xlu0 %v18054_v31, %s17426_s12  ;;  %v6114_v17 = vrot.slane %v16216_v53, %v18060_v3  ;;  %v18067_v59 = vld [vmem:[#allocation173_spill] sm:$0xff] }
 0x643   : > { %8746 = vmatprep.subr.mxu0 %v5772_v37  ;;  %v5236_v60 = vpop.permute.xlu0 %5235  ;;  %10872 = vmatprep.mubr.msk.f32.mxu1 %vm8259_vm10, %v16150_v38  ;;  %v18066_v38 = vld [vmem:[#allocation80_spill] sm:$0xff]  ;;  %v18068_v32 = vld [vmem:[#allocation25_spill] sm:$0xff]  ;;  %p10982_p13 = pneg %p10981_p12 }
 0x644   : > { %v5263_v48 = vsel %vm615_vm6, %v5236_v60, %v16356_v2  ;;  %v5266_v63 = vsel %vm615_vm6, %v18065_v47, %v5236_v60  ;;  %8747 = vmatpush1.msra.mxu0 %v5771_v18 }
 0x645   : > { %v5431_v51 = vmul.f32 %v5358_v9, %v5266_v63  ;;  %v5432_v31 = vmul.f32 %v5362_v45, %v5263_v48  ;;  %v5232_v24 = vpop.permute.xlu1 %5231  ;;  %p10989_p3 = pnand %p10988_p2, %p10982_p13 }
 0x646   : > { %8251 = vperm.xlu0 %10951, %v8247_v13   ;;  %v5264_v47 = vsel %vm615_vm6, %v15735_v34, %v5232_v24  ;;  %v4986_v34 = vrot.slane %v15788_v23, %v18051_v0 }
 0x647   : > { %8748 = vmatprep.subr.mxu0 %v5432_v31  ;;  %v5234_v27 = vpop.permute.xlu0 %5233 }
 0x648   : > { %v5262_v39 = vsel %vm615_vm6, %v5234_v27, %v16372_v33  ;;  %v5265_v26 = vsel %vm615_vm6, %v18066_v38, %v5234_v27  ;;  %8749 = vmatpush1.msra.mxu0 %v5431_v51  ;;  %v5399_v38 = vmul.f32 %v5358_v9, %v5264_v47 }
 0x649   : > { %v5415_v12 = vmul.f32 %v5358_v9, %v5265_v26  ;;  %v5416_v54 = vmul.f32 %v5362_v45, %v5262_v39  ;;  %v5990_v46 = vpop.permute.xlu1 %5989  ;;  %v4990_v39 = vrot.slane %v15788_v23, %v17914_v40  ;;  %v5742_v9 = vrot.slane %v16313_v6, %v18060_v3 }
 0x64a   : > { %v6000_v4 = vsel %vm979_vm4, %v5990_v46, %v18067_v59  ;;  %v6003_v60 = vsel %vm979_vm4, %v16251_v28, %v5990_v46  ;;  %v5738_v23 = vrot.slane %v16313_v6, %v18061_v58  ;;  %v18069_v59 = vld [vmem:[#allocation181_spill] sm:$0xff] }
 0x64b   : > { %8750 = vmatprep.subr.mxu0 %v5416_v54  ;;  %v5992_v41 = vpop.permute.xlu0 %5991  ;;  %v6162_v63 = vmul.f32 %v6114_v17, %v6000_v4  ;;  %v6161_v31 = vmul.f32 %v6110_v50, %v6003_v60 }
 0x64c   : > { %v6001_v18 = vsel %vm979_vm4, %v5992_v41, %v18068_v32  ;;  %v6004_v37 = vsel %vm979_vm4, %v16227_v42, %v5992_v41  ;;  %8751 = vmatpush1.msra.mxu0 %v5415_v12  ;;  %v18070_v32 = vld [vmem:[#allocation110_spill] sm:$0xff] }
 0x64d   : > { %v6177_v53 = vmul.f32 %v6110_v50, %v6004_v37  ;;  %v6178_v13 = vmul.f32 %v6114_v17, %v6001_v18  ;;  %v16417_v48 = vpop.permute.xlu1 %4869 }
 0x64f   : > { %8813 = vmatprep.subr.mxu1 %v6178_v13  ;;  %v16422_v51 = vpop.permute.xlu0 %5237 }
 0x650   : > { %v5261_v42 = vsel %vm615_vm6, %v5232_v24, %v16422_v51  ;;  %8814 = vmatpush1.msra.mxu1 %v6177_v53 }
 0x651   : > { %v5400_v27 = vmul.f32 %v5362_v45, %v5261_v42  ;;  %v4862_v28 = vpop.permute.xlu1 %4861  ;;  %8815 = vmatprep.subr.mxu1 %v6162_v63 }
 0x652   : > { %8816 = vmatpush1.msra.mxu1 %v6161_v31  ;;  %v4893_v13 = vsel %vm434_vm7, %v15881_v21, %v4862_v28 }
 0x653   : > { %8752 = vmatprep.subr.mxu0 %v5400_v27  ;;  %v4864_v26 = vpop.permute.xlu0 %4863 }
 0x654   : > { %v4891_v12 = vsel %vm434_vm7, %v4864_v26, %v16417_v48  ;;  %v4894_v45 = vsel %vm434_vm7, %v15812_v22, %v4864_v26  ;;  %8753 = vmatpush1.msra.mxu0 %v5399_v38 }
 0x655   : > { %v5059_v24 = vmul.f32 %v4986_v34, %v4894_v45  ;;  %v5060_v54 = vmul.f32 %v4990_v39, %v4891_v12  ;;  %v5620_v46 = vpop.permute.xlu1 %5619  ;;  %v18071_v45 = vld [vmem:[#allocation171_spill] sm:$0xff] }
 0x656   : > { %v5629_v4 = vsel %vm797_vm5, %v5620_v46, %v18069_v59  ;;  %v5632_v37 = vsel %vm797_vm5, %v16325_v36, %v5620_v46 }
 0x657   : > { %8754 = vmatprep.subr.mxu0 %v5060_v54  ;;  %v5988_v41 = vpop.permute.xlu0 %5987  ;;  %v5806_v47 = vmul.f32 %v5742_v9, %v5629_v4  ;;  %v5805_v31 = vmul.f32 %v5738_v23, %v5632_v37  ;;  %v18072_v54 = vld [vmem:[#allocation58_spill] sm:$0xff]  ;;  %v7690_v4 = vrot.slane %v15852_v10, %v17914_v40 }
 0x658   : > { %v5999_v22 = vsel %vm979_vm4, %v5988_v41, %v18070_v32  ;;  %v6002_v18 = vsel %vm979_vm4, %v16277_v5, %v5988_v41  ;;  %8755 = vmatpush1.msra.mxu0 %v5059_v24 }
 0x659   : > { %v6145_v60 = vmul.f32 %v6110_v50, %v6002_v18  ;;  %v6146_v53 = vmul.f32 %v6114_v17, %v5999_v22  ;;  %v16453_v6 = vpop.permute.xlu1 %4865  ;;  %v5043_v50 = vmul.f32 %v4986_v34, %v4893_v13  ;;  %v7686_v22 = vrot.slane %v15852_v10, %v18051_v0 }
 0x65a   : > { %v5366_v10 = vrot.slane %v16377_v61, %v18061_v58 }
 0x65b   : > { %8817 = vmatprep.subr.mxu1 %v6146_v53  ;;  %v16458_v63 = vpop.permute.xlu0 %4867 }
 0x65c   : > { %v4890_v5 = vsel %vm434_vm7, %v4862_v28, %v16458_v63  ;;  %8818 = vmatpush1.msra.mxu1 %v6145_v60 }
 0x65d   : > { %v5044_v42 = vmul.f32 %v4990_v39, %v4890_v5  ;;  %v5616_v36 = vpop.permute.xlu1 %5615  ;;  %8819 = vmatprep.subr.mxu1 %v5806_v47  ;;  %v18073_v47 = vld [vmem:[#allocation124_spill] sm:$0xff] }
 0x65e   : > { %8820 = vmatpush1.msra.mxu1 %v5805_v31  ;;  %v5627_v24 = vsel %vm797_vm5, %v5616_v36, %v18071_v45  ;;  %v18074_v5 = vld [vmem:[#allocation60_spill] sm:$0xff] }
 0x65f   : > { %8756 = vmatprep.subr.mxu0 %v5044_v42  ;;  %v4860_v17 = vpop.permute.xlu0 %4859  ;;  %v5774_v32 = vmul.f32 %v5742_v9, %v5627_v24 }
 0x660   : > { %v4889_v21 = vsel %vm434_vm7, %v4860_v17, %v16453_v6  ;;  %v4892_v27 = vsel %vm434_vm7, %v15950_v7, %v4860_v17  ;;  %8757 = vmatpush1.msra.mxu0 %v5043_v50  ;;  %v5630_v7 = vsel %vm797_vm5, %v16338_v11, %v5616_v36 }
 0x661   : > { %v5027_v38 = vmul.f32 %v4986_v34, %v4892_v27  ;;  %v5028_v26 = vmul.f32 %v4990_v39, %v4889_v21  ;;  %v16469_v28 = vpop.permute.xlu1 %7575  ;;  %v5773_v37 = vmul.f32 %v5738_v23, %v5630_v7 }
 0x663   : > { %8758 = vmatprep.subr.mxu0 %v5028_v26  ;;  %v5618_v12 = vpop.permute.xlu0 %5617 }
 0x664   : > { %v5628_v46 = vsel %vm797_vm5, %v5618_v12, %v18072_v54  ;;  %v5631_v41 = vsel %vm797_vm5, %v16306_v20, %v5618_v12  ;;  %8759 = vmatpush1.msra.mxu0 %v5027_v38 }
 0x665   : > { %v5789_v39 = vmul.f32 %v5738_v23, %v5631_v41  ;;  %v5790_v34 = vmul.f32 %v5742_v9, %v5628_v46  ;;  %v7568_v59 = vpop.permute.xlu1 %7567  ;;  %v5370_v9 = vrot.slane %v16377_v61, %v18060_v3 }
 0x666   : > { %v7590_v21 = vsel %vm1739_vm0, %v16052_v25, %v7568_v59 }
 0x667   : > { %8821 = vmatprep.subr.mxu1 %v5790_v34  ;;  %v7570_v18 = vpop.permute.xlu0 %7569  ;;  %v7743_v45 = vmul.f32 %v7686_v22, %v7590_v21 }
 0x668   : > { %v7588_v20 = vsel %vm1739_vm0, %v7570_v18, %v16469_v28  ;;  %v7591_v11 = vsel %vm1739_vm0, %v16027_v30, %v7570_v18  ;;  %8822 = vmatpush1.msra.mxu1 %v5789_v39  ;;  %v10972_v39 = vld [vmem:[%s17096_s1 + $0x8] sm:$0xff] }
 0x669   : > { %v7759_v60 = vmul.f32 %v7686_v22, %v7591_v11  ;;  %v7760_v53 = vmul.f32 %v7690_v4, %v7588_v20  ;;  %v5246_v13 = vpop.permute.xlu1 %5245  ;;  %8823 = vmatprep.subr.mxu1 %v5774_v32  ;;  %v4998_v34 = vrot.slane %v10972_v39, %v18060_v3  ;;  %v4994_v32 = vrot.slane %v10972_v39, %v18061_v58  ;;  %v18075_v18 = vld [vmem:[#allocation42_spill] sm:$0xff]  ;;  %v18076_v20 = vld [vmem:[#allocation85_spill] sm:$0xff] }
 0x66a   : > { %8824 = vmatpush1.msra.mxu1 %v5773_v37  ;;  %v5256_v31 = vsel %vm615_vm6, %v5246_v13, %v18073_v47  ;;  %v5259_v36 = vsel %vm615_vm6, %v16372_v33, %v5246_v13  ;;  %v7318_v13 = vrot.slane %v15919_v55, %v17914_v40 }
 0x66b   : > { %8770 = vmatprep.subr.mxu0 %v7760_v53  ;;  %v5248_v23 = vpop.permute.xlu0 %5247  ;;  %v5418_v27 = vmul.f32 %v5370_v9, %v5256_v31  ;;  %v5417_v26 = vmul.f32 %v5366_v10, %v5259_v36 }
 0x66c   : > { %v5257_v30 = vsel %vm615_vm6, %v5248_v23, %v18074_v5  ;;  %v5260_v42 = vsel %vm615_vm6, %v16356_v2, %v5248_v23  ;;  %8771 = vmatpush2.msra.mxu0 %v7759_v60  ;;  %v7314_v23 = vrot.slane %v15919_v55, %v18051_v0 }
 0x66d   : > { %v5433_v61 = vmul.f32 %v5366_v10, %v5260_v42  ;;  %v5434_v50 = vmul.f32 %v5370_v9, %v5257_v30  ;;  %v16509_v17 = vpop.permute.xlu1 %7571 }
 0x66f   : > { %8825 = vmatprep.subr.mxu1 %v5434_v50  ;;  %v16514_v38 = vpop.permute.xlu0 %7573 }
 0x670   : > { %v7587_v2 = vsel %vm1739_vm0, %v7568_v59, %v16514_v38  ;;  %8826 = vmatpush1.msra.mxu1 %v5433_v61 }
 0x671   : > { %v7744_v12 = vmul.f32 %v7690_v4, %v7587_v2  ;;  %v7198_v33 = vpop.permute.xlu1 %7197  ;;  %8827 = vmatprep.subr.mxu1 %v5418_v27  ;;  %v18077_v27 = vld [vmem:[#allocation155_spill] sm:$0xff] }
 0x672   : > { %8828 = vmatpush1.msra.mxu1 %v5417_v26  ;;  %v7219_v47 = vsel %vm1557_vm1, %v16110_v19, %v7198_v33  ;;  %v18078_v2 = vld [vmem:[#allocation203_spill] sm:$0xff] }
 0x673   : > { %8772 = vmatprep.subr.mxu0 %v7744_v12  ;;  %v7566_v24 = vpop.permute.xlu0 %7565  ;;  %v7387_v30 = vmul.f32 %v7314_v23, %v7219_v47 }
 0x674   : > { %v7586_v25 = vsel %vm1739_vm0, %v7566_v24, %v16509_v17  ;;  %v7589_v54 = vsel %vm1739_vm0, %v16078_v8, %v7566_v24  ;;  %8773 = vmatpush2.msra.mxu0 %v7743_v45 }
 0x675   : > { %v7727_v46 = vmul.f32 %v7686_v22, %v7589_v54  ;;  %v7728_v41 = vmul.f32 %v7690_v4, %v7586_v25  ;;  %v4876_v7 = vpop.permute.xlu1 %4875 }
 0x676   : > { %v4885_v37 = vsel %vm434_vm7, %v4876_v7, %v18075_v18  ;;  %v4888_v22 = vsel %vm434_vm7, %v16417_v48, %v4876_v7 }
 0x677   : > { %8774 = vmatprep.subr.mxu0 %v7728_v41  ;;  %v5244_v59 = vpop.permute.xlu0 %5243  ;;  %v5061_v5 = vmul.f32 %v4994_v32, %v4888_v22 }
 0x678   : > { %v5255_v8 = vsel %vm615_vm6, %v5244_v59, %v18076_v20  ;;  %v5258_v4 = vsel %vm615_vm6, %v16422_v51, %v5244_v59  ;;  %8775 = vmatpush2.msra.mxu0 %v7727_v46  ;;  %v5062_v51 = vmul.f32 %v4998_v34, %v4885_v37  ;;  %v6942_v59 = vrot.slane %v15963_v15, %v18051_v0 }
 0x679   : > { %v5401_v11 = vmul.f32 %v5366_v10, %v5258_v4  ;;  %v5402_v60 = vmul.f32 %v5370_v9, %v5255_v8  ;;  %v16542_v53 = vpop.permute.xlu1 %7201 }
 0x67b   : > { %8829 = vmatprep.subr.mxu1 %v5402_v60  ;;  %v16551_v31 = vpop.permute.xlu0 %7203 }
 0x67c   : > { %v7216_v48 = vsel %vm1557_vm1, %v7198_v33, %v16551_v31  ;;  %8830 = vmatpush1.msra.mxu1 %v5401_v11 }
 0x67d   : > { %v7388_v10 = vmul.f32 %v7318_v13, %v7216_v48  ;;  %v7194_v9 = vpop.permute.xlu1 %7193  ;;  %8831 = vmatprep.subr.mxu1 %v5062_v51  ;;  %v18079_v51 = vld [vmem:[#allocation119_spill] sm:$0xff]  ;;  %v18080_v48 = vld [vmem:[#allocation140_spill] sm:$0xff] }
 0x67e   : > { %8832 = vmatpush1.msra.mxu1 %v5061_v5  ;;  %v7217_v54 = vsel %vm1557_vm1, %v16171_v57, %v7194_v9  ;;  %v6946_v57 = vrot.slane %v15963_v15, %v17914_v40 }
 0x67f   : > { %8776 = vmatprep.subr.mxu0 %v7388_v10  ;;  %v7196_v55 = vpop.permute.xlu0 %7195 }
 0x680   : > { %v7215_v19 = vsel %vm1557_vm1, %v7196_v55, %v16542_v53  ;;  %v7218_v42 = vsel %vm1557_vm1, %v16160_v43, %v7196_v55  ;;  %8777 = vmatpush2.msra.mxu0 %v7387_v30 }
 0x681   : > { %v7371_v36 = vmul.f32 %v7314_v23, %v7218_v42  ;;  %v7372_v61 = vmul.f32 %v7318_v13, %v7215_v19  ;;  %v4872_v50 = vpop.permute.xlu1 %4871 }
 0x682   : > { %v4883_v26 = vsel %vm434_vm7, %v4872_v50, %v18077_v27  ;;  %v4886_v43 = vsel %vm434_vm7, %v16453_v6, %v4872_v50 }
 0x683   : > { %8778 = vmatprep.subr.mxu0 %v7372_v61  ;;  %v4874_v21 = vpop.permute.xlu0 %4873  ;;  %v5030_v46 = vmul.f32 %v4998_v34, %v4883_v26  ;;  %v5029_v7 = vmul.f32 %v4994_v32, %v4886_v43 }
 0x684   : > { %v4884_v12 = vsel %vm434_vm7, %v4874_v21, %v18078_v2  ;;  %v4887_v33 = vsel %vm434_vm7, %v16458_v63, %v4874_v21  ;;  %8779 = vmatpush2.msra.mxu0 %v7371_v36 }
 0x685   : > { %v5045_v45 = vmul.f32 %v4994_v32, %v4887_v33  ;;  %v5046_v24 = vmul.f32 %v4998_v34, %v4884_v12  ;;  %v16574_v25 = vpop.permute.xlu1 %6831  ;;  %v7355_v34 = vmul.f32 %v7314_v23, %v7217_v54 }
 0x687   : > { %8833 = vmatprep.subr.mxu1 %v5046_v24  ;;  %v16579_v41 = vpop.permute.xlu0 %7199 }
 0x688   : > { %v7214_v63 = vsel %vm1557_vm1, %v7194_v9, %v16579_v41  ;;  %8834 = vmatpush1.msra.mxu1 %v5045_v45  ;;  %v10974_v45 = vld [vmem:[%s17096_s1 + $0x78] sm:$0xff] }
 0x689   : > { %v7356_v39 = vmul.f32 %v7318_v13, %v7214_v63  ;;  %v16584_v6 = vpop.permute.xlu1 %6829  ;;  %8835 = vmatprep.subr.mxu1 %v5030_v46  ;;  %v7326_v24 = vrot.slane %v10974_v45, %v18060_v3  ;;  %v7322_v46 = vrot.slane %v10974_v45, %v18061_v58 }
 0x68a   : > { %8836 = vmatpush1.msra.mxu1 %v5029_v7  ;;  %v18081_v7 = vld [vmem:[#allocation150_spill] sm:$0xff] }
 0x68b   : > { %8780 = vmatprep.subr.mxu0 %v7356_v39  ;;  %v6826_v18 = vpop.permute.xlu0 %6825  ;;  %v18082_v39 = vld [vmem:[#allocation86_spill] sm:$0xff] }
 0x68c   : > { %v6844_v32 = vsel %vm1375_vm2, %v6826_v18, %v16574_v25  ;;  %v6847_v37 = vsel %vm1375_vm2, %v16194_v1, %v6826_v18  ;;  %8781 = vmatpush2.msra.mxu0 %v7355_v34  ;;  %v10973_v1 = vld [vmem:[%s17096_s1 + $0x88] sm:$0xff] }
 0x68d   : > { %v7015_v20 = vmul.f32 %v6942_v59, %v6847_v37  ;;  %v7016_v8 = vmul.f32 %v6946_v57, %v6844_v32  ;;  %v6822_v4 = vpop.permute.xlu1 %6821  ;;  %v7694_v13 = vrot.slane %v10973_v1, %v18061_v58  ;;  %v7698_v23 = vrot.slane %v10973_v1, %v18060_v3  ;;  %v16654_v32 = vpop.f32.mrf.mxu1 }
 0x68e   : > { %v6845_v42 = vsel %vm1375_vm2, %v16239_v52, %v6822_v4 }
 0x68f   : > { %8782 = vmatprep.subr.mxu0 %v7016_v8  ;;  %v6824_v0 = vpop.permute.xlu0 %6823  ;;  %v6983_v27 = vmul.f32 %v6942_v59, %v6845_v42 }
 0x690   : > { %v6843_v40 = vsel %vm1375_vm2, %v6824_v0, %v16584_v6  ;;  %v6846_v15 = vsel %vm1375_vm2, %v16206_v62, %v6824_v0  ;;  %8783 = vmatpush2.msra.mxu0 %v7015_v20  ;;  %v16656_v20 = vpop.f32.mrf.mxu0 }
 0x691   : > { %v6999_v22 = vmul.f32 %v6942_v59, %v6846_v15  ;;  %v7000_v11 = vmul.f32 %v6946_v57, %v6843_v40  ;;  %v7580_v60 = vpop.permute.xlu1 %7579  ;;  %v16667_v15 = vpop.f32.mrf.mxu1 }
 0x692   : > { %v7629_v5 = vsel %vm1739_vm0, %v7580_v60, %v18079_v51  ;;  %v7584_v9 = vsel %vm1739_vm0, %v16514_v38, %v7580_v60  ;;  %v18083_v60 = vld [vmem:[#allocation88_spill] sm:$0xff] }
 0x693   : > { %8784 = vmatprep.subr.mxu0 %v7000_v11  ;;  %v7582_v47 = vpop.permute.xlu0 %7581  ;;  %v7746_v36 = vmul.f32 %v7698_v23, %v7629_v5  ;;  %v7745_v61 = vmul.f32 %v7694_v13, %v7584_v9  ;;  %v16670_v11 = vpop.f32.mrf.mxu0  ;;  %v10977_v9 = vld [vmem:[%s17096_s1 + $0x68] sm:$0xff] }
 0x694   : > { %v7585_v62 = vsel %vm1739_vm0, %v16469_v28, %v7582_v47  ;;  %v7630_v10 = vsel %vm1739_vm0, %v7582_v47, %v18080_v48  ;;  %8785 = vmatpush2.msra.mxu0 %v6999_v22  ;;  %v8415_v48 = vpop.f32.mrf.mxu1 }
 0x695   : > { %v7761_v30 = vmul.f32 %v7694_v13, %v7585_v62  ;;  %v7762_v55 = vmul.f32 %v7698_v23, %v7630_v10  ;;  %v16619_v19 = vpop.permute.xlu1 %6459  ;;  %v16687_v62 = vld [vmem:[%s17100_s5] sm:$0xff]  ;;  %v16693_v10 = vld [vmem:[%s17100_s5 + $0x18] sm:$0xff] }
 0x697   : > { %8847 = vmatprep.subr.mxu1 %v7762_v55  ;;  %v16624_v28 = vpop.permute.xlu0 %6827  ;;  %v6954_v55 = vrot.slane %v10977_v9, %v18060_v3 }
 0x698   : > { %v6842_v50 = vsel %vm1375_vm2, %v6822_v4, %v16624_v28  ;;  %8848 = vmatpush2.msra.mxu1 %v7761_v30  ;;  %v6950_v30 = vrot.slane %v10977_v9, %v18061_v58 }
 0x699   : > { %v6984_v21 = vmul.f32 %v6946_v57, %v6842_v50  ;;  %v6452_v38 = vpop.permute.xlu1 %6451  ;;  %8849 = vmatprep.subr.mxu1 %v7746_v36 }
 0x69a   : > { %8850 = vmatpush2.msra.mxu1 %v7745_v61  ;;  %v18085_v61 = vld [vmem:[#allocation123_spill] sm:$0xff] }
 0x69b   : > { %8786 = vmatprep.subr.mxu0 %v6984_v21  ;;  %v6454_v26 = vpop.permute.xlu0 %6453 }
 0x69c   : > { %v6472_v52 = vsel %vm1193_vm3, %v6454_v26, %v16619_v19  ;;  %v6475_v2 = vsel %vm1193_vm3, %v16263_v35, %v6454_v26  ;;  %8787 = vmatpush2.msra.mxu0 %v6983_v27 }
 0x69d   : > { %v6643_v12 = vmul.f32 %v16131_v16, %v6475_v2  ;;  %v6644_v33 = vmul.f32 %v16125_v44, %v6472_v52  ;;  %v7210_v43 = vpop.permute.xlu1 %7209  ;;  %v10978_v52 = vld [vmem:[%s17100_s5 + $0x10] sm:$0xff]  ;;  %v8417_v2 = vpop.f32.mrf.mxu1 }
 0x69e   : > { %v7258_v35 = vsel %vm1557_vm1, %v7210_v43, %v18081_v7  ;;  %v7213_v57 = vsel %vm1557_vm1, %v16551_v31, %v7210_v43  ;;  %v18089_v7 = vld [vmem:[#allocation89_spill] sm:$0xff] }
 0x69f   : > { %8788 = vmatprep.subr.mxu0 %v6644_v33  ;;  %v7578_v54 = vpop.permute.xlu0 %7577  ;;  %v7390_v8 = vmul.f32 %v7326_v24, %v7258_v35  ;;  %v7389_v0 = vmul.f32 %v7322_v46, %v7213_v57  ;;  %v18087_v33 = vmov 0.0  }
 0x6a0   : > { %v7583_v63 = vsel %vm1739_vm0, %v16509_v17, %v7578_v54  ;;  %v7628_v59 = vsel %vm1739_vm0, %v7578_v54, %v18082_v39  ;;  %8789 = vmatpush2.msra.mxu0 %v6643_v12  ;;  %v6474_v17 = vsel %vm1193_vm3, %v16289_v56, %v6452_v38 }
 0x6a1   : > { %v7729_v34 = vmul.f32 %v7694_v13, %v7583_v63  ;;  %v7730_v18 = vmul.f32 %v7698_v23, %v7628_v59  ;;  %v7206_v37 = vpop.permute.xlu1 %7205  ;;  %v6627_v22 = vmul.f32 %v16131_v16, %v6474_v17  ;;  %v16727_v63 = vpop.f32.mrf.mxu1 }
 0x6a2   : > { %v7256_v1 = vsel %vm1557_vm1, %v7206_v37, %v18083_v60  ;;  %v7211_v16 = vsel %vm1557_vm1, %v16579_v41, %v7206_v37 }
 0x6a3   : > { %8851 = vmatprep.subr.mxu1 %v7730_v18  ;;  %v16661_v4 = vpop.permute.xlu0 %6457  ;;  %v7358_v41 = vmul.f32 %v7326_v24, %v7256_v1  ;;  %v7357_v36 = vmul.f32 %v7322_v46, %v7211_v16  ;;  %v8565_v17 = vpop.f32.mrf.mxu1 }
 0x6a4   : > { %v6471_v31 = vsel %vm1193_vm3, %v6452_v38, %v16661_v4  ;;  %8852 = vmatpush2.msra.mxu1 %v7729_v34  ;;  %v18086_v38 = vld [vmem:[#allocation143_spill] sm:$0xff] }
 0x6a5   : > { %v6628_v40 = vmul.f32 %v16125_v44, %v6471_v31  ;;  %8853 = vmatprep.subr.mxu1 %v7390_v8  ;;  %v6836_v13 = vpop.permute.xlu1 %6835  ;;  %v18084_v44 = vld [vmem:[#allocation114_spill] sm:$0xff] }
 0x6a6   : > { %8854 = vmatpush2.msra.mxu1 %v7389_v0  ;;  %v6885_v50 = vsel %vm1375_vm2, %v6836_v13, %v18085_v61  ;;  %v6840_v3 = vsel %vm1375_vm2, %v16584_v6, %v6836_v13  ;;  %v18088_v6 = vld [vmem:[#allocation153_spill] sm:$0xff]  ;;  %v18090_v0 = vld [vmem:[#allocation118_spill] sm:$0xff] }
 0x6a7   : > { %8790 = vmatprep.subr.mxu0 %v6628_v40  ;;  %v7208_v56 = vpop.permute.xlu0 %7207  ;;  %v7002_v43 = vmul.f32 %v6954_v55, %v6885_v50  ;;  %v7001_v45 = vmul.f32 %v6950_v30, %v6840_v3 }
 0x6a8   : > { %v7212_v23 = vsel %vm1557_vm1, %v16542_v53, %v7208_v56  ;;  %v7257_v47 = vsel %vm1557_vm1, %v7208_v56, %v18084_v44  ;;  %8791 = vmatpush2.msra.mxu0 %v6627_v22  ;;  %v8338_v53 = vpop.f32.mrf.mxu0 }
 0x6a9   : > { %v7373_v51 = vmul.f32 %v7322_v46, %v7212_v23  ;;  %v7374_v5 = vmul.f32 %v7326_v24, %v7257_v47  ;;  %8793 = vmatmul.mubr.f32.vlgmr.msra.gmra.mxu0 %v16687_v62  ;;  %v6466_v12 = vpop.permute.xlu1 %6465  ;;  %v8569_v23 = vpop.f32.mrf.mxu1 }
 0x6aa   : > { %10871 = vmatprep.mubr.msk.f32.mxu0 %vm8259_vm10, %v16693_v10  ;;  %v6514_v54 = vsel %vm1193_vm3, %v6466_v12, %v18088_v6  ;;  %v6469_v39 = vsel %vm1193_vm3, %v16619_v19, %v6466_v12 }
 0x6ab   : > { %8855 = vmatprep.subr.mxu1 %v7374_v5  ;;  %v6838_v42 = vpop.permute.xlu0 %6837  ;;  %v6646_v18 = vmul.f32 %v16293_v49, %v6514_v54 }
 0x6ac   : > { %v6841_v21 = vsel %vm1375_vm2, %v16574_v25, %v6838_v42  ;;  %v6886_v27 = vsel %vm1375_vm2, %v6838_v42, %v18086_v38  ;;  %8856 = vmatpush2.msra.mxu1 %v7373_v51  ;;  %v8340_v25 = vpop.f32.mrf.mxu0  ;;  %v8571_v51 = vpop.f32.mrf.mxu1 }
 0x6ad   : > { %v7017_v58 = vmul.f32 %v6950_v30, %v6841_v21  ;;  %v7018_v26 = vmul.f32 %v6954_v55, %v6886_v27  ;;  %8799 = vmatmul.mubr.f32.gmra.mxu0 %v10978_v52  ;;  %8857 = vmatprep.subr.mxu1 %v7358_v41 }
 0x6ae   : > { %8858 = vmatpush2.msra.mxu1 %v7357_v36  ;;  %9042 = vmatprep.mubr.f32.mxu0 %v18087_v33  ;;  %v8486_v34 = vpop.f32.mrf.mxu0 }
 0x6af   : > { %8859 = vmatprep.subr.mxu1 %v7018_v26 }
 0x6b0   : > { %v6834_v24 = vpop.permute.xlu0 %6833  ;;  %8860 = vmatpush2.msra.mxu1 %v7017_v58  ;;  %v8488_v19 = vpop.f32.mrf.mxu0 }
 0x6b1   : > { %v6839_v46 = vsel %vm1375_vm2, %v16624_v28, %v6834_v24  ;;  %v6884_v35 = vsel %vm1375_vm2, %v6834_v24, %v18089_v7  ;;  %8861 = vmatprep.subr.mxu1 %v7002_v43  ;;  %v6645_v28 = vmul.f32 %v16300_v29, %v6469_v39 }
 0x6b2   : > { %v6985_v59 = vmul.f32 %v6950_v30, %v6839_v46  ;;  %v6986_v57 = vmul.f32 %v6954_v55, %v6884_v35  ;;  %8862 = vmatpush2.msra.mxu1 %v7001_v45 }
 0x6b4   : > { %8863 = vmatprep.subr.mxu1 %v6986_v57  ;;  %v6464_v37 = vpop.permute.xlu0 %6463 }
 0x6b5   : > { %v6468_v8 = vsel %vm1193_vm3, %v16661_v4, %v6464_v37  ;;  %v6513_v31 = vsel %vm1193_vm3, %v6464_v37, %v18090_v0  ;;  %8864 = vmatpush2.msra.mxu1 %v6985_v59 }
 0x6b6   : > { %v6629_v40 = vmul.f32 %v16300_v29, %v6468_v8  ;;  %v6630_v22 = vmul.f32 %v16293_v49, %v6513_v31  ;;  %8865 = vmatprep.subr.mxu1 %v6646_v18  ;;  %v16742_v56 = vpop.permute.xlu1 %8256  ;;  %v8492_v49 = vpop.f32.mrf.mxu0 }
 0x6b7   : > { %8866 = vmatpush2.msra.mxu1 %v6645_v28  ;;  %v16745_v60 = vadd.f32 %v8340_v25, %v16742_v56  ;;  %v8418_v1 = vadd.f32 %v8417_v2, %v16742_v56  ;;  %v16749_v4 = vadd.f32 %v8338_v53, %v16742_v56  ;;  %v8416_v14 = vadd.f32 %v8415_v48, %v16742_v56 }
 0x6b8   : > { %8867 = vmatprep.subr.mxu1 %v6630_v22  ;;  %v8494_v16 = vpop.f32.mrf.mxu0  ;;  %v8493_v30 = vadd.f32 %v8492_v49, %v16742_v56  ;;  %v8570_v55 = vadd.f32 %v8569_v23, %v16742_v56 }
 0x6b9   : > { %8868 = vmatpush2.msra.mxu1 %v6629_v40  ;;  %v8899_v29 = vmax.f32 %v16745_v60, 0.0  ;;  %v16753_v13 = vmax.f32 %v8418_v1, 0.0  ;;  %v8898_v44 = vmax.f32 %v16749_v4, 0.0  ;;  %v16757_v47 = vmax.f32 %v8416_v14, 0.0  ;;  %v16887_v1 = vld [vmem:[%s17102_s7 + $0x10] sm:$0xff] }
 0x6ba   : > { %8870 = vmatmul.mubr.f32.vlgmr.msra.gmra.mxu1 %v16687_v62  ;;  %v8495_v5 = vadd.f32 %v8494_v16, %v16742_v56  ;;  %v8572_v62 = vadd.f32 %v8571_v51, %v16742_v56  ;;  %v16814_v3 = vmax.f32 %v8493_v30, 0.0  ;;  %v16816_v58 = vmax.f32 %v8570_v55, 0.0 }
 0x6bb   : > { %9006 = vmatprep.subr.mxu0 %v8899_v29  ;;  %9077 = vmatprep.subr.mxu1 %v16753_v13 }
 0x6bc   : > { %10873 = vmatprep.mubr.msk.f32.mxu1 %vm8259_vm10, %v16693_v10  ;;  %9007 = vmatpush1.msra.mxu0 %v8898_v44  ;;  %v16794_v50 = vmax.f32 %v8495_v5, 0.0  ;;  %v16796_v21 = vmax.f32 %v8572_v62, 0.0 }
 0x6bd   : > { %9078 = vmatpush1.msra.mxu1 %v16757_v47 }
 0x6be   : > { %8876 = vmatmul.mubr.f32.gmra.mxu1 %v10978_v52 }
 0x6bf   : > { %9113 = vmatprep.mubr.f32.mxu1 %v18087_v33 }
 0x6c1   : > { %v16770_v48 = vpop.permute.xlu0 %8251 }
 0x6c2   : > { %v16774_v53 = vadd.f32 %v16670_v11, %v16770_v48  ;;  %v8412_v10 = vadd.f32 %v16667_v15, %v16770_v48  ;;  %v16780_v41 = vadd.f32 %v16656_v20, %v16770_v48  ;;  %v8410_v9 = vadd.f32 %v16654_v32, %v16770_v48  ;;  %v16804_v32 = vld [vmem:[%s17102_s7] sm:$0xff] }
 0x6c3   : > { %v8489_v15 = vadd.f32 %v8488_v19, %v16770_v48  ;;  %v8566_v20 = vadd.f32 %v8565_v17, %v16770_v48  ;;  %v8487_v38 = vadd.f32 %v8486_v34, %v16770_v48  ;;  %v8564_v27 = vadd.f32 %v16727_v63, %v16770_v48 }
 0x6c4   : > { %v8883_v42 = vmax.f32 %v16774_v53, 0.0  ;;  %v16787_v36 = vmax.f32 %v8412_v10, 0.0  ;;  %v8882_v11 = vmax.f32 %v16780_v41, 0.0  ;;  %v16790_v61 = vmax.f32 %v8410_v9, 0.0 }
 0x6c5   : > { %v16822_v52 = vmax.f32 %v8489_v15, 0.0  ;;  %v16824_v2 = vmax.f32 %v8566_v20, 0.0  ;;  %v16828_v12 = vmax.f32 %v8487_v38, 0.0  ;;  %v16830_v25 = vmax.f32 %v8564_v27, 0.0 }
 0x6c6   : > { %9008 = vmatprep.subr.mxu0 %v8883_v42  ;;  %9079 = vmatprep.subr.mxu1 %v16787_v36 }
 0x6c7   : > { %9009 = vmatpush1.msra.mxu0 %v8882_v11  ;;  %9080 = vmatpush1.msra.mxu1 %v16790_v61 }
 0x6c8   : > { %9148 = vmatprep.subr.mxu0 %v16794_v50  ;;  %9219 = vmatprep.subr.mxu1 %v16796_v21  ;;  %v8640_v26 = vpop.f32.mrf.mxu0 }
 0x6c9   : > { %10874 = vmatmul.mubr.msk.f32.vlgmr.msra.gmra.mxu0 %vm2749_vm9, %v16804_v32  ;;  %10875 = vmatmul.mubr.msk.f32.vlgmr.msra.gmra.mxu1 %vm2749_vm9, %v16804_v32  ;;  %v8641_v7 = vadd.f32 %v8640_v26, %v16770_v48 }
 0x6ca   : > { %9149 = vmatpush1.msra.mxu0 %v16814_v3  ;;  %9220 = vmatpush1.msra.mxu1 %v16816_v58  ;;  %v8642_v43 = vpop.f32.mrf.mxu0 }
 0x6cb   : > { %9150 = vmatprep.subr.mxu0 %v16822_v52  ;;  %9221 = vmatprep.subr.mxu1 %v16824_v2  ;;  %v8643_v54 = vadd.f32 %v8642_v43, %v16770_v48  ;;  %v16855_v59 = vmax.f32 %v8641_v7, 0.0 }
 0x6cc   : > { %9151 = vmatpush1.msra.mxu0 %v16828_v12  ;;  %9222 = vmatpush1.msra.mxu1 %v16830_v25  ;;  %v8646_v45 = vpop.f32.mrf.mxu0 }
 0x6cd   : > { %9184 = vmatprep.mubr.f32.mxu0 %v18087_v33  ;;  %9255 = vmatprep.mubr.f32.mxu1 %v18087_v33  ;;  %v8647_v24 = vadd.f32 %v8646_v45, %v16742_v56  ;;  %v16852_v39 = vmax.f32 %v8643_v54, 0.0 }
 0x6ce   : > { %v8648_v6 = vpop.f32.mrf.mxu0  ;;  %10876 = vmatmul.mubr.msk.f32.vlgmr.msra.gmra.mxu0 %vm2749_vm9, %v16804_v32  ;;  %10877 = vmatmul.mubr.msk.f32.vlgmr.msra.gmra.mxu1 %vm2749_vm9, %v16804_v32 }
 0x6cf   : > { %v8649_v46 = vadd.f32 %v8648_v6, %v16742_v56  ;;  %9397 = vmatprep.mubr.f32.mxu1 %v18087_v33  ;;  %9326 = vmatprep.mubr.f32.mxu0 %v18087_v33  ;;  %v16850_v63 = vmax.f32 %v8647_v24, 0.0 }
 0x6d1   : > { %v16848_v35 = vmax.f32 %v8649_v46, 0.0  ;;  %v10881_v46 = vld [vmem:[%s17102_s7 + $0x8] sm:$0xff] }
 0x6d3   : > { %9290 = vmatprep.subr.mxu0 %v16848_v35 }
 0x6d4   : > { %9291 = vmatpush1.msra.mxu0 %v16850_v63 }
 0x6d5   : > { %9292 = vmatprep.subr.mxu0 %v16852_v39 }
 0x6d6   : > { %9293 = vmatpush1.msra.mxu0 %v16855_v59 }
 0x6d7   : > { %10878 = vmatmul.mubr.msk.f32.vlgmr.msra.gmra.mxu0 %vm2749_vm9, %v16804_v32 }
 0x6d8   : > { %9468 = vmatprep.mubr.f32.mxu0 %v18087_v33 }
 0x6f9   : > { %v8717_v57 = vpop.f32.mrf.mxu1 }
 0x6fa   : > { %v8718_v0 = vadd.f32 %v8717_v57, %v16770_v48 }
 0x6fb   : > { %v8719_v34 = vpop.f32.mrf.mxu1 }
 0x6fc   : > { %v8720_v17 = vadd.f32 %v8719_v34, %v16770_v48  ;;  %v16874_v22 = vmax.f32 %v8718_v0, 0.0 }
 0x6fe   : > { %v8723_v18 = vpop.f32.mrf.mxu1  ;;  %v16871_v40 = vmax.f32 %v8720_v17, 0.0 }
 0x6ff   : > { %v8724_v37 = vadd.f32 %v8723_v18, %v16742_v56 }
 0x700   : > { %v8725_v28 = vpop.f32.mrf.mxu1 }
 0x701   : > { %v8726_v8 = vadd.f32 %v8725_v28, %v16742_v56  ;;  %v16869_v19 = vmax.f32 %v8724_v37, 0.0 }
 0x703   : > { %v16867_v31 = vmax.f32 %v8726_v8, 0.0  ;;  %v17028_v8 = vpop.permute.xlu1 %10601 }
 0x705   : > { %9361 = vmatprep.subr.mxu1 %v16867_v31 }
 0x706   : > { %9362 = vmatpush1.msra.mxu1 %v16869_v19 }
 0x707   : > { %9363 = vmatprep.subr.mxu1 %v16871_v40 }
 0x708   : > { %9364 = vmatpush1.msra.mxu1 %v16874_v22 }
 0x709   : > { %9542 = vmatprep.subr.mxu1 %v16753_v13  ;;  %10879 = vmatmul.mubr.msk.f32.vlgmr.msra.gmra.mxu1 %vm2749_vm9, %v16804_v32 }
 0x70a   : > { %9543 = vmatpush1.msra.mxu1 %v16757_v47  ;;  %9578 = vmatprep.mubr.f32.mxu1 %v18087_v33 }
 0x70b   : > { %9544 = vmatprep.subr.mxu1 %v16787_v36 }
 0x70c   : > { %9545 = vmatpush1.msra.mxu1 %v16790_v61 }
 0x70d   : > { %9684 = vmatprep.subr.mxu1 %v16796_v21  ;;  %10883 = vmatmul.mubr.msk.f32.vlgmr.msra.gmra.mxu1 %vm2749_vm9, %v16887_v1 }
 0x70e   : > { %9685 = vmatpush1.msra.mxu1 %v16816_v58  ;;  %9720 = vmatprep.mubr.f32.mxu1 %v18087_v33 }
 0x70f   : > { %9686 = vmatprep.subr.mxu1 %v16824_v2 }
 0x710   : > { %9687 = vmatpush1.msra.mxu1 %v16830_v25 }
 0x711   : > { %9826 = vmatprep.subr.mxu1 %v16867_v31  ;;  %10885 = vmatmul.mubr.msk.f32.vlgmr.msra.gmra.mxu1 %vm2749_vm9, %v16887_v1 }
 0x712   : > { %9827 = vmatpush1.msra.mxu1 %v16869_v19  ;;  %9862 = vmatprep.mubr.f32.mxu1 %v18087_v33 }
 0x713   : > { %9828 = vmatprep.subr.mxu1 %v16871_v40 }
 0x714   : > { %9829 = vmatpush1.msra.mxu1 %v16874_v22 }
 0x715   : > { %10887 = vmatmul.mubr.msk.f32.vlgmr.msra.gmra.mxu1 %vm2749_vm9, %v16887_v1 }
 0x716   : > { %10004 = vmatprep.mubr.f32.mxu1 %v18087_v33 }
 0x769   : > { %v8794_v14 = vpop.f32.mrf.mxu0 }
 0x76a   : > { %v8795_v10 = vadd.f32 %v8794_v14, %v16770_v48 }
 0x76b   : > { %v8796_v49 = vpop.f32.mrf.mxu0 }
 0x76c   : > { %v8797_v5 = vadd.f32 %v8796_v49, %v16770_v48  ;;  %v16919_v15 = vmax.f32 %v8795_v10, 0.0 }
 0x76d   : > { %v8800_v23 = vpop.f32.mrf.mxu0 }
 0x76e   : > { %v8801_v16 = vadd.f32 %v8800_v23, %v16742_v56  ;;  %v16916_v55 = vmax.f32 %v8797_v5, 0.0 }
 0x76f   : > { %v8802_v51 = vpop.f32.mrf.mxu0 }
 0x770   : > { %v8803_v62 = vadd.f32 %v8802_v51, %v16742_v56  ;;  %v16914_v30 = vmax.f32 %v8801_v16, 0.0 }
 0x772   : > { %v16912_v9 = vmax.f32 %v8803_v62, 0.0 }
 0x774   : > { %9432 = vmatprep.subr.mxu0 %v16912_v9 }
 0x775   : > { %9433 = vmatpush1.msra.mxu0 %v16914_v30 }
 0x776   : > { %9434 = vmatprep.subr.mxu0 %v16916_v55 }
 0x777   : > { %9435 = vmatpush1.msra.mxu0 %v16919_v15 }
 0x778   : > { %10880 = vmatmul.mubr.msk.f32.vlgmr.msra.gmra.mxu0 %vm2749_vm9, %v16804_v32  ;;  %9613 = vmatprep.subr.mxu0 %v16794_v50 }
 0x779   : > { %9614 = vmatpush1.msra.mxu0 %v16814_v3  ;;  %9649 = vmatprep.mubr.f32.mxu0 %v18087_v33 }
 0x77a   : > { %v8871_v20 = vpop.f32.mrf.mxu1  ;;  %9615 = vmatprep.subr.mxu0 %v16822_v52 }
 0x77b   : > { %9616 = vmatpush1.msra.mxu0 %v16828_v12  ;;  %v8872_v24 = vadd.f32 %v8871_v20, %v16770_v48 }
 0x77c   : > { %v8873_v38 = vpop.f32.mrf.mxu1  ;;  %10884 = vmatmul.mubr.msk.f32.vlgmr.msra.gmra.mxu0 %vm2749_vm9, %v16887_v1  ;;  %9755 = vmatprep.subr.mxu0 %v16848_v35 }
 0x77d   : > { %9756 = vmatpush1.msra.mxu0 %v16850_v63  ;;  %9791 = vmatprep.mubr.f32.mxu0 %v18087_v33  ;;  %v16945_v43 = vadd.f32 %v8873_v38, %v16770_v48  ;;  %v8896_v48 = vmax.f32 %v8872_v24, 0.0 }
 0x77e   : > { %v8877_v32 = vpop.f32.mrf.mxu1  ;;  %9757 = vmatprep.subr.mxu0 %v16852_v39 }
 0x77f   : > { %9758 = vmatpush1.msra.mxu0 %v16855_v59  ;;  %v16939_v27 = vadd.f32 %v8877_v32, %v16742_v56 }
 0x780   : > { %v8879_v26 = vpop.f32.mrf.mxu1  ;;  %10886 = vmatmul.mubr.msk.f32.vlgmr.msra.gmra.mxu0 %vm2749_vm9, %v16887_v1  ;;  %9897 = vmatprep.subr.mxu0 %v16912_v9 }
 0x781   : > { %v8880_v45 = vadd.f32 %v8879_v26, %v16742_v56  ;;  %9898 = vmatpush1.msra.mxu0 %v16914_v30  ;;  %9933 = vmatprep.mubr.f32.mxu0 %v18087_v33  ;;  %v8912_v54 = vmax.f32 %v16939_v27, 0.0  ;;  %v8897_v56 = vmax.f32 %v16945_v43, 0.0 }
 0x782   : > { %9899 = vmatprep.subr.mxu0 %v16916_v55 }
 0x783   : > { %v8913_v6 = vmax.f32 %v8880_v45, 0.0  ;;  %9900 = vmatpush1.msra.mxu0 %v16919_v15 }
 0x784   : > { %10888 = vmatmul.mubr.msk.f32.vlgmr.msra.gmra.mxu0 %vm2749_vm9, %v16887_v1  ;;  %10042 = vmatprep.subr.mxu0 %v8899_v29 }
 0x785   : > { %9968 = vmatprep.subr.mxu1 %v8913_v6  ;;  %10043 = vmatpush1.msra.mxu0 %v8898_v44 }
 0x786   : > { %9969 = vmatpush1.msra.mxu1 %v8912_v54  ;;  %10044 = vmatprep.subr.mxu0 %v8883_v42 }
 0x787   : > { %9970 = vmatprep.subr.mxu1 %v8897_v56  ;;  %10045 = vmatpush1.msra.mxu0 %v8882_v11 }
 0x788   : > { %9971 = vmatpush1.msra.mxu1 %v8896_v48  ;;  %10078 = vmatprep.mubr.f32.mxu0 %v18087_v33 }
 0x789   : > { %10889 = vmatmul.mubr.msk.f32.vlgmr.msra.gmra.mxu1 %vm2749_vm9, %v16887_v1  ;;  %10890 = vmatmul.mubr.msk.f32.vlgmr.msra.gmra.mxu0 %vm2749_vm9, %v10881_v46  ;;  %v9115_v60 = vpop.f32.mrf.mxu1  ;;  %v9044_v29 = vpop.f32.mrf.mxu0 }
 0x78a   : > { %10113 = vmatprep.subr.mxu1 %v16753_v13  ;;  %10184 = vmatprep.subr.mxu0 %v16794_v50 }
 0x78b   : > { %10114 = vmatpush1.msra.mxu1 %v16757_v47  ;;  %10185 = vmatpush1.msra.mxu0 %v16814_v3  ;;  %v9117_v4 = vpop.f32.mrf.mxu1  ;;  %v9046_v44 = vpop.f32.mrf.mxu0 }
 0x78c   : > { %10115 = vmatprep.subr.mxu1 %v16787_v36  ;;  %10186 = vmatprep.subr.mxu0 %v16822_v52 }
 0x78d   : > { %10116 = vmatpush1.msra.mxu1 %v16790_v61  ;;  %10149 = vmatprep.mubr.f32.mxu1 %v18087_v33 }
 0x78e   : > { %10187 = vmatpush1.msra.mxu0 %v16828_v12  ;;  %10220 = vmatprep.mubr.f32.mxu0 %v18087_v33  ;;  %v9257_v13 = vpop.f32.mrf.mxu1  ;;  %v9186_v53 = vpop.f32.mrf.mxu0 }
 0x78f   : > { %10891 = vmatmul.mubr.msk.f32.vlgmr.msra.gmra.mxu1 %vm2749_vm9, %v10881_v46  ;;  %10892 = vmatmul.mubr.msk.f32.vlgmr.msra.gmra.mxu0 %vm2749_vm9, %v10881_v46 }
 0x790   : > { %10255 = vmatprep.subr.mxu1 %v16796_v21  ;;  %10326 = vmatprep.subr.mxu0 %v16848_v35  ;;  %v9259_v47 = vpop.f32.mrf.mxu1  ;;  %v9188_v42 = vpop.f32.mrf.mxu0 }
 0x791   : > { %10256 = vmatpush1.msra.mxu1 %v16816_v58  ;;  %10327 = vmatpush1.msra.mxu0 %v16850_v63 }
 0x792   : > { %10257 = vmatprep.subr.mxu1 %v16824_v2  ;;  %10328 = vmatprep.subr.mxu0 %v16852_v39 }
 0x793   : > { %10258 = vmatpush1.msra.mxu1 %v16830_v25  ;;  %10291 = vmatprep.mubr.f32.mxu1 %v18087_v33 }
 0x794   : > { %10329 = vmatpush1.msra.mxu0 %v16855_v59  ;;  %10362 = vmatprep.mubr.f32.mxu0 %v18087_v33 }
 0x795   : > { %10893 = vmatmul.mubr.msk.f32.vlgmr.msra.gmra.mxu1 %vm2749_vm9, %v10881_v46  ;;  %10894 = vmatmul.mubr.msk.f32.vlgmr.msra.gmra.mxu0 %vm2749_vm9, %v10881_v46 }
 0x796   : > { %10397 = vmatprep.subr.mxu1 %v16867_v31  ;;  %10468 = vmatprep.subr.mxu0 %v16912_v9 }
 0x797   : > { %10398 = vmatpush1.msra.mxu1 %v16869_v19  ;;  %10469 = vmatpush1.msra.mxu0 %v16914_v30  ;;  %v17014_v11 = vpop.f32.mrf.mxu0 }
 0x798   : > { %10399 = vmatprep.subr.mxu1 %v16871_v40  ;;  %10470 = vmatprep.subr.mxu0 %v16916_v55 }
 0x799   : > { %10400 = vmatpush1.msra.mxu1 %v16874_v22  ;;  %10433 = vmatprep.mubr.f32.mxu1 %v18087_v33  ;;  %v17016_v61 = vpop.f32.mrf.mxu0 }
 0x79a   : > { %10471 = vmatpush1.msra.mxu0 %v16919_v15  ;;  %10504 = vmatprep.mubr.f32.mxu0 %v18087_v33 }
 0x79b   : > { %10895 = vmatmul.mubr.msk.f32.vlgmr.msra.gmra.mxu1 %vm2749_vm9, %v10881_v46  ;;  %10896 = vmatmul.mubr.msk.f32.vlgmr.msra.gmra.mxu0 %vm2749_vm9, %v10881_v46 }
 0x79c   : > { %10539 = vmatprep.subr.mxu1 %v8913_v6  ;;  %10575 = vmatprep.mubr.f32.mxu1 %v18087_v33 }
 0x79d   : > { %10540 = vmatpush1.msra.mxu1 %v8912_v54 }
 0x79e   : > { %10541 = vmatprep.subr.mxu1 %v8897_v56 }
 0x79f   : > { %10542 = vmatpush1.msra.mxu1 %v8896_v48 }
 0x7a0   : > { %10897 = vmatmul.mubr.msk.f32.vlgmr.msra.gmra.mxu1 %vm2749_vm9, %v10881_v46 }
 0x7c9   : > { %v17010_v41 = vpop.f32.mrf.mxu1 }
 0x7cb   : > { %v17012_v36 = vpop.f32.mrf.mxu1 }
 0x7cd   : > { %v9580_v33 = vpop.f32.mrf.mxu1 }
 0x7cf   : > { %v9582_v50 = vpop.f32.mrf.mxu1 }
 0x7d1   : > { %v9722_v58 = vpop.f32.mrf.mxu1 }
 0x7d3   : > { %v9724_v12 = vpop.f32.mrf.mxu1 }
 0x7d5   : > { %v9864_v35 = vpop.f32.mrf.mxu1 }
 0x7d7   : > { %v9866_v59 = vpop.f32.mrf.mxu1 }
 0x838   : > { %v17018_v21 = vpop.f32.mrf.mxu0 }
 0x83a   : > { %v17020_v3 = vpop.f32.mrf.mxu0 }
 0x83c   : > { %v9651_v52 = vpop.f32.mrf.mxu0 }
 0x83e   : > { %v9653_v2 = vpop.f32.mrf.mxu0 }
 0x840   : > { %v9793_v25 = vpop.f32.mrf.mxu0 }
 0x842   : > { %v9795_v7 = vpop.f32.mrf.mxu0 }
 0x844   : > { %v9935_v63 = vpop.f32.mrf.mxu0 }
 0x846   : > { %v17022_v39 = vpop.f32.mrf.mxu0 }
 0x849   : > { %v17024_v57 = vpop.f32.mrf.mxu1  ;;  %v10080_v34 = vpop.f32.mrf.mxu0 }
 0x84a   : > { %v10582_v18 = vadd.f32 %v10080_v34, %v9580_v33 }
 0x84b   : > { %v17026_v37 = vpop.f32.mrf.mxu1  ;;  %v10082_v28 = vpop.f32.mrf.mxu0 }
 0x84c   : > { %v10583_v17 = vadd.f32 %v10082_v28, %v9582_v50  ;;  %v10604_v31 = vadd.f32 %v17028_v8, %v10582_v18 }
 0x84e   : > { %v10605_v0 = vadd.f32 %v17028_v8, %v10583_v17  ;;  %v10620_v62 = vmax.f32 %v10604_v31, 0.0 }
 0x84f   : > { %v10151_v19 = vpop.f32.mrf.mxu1  ;;  %v10222_v40 = vpop.f32.mrf.mxu0 }
 0x850   : > { %v10152_v22 = vadd.f32 %v10151_v19, %v9044_v29  ;;  %v10223_v1 = vadd.f32 %v10222_v40, %v9115_v60  ;;  %v10621_v14 = vmax.f32 %v10605_v0, 0.0 }
 0x851   : > { %v10153_v49 = vpop.f32.mrf.mxu1  ;;  %v10224_v23 = vpop.f32.mrf.mxu0 }
 0x852   : > { %v10584_v16 = vadd.f32 %v10152_v22, %v9651_v52  ;;  %v10586_v51 = vadd.f32 %v10223_v1, %v9722_v58  ;;  %v10154_v5 = vadd.f32 %v10153_v49, %v9046_v44  ;;  %v10225_v10 = vadd.f32 %v10224_v23, %v9117_v4 }
 0x853   : > { %v10636_v55 = vadd.f32 %v10621_v14, %v10620_v62 }
 0x854   : > { %v10606_v9 = vadd.f32 %v17028_v8, %v10584_v16  ;;  %v10585_v30 = vadd.f32 %v10154_v5, %v9653_v2  ;;  %v10587_v15 = vadd.f32 %v10225_v10, %v9724_v12  ;;  %v10608_v27 = vadd.f32 %v17028_v8, %v10586_v51 }
 0x855   : > { %v10293_v20 = vpop.f32.mrf.mxu1  ;;  %v10364_v38 = vpop.f32.mrf.mxu0 }
 0x856   : > { %v10622_v32 = vmax.f32 %v10606_v9, 0.0  ;;  %v10607_v26 = vadd.f32 %v17028_v8, %v10585_v30  ;;  %v10294_v43 = vadd.f32 %v10293_v20, %v9186_v53  ;;  %v10609_v45 = vadd.f32 %v17028_v8, %v10587_v15 }
 0x857   : > { %v10365_v24 = vadd.f32 %v10364_v38, %v9257_v13  ;;  %v10295_v6 = vpop.f32.mrf.mxu1  ;;  %v10366_v54 = vpop.f32.mrf.mxu0  ;;  %v10624_v44 = vmax.f32 %v10608_v27, 0.0 }
 0x858   : > { %v10637_v56 = vadd.f32 %v10636_v55, %v10622_v32  ;;  %v10623_v48 = vmax.f32 %v10607_v26, 0.0  ;;  %v10588_v46 = vadd.f32 %v10294_v43, %v9793_v25  ;;  %v10296_v60 = vadd.f32 %v10295_v6, %v9188_v42 }
 0x859   : > { %v10590_v4 = vadd.f32 %v10365_v24, %v9864_v35  ;;  %v10367_v29 = vadd.f32 %v10366_v54, %v9259_v47  ;;  %v10625_v53 = vmax.f32 %v10609_v45, 0.0 }
 0x85a   : > { %v10638_v33 = vadd.f32 %v10637_v56, %v10623_v48  ;;  %v10610_v50 = vadd.f32 %v17028_v8, %v10588_v46  ;;  %v10589_v58 = vadd.f32 %v10296_v60, %v9795_v7 }
 0x85b   : > { %v10591_v52 = vadd.f32 %v10367_v29, %v9866_v59  ;;  %v10435_v2 = vpop.f32.mrf.mxu1  ;;  %v10506_v12 = vpop.f32.mrf.mxu0  ;;  %v10612_v25 = vadd.f32 %v17028_v8, %v10590_v4  ;;  %v10664_v29 = vld [vmem:[%s17105_s10] sm:$0x1] }
 0x85c   : > { %v10639_v34 = vadd.f32 %v10638_v33, %v10624_v44  ;;  %v10611_v13 = vadd.f32 %v17028_v8, %v10589_v58  ;;  %v10436_v18 = vadd.f32 %v10435_v2, %v17014_v11  ;;  %v10626_v28 = vmax.f32 %v10610_v50, 0.0 }
 0x85d   : > { %v10437_v42 = vpop.f32.mrf.mxu1  ;;  %v10508_v35 = vpop.f32.mrf.mxu0  ;;  %v10507_v0 = vadd.f32 %v10506_v12, %v17010_v41  ;;  %v10613_v59 = vadd.f32 %v17028_v8, %v10591_v52  ;;  %v10628_v1 = vmax.f32 %v10612_v25, 0.0 }
 0x85e   : > { %v10640_v47 = vadd.f32 %v10639_v34, %v10625_v53  ;;  %v10592_v17 = vadd.f32 %v10436_v18, %v9935_v63  ;;  %v10438_v7 = vadd.f32 %v10437_v42, %v17016_v61  ;;  %v10627_v19 = vmax.f32 %v10611_v13, 0.0 }
 0x85f   : > { %v10509_v22 = vadd.f32 %v10508_v35, %v17012_v36  ;;  %v10594_v23 = vadd.f32 %v10507_v0, %v17024_v57  ;;  %v10629_v63 = vmax.f32 %v10613_v59, 0.0 }
 0x860   : > { %v10641_v31 = vadd.f32 %v10640_v47, %v10626_v28  ;;  %v10593_v40 = vadd.f32 %v10438_v7, %v17022_v39  ;;  %v10577_v11 = vpop.f32.mrf.mxu1  ;;  %v10614_v49 = vadd.f32 %v17028_v8, %v10592_v17 }
 0x861   : > { %v10595_v61 = vadd.f32 %v10509_v22, %v17026_v37  ;;  %v10616_v39 = vadd.f32 %v17028_v8, %v10594_v23  ;;  %v10578_v36 = vadd.f32 %v10577_v11, %v17018_v21 }
 0x862   : > { %v10642_v14 = vadd.f32 %v10641_v31, %v10627_v19  ;;  %v10615_v41 = vadd.f32 %v17028_v8, %v10593_v40  ;;  %v10579_v51 = vpop.f32.mrf.mxu1  ;;  %v10630_v62 = vmax.f32 %v10614_v49, 0.0 }
 0x863   : > { %v10617_v30 = vadd.f32 %v17028_v8, %v10595_v61  ;;  %v10580_v55 = vadd.f32 %v10579_v51, %v17020_v3  ;;  %v10632_v57 = vmax.f32 %v10616_v39, 0.0  ;;  %v10618_v20 = vadd.f32 %v17028_v8, %v10578_v36  ;;  %v10653_v3 = vld [vmem:[%s17104_s9] sm:$0xff] }
 0x864   : > { %v10643_v16 = vadd.f32 %v10642_v14, %v10628_v1  ;;  %v10631_v9 = vmax.f32 %v10615_v41, 0.0 }
 0x865   : > { %v10633_v38 = vmax.f32 %v10617_v30, 0.0  ;;  %v10619_v37 = vadd.f32 %v17028_v8, %v10580_v55  ;;  %v10634_v27 = vmax.f32 %v10618_v20, 0.0 }
 0x866   : > { %v10644_v5 = vadd.f32 %v10643_v16, %v10629_v63 }
 0x867   : > { %v10635_v45 = vmax.f32 %v10619_v37, 0.0 }
 0x868   : > { %v10645_v10 = vadd.f32 %v10644_v5, %v10630_v62 }
 0x86a   : > { %v10646_v15 = vadd.f32 %v10645_v10, %v10631_v9 }
 0x86c   : > { %v10647_v32 = vadd.f32 %v10646_v15, %v10632_v57 }
 0x86e   : > { %v10648_v26 = vadd.f32 %v10647_v32, %v10633_v38 }
 0x870   : > { %v10649_v43 = vadd.f32 %v10648_v26, %v10634_v27 }
 0x872   : > { %v10650_v21 = vadd.f32 %v10649_v43, %v10635_v45 }
 0x874   : > { %10651 = vadd.xlane.f32.xlu0 %v10650_v21 }
 0x8fd   : > { %v10652_v24 = vpop.xlane.xlu0 %10651 }
 0x8fe   : > { %v10654_v6 = vmul.f32 %v10653_v3, %v10652_v24 }
 0x900   : > { %v10656_v54 = vsel %vm10655_vm11, %v10654_v6, 0.0 }
 0x901   : > { %v10657_v56 = vrot.slane %v10656_v54, 4 }
 0x903   : > { %v10658_v48 = vadd.f32 %v10657_v56, %v10656_v54 }
 0x905   : > { %v10659_v46 = vrot.slane %v10658_v48, 2 }
 0x907   : > { %v10660_v8 = vadd.f32 %v10659_v46, %v10658_v48 }
 0x909   : > { %v10661_v60 = vrot.slane %v10660_v8, 1 }
 0x90b   : > { %v10662_v4 = vadd.f32 %v10661_v60, %v10660_v8 }
 0x90d   : > { %v10663_v44 = vmul.f32 0.000308642, %v10662_v4 }
 0x90f   : > { %v10665_v33 = vadd.f32 %v10664_v29, %v10663_v44 }
 0x911   : > { %10667 = vst.msk [vmem:[%s378_s16] sm:$0x1] %vm10666_vm12, %v10665_v33 }
 0x912   : > { %10992 = shalt.err (!%p10989_p3)
}
 0x913   : > { %s10993_s12 = scalar_lea.hbm %s10679_s13, 16  ;;  %s10997_s16 = scalar_lea.hbm %s17106_s11, 32 }
 0x914   : > { %p10994_p4 = scmp.ne.s32.totalorder %s10679_s13, %s10993_s12  ;;  %p10998_p9 = scmp.lt.s32.totalorder %s10679_s13, %s17106_s11 }
 0x915   : > { %p10999_p10 = scmp.lt.s32.totalorder %s10997_s16, %s10993_s12 }
 0x916   : > { %p10995_p7 = pnand %p10994_p4, %p11150_p5 }
 0x917   : > { %p11000_p11 = por %p10999_p10, %p10998_p9 }
 0x918   : > { %p10996_p8 = pneg %p10995_p7 }
 0x91a   : > { %p11001_p12 = pnand %p11000_p11, %p10996_p8 }
 0x91c   : > { %11004 = shalt.err (!%p11001_p12)
}
 0x91d   : > { %10902 = dma.vmem_to_hbm [thread:$0]  (%p11150_p5), %s10682_s29, 16, %s10679_s13, %s10669_s30  }
 0x91e PF: > { %p10908_p13 = scmp.ge.s32.totalorder %s11039_s20, 2  ;;  %s10693_s24 = sand.u32 1, %s11027_s17  }
 0x91f   : > { %s10694_s0 = scalar_lea.sflag [#allocation8], %s10693_s24 }
 0x920   : > { %p10905_p0 = pnand %p10908_p13, %p11154_p6 }
 0x922   : > { %p10906_p1 = pneg %p10905_p0 }
 0x924   : > { %11022 = dma.done.wait (%p10906_p1), %s10694_s0, 16  }
 0x925   : > { %11024 = vsyncadd (%p10906_p1), %s10694_s0, 4294967280  ;;  %p21_p2 = scmp.ge.s32.totalorder %s11137_s23, 4   ;;  %s18091_s17 = smov %s11031_s18 }
 0x926   : > { %s18092_s18 = smov %s11035_s19  ;;  %s18093_s19 = smov %s11148_s26 }
 0x927   : > { %s18094_s20 = smov %s11137_s23  ;;  %23 = sbr.rel (!%p21_p2) target bundleno = 6 (0x6), region = 110 }
 0x92c   :  { %10698 = vsyncpa [#allocation8], 1 }
 0x92d   :  { %10700 = vsyncpa [#allocation8 + $0x1], 1 }

</bundles_post_ra>
